<compile_context>
chip_gen: v6e
topology: v6e:2x2x1
jax: 0.10.0
libtpu: 0.0.40
codegen_flags: <defaults>
</compile_context>

<pallas_src>
import jax
import jax.numpy as jnp
from jax.experimental import pallas as pl
from jax.experimental.pallas import tpu as pltpu

# Module constants (from the PyTorch source).
GEN_NOISE_DIM = 256
GEN_INPUT_OUT = 512
GEN_COMBINE = 1024
GEN_HIDDEN = 1024
# dp.DataSize / dp.LabelSize are dataset dependent; pick small deterministic
# values consistent with a hyperspectral setup (Indian-Pines-like).
GEN_OUTPUT_SIZE = 200   # dp.DataSize
GEN_OUTPUT_PAD = 256    # output padded to a lane multiple for unmasked stores
LABEL_SIZE = 16         # dp.LabelSize
LABEL_PAD = 128         # label one-hot padded to a full lane group

BN_EPS = 1e-5


def _bn_relu(z, gamma, beta):
    """Training-mode BatchNorm1d (batch stats, biased var) followed by ReLU.

    gamma is fused with rsqrt(var+eps) into a single per-feature scale so the
    per-element work is one multiply-add (plus the ReLU max)."""
    mean = jnp.mean(z, axis=0, keepdims=True)
    zc = z - mean
    var = jnp.mean(zc * zc, axis=0, keepdims=True)
    scale = gamma * jax.lax.rsqrt(var + BN_EPS)   # (1, N) — cheap
    return jnp.maximum(zc * scale + beta, 0.0)


def _bf16_dot(x_f32, w_ref):
    """bf16 x bf16 matmul on the MXU with f32 accumulation."""
    return jnp.dot(x_f32.astype(jnp.bfloat16), w_ref[...],
                   preferred_element_type=jnp.float32)


def generator_kernel(
    noise_ref, label_ref,
    w1_ref, g1_ref, be1_ref,
    w2_ref, g2_ref, be2_ref,
    w3t_ref, w3b_ref, g3_ref, be3_ref,
    w4_ref, g4_ref, be4_ref,
    w5_ref, b5_ref,
    out_ref,
):
    # noise branch: Linear -> BN -> ReLU   (bias cancelled exactly by BN)
    x = _bn_relu(_bf16_dot(noise_ref[...], w1_ref), g1_ref[...], be1_ref[...])

    # label branch: Linear -> BN -> ReLU   (label/K dim zero-padded to 128)
    y = _bn_relu(_bf16_dot(label_ref[...], w2_ref), g2_ref[...], be2_ref[...])

    # combine layer: concat folded into split-w3 accumulation
    z = _bf16_dot(x, w3t_ref) + _bf16_dot(y, w3b_ref)
    z = _bn_relu(z, g3_ref[...], be3_ref[...])

    # hidden layer: Linear -> BN -> ReLU
    h = _bn_relu(_bf16_dot(z, w4_ref), g4_ref[...], be4_ref[...])

    # output layer: Linear (lane-padded) -> sigmoid
    o = _bf16_dot(h, w5_ref) + b5_ref[...]
    out_ref[...] = jax.nn.sigmoid(o)


def quantize_params_for_kernel(params):
    """Convert PyTorch-style f32 params into the kernel's bf16 layout.

    - drops b1..b4 (exactly cancelled by training-mode BN)
    - zero-pads w2's contraction dim 16 -> 128 (matches the padded label)
    - splits w3 into top/bottom halves (folds the concat)
    - zero-pads w5/b5 from 200 -> 256 output lanes
    """
    (w1, _b1, g1, be1,
     w2, _b2, g2, be2,
     w3, _b3, g3, be3,
     w4, _b4, g4, be4,
     w5, b5) = params

    bf = jnp.bfloat16

    w2p = jnp.zeros((LABEL_PAD, GEN_INPUT_OUT), jnp.float32)
    w2p = w2p.at[:LABEL_SIZE, :].set(w2)

    w5p = jnp.zeros((GEN_HIDDEN, GEN_OUTPUT_PAD), jnp.float32)
    w5p = w5p.at[:, :GEN_OUTPUT_SIZE].set(w5)
    b5p = jnp.zeros((1, GEN_OUTPUT_PAD), jnp.float32)
    b5p = b5p.at[:, :GEN_OUTPUT_SIZE].set(b5)

    return (
        w1.astype(bf), g1, be1,
        w2p.astype(bf), g2, be2,
        w3[:GEN_INPUT_OUT].astype(bf), w3[GEN_INPUT_OUT:].astype(bf), g3, be3,
        w4.astype(bf), g4, be4,
        w5p.astype(bf), b5p,
    )


@jax.jit
def generator_forward(noise, label, kparams):
    batch = noise.shape[0]

    # Lane-pad the one-hot label to 128 lanes (zeros contribute exactly 0).
    label_p = jnp.pad(label, ((0, 0), (0, LABEL_PAD - label.shape[1])))

    flat_inputs = [noise, label_p, *kparams]
    vmem_spec = pl.BlockSpec(memory_space=pltpu.MemorySpace.VMEM)

    flops = 2 * batch * (
        GEN_NOISE_DIM * GEN_INPUT_OUT
        + LABEL_PAD * GEN_INPUT_OUT
        + 2 * GEN_INPUT_OUT * GEN_COMBINE
        + GEN_COMBINE * GEN_HIDDEN
        + GEN_HIDDEN * GEN_OUTPUT_PAD
    )
    bytes_accessed = int(
        sum(x.size * x.dtype.itemsize for x in flat_inputs)
        + batch * GEN_OUTPUT_PAD * 4
    )
    transcendentals = batch * GEN_OUTPUT_PAD + 4 * (
        GEN_INPUT_OUT * 2 + GEN_COMBINE + GEN_HIDDEN
    ) // 4  # sigmoid lanes + per-feature rsqrt in 4 BN layers (rough hint)

    out = pl.pallas_call(
        generator_kernel,
        out_shape=jax.ShapeDtypeStruct((batch, GEN_OUTPUT_PAD), jnp.float32),
        in_specs=[vmem_spec] * len(flat_inputs),
        out_specs=vmem_spec,
        compiler_params=pltpu.CompilerParams(vmem_limit_bytes=32 * 1024 * 1024),
        cost_estimate=pl.CostEstimate(
            flops=flops,
            transcendentals=transcendentals,
            bytes_accessed=bytes_accessed,
        ),
    )(*flat_inputs)
    # Slice the lane-padding back off in the wrapper (cheap, outside kernel).
    return out[:, :GEN_OUTPUT_SIZE]


def init_params(key):
    """Deterministic parameter init mirroring weight_init(mean=0, std=0.02)."""
    ks = jax.random.split(key, 5)

    def linear(k, fan_in, fan_out):
        w = 0.02 * jax.random.normal(k, (fan_in, fan_out), dtype=jnp.float32)
        b = jnp.zeros((1, fan_out), dtype=jnp.float32)
        return w, b

    def bn(size):
        return jnp.ones((1, size), jnp.float32), jnp.zeros((1, size), jnp.float32)

    w1, b1 = linear(ks[0], GEN_NOISE_DIM, GEN_INPUT_OUT)
    g1, be1 = bn(GEN_INPUT_OUT)
    w2, b2 = linear(ks[1], LABEL_SIZE, GEN_INPUT_OUT)
    g2, be2 = bn(GEN_INPUT_OUT)
    w3, b3 = linear(ks[2], GEN_INPUT_OUT * 2, GEN_COMBINE)
    g3, be3 = bn(GEN_COMBINE)
    w4, b4 = linear(ks[3], GEN_COMBINE, GEN_HIDDEN)
    g4, be4 = bn(GEN_HIDDEN)
    w5, b5 = linear(ks[4], GEN_HIDDEN, GEN_OUTPUT_SIZE)

    return (w1, b1, g1, be1,
            w2, b2, g2, be2,
            w3, b3, g3, be3,
            w4, b4, g4, be4,
            w5, b5)


def reference_forward(noise, label, params, quantized):
    """Pure-JAX reference. quantized=True mirrors the kernel's bf16 weight /
    bf16 activation-input matmuls with f32 accumulation; quantized=False is
    the exact f32 PyTorch-module math (for a looser sanity check)."""
    (w1, b1, g1, be1, w2, b2, g2, be2,
     w3, b3, g3, be3, w4, b4, g4, be4, w5, b5) = params

    if quantized:
        def dot(x, w):
            return jnp.dot(x.astype(jnp.bfloat16), w.astype(jnp.bfloat16),
                           preferred_element_type=jnp.float32)
    else:
        def dot(x, w):
            return jnp.dot(x, w, preferred_element_type=jnp.float32)

    def bn_relu(z, g, b):
        m = jnp.mean(z, axis=0, keepdims=True)
        v = jnp.mean((z - m) ** 2, axis=0, keepdims=True)
        return jnp.maximum((z - m) / jnp.sqrt(v + BN_EPS) * g + b, 0.0)

    x = bn_relu(dot(noise, w1) + b1, g1, be1)
    y = bn_relu(dot(label, w2) + b2, g2, be2)
    xy = jnp.concatenate([x, y], axis=1)
    z = bn_relu(dot(xy, w3) + b3, g3, be3)
    h = bn_relu(dot(z, w4) + b4, g4, be4)
    return jax.nn.sigmoid(dot(h, w5) + b5)


if __name__ == "__main__":
    key = jax.random.PRNGKey(0)
    k_param, k_noise, k_label = jax.random.split(key, 3)

    batch = 8  # keep a multiple of 8 (f32 sublane tile) so BN batch stats are clean
    params = init_params(k_param)
    kparams = quantize_params_for_kernel(params)

    noise = jax.random.normal(k_noise, (batch, GEN_NOISE_DIM), dtype=jnp.float32)
    label_idx = jax.random.randint(k_label, (batch,), 0, LABEL_SIZE)
    label = jax.nn.one_hot(label_idx, LABEL_SIZE, dtype=jnp.float32)

    out = generator_forward(noise, label, kparams)
    out = jax.block_until_ready(out)
    assert out.shape == (batch, GEN_OUTPUT_SIZE), out.shape

    # Exact-math check against a reference using the same bf16 weight path.
    ref_q = reference_forward(noise, label, params, quantized=True)
    assert jnp.allclose(out, ref_q, atol=2e-3, rtol=2e-3), (
        "quantized-ref mismatch, max abs diff = "
        + str(float(jnp.max(jnp.abs(out - ref_q)))))

    # Looser sanity check against the full-f32 PyTorch-module math.
    ref_f32 = reference_forward(noise, label, params, quantized=False)
    assert jnp.allclose(out, ref_f32, atol=5e-2), (
        "f32-ref mismatch, max abs diff = "
        + str(float(jnp.max(jnp.abs(out - ref_f32)))))

    print("KERNEL_OK")
</pallas_src>

<mosaic_0001>
module attributes {stable_mosaic.version = 11 : i64} {
  func.func @generator_kernel(%arg0: memref<8x256xf32, #tpu.memory_space<vmem>>, %arg1: memref<8x128xf32, #tpu.memory_space<vmem>>, %arg2: memref<256x512xbf16, #tpu.memory_space<vmem>>, %arg3: memref<1x512xf32, #tpu.memory_space<vmem>>, %arg4: memref<1x512xf32, #tpu.memory_space<vmem>>, %arg5: memref<128x512xbf16, #tpu.memory_space<vmem>>, %arg6: memref<1x512xf32, #tpu.memory_space<vmem>>, %arg7: memref<1x512xf32, #tpu.memory_space<vmem>>, %arg8: memref<512x1024xbf16, #tpu.memory_space<vmem>>, %arg9: memref<512x1024xbf16, #tpu.memory_space<vmem>>, %arg10: memref<1x1024xf32, #tpu.memory_space<vmem>>, %arg11: memref<1x1024xf32, #tpu.memory_space<vmem>>, %arg12: memref<1024x1024xbf16, #tpu.memory_space<vmem>>, %arg13: memref<1x1024xf32, #tpu.memory_space<vmem>>, %arg14: memref<1x1024xf32, #tpu.memory_space<vmem>>, %arg15: memref<1024x256xbf16, #tpu.memory_space<vmem>>, %arg16: memref<1x256xf32, #tpu.memory_space<vmem>>, %arg17: memref<8x256xf32, #tpu.memory_space<vmem>>) attributes {dimension_semantics = [], scalar_prefetch = 0 : i64, scratch_operands = 0 : i64, tpu.core_type = #tpu.core_type<tc>} {
    %c0 = arith.constant 0 : index
    %c0_0 = arith.constant 0 : index
    %0 = vector.load %arg0[%c0, %c0_0] : memref<8x256xf32, #tpu.memory_space<vmem>>, vector<8x256xf32>
    %1 = arith.truncf %0 : vector<8x256xf32> to vector<8x256xbf16>
    %c0_1 = arith.constant 0 : index
    %c0_2 = arith.constant 0 : index
    %2 = vector.load %arg2[%c0_1, %c0_2] : memref<256x512xbf16, #tpu.memory_space<vmem>>, vector<256x512xbf16>
    %cst = arith.constant dense<0.000000e+00> : vector<8x512xf32>
    %3 = tpu.matmul %1, %2, %cst {dimension_numbers = #tpu.dot_dimension_numbers<[1], [0], [0], [1], [0, 0, 1, 1], [], []>} : vector<8x256xbf16>, vector<256x512xbf16>, vector<8x512xf32> -> vector<8x512xf32>
    %c0_3 = arith.constant 0 : index
    %c0_4 = arith.constant 0 : index
    %4 = vector.load %arg3[%c0_3, %c0_4] : memref<1x512xf32, #tpu.memory_space<vmem>>, vector<1x512xf32>
    %c0_5 = arith.constant 0 : index
    %c0_6 = arith.constant 0 : index
    %5 = vector.load %arg4[%c0_5, %c0_6] : memref<1x512xf32, #tpu.memory_space<vmem>>, vector<1x512xf32>
    %cst_7 = arith.constant dense<0.000000e+00> : vector<512xf32>
    %6 = vector.multi_reduction <add>, %3, %cst_7 [0] : vector<8x512xf32> to vector<512xf32>
    %7 = vector.shape_cast %6 : vector<512xf32> to vector<1x512xf32>
    %cst_8 = arith.constant 8.000000e+00 : f32
    %8 = vector.broadcast %cst_8 : f32 to vector<1x512xf32>
    %9 = arith.divf %7, %8 : vector<1x512xf32>
    %10 = vector.broadcast %9 : vector<1x512xf32> to vector<8x512xf32>
    %11 = arith.subf %3, %10 : vector<8x512xf32>
    %12 = arith.mulf %11, %11 : vector<8x512xf32>
    %cst_9 = arith.constant dense<0.000000e+00> : vector<512xf32>
    %13 = vector.multi_reduction <add>, %12, %cst_9 [0] : vector<8x512xf32> to vector<512xf32>
    %14 = vector.shape_cast %13 : vector<512xf32> to vector<1x512xf32>
    %cst_10 = arith.constant 8.000000e+00 : f32
    %15 = vector.broadcast %cst_10 : f32 to vector<1x512xf32>
    %16 = arith.divf %14, %15 : vector<1x512xf32>
    %cst_11 = arith.constant 9.99999974E-6 : f32
    %17 = vector.broadcast %cst_11 : f32 to vector<1x512xf32>
    %18 = arith.addf %16, %17 : vector<1x512xf32>
    %19 = math.rsqrt %18 : vector<1x512xf32>
    %20 = arith.mulf %4, %19 : vector<1x512xf32>
    %21 = vector.broadcast %20 : vector<1x512xf32> to vector<8x512xf32>
    %22 = arith.mulf %11, %21 : vector<8x512xf32>
    %23 = vector.broadcast %5 : vector<1x512xf32> to vector<8x512xf32>
    %24 = arith.addf %22, %23 : vector<8x512xf32>
    %cst_12 = arith.constant 0.000000e+00 : f32
    %25 = vector.broadcast %cst_12 : f32 to vector<8x512xf32>
    %26 = arith.maximumf %24, %25 : vector<8x512xf32>
    %c0_13 = arith.constant 0 : index
    %c0_14 = arith.constant 0 : index
    %27 = vector.load %arg1[%c0_13, %c0_14] : memref<8x128xf32, #tpu.memory_space<vmem>>, vector<8x128xf32>
    %28 = arith.truncf %27 : vector<8x128xf32> to vector<8x128xbf16>
    %c0_15 = arith.constant 0 : index
    %c0_16 = arith.constant 0 : index
    %29 = vector.load %arg5[%c0_15, %c0_16] : memref<128x512xbf16, #tpu.memory_space<vmem>>, vector<128x512xbf16>
    %cst_17 = arith.constant dense<0.000000e+00> : vector<8x512xf32>
    %30 = tpu.matmul %28, %29, %cst_17 {dimension_numbers = #tpu.dot_dimension_numbers<[1], [0], [0], [1], [0, 0, 1, 1], [], []>} : vector<8x128xbf16>, vector<128x512xbf16>, vector<8x512xf32> -> vector<8x512xf32>
    %c0_18 = arith.constant 0 : index
    %c0_19 = arith.constant 0 : index
    %31 = vector.load %arg6[%c0_18, %c0_19] : memref<1x512xf32, #tpu.memory_space<vmem>>, vector<1x512xf32>
    %c0_20 = arith.constant 0 : index
    %c0_21 = arith.constant 0 : index
    %32 = vector.load %arg7[%c0_20, %c0_21] : memref<1x512xf32, #tpu.memory_space<vmem>>, vector<1x512xf32>
    %cst_22 = arith.constant dense<0.000000e+00> : vector<512xf32>
    %33 = vector.multi_reduction <add>, %30, %cst_22 [0] : vector<8x512xf32> to vector<512xf32>
    %34 = vector.shape_cast %33 : vector<512xf32> to vector<1x512xf32>
    %cst_23 = arith.constant 8.000000e+00 : f32
    %35 = vector.broadcast %cst_23 : f32 to vector<1x512xf32>
    %36 = arith.divf %34, %35 : vector<1x512xf32>
    %37 = vector.broadcast %36 : vector<1x512xf32> to vector<8x512xf32>
    %38 = arith.subf %30, %37 : vector<8x512xf32>
    %39 = arith.mulf %38, %38 : vector<8x512xf32>
    %cst_24 = arith.constant dense<0.000000e+00> : vector<512xf32>
    %40 = vector.multi_reduction <add>, %39, %cst_24 [0] : vector<8x512xf32> to vector<512xf32>
    %41 = vector.shape_cast %40 : vector<512xf32> to vector<1x512xf32>
    %cst_25 = arith.constant 8.000000e+00 : f32
    %42 = vector.broadcast %cst_25 : f32 to vector<1x512xf32>
    %43 = arith.divf %41, %42 : vector<1x512xf32>
    %cst_26 = arith.constant 9.99999974E-6 : f32
    %44 = vector.broadcast %cst_26 : f32 to vector<1x512xf32>
    %45 = arith.addf %43, %44 : vector<1x512xf32>
    %46 = math.rsqrt %45 : vector<1x512xf32>
    %47 = arith.mulf %31, %46 : vector<1x512xf32>
    %48 = vector.broadcast %47 : vector<1x512xf32> to vector<8x512xf32>
    %49 = arith.mulf %38, %48 : vector<8x512xf32>
    %50 = vector.broadcast %32 : vector<1x512xf32> to vector<8x512xf32>
    %51 = arith.addf %49, %50 : vector<8x512xf32>
    %cst_27 = arith.constant 0.000000e+00 : f32
    %52 = vector.broadcast %cst_27 : f32 to vector<8x512xf32>
    %53 = arith.maximumf %51, %52 : vector<8x512xf32>
    %54 = arith.truncf %26 : vector<8x512xf32> to vector<8x512xbf16>
    %c0_28 = arith.constant 0 : index
    %c0_29 = arith.constant 0 : index
    %55 = vector.load %arg8[%c0_28, %c0_29] : memref<512x1024xbf16, #tpu.memory_space<vmem>>, vector<512x1024xbf16>
    %cst_30 = arith.constant dense<0.000000e+00> : vector<8x1024xf32>
    %56 = tpu.matmul %54, %55, %cst_30 {dimension_numbers = #tpu.dot_dimension_numbers<[1], [0], [0], [1], [0, 0, 1, 1], [], []>} : vector<8x512xbf16>, vector<512x1024xbf16>, vector<8x1024xf32> -> vector<8x1024xf32>
    %57 = arith.truncf %53 : vector<8x512xf32> to vector<8x512xbf16>
    %c0_31 = arith.constant 0 : index
    %c0_32 = arith.constant 0 : index
    %58 = vector.load %arg9[%c0_31, %c0_32] : memref<512x1024xbf16, #tpu.memory_space<vmem>>, vector<512x1024xbf16>
    %cst_33 = arith.constant dense<0.000000e+00> : vector<8x1024xf32>
    %59 = tpu.matmul %57, %58, %cst_33 {dimension_numbers = #tpu.dot_dimension_numbers<[1], [0], [0], [1], [0, 0, 1, 1], [], []>} : vector<8x512xbf16>, vector<512x1024xbf16>, vector<8x1024xf32> -> vector<8x1024xf32>
    %60 = arith.addf %56, %59 : vector<8x1024xf32>
    %c0_34 = arith.constant 0 : index
    %c0_35 = arith.constant 0 : index
    %61 = vector.load %arg10[%c0_34, %c0_35] : memref<1x1024xf32, #tpu.memory_space<vmem>>, vector<1x1024xf32>
    %c0_36 = arith.constant 0 : index
    %c0_37 = arith.constant 0 : index
    %62 = vector.load %arg11[%c0_36, %c0_37] : memref<1x1024xf32, #tpu.memory_space<vmem>>, vector<1x1024xf32>
    %cst_38 = arith.constant dense<0.000000e+00> : vector<1024xf32>
    %63 = vector.multi_reduction <add>, %60, %cst_38 [0] : vector<8x1024xf32> to vector<1024xf32>
    %64 = vector.shape_cast %63 : vector<1024xf32> to vector<1x1024xf32>
    %cst_39 = arith.constant 8.000000e+00 : f32
    %65 = vector.broadcast %cst_39 : f32 to vector<1x1024xf32>
    %66 = arith.divf %64, %65 : vector<1x1024xf32>
    %67 = vector.broadcast %66 : vector<1x1024xf32> to vector<8x1024xf32>
    %68 = arith.subf %60, %67 : vector<8x1024xf32>
    %69 = arith.mulf %68, %68 : vector<8x1024xf32>
    %cst_40 = arith.constant dense<0.000000e+00> : vector<1024xf32>
    %70 = vector.multi_reduction <add>, %69, %cst_40 [0] : vector<8x1024xf32> to vector<1024xf32>
    %71 = vector.shape_cast %70 : vector<1024xf32> to vector<1x1024xf32>
    %cst_41 = arith.constant 8.000000e+00 : f32
    %72 = vector.broadcast %cst_41 : f32 to vector<1x1024xf32>
    %73 = arith.divf %71, %72 : vector<1x1024xf32>
    %cst_42 = arith.constant 9.99999974E-6 : f32
    %74 = vector.broadcast %cst_42 : f32 to vector<1x1024xf32>
    %75 = arith.addf %73, %74 : vector<1x1024xf32>
    %76 = math.rsqrt %75 : vector<1x1024xf32>
    %77 = arith.mulf %61, %76 : vector<1x1024xf32>
    %78 = vector.broadcast %77 : vector<1x1024xf32> to vector<8x1024xf32>
    %79 = arith.mulf %68, %78 : vector<8x1024xf32>
    %80 = vector.broadcast %62 : vector<1x1024xf32> to vector<8x1024xf32>
    %81 = arith.addf %79, %80 : vector<8x1024xf32>
    %cst_43 = arith.constant 0.000000e+00 : f32
    %82 = vector.broadcast %cst_43 : f32 to vector<8x1024xf32>
    %83 = arith.maximumf %81, %82 : vector<8x1024xf32>
    %84 = arith.truncf %83 : vector<8x1024xf32> to vector<8x1024xbf16>
    %c0_44 = arith.constant 0 : index
    %c0_45 = arith.constant 0 : index
    %85 = vector.load %arg12[%c0_44, %c0_45] : memref<1024x1024xbf16, #tpu.memory_space<vmem>>, vector<1024x1024xbf16>
    %cst_46 = arith.constant dense<0.000000e+00> : vector<8x1024xf32>
    %86 = tpu.matmul %84, %85, %cst_46 {dimension_numbers = #tpu.dot_dimension_numbers<[1], [0], [0], [1], [0, 0, 1, 1], [], []>} : vector<8x1024xbf16>, vector<1024x1024xbf16>, vector<8x1024xf32> -> vector<8x1024xf32>
    %c0_47 = arith.constant 0 : index
    %c0_48 = arith.constant 0 : index
    %87 = vector.load %arg13[%c0_47, %c0_48] : memref<1x1024xf32, #tpu.memory_space<vmem>>, vector<1x1024xf32>
    %c0_49 = arith.constant 0 : index
    %c0_50 = arith.constant 0 : index
    %88 = vector.load %arg14[%c0_49, %c0_50] : memref<1x1024xf32, #tpu.memory_space<vmem>>, vector<1x1024xf32>
    %cst_51 = arith.constant dense<0.000000e+00> : vector<1024xf32>
    %89 = vector.multi_reduction <add>, %86, %cst_51 [0] : vector<8x1024xf32> to vector<1024xf32>
    %90 = vector.shape_cast %89 : vector<1024xf32> to vector<1x1024xf32>
    %cst_52 = arith.constant 8.000000e+00 : f32
    %91 = vector.broadcast %cst_52 : f32 to vector<1x1024xf32>
    %92 = arith.divf %90, %91 : vector<1x1024xf32>
    %93 = vector.broadcast %92 : vector<1x1024xf32> to vector<8x1024xf32>
    %94 = arith.subf %86, %93 : vector<8x1024xf32>
    %95 = arith.mulf %94, %94 : vector<8x1024xf32>
    %cst_53 = arith.constant dense<0.000000e+00> : vector<1024xf32>
    %96 = vector.multi_reduction <add>, %95, %cst_53 [0] : vector<8x1024xf32> to vector<1024xf32>
    %97 = vector.shape_cast %96 : vector<1024xf32> to vector<1x1024xf32>
    %cst_54 = arith.constant 8.000000e+00 : f32
    %98 = vector.broadcast %cst_54 : f32 to vector<1x1024xf32>
    %99 = arith.divf %97, %98 : vector<1x1024xf32>
    %cst_55 = arith.constant 9.99999974E-6 : f32
    %100 = vector.broadcast %cst_55 : f32 to vector<1x1024xf32>
    %101 = arith.addf %99, %100 : vector<1x1024xf32>
    %102 = math.rsqrt %101 : vector<1x1024xf32>
    %103 = arith.mulf %87, %102 : vector<1x1024xf32>
    %104 = vector.broadcast %103 : vector<1x1024xf32> to vector<8x1024xf32>
    %105 = arith.mulf %94, %104 : vector<8x1024xf32>
    %106 = vector.broadcast %88 : vector<1x1024xf32> to vector<8x1024xf32>
    %107 = arith.addf %105, %106 : vector<8x1024xf32>
    %cst_56 = arith.constant 0.000000e+00 : f32
    %108 = vector.broadcast %cst_56 : f32 to vector<8x1024xf32>
    %109 = arith.maximumf %107, %108 : vector<8x1024xf32>
    %110 = arith.truncf %109 : vector<8x1024xf32> to vector<8x1024xbf16>
    %c0_57 = arith.constant 0 : index
    %c0_58 = arith.constant 0 : index
    %111 = vector.load %arg15[%c0_57, %c0_58] : memref<1024x256xbf16, #tpu.memory_space<vmem>>, vector<1024x256xbf16>
    %cst_59 = arith.constant dense<0.000000e+00> : vector<8x256xf32>
    %112 = tpu.matmul %110, %111, %cst_59 {dimension_numbers = #tpu.dot_dimension_numbers<[1], [0], [0], [1], [0, 0, 1, 1], [], []>} : vector<8x1024xbf16>, vector<1024x256xbf16>, vector<8x256xf32> -> vector<8x256xf32>
    %c0_60 = arith.constant 0 : index
    %c0_61 = arith.constant 0 : index
    %113 = vector.load %arg16[%c0_60, %c0_61] : memref<1x256xf32, #tpu.memory_space<vmem>>, vector<1x256xf32>
    %114 = vector.broadcast %113 : vector<1x256xf32> to vector<8x256xf32>
    %115 = arith.addf %112, %114 : vector<8x256xf32>
    %116 = arith.negf %115 : vector<8x256xf32>
    %117 = math.exp %116 : vector<8x256xf32>
    %cst_62 = arith.constant 1.000000e+00 : f32
    %118 = vector.broadcast %cst_62 : f32 to vector<8x256xf32>
    %119 = arith.addf %118, %117 : vector<8x256xf32>
    %120 = arith.divf %118, %119 : vector<8x256xf32>
    %c0_63 = arith.constant 0 : index
    %c0_64 = arith.constant 0 : index
    %121 = vector.load %arg17[%c0_63, %c0_64] : memref<8x256xf32, #tpu.memory_space<vmem>>, vector<8x256xf32>
    tpu.vector_store %arg17[%c0_63, %c0_64], %120 {strides = array<i32>} : memref<8x256xf32, #tpu.memory_space<vmem>>, vector<8x256xf32>,
    return
  }
}

</mosaic_0001>

<bundles_post_ra>
// kernel: generator_forward.1
= control target key start
LH: loop header
LB: loop body
LE: loop exit
PB: predicated region body
PF: predicated region fallthrough
CT: control target
= control target key end

     0   :  { %s13111_s0 = inlined_call_operand.hbm [shape: f32[8,256], index: 0, kind: input, shape index: {}]   ;;  %s13112_s1 = inlined_call_operand.vmem [shape: f32[8,128], index: 1, kind: input, shape index: {}]   ;;  %s13113_s2 = inlined_call_operand.hbm [shape: bf16[256,512], index: 2, kind: input, shape index: {}]   ;;  %s13114_s3 = inlined_call_operand.hbm [shape: f32[1,512], index: 3, kind: input, shape index: {}]   ;;  %s13115_s4 = inlined_call_operand.hbm [shape: f32[1,512], index: 4, kind: input, shape index: {}]   ;;  %s13116_s5 = inlined_call_operand.hbm [shape: bf16[128,512], index: 5, kind: input, shape index: {}]   ;;  %s13117_s6 = inlined_call_operand.hbm [shape: f32[1,512], index: 6, kind: input, shape index: {}]   ;;  %s13118_s7 = inlined_call_operand.hbm [shape: f32[1,512], index: 7, kind: input, shape index: {}]   ;;  %s13119_s8 = inlined_call_operand.hbm [shape: bf16[512,1024], index: 8, kind: input, shape index: {}]   ;;  %s13120_s9 = inlined_call_operand.hbm [shape: bf16[512,1024], index: 9, kind: input, shape index: {}]   ;;  %s13121_s10 = inlined_call_operand.hbm [shape: f32[1,1024], index: 10, kind: input, shape index: {}]   ;;  %s13122_s11 = inlined_call_operand.hbm [shape: f32[1,1024], index: 11, kind: input, shape index: {}]   ;;  %s13123_s12 = inlined_call_operand.hbm [shape: bf16[1024,1024], index: 12, kind: input, shape index: {}]   ;;  %s13124_s13 = inlined_call_operand.hbm [shape: f32[1,1024], index: 13, kind: input, shape index: {}]   ;;  %s13125_s14 = inlined_call_operand.hbm [shape: f32[1,1024], index: 14, kind: input, shape index: {}]   ;;  %s13126_s15 = inlined_call_operand.hbm [shape: bf16[1024,256], index: 15, kind: input, shape index: {}]   ;;  %s13127_s16 = inlined_call_operand.hbm [shape: f32[1,256], index: 16, kind: input, shape index: {}]   ;;  %s13128_s17 = inlined_call_operand.hbm [shape: f32[8,256], index: 17, kind: output, shape index: {}]  }
   0x1   :  { %13129 = sst [smem:[#allocation39_spill]] %s13111_s0 }
   0x2   :  { %13130 = sst [smem:[#allocation40_spill]] %s13112_s1 }
   0x3   :  { %22 = vsyncpa [#allocation3], 0 }
   0x4   :  { %23 = vsyncpa [#allocation6], 0 }
   0x5   :  { %24 = vsyncpa [#allocation9], 0 }
   0x6   :  { %25 = vsyncpa [#allocation12], 0 }
   0x7   :  { %26 = vsyncpa [#allocation15], 0 }
   0x8   :  { %27 = vsyncpa [#allocation18], 0 }
   0x9   :  { %28 = vsyncpa [#allocation21], 0 }
   0xa   :  { %29 = vsyncpa [#allocation24], 0 }
   0xb   :  { %30 = vsyncpa [#allocation27], 0 }
   0xc   :  { %31 = vsyncpa [#allocation4], 0  ;;  %s12428_s24 = smov [#allocation5]  }
   0xd   :  { %s49_s25 = sshll.u32 %s12428_s24, 4  ;;  %s50_s25 = int_to_ptr.vmem [resolvable:$true] %s49_s25 }
   0xe   :  { %s12076_s26 = scalar_lea.vmem %s50_s25, 8192  ;;  %p12081_p1 = scmp.lt.s32.totalorder %s50_s25, %s50_s25 }
   0xf   :  { %p12077_p0 = scmp.ne.s32.totalorder %s50_s25, %s12076_s26  ;;  %p12082_p2 = scmp.lt.s32.totalorder %s12076_s26, %s12076_s26 }
  0x11   :  { %p12083_p3 = por %p12082_p2, %p12081_p1 }
  0x13   :  { %p12084_p4 = pnand %p12083_p3, %p12077_p0 }
  0x15   :  { %12087 = shalt.err (!%p12084_p4)
}
  0x16   :  { %s12429_s27 = smov 256   ;;  %s12430_s28 = smov 16  }
  0x17   :  { %55 = dma.hbm_to_vmem [thread:$0]  %s13113_s2, 8192, %s50_s25, [#allocation6], %s12429_s27, %s12429_s27, %s12430_s28  }
  0x18   :  { %s12431_s30 = smov [#allocation8]   ;;  %s12432_s19 = smov [#allocation11]  }
  0x19   :  { %s72_s18 = sshll.u32 %s12431_s30, 4  ;;  %s94_s1 = sshll.u32 %s12432_s19, 4  ;;  %s73_s18 = int_to_ptr.vmem [resolvable:$true] %s72_s18  ;;  %s95_s1 = int_to_ptr.vmem [resolvable:$true] %s94_s1 }
  0x1a   :  { %s12096_s20 = scalar_lea.vmem %s73_s18, 64  ;;  %p12101_p6 = scmp.lt.s32.totalorder %s73_s18, %s73_s18 }
  0x1b   :  { %p12097_p5 = scmp.ne.s32.totalorder %s73_s18, %s12096_s20  ;;  %p12102_p7 = scmp.lt.s32.totalorder %s12096_s20, %s12096_s20 }
  0x1d   :  { %p12103_p8 = por %p12102_p7, %p12101_p6 }
  0x1f   :  { %p12104_p9 = pnand %p12103_p8, %p12097_p5 }
  0x21   :  { %12107 = shalt.err (!%p12104_p9)
}
  0x22   :  { %75 = dma.hbm_to_vmem [thread:$0]  %s13115_s4, 64, %s73_s18, [#allocation9]  }
  0x23   :  { %s12116_s23 = scalar_lea.vmem %s95_s1, 64  ;;  %p12121_p11 = scmp.lt.s32.totalorder %s95_s1, %s95_s1 }
  0x24   :  { %p12117_p10 = scmp.ne.s32.totalorder %s95_s1, %s12116_s23  ;;  %p12122_p12 = scmp.lt.s32.totalorder %s12116_s23, %s12116_s23 }
  0x26   :  { %p12123_p13 = por %p12122_p12, %p12121_p11 }
  0x28   :  { %p12124_p0 = pnand %p12123_p13, %p12117_p10 }
  0x2a   :  { %12127 = shalt.err (!%p12124_p0)
}
  0x2b   :  { %97 = dma.hbm_to_vmem [thread:$0]  %s13117_s6, 64, %s95_s1, [#allocation12]  }
  0x2c   :  { %s12433_s25 = smov [#allocation14]  }
  0x2d   :  { %s113_s26 = sshll.u32 %s12433_s25, 4  ;;  %s114_s26 = int_to_ptr.vmem [resolvable:$true] %s113_s26 }
  0x2e   :  { %s12136_s29 = scalar_lea.vmem %s114_s26, 32768  ;;  %p12141_p2 = scmp.lt.s32.totalorder %s114_s26, %s114_s26 }
  0x2f   :  { %p12137_p1 = scmp.ne.s32.totalorder %s114_s26, %s12136_s29  ;;  %p12142_p3 = scmp.lt.s32.totalorder %s12136_s29, %s12136_s29 }
  0x31   :  { %p12143_p4 = por %p12142_p3, %p12141_p2 }
  0x33   :  { %p12144_p5 = pnand %p12143_p4, %p12137_p1 }
  0x35   :  { %12147 = shalt.err (!%p12144_p5)
}
  0x36   :  { %s12434_s4 = smov 512   ;;  %s12435_s0 = smov 32  }
  0x37   :  { %119 = dma.hbm_to_vmem [thread:$0]  %s13119_s8, 32768, %s114_s26, [#allocation15], %s12434_s4, %s12434_s4, %s12435_s0  }
  0x38   :  { %s12436_s6 = smov [#allocation17]   ;;  %s12437_s1 = smov [#allocation20]  }
  0x39   :  { %s138_s19 = sshll.u32 %s12436_s6, 4  ;;  %s157_s20 = sshll.u32 %s12437_s1, 4  ;;  %s139_s19 = int_to_ptr.vmem [resolvable:$true] %s138_s19  ;;  %s158_s20 = int_to_ptr.vmem [resolvable:$true] %s157_s20 }
  0x3a   :  { %s12156_s21 = scalar_lea.vmem %s139_s19, 128  ;;  %p12161_p7 = scmp.lt.s32.totalorder %s139_s19, %s139_s19 }
  0x3b   :  { %p12157_p6 = scmp.ne.s32.totalorder %s139_s19, %s12156_s21  ;;  %p12162_p8 = scmp.lt.s32.totalorder %s12156_s21, %s12156_s21 }
  0x3d   :  { %p12163_p9 = por %p12162_p8, %p12161_p7 }
  0x3f   :  { %p12164_p10 = pnand %p12163_p9, %p12157_p6 }
  0x41   :  { %12167 = shalt.err (!%p12164_p10)
}
  0x42   :  { %141 = dma.hbm_to_vmem [thread:$0]  %s13121_s10, 128, %s139_s19, [#allocation18]  }
  0x43   :  { %s12176_s2 = scalar_lea.vmem %s158_s20, 65536  ;;  %p12181_p12 = scmp.lt.s32.totalorder %s158_s20, %s158_s20 }
  0x44   :  { %p12177_p11 = scmp.ne.s32.totalorder %s158_s20, %s12176_s2  ;;  %p12182_p13 = scmp.lt.s32.totalorder %s12176_s2, %s12176_s2 }
  0x46   :  { %p12183_p0 = por %p12182_p13, %p12181_p12 }
  0x48   :  { %p12184_p1 = pnand %p12183_p0, %p12177_p11 }
  0x4a   :  { %12187 = shalt.err (!%p12184_p1)
}
  0x4b   :  { %163 = dma.hbm_to_vmem [thread:$0]  %s13123_s12, 65536, %s158_s20, [#allocation21], %s12434_s4, %s12434_s4, %s12435_s0  }
  0x4c   :  { %s12438_s25 = smov [#allocation23]   ;;  %s12439_s29 = smov [#allocation2]  }
  0x4d   :  { %s180_s26 = sshll.u32 %s12438_s25, 4  ;;  %s38_s30 = sshll.u32 %s12439_s29, 4  ;;  %s181_s26 = int_to_ptr.vmem [resolvable:$true] %s180_s26  ;;  %s39_s30 = int_to_ptr.vmem [resolvable:$true] %s38_s30 }
  0x4e   :  { %s12196_s10 = scalar_lea.vmem %s181_s26, 128  ;;  %p12201_p3 = scmp.lt.s32.totalorder %s181_s26, %s181_s26 }
  0x4f   :  { %p12197_p2 = scmp.ne.s32.totalorder %s181_s26, %s12196_s10  ;;  %p12202_p4 = scmp.lt.s32.totalorder %s12196_s10, %s12196_s10 }
  0x51   :  { %p12203_p5 = por %p12202_p4, %p12201_p3 }
  0x53   :  { %p12204_p6 = pnand %p12203_p5, %p12197_p2 }
  0x55   :  { %12207 = shalt.err (!%p12204_p6)
}
  0x56   :  { %183 = dma.hbm_to_vmem [thread:$0]  %s13125_s14, 128, %s181_s26, [#allocation24]  }
  0x57   :  { %s12216_s19 = scalar_lea.vmem %s39_s30, 256  ;;  %p12221_p8 = scmp.lt.s32.totalorder %s39_s30, %s39_s30 }
  0x58   :  { %p12217_p7 = scmp.ne.s32.totalorder %s39_s30, %s12216_s19  ;;  %p12222_p9 = scmp.lt.s32.totalorder %s12216_s19, %s12216_s19 }
  0x5a   :  { %p12223_p10 = por %p12222_p9, %p12221_p8 }
  0x5c   :  { %p12224_p11 = pnand %p12223_p10, %p12217_p7 }
  0x5e   :  { %12227 = shalt.err (!%p12224_p11)
}
  0x5f   :  { %s13131_s20 = sld [smem:[#allocation39_spill]]  ;;  %s12440_s21 = smov [#allocation7]  }
  0x60   :  { %s62_s22 = sshll.u32 %s12440_s21, 4  ;;  %s12441_s23 = smov [#allocation10]   ;;  %s63_s22 = int_to_ptr.vmem [resolvable:$true] %s62_s22 }
  0x61   :  { %s81_s2 = sshll.u32 %s12441_s23, 4  ;;  %s12236_s8 = scalar_lea.vmem %s63_s22, 64  ;;  %s82_s2 = int_to_ptr.vmem [resolvable:$true] %s81_s2 }
  0x62   :  { %p12237_p12 = scmp.ne.s32.totalorder %s63_s22, %s12236_s8  ;;  %p12241_p13 = scmp.lt.s32.totalorder %s63_s22, %s63_s22 }
  0x63   :  { %p12242_p0 = scmp.lt.s32.totalorder %s12236_s8, %s12236_s8 }
  0x65   :  { %41 = dma.hbm_to_vmem [thread:$0]  %s13131_s20, 256, %s39_s30, [#allocation3]  }
  0x66   :  { %p12243_p1 = por %p12242_p0, %p12241_p13 }
  0x68   :  { %p12244_p2 = pnand %p12243_p1, %p12237_p12 }
  0x6a   :  { %12247 = shalt.err (!%p12244_p2)
}
  0x6b   :  { %65 = dma.hbm_to_vmem [thread:$0]  %s13114_s3, 64, %s63_s22, [#allocation6]  }
  0x6c   :  { %s12256_s25 = scalar_lea.vmem %s82_s2, 4096  ;;  %p12261_p4 = scmp.lt.s32.totalorder %s82_s2, %s82_s2 }
  0x6d   :  { %p12257_p3 = scmp.ne.s32.totalorder %s82_s2, %s12256_s25  ;;  %p12262_p5 = scmp.lt.s32.totalorder %s12256_s25, %s12256_s25 }
  0x6f   :  { %p12263_p6 = por %p12262_p5, %p12261_p4 }
  0x71   :  { %p12264_p7 = pnand %p12263_p6, %p12257_p3 }
  0x73   :  { %12267 = shalt.err (!%p12264_p7)
}
  0x74   :  { %87 = dma.hbm_to_vmem [thread:$0]  %s13116_s5, 4096, %s82_s2, [#allocation9], %s12429_s27, %s12429_s27, %s12430_s28  }
  0x75   :  { %s12442_s30 = smov [#allocation13]   ;;  %s12443_s18 = smov [#allocation16]  }
  0x76   :  { %s104_s10 = sshll.u32 %s12442_s30, 4  ;;  %s125_s6 = sshll.u32 %s12443_s18, 4  ;;  %s105_s10 = int_to_ptr.vmem [resolvable:$true] %s104_s10  ;;  %s126_s6 = int_to_ptr.vmem [resolvable:$true] %s125_s6 }
  0x77   :  { %s12276_s3 = scalar_lea.vmem %s105_s10, 64  ;;  %p12281_p9 = scmp.lt.s32.totalorder %s105_s10, %s105_s10 }
  0x78   :  { %p12277_p8 = scmp.ne.s32.totalorder %s105_s10, %s12276_s3  ;;  %p12282_p10 = scmp.lt.s32.totalorder %s12276_s3, %s12276_s3 }
  0x7a   :  { %p12283_p11 = por %p12282_p10, %p12281_p9 }
  0x7c   :  { %p12284_p12 = pnand %p12283_p11, %p12277_p8 }
  0x7e   :  { %12287 = shalt.err (!%p12284_p12)
}
  0x7f   :  { %107 = dma.hbm_to_vmem [thread:$0]  %s13118_s7, 64, %s105_s10, [#allocation12]  }
  0x80   :  { %s12296_s1 = scalar_lea.vmem %s126_s6, 32768  ;;  %p12301_p0 = scmp.lt.s32.totalorder %s126_s6, %s126_s6 }
  0x81   :  { %p12297_p13 = scmp.ne.s32.totalorder %s126_s6, %s12296_s1  ;;  %p12302_p1 = scmp.lt.s32.totalorder %s12296_s1, %s12296_s1 }
  0x83   :  { %p12303_p2 = por %p12302_p1, %p12301_p0 }
  0x85   :  { %p12304_p3 = pnand %p12303_p2, %p12297_p13 }
  0x87   :  { %12307 = shalt.err (!%p12304_p3)
}
  0x88   :  { %131 = dma.hbm_to_vmem [thread:$0]  %s13120_s9, 32768, %s126_s6, [#allocation15], %s12434_s4, %s12434_s4, %s12435_s0  }
  0x89   :  { %s12444_s28 = smov [#allocation19]   ;;  %s12445_s21 = smov [#allocation22]  }
  0x8a   :  { %s148_s20 = sshll.u32 %s12444_s28, 4  ;;  %s170_s22 = sshll.u32 %s12445_s21, 4  ;;  %s149_s20 = int_to_ptr.vmem [resolvable:$true] %s148_s20  ;;  %s171_s22 = int_to_ptr.vmem [resolvable:$true] %s170_s22 }
  0x8b   :  { %s12316_s7 = scalar_lea.vmem %s149_s20, 128  ;;  %p12321_p5 = scmp.lt.s32.totalorder %s149_s20, %s149_s20 }
  0x8c   :  { %p12317_p4 = scmp.ne.s32.totalorder %s149_s20, %s12316_s7  ;;  %p12322_p6 = scmp.lt.s32.totalorder %s12316_s7, %s12316_s7 }
  0x8e   :  { %p12323_p7 = por %p12322_p6, %p12321_p5 }
  0x90   :  { %p12324_p8 = pnand %p12323_p7, %p12317_p4 }
  0x92   :  { %12327 = shalt.err (!%p12324_p8)
}
  0x93   :  { %151 = dma.hbm_to_vmem [thread:$0]  %s13122_s11, 128, %s149_s20, [#allocation18]  }
  0x94   :  { %s12336_s8 = scalar_lea.vmem %s171_s22, 128  ;;  %p12341_p10 = scmp.lt.s32.totalorder %s171_s22, %s171_s22 }
  0x95   :  { %p12337_p9 = scmp.ne.s32.totalorder %s171_s22, %s12336_s8  ;;  %p12342_p11 = scmp.lt.s32.totalorder %s12336_s8, %s12336_s8 }
  0x97   :  { %p12343_p12 = por %p12342_p11, %p12341_p10 }
  0x99   :  { %p12344_p13 = pnand %p12343_p12, %p12337_p9 }
  0x9b   :  { %12347 = shalt.err (!%p12344_p13)
}
  0x9c   :  { %173 = dma.hbm_to_vmem [thread:$0]  %s13124_s13, 128, %s171_s22, [#allocation21]  }
  0x9d   :  { %s12446_s0 = smov [#allocation25]  }
  0x9e   :  { %s189_s14 = sshll.u32 %s12446_s0, 4  ;;  %s190_s14 = int_to_ptr.vmem [resolvable:$true] %s189_s14 }
  0x9f   :  { %s12356_s24 = scalar_lea.vmem %s190_s14, 16384  ;;  %p12361_p1 = scmp.lt.s32.totalorder %s190_s14, %s190_s14 }
  0xa0   :  { %p12357_p0 = scmp.ne.s32.totalorder %s190_s14, %s12356_s24  ;;  %p12362_p2 = scmp.lt.s32.totalorder %s12356_s24, %s12356_s24 }
  0xa2   :  { %p12363_p3 = por %p12362_p2, %p12361_p1 }
  0xa4   :  { %p12364_p4 = pnand %p12363_p3, %p12357_p0 }
  0xa6   :  { %12367 = shalt.err (!%p12364_p4)
}
  0xa7   :  { %s12447_s11 = smov 128   ;;  %s12448_s25 = smov 8  }
  0xa8   :  { %195 = dma.hbm_to_vmem [thread:$0]  %s13126_s15, 16384, %s190_s14, [#allocation24], %s12447_s11, %s12447_s11, %s12448_s25  }
  0xa9   :  { %s12449_s30 = smov [#allocation26]  }
  0xaa   :  { %s202_s10 = sshll.u32 %s12449_s30, 4  ;;  %s203_s10 = int_to_ptr.vmem [resolvable:$true] %s202_s10 }
  0xab   :  { %s12376_s13 = scalar_lea.vmem %s203_s10, 32  ;;  %p12381_p6 = scmp.lt.s32.totalorder %s203_s10, %s203_s10 }
  0xac   :  { %p12377_p5 = scmp.ne.s32.totalorder %s203_s10, %s12376_s13  ;;  %p12382_p7 = scmp.lt.s32.totalorder %s12376_s13, %s12376_s13 }
  0xae   :  { %p12383_p8 = por %p12382_p7, %p12381_p6 }
  0xb0   :  { %p12384_p9 = pnand %p12383_p8, %p12377_p5 }
  0xb2   :  { %12387 = shalt.err (!%p12384_p9)
}
  0xb3   :  { %205 = dma.hbm_to_vmem [thread:$0]  %s13127_s16, 32, %s203_s10, [#allocation27]  }
  0xb4   :  { %12408 = dma.done.wait [#allocation3], 256  }
  0xb5   :  { %12409 = vsyncadd [#allocation3], 4294967040 }
  0xb6   :  { %12410 = dma.done.wait [#allocation6], 8256  }
  0xb7   :  { %12411 = vsyncadd [#allocation6], 4294959040 }
  0xb8   :  { %12412 = dma.done.wait [#allocation9], 4160  }
  0xb9   :  { %12413 = vsyncadd [#allocation9], 4294963136 }
  0xba   :  { %12414 = dma.done.wait [#allocation12], 128  }
  0xbb   :  { %12415 = vsyncadd [#allocation12], 4294967168 }
  0xbc   :  { %12416 = dma.done.wait [#allocation15], 65536  }
  0xbd   :  { %12417 = vsyncadd [#allocation15], 4294901760 }
  0xbe   :  { %12418 = dma.done.wait [#allocation18], 256  }
  0xbf   :  { %12419 = vsyncadd [#allocation18], 4294967040 }
  0xc0   :  { %12420 = dma.done.wait [#allocation21], 65664  }
  0xc1   :  { %12421 = vsyncadd [#allocation21], 4294901632 }
  0xc2   :  { %12422 = dma.done.wait [#allocation24], 16512  }
  0xc3   :  { %12423 = vsyncadd [#allocation24], 4294950784 }
  0xc4   :  { %12424 = dma.done.wait [#allocation27], 32  }
  0xc5   :  { %12425 = vsyncadd [#allocation27], 4294967264  ;;  %v11676_v0 = vld [vmem:[#allocation5 + $0xe4] ss:$16 sps:$4 sm:$0xff]   ;;  %v11678_v1 = vld [vmem:[#allocation5 + $0xec] ss:$16 sps:$4 sm:$0xff]  }
  0xc6   :  { %643 = vmatprep.subr.bf16.mxu0 %v11676_v0  ;;  %v11680_v2 = vld [vmem:[#allocation5 + $0xe0] ss:$16 sps:$4 sm:$0xff]   ;;  %v11681_v3 = vld [vmem:[#allocation5 + $0xe8] ss:$16 sps:$4 sm:$0xff]   ;;  %684 = vmatprep.subr.bf16.mxu1 %v11678_v1  ;;  %v11682_v4 = vld [vmem:[#allocation5 + $0xc4] ss:$16 sps:$4 sm:$0xff]  }
  0xc7   :  { %644 = vmatpush1.bf16.msra.mxu0 %v11680_v2  ;;  %685 = vmatpush1.bf16.msra.mxu1 %v11681_v3  ;;  %v11684_v5 = vld [vmem:[#allocation5 + $0xcc] ss:$16 sps:$4 sm:$0xff]   ;;  %v11686_v6 = vld [vmem:[#allocation5 + $0xc0] ss:$16 sps:$4 sm:$0xff]   ;;  %v11687_v7 = vld [vmem:[#allocation5 + $0xc8] ss:$16 sps:$4 sm:$0xff]  }
  0xc8   :  { %645 = vmatprep.subr.bf16.mxu0 %v11682_v4  ;;  %686 = vmatprep.subr.bf16.mxu1 %v11684_v5  ;;  %v11688_v8 = vld [vmem:[#allocation5 + $0xa4] ss:$16 sps:$4 sm:$0xff]   ;;  %v11690_v9 = vld [vmem:[#allocation5 + $0xac] ss:$16 sps:$4 sm:$0xff]   ;;  %v11692_v10 = vld [vmem:[#allocation5 + $0xa0] ss:$16 sps:$4 sm:$0xff]  }
  0xc9   :  { %v11693_v11 = vld [vmem:[#allocation5 + $0xa8] ss:$16 sps:$4 sm:$0xff]   ;;  %v11694_v12 = vld [vmem:[#allocation5 + $0x84] ss:$16 sps:$4 sm:$0xff]   ;;  %v11696_v13 = vld [vmem:[#allocation5 + $0x8c] ss:$16 sps:$4 sm:$0xff]  }
  0xca   :  { %v11698_v14 = vld [vmem:[#allocation5 + $0x80] ss:$16 sps:$4 sm:$0xff]   ;;  %v11699_v15 = vld [vmem:[#allocation5 + $0x88] ss:$16 sps:$4 sm:$0xff]   ;;  %v11700_v16 = vld [vmem:[#allocation5 + $0x64] ss:$16 sps:$4 sm:$0xff]  }
  0xcb   :  { %646 = vmatpush1.bf16.msra.mxu0 %v11686_v6  ;;  %687 = vmatpush1.bf16.msra.mxu1 %v11687_v7  ;;  %v11702_v17 = vld [vmem:[#allocation5 + $0x6c] ss:$16 sps:$4 sm:$0xff]   ;;  %v11704_v18 = vld [vmem:[#allocation5 + $0x60] ss:$16 sps:$4 sm:$0xff]   ;;  %v11705_v19 = vld [vmem:[#allocation5 + $0x68] ss:$16 sps:$4 sm:$0xff]  }
  0xcc   :  { %647 = vmatprep.subr.bf16.mxu0 %v11688_v8  ;;  %688 = vmatprep.subr.bf16.mxu1 %v11690_v9  ;;  %v11706_v20 = vld [vmem:[#allocation5 + $0x44] ss:$16 sps:$4 sm:$0xff]   ;;  %v11708_v21 = vld [vmem:[#allocation5 + $0x4c] ss:$16 sps:$4 sm:$0xff]   ;;  %v11710_v22 = vld [vmem:[#allocation5 + $0x40] ss:$16 sps:$4 sm:$0xff]  }
  0xcd   :  { %v11711_v23 = vld [vmem:[#allocation5 + $0x48] ss:$16 sps:$4 sm:$0xff]   ;;  %v11712_v24 = vld [vmem:[#allocation5 + $0x24] ss:$16 sps:$4 sm:$0xff]   ;;  %v11714_v25 = vld [vmem:[#allocation5 + $0x2c] ss:$16 sps:$4 sm:$0xff]  }
  0xce   :  { %v11716_v26 = vld [vmem:[#allocation5 + $0x20] ss:$16 sps:$4 sm:$0xff]   ;;  %v11717_v27 = vld [vmem:[#allocation5 + $0x28] ss:$16 sps:$4 sm:$0xff]   ;;  %v11718_v28 = vld [vmem:[#allocation5 + $0x4] ss:$16 sps:$4 sm:$0xff]  }
  0xcf   :  { %648 = vmatpush1.bf16.msra.mxu0 %v11692_v10  ;;  %689 = vmatpush1.bf16.msra.mxu1 %v11693_v11  ;;  %v11720_v29 = vld [vmem:[#allocation5 + $0xc] ss:$16 sps:$4 sm:$0xff]   ;;  %v11722_v30 = vld [vmem:[#allocation5] ss:$16 sps:$4 sm:$0xff]   ;;  %v11723_v31 = vld [vmem:[#allocation5 + $0x8] ss:$16 sps:$4 sm:$0xff]  }
  0xd0   :  { %649 = vmatprep.subr.bf16.mxu0 %v11694_v12  ;;  %690 = vmatprep.subr.bf16.mxu1 %v11696_v13  ;;  %v11724_v32 = vld [vmem:[#allocation5 + $0x1e4] ss:$16 sps:$4 sm:$0xff]   ;;  %v11726_v33 = vld [vmem:[#allocation5 + $0x1ec] ss:$16 sps:$4 sm:$0xff]   ;;  %v11728_v34 = vld [vmem:[#allocation5 + $0x1e0] ss:$16 sps:$4 sm:$0xff]  }
  0xd1   :  { %v11729_v35 = vld [vmem:[#allocation5 + $0x1e8] ss:$16 sps:$4 sm:$0xff]   ;;  %v11730_v36 = vld [vmem:[#allocation5 + $0x1c4] ss:$16 sps:$4 sm:$0xff]   ;;  %v11732_v37 = vld [vmem:[#allocation5 + $0x1cc] ss:$16 sps:$4 sm:$0xff]  }
  0xd2   :  { %v11734_v38 = vld [vmem:[#allocation5 + $0x1c0] ss:$16 sps:$4 sm:$0xff]   ;;  %v11735_v39 = vld [vmem:[#allocation5 + $0x1c8] ss:$16 sps:$4 sm:$0xff]   ;;  %v11736_v40 = vld [vmem:[#allocation5 + $0x1a4] ss:$16 sps:$4 sm:$0xff]  }
  0xd3   :  { %650 = vmatpush1.bf16.msra.mxu0 %v11698_v14  ;;  %691 = vmatpush1.bf16.msra.mxu1 %v11699_v15  ;;  %v11738_v41 = vld [vmem:[#allocation5 + $0x1ac] ss:$16 sps:$4 sm:$0xff]   ;;  %v11740_v42 = vld [vmem:[#allocation5 + $0x1a0] ss:$16 sps:$4 sm:$0xff]   ;;  %v11741_v43 = vld [vmem:[#allocation5 + $0x1a8] ss:$16 sps:$4 sm:$0xff]  }
  0xd4   :  { %651 = vmatprep.subr.bf16.mxu0 %v11700_v16  ;;  %692 = vmatprep.subr.bf16.mxu1 %v11702_v17  ;;  %v11742_v44 = vld [vmem:[#allocation5 + $0x184] ss:$16 sps:$4 sm:$0xff]   ;;  %v11744_v45 = vld [vmem:[#allocation5 + $0x18c] ss:$16 sps:$4 sm:$0xff]   ;;  %v11746_v48 = vld [vmem:[#allocation5 + $0x180] ss:$16 sps:$4 sm:$0xff]  }
  0xd5   :  { %v256_v46 = vld [vmem:[#allocation2 + $0x8] sm:$0xff]  ;;  %v11748_v50 = vld [vmem:[#allocation5 + $0x164] ss:$16 sps:$4 sm:$0xff]   ;;  %v11752_v52 = vld [vmem:[#allocation5 + $0x160] ss:$16 sps:$4 sm:$0xff]   ;;  %v12450_v16 = vmov 0  }
  0xd6   :  { %v258_v47 = vpack.c.bf16 %v256_v46, %v256_v46  ;;  %v11747_v49 = vld [vmem:[#allocation5 + $0x188] ss:$16 sps:$4 sm:$0xff]   ;;  %v11750_v51 = vld [vmem:[#allocation5 + $0x16c] ss:$16 sps:$4 sm:$0xff]   ;;  %v11754_v54 = vld [vmem:[#allocation5 + $0x144] ss:$16 sps:$4 sm:$0xff]  }
  0xd7   :  { %652 = vmatpush1.bf16.msra.mxu0 %v11704_v18  ;;  %693 = vmatpush1.bf16.msra.mxu1 %v11705_v19  ;;  %v11753_v53 = vld [vmem:[#allocation5 + $0x168] ss:$16 sps:$4 sm:$0xff]   ;;  %v11756_v55 = vld [vmem:[#allocation5 + $0x14c] ss:$16 sps:$4 sm:$0xff]   ;;  %v11758_v56 = vld [vmem:[#allocation5 + $0x140] ss:$16 sps:$4 sm:$0xff]  }
  0xd8   :  { %653 = vmatprep.subr.bf16.mxu0 %v11706_v20  ;;  %694 = vmatprep.subr.bf16.mxu1 %v11708_v21  ;;  %v11759_v57 = vld [vmem:[#allocation5 + $0x148] ss:$16 sps:$4 sm:$0xff]   ;;  %v11760_v58 = vld [vmem:[#allocation5 + $0x124] ss:$16 sps:$4 sm:$0xff]   ;;  %v11762_v59 = vld [vmem:[#allocation5 + $0x12c] ss:$16 sps:$4 sm:$0xff]  }
  0xd9   :  { %675 = vmatprep.mubr.bf16.mxu0 %v258_v47  ;;  %716 = vmatprep.mubr.bf16.mxu1 %v258_v47  ;;  %v11764_v60 = vld [vmem:[#allocation5 + $0x120] ss:$16 sps:$4 sm:$0xff]   ;;  %v11765_v61 = vld [vmem:[#allocation5 + $0x128] ss:$16 sps:$4 sm:$0xff]   ;;  %v11766_v62 = vld [vmem:[#allocation5 + $0x104] ss:$16 sps:$4 sm:$0xff]  }
  0xda   :  { %v11768_v63 = vld [vmem:[#allocation5 + $0x10c] ss:$16 sps:$4 sm:$0xff]   ;;  %v11770_v0 = vld [vmem:[#allocation5 + $0x100] ss:$16 sps:$4 sm:$0xff]   ;;  %v11771_v1 = vld [vmem:[#allocation5 + $0x108] ss:$16 sps:$4 sm:$0xff]  }
  0xdb   :  { %654 = vmatpush1.bf16.msra.mxu0 %v11710_v22  ;;  %695 = vmatpush1.bf16.msra.mxu1 %v11711_v23  ;;  %v255_v2 = vld [vmem:[#allocation2] sm:$0xff]  ;;  %v11774_v3 = vld [vmem:[#allocation10 + $0xe4] ss:$16 sps:$4 sm:$0xff]   ;;  %v11772_v6 = vld [vmem:[#allocation10 + $0xe0] ss:$16 sps:$4 sm:$0xff]   ;;  %s13132_s3 = sld [smem:[#allocation40_spill]] }
  0xdc   :  { %655 = vmatprep.subr.bf16.mxu0 %v11712_v24  ;;  %696 = vmatprep.subr.bf16.mxu1 %v11714_v25  ;;  %v11777_v4 = vld [vmem:[#allocation10 + $0xec] ss:$16 sps:$4 sm:$0xff]   ;;  %v257_v5 = vpack.c.bf16 %v255_v2, %v255_v2  ;;  %v11775_v7 = vld [vmem:[#allocation10 + $0xe8] ss:$16 sps:$4 sm:$0xff]   ;;  %v11780_v8 = vld [vmem:[#allocation10 + $0xc4] ss:$16 sps:$4 sm:$0xff]  }
  0xdd   :  { %v11783_v9 = vld [vmem:[#allocation10 + $0xcc] ss:$16 sps:$4 sm:$0xff]   ;;  %v11778_v10 = vld [vmem:[#allocation10 + $0xc0] ss:$16 sps:$4 sm:$0xff]   ;;  %v11781_v11 = vld [vmem:[#allocation10 + $0xc8] ss:$16 sps:$4 sm:$0xff]  }
  0xde   :  { %v11786_v12 = vld [vmem:[#allocation10 + $0xa4] ss:$16 sps:$4 sm:$0xff]   ;;  %v11789_v13 = vld [vmem:[#allocation10 + $0xac] ss:$16 sps:$4 sm:$0xff]   ;;  %v11784_v14 = vld [vmem:[#allocation10 + $0xa0] ss:$16 sps:$4 sm:$0xff]  }
  0xdf   :  { %656 = vmatpush1.bf16.msra.mxu0 %v11716_v26  ;;  %697 = vmatpush1.bf16.msra.mxu1 %v11717_v27  ;;  %v11787_v15 = vld [vmem:[#allocation10 + $0xa8] ss:$16 sps:$4 sm:$0xff]   ;;  %v11792_v17 = vld [vmem:[#allocation10 + $0x84] ss:$16 sps:$4 sm:$0xff]   ;;  %v11795_v18 = vld [vmem:[#allocation10 + $0x8c] ss:$16 sps:$4 sm:$0xff]  }
  0xe0   :  { %657 = vmatprep.subr.bf16.mxu0 %v11718_v28  ;;  %698 = vmatprep.subr.bf16.mxu1 %v11720_v29  ;;  %v11790_v19 = vld [vmem:[#allocation10 + $0x80] ss:$16 sps:$4 sm:$0xff]   ;;  %v11793_v20 = vld [vmem:[#allocation10 + $0x88] ss:$16 sps:$4 sm:$0xff]   ;;  %v11798_v21 = vld [vmem:[#allocation10 + $0x64] ss:$16 sps:$4 sm:$0xff]  }
  0xe1   :  { %v11801_v22 = vld [vmem:[#allocation10 + $0x6c] ss:$16 sps:$4 sm:$0xff]   ;;  %v11796_v23 = vld [vmem:[#allocation10 + $0x60] ss:$16 sps:$4 sm:$0xff]   ;;  %v11799_v24 = vld [vmem:[#allocation10 + $0x68] ss:$16 sps:$4 sm:$0xff]  }
  0xe2   :  { %v11804_v25 = vld [vmem:[#allocation10 + $0x44] ss:$16 sps:$4 sm:$0xff]   ;;  %v11807_v26 = vld [vmem:[#allocation10 + $0x4c] ss:$16 sps:$4 sm:$0xff]   ;;  %v11802_v27 = vld [vmem:[#allocation10 + $0x40] ss:$16 sps:$4 sm:$0xff]  }
  0xe3   :  { %658 = vmatpush1.bf16.msra.mxu0 %v11722_v30  ;;  %699 = vmatpush1.bf16.msra.mxu1 %v11723_v31  ;;  %v11805_v28 = vld [vmem:[#allocation10 + $0x48] ss:$16 sps:$4 sm:$0xff]   ;;  %v11810_v29 = vld [vmem:[#allocation10 + $0x24] ss:$16 sps:$4 sm:$0xff]   ;;  %v11813_v30 = vld [vmem:[#allocation10 + $0x2c] ss:$16 sps:$4 sm:$0xff]  }
  0xe4   :  { %659 = vmatprep.subr.bf16.mxu0 %v11724_v32  ;;  %700 = vmatprep.subr.bf16.mxu1 %v11726_v33  ;;  %v11808_v31 = vld [vmem:[#allocation10 + $0x20] ss:$16 sps:$4 sm:$0xff]   ;;  %v11811_v32 = vld [vmem:[#allocation10 + $0x28] ss:$16 sps:$4 sm:$0xff]   ;;  %v11816_v33 = vld [vmem:[#allocation10 + $0x4] ss:$16 sps:$4 sm:$0xff]  }
  0xe5   :  { %v1630_v47 = vld [vmem:[#allocation16 + $0x180] sm:$0xff]  ;;  %s12452_s19 = smov [#allocation28]  }
  0xe6   :  { %s10384_s12 = sshll.u32 %s12452_s19, 4  ;;  %s10385_s12 = int_to_ptr.vmem [resolvable:$true] %s10384_s12 }
  0xe7   :  { %660 = vmatpush2.bf16.msra.mxu0 %v11728_v34  ;;  %701 = vmatpush2.bf16.msra.mxu1 %v11729_v35  ;;  %v11819_v34 = vld [vmem:[#allocation10 + $0xc] ss:$16 sps:$4 sm:$0xff]   ;;  %v11814_v35 = vld [vmem:[#allocation10] ss:$16 sps:$4 sm:$0xff]   ;;  %s12388_s1 = scalar_lea.vmem %s10385_s12, 256  ;;  %p12393_p11 = scmp.lt.s32.totalorder %s10385_s12, %s10385_s12 }
  0xe8   :  { %661 = vmatprep.subr.bf16.mxu0 %v11730_v36  ;;  %702 = vmatprep.subr.bf16.mxu1 %v11732_v37  ;;  %v11817_v36 = vld [vmem:[#allocation10 + $0x8] ss:$16 sps:$4 sm:$0xff]   ;;  %p12389_p10 = scmp.ne.s32.totalorder %s10385_s12, %s12388_s1  ;;  %p12394_p12 = scmp.lt.s32.totalorder %s12388_s1, %s12388_s1 }
  0xe9   :  { %v884_v37 = vld [vmem:[%s13132_s3] sm:$0xff] }
  0xea   :  { %p12395_p13 = por %p12394_p12, %p12393_p11 }
  0xeb   :  { %662 = vmatpush2.bf16.msra.mxu0 %v11734_v38  ;;  %703 = vmatpush2.bf16.msra.mxu1 %v11735_v39  ;;  %v885_v38 = vpack.c.bf16 %v884_v37, %v884_v37  ;;  %v1638_v39 = vld [vmem:[#allocation16 + $0x1c0] sm:$0xff] }
  0xec   :  { %663 = vmatprep.subr.bf16.mxu0 %v11736_v40  ;;  %704 = vmatprep.subr.bf16.mxu1 %v11738_v41  ;;  %v1642_v40 = vld [vmem:[#allocation16 + $0x1e0] sm:$0xff]  ;;  %p12396_p0 = pnand %p12395_p13, %p12389_p10 }
  0xed   :  { %v1766_v41 = vld [vmem:[#allocation16 + $0x5c0] sm:$0xff] }
  0xef   :  { %664 = vmatpush2.bf16.msra.mxu0 %v11740_v42  ;;  %705 = vmatpush2.bf16.msra.mxu1 %v11741_v43  ;;  %v10554_v42 = vcombine.high %v1638_v39, %v1642_v40  ;;  %v1770_v43 = vld [vmem:[#allocation16 + $0x5e0] sm:$0xff] }
  0xf0   :  { %665 = vmatprep.subr.bf16.mxu0 %v11742_v44  ;;  %706 = vmatprep.subr.bf16.mxu1 %v11744_v45  ;;  %v10553_v44 = vcombine.low %v1638_v39, %v1642_v40  ;;  %v10681_v45 = vcombine.low %v1766_v41, %v1770_v43  ;;  %v10682_v46 = vcombine.high %v1766_v41, %v1770_v43  ;;  %v1702_v39 = vld [vmem:[#allocation16 + $0x3c0] sm:$0xff] }
  0xf1   :  { %v1706_v40 = vld [vmem:[#allocation16 + $0x3e0] sm:$0xff] }
  0xf2   :  { %v1830_v41 = vld [vmem:[#allocation16 + $0x7c0] sm:$0xff]  ;;  %v10617_v43 = vcombine.low %v1702_v39, %v1706_v40 }
  0xf3   :  { %666 = vmatpush2.bf16.msra.mxu0 %v11746_v48  ;;  %707 = vmatpush2.bf16.msra.mxu1 %v11747_v49  ;;  %v1634_v48 = vld [vmem:[#allocation16 + $0x1a0] sm:$0xff] }
  0xf4   :  { %667 = vmatprep.subr.bf16.mxu0 %v11748_v50  ;;  %708 = vmatprep.subr.bf16.mxu1 %v11750_v51  ;;  %v1758_v49 = vld [vmem:[#allocation16 + $0x580] sm:$0xff]  ;;  %v10546_v50 = vcombine.high %v1630_v47, %v1634_v48 }
  0xf5   :  { %v1762_v51 = vld [vmem:[#allocation16 + $0x5a0] sm:$0xff] }
  0xf7   :  { %668 = vmatpush2.bf16.msra.mxu0 %v11752_v52  ;;  %709 = vmatpush2.bf16.msra.mxu1 %v11753_v53  ;;  %v10545_v52 = vcombine.low %v1630_v47, %v1634_v48  ;;  %v10673_v53 = vcombine.low %v1758_v49, %v1762_v51  ;;  %v1694_v47 = vld [vmem:[#allocation16 + $0x380] sm:$0xff] }
  0xf8   :  { %669 = vmatprep.subr.bf16.mxu0 %v11754_v54  ;;  %710 = vmatprep.subr.bf16.mxu1 %v11756_v55  ;;  %v10674_v54 = vcombine.high %v1758_v49, %v1762_v51  ;;  %v1622_v55 = vld [vmem:[#allocation16 + $0x140] sm:$0xff] }
  0xf9   :  { %v1698_v48 = vld [vmem:[#allocation16 + $0x3a0] sm:$0xff] }
  0xfa   :  { %v1822_v49 = vld [vmem:[#allocation16 + $0x780] sm:$0xff] }
  0xfb   :  { %670 = vmatpush2.bf16.msra.mxu0 %v11758_v56  ;;  %711 = vmatpush2.bf16.msra.mxu1 %v11759_v57  ;;  %v1626_v56 = vld [vmem:[#allocation16 + $0x160] sm:$0xff] }
  0xfc   :  { %671 = vmatprep.subr.bf16.mxu0 %v11760_v58  ;;  %712 = vmatprep.subr.bf16.mxu1 %v11762_v59  ;;  %v1750_v57 = vld [vmem:[#allocation16 + $0x540] sm:$0xff]  ;;  %v10538_v58 = vcombine.high %v1622_v55, %v1626_v56 }
  0xfd   :  { %v1754_v59 = vld [vmem:[#allocation16 + $0x560] sm:$0xff] }
  0xfe   :  { %v1826_v51 = vld [vmem:[#allocation16 + $0x7a0] sm:$0xff] }
  0xff   :  { %672 = vmatpush2.bf16.msra.mxu0 %v11764_v60  ;;  %713 = vmatpush2.bf16.msra.mxu1 %v11765_v61  ;;  %v10537_v60 = vcombine.low %v1622_v55, %v1626_v56  ;;  %v10665_v61 = vcombine.low %v1750_v57, %v1754_v59  ;;  %v1686_v55 = vld [vmem:[#allocation16 + $0x340] sm:$0xff] }
 0x100   :  { %673 = vmatprep.subr.bf16.mxu0 %v11766_v62  ;;  %714 = vmatprep.subr.bf16.mxu1 %v11768_v63  ;;  %v10666_v62 = vcombine.high %v1750_v57, %v1754_v59  ;;  %v1614_v63 = vld [vmem:[#allocation16 + $0x100] sm:$0xff] }
 0x101   :  { %v1690_v56 = vld [vmem:[#allocation16 + $0x360] sm:$0xff] }
 0x102   :  { %v1814_v57 = vld [vmem:[#allocation16 + $0x740] sm:$0xff] }
 0x103   :  { %674 = vmatpush2.bf16.msra.mxu0 %v11770_v0  ;;  %715 = vmatpush2.bf16.msra.mxu1 %v11771_v1  ;;  %v1618_v0 = vld [vmem:[#allocation16 + $0x120] sm:$0xff] }
 0x104   :  { %1078 = vmatprep.subr.bf16.mxu0 %v11774_v3  ;;  %1119 = vmatprep.subr.bf16.mxu1 %v11777_v4  ;;  %v1742_v1 = vld [vmem:[#allocation16 + $0x500] sm:$0xff]  ;;  %v10530_v2 = vcombine.high %v1614_v63, %v1618_v0  ;;  %v10529_v4 = vcombine.low %v1614_v63, %v1618_v0 }
 0x105   :  { %v1746_v3 = vld [vmem:[#allocation16 + $0x520] sm:$0xff] }
 0x106   :  { %676 = vmatmul.mubr.bf16.vlgmr.msra.gmra.mxu0 %v257_v5  ;;  %717 = vmatmul.mubr.bf16.vlgmr.msra.gmra.mxu1 %v257_v5  ;;  %v10657_v5 = vcombine.low %v1742_v1, %v1746_v3  ;;  %v1818_v59 = vld [vmem:[#allocation16 + $0x760] sm:$0xff] }
 0x107   :  { %1079 = vmatpush1.bf16.msra.mxu0 %v11772_v6  ;;  %1120 = vmatpush1.bf16.msra.mxu1 %v11775_v7  ;;  %v10658_v6 = vcombine.high %v1742_v1, %v1746_v3  ;;  %v1606_v7 = vld [vmem:[#allocation16 + $0xc0] sm:$0xff] }
 0x108   :  { %1080 = vmatprep.subr.bf16.mxu0 %v11780_v8  ;;  %1121 = vmatprep.subr.bf16.mxu1 %v11783_v9  ;;  %v1610_v8 = vld [vmem:[#allocation16 + $0xe0] sm:$0xff] }
 0x109   :  { %1110 = vmatprep.mubr.bf16.mxu0 %v12450_v16  ;;  %1151 = vmatprep.mubr.bf16.mxu1 %v12450_v16  ;;  %v1734_v9 = vld [vmem:[#allocation16 + $0x4c0] sm:$0xff] }
 0x10a   :  { %v1602_v16 = vld [vmem:[#allocation16 + $0xa0] sm:$0xff] }
 0x10b   :  { %1081 = vmatpush1.bf16.msra.mxu0 %v11778_v10  ;;  %1122 = vmatpush1.bf16.msra.mxu1 %v11781_v11  ;;  %v10522_v10 = vcombine.high %v1606_v7, %v1610_v8  ;;  %v1738_v11 = vld [vmem:[#allocation16 + $0x4e0] sm:$0xff] }
 0x10c   :  { %1082 = vmatprep.subr.bf16.mxu0 %v11786_v12  ;;  %1123 = vmatprep.subr.bf16.mxu1 %v11789_v13  ;;  %v10521_v12 = vcombine.low %v1606_v7, %v1610_v8  ;;  %v10649_v13 = vcombine.low %v1734_v9, %v1738_v11  ;;  %v1678_v63 = vld [vmem:[#allocation16 + $0x300] sm:$0xff] }
 0x10d   :  { %v1682_v0 = vld [vmem:[#allocation16 + $0x320] sm:$0xff] }
 0x10e   :  { %v1806_v1 = vld [vmem:[#allocation16 + $0x700] sm:$0xff] }
 0x10f   :  { %1083 = vmatpush1.bf16.msra.mxu0 %v11784_v14  ;;  %1124 = vmatpush1.bf16.msra.mxu1 %v11787_v15  ;;  %v10650_v14 = vcombine.high %v1734_v9, %v1738_v11  ;;  %v1598_v15 = vld [vmem:[#allocation16 + $0x80] sm:$0xff] }
 0x110   :  { %1084 = vmatprep.subr.bf16.mxu0 %v11792_v17  ;;  %1125 = vmatprep.subr.bf16.mxu1 %v11795_v18  ;;  %v1726_v17 = vld [vmem:[#allocation16 + $0x480] sm:$0xff]  ;;  %v10514_v18 = vcombine.high %v1598_v15, %v1602_v16 }
 0x111   :  { %v1810_v3 = vld [vmem:[#allocation16 + $0x720] sm:$0xff] }
 0x112   :  { %v1670_v7 = vld [vmem:[#allocation16 + $0x2c0] sm:$0xff] }
 0x113   :  { %1085 = vmatpush1.bf16.msra.mxu0 %v11790_v19  ;;  %1126 = vmatpush1.bf16.msra.mxu1 %v11793_v20  ;;  %v1730_v19 = vld [vmem:[#allocation16 + $0x4a0] sm:$0xff]  ;;  %v10513_v20 = vcombine.low %v1598_v15, %v1602_v16 }
 0x114   :  { %1086 = vmatprep.subr.bf16.mxu0 %v11798_v21  ;;  %1127 = vmatprep.subr.bf16.mxu1 %v11801_v22  ;;  %v10641_v21 = vcombine.low %v1726_v17, %v1730_v19  ;;  %v10642_v22 = vcombine.high %v1726_v17, %v1730_v19  ;;  %v1674_v8 = vld [vmem:[#allocation16 + $0x2e0] sm:$0xff] }
 0x115   :  { %v1798_v9 = vld [vmem:[#allocation16 + $0x6c0] sm:$0xff] }
 0x116   :  { %v1802_v11 = vld [vmem:[#allocation16 + $0x6e0] sm:$0xff] }
 0x117   :  { %1087 = vmatpush1.bf16.msra.mxu0 %v11796_v23  ;;  %1128 = vmatpush1.bf16.msra.mxu1 %v11799_v24  ;;  %v1590_v23 = vld [vmem:[#allocation16 + $0x40] sm:$0xff] }
 0x118   :  { %1088 = vmatprep.subr.bf16.mxu0 %v11804_v25  ;;  %1129 = vmatprep.subr.bf16.mxu1 %v11807_v26  ;;  %v1594_v24 = vld [vmem:[#allocation16 + $0x60] sm:$0xff] }
 0x119   :  { %v1718_v25 = vld [vmem:[#allocation16 + $0x440] sm:$0xff]  ;;  %v10506_v26 = vcombine.high %v1590_v23, %v1594_v24 }
 0x11a   :  { %v1662_v15 = vld [vmem:[#allocation16 + $0x280] sm:$0xff] }
 0x11b   :  { %1089 = vmatpush1.bf16.msra.mxu0 %v11802_v27  ;;  %1130 = vmatpush1.bf16.msra.mxu1 %v11805_v28  ;;  %v1722_v27 = vld [vmem:[#allocation16 + $0x460] sm:$0xff]  ;;  %v10505_v28 = vcombine.low %v1590_v23, %v1594_v24 }
 0x11c   :  { %1090 = vmatprep.subr.bf16.mxu0 %v11810_v29  ;;  %1131 = vmatprep.subr.bf16.mxu1 %v11813_v30  ;;  %v10633_v29 = vcombine.low %v1718_v25, %v1722_v27  ;;  %v10634_v30 = vcombine.high %v1718_v25, %v1722_v27  ;;  %v1666_v16 = vld [vmem:[#allocation16 + $0x2a0] sm:$0xff] }
 0x11d   :  { %v1790_v17 = vld [vmem:[#allocation16 + $0x680] sm:$0xff] }
 0x11e   :  { %v1794_v19 = vld [vmem:[#allocation16 + $0x6a0] sm:$0xff] }
 0x11f   :  { %1091 = vmatpush1.bf16.msra.mxu0 %v11808_v31  ;;  %1132 = vmatpush1.bf16.msra.mxu1 %v11811_v32  ;;  %v1582_v31 = vld [vmem:[#allocation16] sm:$0xff] }
 0x120   :  { %1092 = vmatprep.subr.bf16.mxu0 %v11816_v33  ;;  %1133 = vmatprep.subr.bf16.mxu1 %v11819_v34  ;;  %v1586_v32 = vld [vmem:[#allocation16 + $0x20] sm:$0xff] }
 0x121   :  { %v1710_v33 = vld [vmem:[#allocation16 + $0x400] sm:$0xff]  ;;  %v10498_v34 = vcombine.high %v1582_v31, %v1586_v32 }
 0x122   :  { %v1654_v23 = vld [vmem:[#allocation16 + $0x240] sm:$0xff] }
 0x123   :  { %1093 = vmatpush1.bf16.msra.mxu0 %v11814_v35  ;;  %1134 = vmatpush1.bf16.msra.mxu1 %v11817_v36  ;;  %v1714_v35 = vld [vmem:[#allocation16 + $0x420] sm:$0xff]  ;;  %v10497_v36 = vcombine.low %v1582_v31, %v1586_v32 }
 0x124   :  { %3118 = vmatprep.subr.bf16.mxu0 %v10554_v42  ;;  %3159 = vmatprep.subr.bf16.mxu1 %v10682_v46  ;;  %v10625_v37 = vcombine.low %v1710_v33, %v1714_v35  ;;  %v1834_v42 = vld [vmem:[#allocation16 + $0x7e0] sm:$0xff] }
 0x125   :  { %v10746_v46 = vcombine.high %v1830_v41, %v1834_v42  ;;  %v1658_v24 = vld [vmem:[#allocation16 + $0x260] sm:$0xff] }
 0x126   :  { %1111 = vmatmul.mubr.bf16.vlgmr.msra.gmra.mxu0 %v885_v38  ;;  %1152 = vmatmul.mubr.bf16.vlgmr.msra.gmra.mxu1 %v885_v38  ;;  %v10626_v38 = vcombine.high %v1710_v33, %v1714_v35  ;;  %v1782_v25 = vld [vmem:[#allocation16 + $0x640] sm:$0xff] }
 0x127   :  { %3119 = vmatpush1.bf16.msra.mxu0 %v10553_v44  ;;  %3160 = vmatpush1.bf16.msra.mxu1 %v10681_v45  ;;  %v10618_v44 = vcombine.high %v1702_v39, %v1706_v40  ;;  %v10745_v45 = vcombine.low %v1830_v41, %v1834_v42  ;;  %v1786_v27 = vld [vmem:[#allocation16 + $0x660] sm:$0xff]  ;;  %v12609_v39 = vld [vmem:[#allocation16 + $0x1c8] sm:$0xff] }
 0x128   :  { %3120 = vmatprep.subr.bf16.mxu0 %v10546_v50  ;;  %3161 = vmatprep.subr.bf16.mxu1 %v10674_v54  ;;  %v10610_v50 = vcombine.high %v1694_v47, %v1698_v48  ;;  %v10738_v54 = vcombine.high %v1822_v49, %v1826_v51  ;;  %v1646_v31 = vld [vmem:[#allocation16 + $0x200] sm:$0xff]  ;;  %v12611_v40 = vld [vmem:[#allocation16 + $0x1e8] sm:$0xff] }
 0x129   :  { %v1650_v32 = vld [vmem:[#allocation16 + $0x220] sm:$0xff]  ;;  %v12613_v41 = vld [vmem:[#allocation16 + $0x5c8] sm:$0xff]  ;;  %v10556_v42 = vcombine.high %v12609_v39, %v12611_v40 }
 0x12a   :  { %v1774_v33 = vld [vmem:[#allocation16 + $0x600] sm:$0xff]  ;;  %v10562_v35 = vcombine.high %v1646_v31, %v1650_v32 }
 0x12b   :  { %3121 = vmatpush1.bf16.msra.mxu0 %v10545_v52  ;;  %3162 = vmatpush1.bf16.msra.mxu1 %v10673_v53  ;;  %v10609_v52 = vcombine.low %v1694_v47, %v1698_v48  ;;  %v10737_v53 = vcombine.low %v1822_v49, %v1826_v51 }
 0x12c   :  { %3122 = vmatprep.subr.bf16.mxu0 %v10538_v58  ;;  %3163 = vmatprep.subr.bf16.mxu1 %v10666_v62  ;;  %v10602_v58 = vcombine.high %v1686_v55, %v1690_v56  ;;  %v10730_v62 = vcombine.high %v1814_v57, %v1818_v59 }
 0x12f   :  { %3123 = vmatpush1.bf16.msra.mxu0 %v10537_v60  ;;  %3164 = vmatpush1.bf16.msra.mxu1 %v10665_v61  ;;  %v10601_v60 = vcombine.low %v1686_v55, %v1690_v56  ;;  %v10729_v61 = vcombine.low %v1814_v57, %v1818_v59 }
 0x130   :  { %3124 = vmatprep.subr.bf16.mxu0 %v10530_v2  ;;  %3165 = vmatprep.subr.bf16.mxu1 %v10658_v6  ;;  %v10594_v2 = vcombine.high %v1678_v63, %v1682_v0  ;;  %v10722_v6 = vcombine.high %v1806_v1, %v1810_v3 }
 0x133   :  { %3125 = vmatpush1.bf16.msra.mxu0 %v10529_v4  ;;  %3166 = vmatpush1.bf16.msra.mxu1 %v10657_v5  ;;  %v10593_v4 = vcombine.low %v1678_v63, %v1682_v0  ;;  %v10721_v5 = vcombine.low %v1806_v1, %v1810_v3 }
 0x134   :  { %3126 = vmatprep.subr.bf16.mxu0 %v10522_v10  ;;  %3167 = vmatprep.subr.bf16.mxu1 %v10650_v14  ;;  %v10586_v10 = vcombine.high %v1670_v7, %v1674_v8  ;;  %v10714_v14 = vcombine.high %v1798_v9, %v1802_v11 }
 0x137   :  { %3127 = vmatpush1.bf16.msra.mxu0 %v10521_v12  ;;  %3168 = vmatpush1.bf16.msra.mxu1 %v10649_v13  ;;  %v10585_v12 = vcombine.low %v1670_v7, %v1674_v8  ;;  %v10713_v13 = vcombine.low %v1798_v9, %v1802_v11 }
 0x138   :  { %3128 = vmatprep.subr.bf16.mxu0 %v10514_v18  ;;  %3169 = vmatprep.subr.bf16.mxu1 %v10642_v22  ;;  %v10578_v18 = vcombine.high %v1662_v15, %v1666_v16  ;;  %v10706_v22 = vcombine.high %v1790_v17, %v1794_v19 }
 0x13b   :  { %3129 = vmatpush1.bf16.msra.mxu0 %v10513_v20  ;;  %3170 = vmatpush1.bf16.msra.mxu1 %v10641_v21  ;;  %v10577_v20 = vcombine.low %v1662_v15, %v1666_v16  ;;  %v10705_v21 = vcombine.low %v1790_v17, %v1794_v19 }
 0x13c   :  { %3130 = vmatprep.subr.bf16.mxu0 %v10506_v26  ;;  %3171 = vmatprep.subr.bf16.mxu1 %v10634_v30  ;;  %v10570_v26 = vcombine.high %v1654_v23, %v1658_v24  ;;  %v10698_v30 = vcombine.high %v1782_v25, %v1786_v27 }
 0x13f   :  { %3131 = vmatpush1.bf16.msra.mxu0 %v10505_v28  ;;  %3172 = vmatpush1.bf16.msra.mxu1 %v10633_v29  ;;  %v10569_v28 = vcombine.low %v1654_v23, %v1658_v24  ;;  %v10697_v29 = vcombine.low %v1782_v25, %v1786_v27 }
 0x140   :  { %3132 = vmatprep.subr.bf16.mxu0 %v10498_v34  ;;  %3173 = vmatprep.subr.bf16.mxu1 %v10626_v38  ;;  %v10561_v34 = vcombine.low %v1646_v31, %v1650_v32 }
 0x143   :  { %3133 = vmatpush1.bf16.msra.mxu0 %v10497_v36  ;;  %3174 = vmatpush1.bf16.msra.mxu1 %v10625_v37  ;;  %v1778_v36 = vld [vmem:[#allocation16 + $0x620] sm:$0xff] }
 0x144   :  { %3134 = vmatprep.subr.bf16.mxu0 %v10618_v44  ;;  %3175 = vmatprep.subr.bf16.mxu1 %v10746_v46  ;;  %v10689_v37 = vcombine.low %v1774_v33, %v1778_v36  ;;  %v10690_v38 = vcombine.high %v1774_v33, %v1778_v36  ;;  %v10555_v44 = vcombine.low %v12609_v39, %v12611_v40 }
 0x147   :  { %3135 = vmatpush2.bf16.msra.mxu0 %v10617_v43  ;;  %3176 = vmatpush2.bf16.msra.mxu1 %v10745_v45  ;;  %v12617_v43 = vld [vmem:[#allocation16 + $0x5e8] sm:$0xff] }
 0x148   :  { %3136 = vmatprep.subr.bf16.mxu0 %v10610_v50  ;;  %3177 = vmatprep.subr.bf16.mxu1 %v10738_v54  ;;  %v10683_v45 = vcombine.low %v12613_v41, %v12617_v43  ;;  %v10684_v46 = vcombine.high %v12613_v41, %v12617_v43 }
 0x14b   :  { %3137 = vmatpush2.bf16.msra.mxu0 %v10609_v52  ;;  %3178 = vmatpush2.bf16.msra.mxu1 %v10737_v53 }
 0x14c   :  { %3138 = vmatprep.subr.bf16.mxu0 %v10602_v58  ;;  %3179 = vmatprep.subr.bf16.mxu1 %v10730_v62 }
 0x14f   :  { %3139 = vmatpush2.bf16.msra.mxu0 %v10601_v60  ;;  %3180 = vmatpush2.bf16.msra.mxu1 %v10729_v61 }
 0x150   :  { %3140 = vmatprep.subr.bf16.mxu0 %v10594_v2  ;;  %3181 = vmatprep.subr.bf16.mxu1 %v10722_v6 }
 0x153   :  { %3141 = vmatpush2.bf16.msra.mxu0 %v10593_v4  ;;  %3182 = vmatpush2.bf16.msra.mxu1 %v10721_v5 }
 0x154   :  { %3142 = vmatprep.subr.bf16.mxu0 %v10586_v10  ;;  %3183 = vmatprep.subr.bf16.mxu1 %v10714_v14 }
 0x157   :  { %3143 = vmatpush2.bf16.msra.mxu0 %v10585_v12  ;;  %3184 = vmatpush2.bf16.msra.mxu1 %v10713_v13 }
 0x158   :  { %3144 = vmatprep.subr.bf16.mxu0 %v10578_v18  ;;  %3185 = vmatprep.subr.bf16.mxu1 %v10706_v22 }
 0x15b   :  { %3145 = vmatpush2.bf16.msra.mxu0 %v10577_v20  ;;  %3186 = vmatpush2.bf16.msra.mxu1 %v10705_v21 }
 0x15c   :  { %3146 = vmatprep.subr.bf16.mxu0 %v10570_v26  ;;  %3187 = vmatprep.subr.bf16.mxu1 %v10698_v30 }
 0x15f   :  { %3147 = vmatpush2.bf16.msra.mxu0 %v10569_v28  ;;  %3188 = vmatpush2.bf16.msra.mxu1 %v10697_v29 }
 0x160   :  { %3148 = vmatprep.subr.bf16.mxu0 %v10562_v35  ;;  %3189 = vmatprep.subr.bf16.mxu1 %v10690_v38 }
 0x163   :  { %3149 = vmatpush2.bf16.msra.mxu0 %v10561_v34  ;;  %3190 = vmatpush2.bf16.msra.mxu1 %v10689_v37 }
 0x164   :  { %3200 = vmatprep.subr.bf16.mxu0 %v10556_v42  ;;  %3241 = vmatprep.subr.bf16.mxu1 %v10684_v46 }
 0x1c6   :  { %v677_v47 = vpop.f32.mrf.mxu0  ;;  %v718_v48 = vpop.f32.mrf.mxu1 }
 0x1c7   :  { %v727_v49 = vrot.slane %v677_v47, 4  ;;  %v739_v50 = vrot.slane %v718_v48, 4 }
 0x1c8   :  { %v679_v51 = vpop.f32.mrf.mxu0  ;;  %v720_v52 = vpop.f32.mrf.mxu1 }
 0x1c9   :  { %v728_v53 = vadd.f32 %v727_v49, %v677_v47  ;;  %v740_v54 = vadd.f32 %v739_v50, %v718_v48  ;;  %v733_v55 = vrot.slane %v679_v51, 4  ;;  %v745_v56 = vrot.slane %v720_v52, 4 }
 0x1ca   :  { %v681_v57 = vpop.f32.mrf.mxu0  ;;  %v722_v58 = vpop.f32.mrf.mxu1 }
 0x1cb   :  { %v729_v59 = vrot.slane %v728_v53, 2  ;;  %v741_v60 = vrot.slane %v740_v54, 2  ;;  %v734_v61 = vadd.f32 %v733_v55, %v679_v51  ;;  %v746_v62 = vadd.f32 %v745_v56, %v720_v52 }
 0x1cc   :  { %v682_v63 = vpop.f32.mrf.mxu0  ;;  %v723_v0 = vpop.f32.mrf.mxu1 }
 0x1cd   :  { %v730_v1 = vadd.f32 %v729_v59, %v728_v53  ;;  %v742_v2 = vadd.f32 %v741_v60, %v740_v54  ;;  %v735_v3 = vrot.slane %v734_v61, 2  ;;  %v747_v4 = vrot.slane %v746_v62, 2 }
 0x1cf   :  { %v731_v5 = vrot.slane %v730_v1, 1  ;;  %v743_v6 = vrot.slane %v742_v2, 1  ;;  %v736_v7 = vadd.f32 %v735_v3, %v734_v61  ;;  %v748_v8 = vadd.f32 %v747_v4, %v746_v62 }
 0x1d1   :  { %v732_v9 = vadd.f32 %v731_v5, %v730_v1  ;;  %v744_v10 = vadd.f32 %v743_v6, %v742_v2  ;;  %v737_v11 = vrot.slane %v736_v7, 1  ;;  %v749_v12 = vrot.slane %v748_v8, 1 }
 0x1d3   :  { %v752_v13 = vmul.f32 0.125, %v732_v9  ;;  %v754_v14 = vmul.f32 0.125, %v744_v10  ;;  %v738_v15 = vadd.f32 %v737_v11, %v736_v7  ;;  %v750_v16 = vadd.f32 %v749_v12, %v748_v8 }
 0x1d5   :  { %v12625_v17 = vsub.f32 %v677_v47, %v752_v13  ;;  %v12627_v18 = vsub.f32 %v718_v48, %v754_v14  ;;  %v753_v19 = vmul.f32 0.125, %v738_v15  ;;  %v755_v20 = vmul.f32 0.125, %v750_v16 }
 0x1d7   :  { %v760_v21 = vmul.f32 %v12625_v17, %v12625_v17  ;;  %v762_v22 = vmul.f32 %v12627_v18, %v12627_v18  ;;  %v12633_v23 = vsub.f32 %v679_v51, %v753_v19  ;;  %v12635_v24 = vsub.f32 %v720_v52, %v755_v20 }
 0x1d9   :  { %v764_v25 = vrot.slane %v760_v21, 4  ;;  %v776_v26 = vrot.slane %v762_v22, 4  ;;  %v761_v27 = vmul.f32 %v12633_v23, %v12633_v23  ;;  %v763_v28 = vmul.f32 %v12635_v24, %v12635_v24 }
 0x1db   :  { %v765_v29 = vadd.f32 %v764_v25, %v760_v21  ;;  %v777_v30 = vadd.f32 %v776_v26, %v762_v22  ;;  %v770_v31 = vrot.slane %v761_v27, 4  ;;  %v782_v32 = vrot.slane %v763_v28, 4 }
 0x1dd   :  { %v766_v33 = vrot.slane %v765_v29, 2  ;;  %v778_v34 = vrot.slane %v777_v30, 2  ;;  %v771_v35 = vadd.f32 %v770_v31, %v761_v27  ;;  %v783_v36 = vadd.f32 %v782_v32, %v763_v28 }
 0x1de   :  { %v12451_v27 = vmov 1966171168  }
 0x1df   :  { %v767_v37 = vadd.f32 %v766_v33, %v765_v29  ;;  %v779_v38 = vadd.f32 %v778_v34, %v777_v30  ;;  %v772_v42 = vrot.slane %v771_v35, 2  ;;  %v784_v46 = vrot.slane %v783_v36, 2 }
 0x1e0   :  { %v807_v28 = vunpack.c.l.s4 %v12451_v27  ;;  %v809_v29 = vlaneseq }
 0x1e1   :  { %v768_v47 = vrot.slane %v767_v37, 1  ;;  %v780_v48 = vrot.slane %v779_v38, 1  ;;  %v773_v49 = vadd.f32 %v772_v42, %v771_v35  ;;  %v785_v50 = vadd.f32 %v784_v46, %v783_v36 }
 0x1e2   :  { %v12641_v42 = vshrl.u32 %v809_v29, 7 }
 0x1e3   :  { %v769_v51 = vadd.f32 %v768_v47, %v767_v37  ;;  %v781_v52 = vadd.f32 %v780_v48, %v779_v38  ;;  %v774_v53 = vrot.slane %v773_v49, 1  ;;  %v786_v54 = vrot.slane %v785_v50, 1 }
 0x1e4   :  { %v808_v38 = vunpack.c.0.s8 %v807_v28  ;;  %v12669_v28 = vsub.s32 1, %v12641_v42 }
 0x1e5   :  { %v788_v55 = vmul.f32 0.125, %v769_v51  ;;  %v790_v56 = vmul.f32 0.125, %v781_v52  ;;  %v775_v57 = vadd.f32 %v774_v53, %v773_v49  ;;  %v787_v58 = vadd.f32 %v786_v54, %v785_v50 }
 0x1e6   :  { %v1112_v59 = vpop.f32.mrf.mxu0  ;;  %v1153_v60 = vpop.f32.mrf.mxu1 }
 0x1e7   :  { %v792_v61 = vadd.f32 1e-05, %v788_v55  ;;  %v794_v62 = vadd.f32 1e-05, %v790_v56  ;;  %v789_v63 = vmul.f32 0.125, %v775_v57  ;;  %v791_v0 = vmul.f32 0.125, %v787_v58 }
 0x1e8   :  { %v1162_v1 = vrot.slane %v1112_v59, 4  ;;  %v1174_v2 = vrot.slane %v1153_v60, 4  ;;  %v1114_v3 = vpop.f32.mrf.mxu0  ;;  %v1155_v4 = vpop.f32.mrf.mxu1  ;;  %v12648_v56 = vsub.s32 %v808_v38, %v12641_v42 }
 0x1e9   :  { %12012 = vrsqrt.f32 %v792_v61  ;;  %v793_v5 = vadd.f32 1e-05, %v789_v63  ;;  %v795_v6 = vadd.f32 1e-05, %v791_v0  ;;  %v1168_v7 = vrot.slane %v1114_v3, 4 }
 0x1ea   :  { %12014 = vrsqrt.f32 %v794_v62  ;;  %v1163_v8 = vadd.f32 %v1162_v1, %v1112_v59  ;;  %v1175_v9 = vadd.f32 %v1174_v2, %v1153_v60  ;;  %v1180_v10 = vrot.slane %v1155_v4, 4  ;;  %v1116_v11 = vpop.f32.mrf.mxu0  ;;  %v1157_v12 = vpop.f32.mrf.mxu1 }
 0x1eb   :  { %12016 = vrsqrt.f32 %v793_v5  ;;  %v1169_v13 = vadd.f32 %v1168_v7, %v1114_v3 }
 0x1ec   :  { %12018 = vrsqrt.f32 %v795_v6  ;;  %v1164_v14 = vrot.slane %v1163_v8, 2  ;;  %v1176_v15 = vrot.slane %v1175_v9, 2  ;;  %v1181_v16 = vadd.f32 %v1180_v10, %v1155_v4  ;;  %v1117_v19 = vpop.f32.mrf.mxu0  ;;  %v1158_v20 = vpop.f32.mrf.mxu1 }
 0x1ed   :  { %v1170_v21 = vrot.slane %v1169_v13, 2  ;;  %v12665_v19 = vsub.s32 3, %v12641_v42 }
 0x1ee   :  { %v1165_v22 = vadd.f32 %v1164_v14, %v1163_v8  ;;  %v1177_v25 = vadd.f32 %v1176_v15, %v1175_v9  ;;  %v1182_v26 = vrot.slane %v1181_v16, 2 }
 0x1ef   :  { %v1171_v30 = vadd.f32 %v1170_v21, %v1169_v13 }
 0x1f0   :  { %v1166_v31 = vrot.slane %v1165_v22, 1  ;;  %v1178_v32 = vrot.slane %v1177_v25, 1  ;;  %v1183_v33 = vadd.f32 %v1182_v26, %v1181_v16  ;;  %v725_v16 = vld [vmem:[#allocation7] sm:$0xf] }
 0x1f1   :  { %v1172_v34 = vrot.slane %v1171_v30, 1 }
 0x1f2   :  { %v1167_v35 = vadd.f32 %v1166_v31, %v1165_v22  ;;  %v1179_v36 = vadd.f32 %v1178_v32, %v1177_v25  ;;  %v1184_v37 = vrot.slane %v1183_v33, 1 }
 0x1f3   :  { %v1173_v46 = vadd.f32 %v1172_v34, %v1171_v30 }
 0x1f4   :  { %v1186_v47 = vmul.f32 0.125, %v1167_v35  ;;  %v1188_v48 = vmul.f32 0.125, %v1179_v36  ;;  %v1185_v49 = vadd.f32 %v1184_v37, %v1183_v33 }
 0x1f5   :  { %v1187_v50 = vmul.f32 0.125, %v1173_v46  ;;  %v12673_v46 = vsub.s32 0, %v12641_v42 }
 0x1f6   :  { %v12013_v51 = vpop.eup %12012  ;;  %v12643_v52 = vsub.f32 %v1112_v59, %v1186_v47  ;;  %v12645_v53 = vsub.f32 %v1153_v60, %v1188_v48  ;;  %v1189_v54 = vmul.f32 0.125, %v1185_v49 }
 0x1f7   :  { %v12015_v55 = vpop.eup %12014  ;;  %v12650_v57 = vsub.f32 %v1114_v3, %v1187_v50 }
 0x1f8   :  { %v12017_v58 = vpop.eup %12016  ;;  %v1194_v61 = vmul.f32 %v12643_v52, %v12643_v52  ;;  %v1196_v62 = vmul.f32 %v12645_v53, %v12645_v53  ;;  %v12656_v63 = vsub.f32 %v1155_v4, %v1189_v54 }
 0x1f9   :  { %v12019_v59 = vpop.eup %12018  ;;  %v804_v0 = vcombine.low %v12013_v51, %v12017_v58  ;;  %v1195_v60 = vmul.f32 %v12650_v57, %v12650_v57 }
 0x1fa   :  { %v805_v1 = vcombine.low %v12015_v55, %v12019_v59  ;;  %v1198_v2 = vrot.slane %v1194_v61, 4  ;;  %v1210_v5 = vrot.slane %v1196_v62, 4  ;;  %v1197_v3 = vmul.f32 %v12656_v63, %v12656_v63 }
 0x1fb   :  { %v812_v6 = vrot.slane %v804_v0, %v12648_v56  ;;  %v1204_v7 = vrot.slane %v1195_v60, 4  ;;  %v12683_v0 = vsub.s32 2, %v12641_v42 }
 0x1fc   :  { %v819_v8 = vrot.slane %v805_v1, %v12648_v56  ;;  %v1199_v9 = vadd.f32 %v1198_v2, %v1194_v61  ;;  %v1211_v10 = vadd.f32 %v1210_v5, %v1196_v62  ;;  %v1216_v4 = vrot.slane %v1197_v3, 4 }
 0x1fd   :  { %v1205_v11 = vadd.f32 %v1204_v7, %v1195_v60 }
 0x1fe   :  { %v820_v12 = vcombine.low %v812_v6, %v819_v8  ;;  %v1200_v13 = vrot.slane %v1199_v9, 2  ;;  %v1212_v14 = vrot.slane %v1211_v10, 2  ;;  %v1217_v15 = vadd.f32 %v1216_v4, %v1197_v3 }
 0x1ff   :  { %v1206_v20 = vrot.slane %v1205_v11, 2 }
 0x200   :  { %v827_v21 = vrot.slane %v820_v12, %v12648_v56  ;;  %v1201_v22 = vadd.f32 %v1200_v13, %v1199_v9  ;;  %v1213_v25 = vadd.f32 %v1212_v14, %v1211_v10  ;;  %v1218_v26 = vrot.slane %v1217_v15, 2  ;;  %v1160_v12 = vld [vmem:[#allocation11] sm:$0xf]  ;;  %v1161_v13 = vld [vmem:[#allocation13] sm:$0xf] }
 0x201   :  { %v1207_v27 = vadd.f32 %v1206_v20, %v1205_v11  ;;  %v1301_v20 = vrot.slane %v1161_v13, %v12683_v0 }
 0x202   :  { %v829_v29 = vmul.f32 %v827_v21, %v725_v16  ;;  %v1202_v30 = vrot.slane %v1201_v22, 1  ;;  %v1214_v31 = vrot.slane %v1213_v25, 1  ;;  %v1219_v32 = vadd.f32 %v1218_v26, %v1217_v15 }
 0x203   :  { %v1208_v33 = vrot.slane %v1207_v27, 1  ;;  %v1305_v15 = vrot.slane %v1161_v13, %v12665_v19  ;;  %v1293_v16 = vrot.slane %v1161_v13, %v12673_v46 }
 0x204   :  { %v846_v34 = vrot.slane %v829_v29, %v12665_v19  ;;  %v1203_v35 = vadd.f32 %v1202_v30, %v1201_v22  ;;  %v1215_v36 = vadd.f32 %v1214_v31, %v1213_v25  ;;  %v1220_v37 = vrot.slane %v1219_v32, 1 }
 0x205   :  { %v1209_v38 = vadd.f32 %v1208_v33, %v1207_v27  ;;  %v838_v47 = vrot.slane %v829_v29, %v12669_v28  ;;  %v834_v1 = vrot.slane %v829_v29, %v12673_v46 }
 0x206   :  { %v12677_v48 = vmul.f32 %v846_v34, %v12635_v24  ;;  %v1222_v49 = vmul.f32 0.125, %v1203_v35  ;;  %v1224_v50 = vmul.f32 0.125, %v1215_v36  ;;  %v1221_v51 = vadd.f32 %v1220_v37, %v1219_v32 }
 0x207   :  { %v1223_v54 = vmul.f32 0.125, %v1209_v38  ;;  %v12680_v55 = vmul.f32 %v838_v47, %v12633_v23  ;;  %v12687_v24 = vmul.f32 %v834_v1, %v12625_v17  ;;  %v842_v23 = vrot.slane %v829_v29, %v12683_v0  ;;  %v1755_v1 = vld [vmem:[#allocation16 + $0x568] sm:$0xff] }
 0x208   :  { %v1226_v58 = vadd.f32 1e-05, %v1222_v49  ;;  %v1228_v61 = vadd.f32 1e-05, %v1224_v50  ;;  %v1225_v62 = vmul.f32 0.125, %v1221_v51  ;;  %v1631_v49 = vld [vmem:[#allocation16 + $0x188] sm:$0xff] }
 0x209   :  { %v1227_v59 = vadd.f32 1e-05, %v1223_v54  ;;  %v12691_v2 = vmul.f32 %v842_v23, %v12627_v18  ;;  %v1297_v18 = vrot.slane %v1161_v13, %v12669_v28  ;;  %v1635_v50 = vld [vmem:[#allocation16 + $0x1a8] sm:$0xff] }
 0x20a   :  { %12020 = vrsqrt.f32 %v1226_v58  ;;  %v1229_v60 = vadd.f32 1e-05, %v1225_v62  ;;  %v1759_v51 = vld [vmem:[#allocation16 + $0x588] sm:$0xff]  ;;  %v10547_v23 = vcombine.low %v1631_v49, %v1635_v50 }
 0x20b   :  { %12022 = vrsqrt.f32 %v1228_v61  ;;  %v1763_v54 = vld [vmem:[#allocation16 + $0x5a8] sm:$0xff]  ;;  %v10548_v61 = vcombine.high %v1631_v49, %v1635_v50 }
 0x20c   :  { %12024 = vrsqrt.f32 %v1227_v59  ;;  %v10676_v62 = vcombine.high %v1759_v51, %v1763_v54  ;;  %v1627_v59 = vld [vmem:[#allocation16 + $0x168] sm:$0xff] }
 0x20d   :  { %12026 = vrsqrt.f32 %v1229_v60  ;;  %v1751_v60 = vld [vmem:[#allocation16 + $0x548] sm:$0xff] }
 0x20e   :  { %v10667_v40 = vcombine.low %v1751_v60, %v1755_v1 }
 0x217   :  { %v12021_v5 = vpop.eup %12020 }
 0x218   :  { %v12023_v3 = vpop.eup %12022 }
 0x219   :  { %v12025_v6 = vpop.eup %12024 }
 0x21a   :  { %v12027_v7 = vpop.eup %12026  ;;  %v1238_v8 = vcombine.low %v12021_v5, %v12025_v6  ;;  %v10675_v5 = vcombine.low %v1759_v51, %v1763_v54  ;;  %v10668_v6 = vcombine.high %v1751_v60, %v1755_v1 }
 0x21b   :  { %v1239_v9 = vcombine.low %v12023_v3, %v12027_v7  ;;  %v1615_v7 = vld [vmem:[#allocation16 + $0x108] sm:$0xff] }
 0x21c   :  { %v1246_v10 = vrot.slane %v1238_v8, %v12648_v56  ;;  %v1619_v8 = vld [vmem:[#allocation16 + $0x128] sm:$0xff] }
 0x21d   :  { %v1253_v4 = vrot.slane %v1239_v9, %v12648_v56  ;;  %v1743_v9 = vld [vmem:[#allocation16 + $0x508] sm:$0xff]  ;;  %v10532_v41 = vcombine.high %v1615_v7, %v1619_v8 }
 0x21f   :  { %v1254_v11 = vcombine.low %v1246_v10, %v1253_v4  ;;  %v1747_v10 = vld [vmem:[#allocation16 + $0x528] sm:$0xff] }
 0x220   :  { %v10660_v43 = vcombine.high %v1743_v9, %v1747_v10  ;;  %v1735_v4 = vld [vmem:[#allocation16 + $0x4c8] sm:$0xff]  ;;  %v10659_v13 = vcombine.low %v1743_v9, %v1747_v10 }
 0x221   :  { %v1261_v17 = vrot.slane %v1254_v11, %v12648_v56  ;;  %v1739_v11 = vld [vmem:[#allocation16 + $0x4e8] sm:$0xff] }
 0x223   :  { %v1263_v14 = vmul.f32 %v1261_v17, %v1160_v12  ;;  %v10531_v12 = vcombine.low %v1615_v7, %v1619_v8  ;;  %v1823_v7 = vld [vmem:[#allocation16 + $0x788] sm:$0xff] }
 0x224   :  { %v1827_v8 = vld [vmem:[#allocation16 + $0x7a8] sm:$0xff] }
 0x225   :  { %v1280_v21 = vrot.slane %v1263_v14, %v12665_v19  ;;  %v1272_v22 = vrot.slane %v1263_v14, %v12669_v28  ;;  %v1268_v25 = vrot.slane %v1263_v14, %v12673_v46  ;;  %v1276_v26 = vrot.slane %v1263_v14, %v12683_v0 }
 0x226   :  { %v10652_v14 = vcombine.high %v1735_v4, %v1739_v11 }
 0x227   :  { %v1288_v27 = vmul.f32 %v1280_v21, %v12656_v63  ;;  %v1286_v29 = vmul.f32 %v1272_v22, %v12650_v57  ;;  %v1285_v30 = vmul.f32 %v1268_v25, %v12643_v52  ;;  %v1287_v31 = vmul.f32 %v1276_v26, %v12645_v53  ;;  %v1623_v53 = vld [vmem:[#allocation16 + $0x148] sm:$0xff] }
 0x228   :  { %v10540_v3 = vcombine.high %v1623_v53, %v1627_v59  ;;  %v10539_v39 = vcombine.low %v1623_v53, %v1627_v59  ;;  %v10651_v22 = vcombine.low %v1735_v4, %v1739_v11  ;;  %v1703_v53 = vld [vmem:[#allocation16 + $0x3c8] sm:$0xff]  ;;  %v10739_v11 = vcombine.low %v1823_v7, %v1827_v8 }
 0x229   :  { %v1313_v32 = vadd.f32 %v1305_v15, %v1288_v27  ;;  %v1311_v33 = vadd.f32 %v1297_v18, %v1286_v29  ;;  %v1310_v34 = vadd.f32 %v1293_v16, %v1285_v30  ;;  %v1312_v35 = vadd.f32 %v1301_v20, %v1287_v31  ;;  %v1599_v15 = vld [vmem:[#allocation16 + $0x88] sm:$0xff] }
 0x22a   :  { %v1603_v18 = vld [vmem:[#allocation16 + $0xa8] sm:$0xff] }
 0x22b   :  { %v1315_v36 = vmax.f32 %v1311_v33, 0.0  ;;  %v1317_v37 = vmax.f32 %v1313_v32, 0.0  ;;  %v1314_v38 = vmax.f32 %v1310_v34, 0.0  ;;  %v1316_v47 = vmax.f32 %v1312_v35, 0.0  ;;  %v1727_v16 = vld [vmem:[#allocation16 + $0x488] sm:$0xff] }
 0x22c   :  { %v1731_v20 = vld [vmem:[#allocation16 + $0x4a8] sm:$0xff]  ;;  %v10516_v25 = vcombine.high %v1599_v15, %v1603_v18  ;;  %v10515_v32 = vcombine.low %v1599_v15, %v1603_v18 }
 0x22d   :  { %v12708_v58 = vpack.c.bf16 %v1315_v36, %v1315_v36  ;;  %v12710_v63 = vpack.c.bf16 %v1317_v37, %v1317_v37  ;;  %v12712_v57 = vpack.c.bf16 %v1314_v38, %v1314_v38  ;;  %v12714_v52 = vpack.c.bf16 %v1316_v47, %v1316_v47  ;;  %v1591_v27 = vld [vmem:[#allocation16 + $0x48] sm:$0xff] }
 0x22e   :  { %v10644_v26 = vcombine.high %v1727_v16, %v1731_v20  ;;  %v1595_v29 = vld [vmem:[#allocation16 + $0x68] sm:$0xff]  ;;  %v10643_v33 = vcombine.low %v1727_v16, %v1731_v20 }
 0x22f   :  { %3150 = vmatprep.mubr.bf16.mxu0 %v12708_v58  ;;  %3191 = vmatprep.mubr.bf16.mxu1 %v12710_v63  ;;  %v1719_v30 = vld [vmem:[#allocation16 + $0x448] sm:$0xff]  ;;  %v10508_v34 = vcombine.high %v1591_v27, %v1595_v29  ;;  %v10507_v49 = vcombine.low %v1591_v27, %v1595_v29 }
 0x230   :  { %3151 = vmatmul.mubr.bf16.vlgmr.msra.gmra.mxu0 %v12712_v57  ;;  %3192 = vmatmul.mubr.bf16.vlgmr.msra.gmra.mxu1 %v12714_v52  ;;  %v1723_v31 = vld [vmem:[#allocation16 + $0x468] sm:$0xff] }
 0x231   :  { %3201 = vmatpush1.bf16.msra.mxu0 %v10555_v44  ;;  %3242 = vmatpush1.bf16.msra.mxu1 %v10683_v45  ;;  %v1607_v44 = vld [vmem:[#allocation16 + $0xc8] sm:$0xff]  ;;  %v10636_v35 = vcombine.high %v1719_v30, %v1723_v31  ;;  %v10635_v50 = vcombine.low %v1719_v30, %v1723_v31 }
 0x232   :  { %3232 = vmatprep.mubr.bf16.mxu0 %v12708_v58  ;;  %3273 = vmatprep.mubr.bf16.mxu1 %v12710_v63  ;;  %v1611_v45 = vld [vmem:[#allocation16 + $0xe8] sm:$0xff] }
 0x233   :  { %3202 = vmatprep.subr.bf16.mxu0 %v10548_v61  ;;  %3243 = vmatprep.subr.bf16.mxu1 %v10676_v62  ;;  %v10524_v17 = vcombine.high %v1607_v44, %v1611_v45  ;;  %v10523_v21 = vcombine.low %v1607_v44, %v1611_v45  ;;  %v1583_v36 = vld [vmem:[#allocation16 + $0x8] sm:$0xff] }
 0x234   :  { %v1587_v37 = vld [vmem:[#allocation16 + $0x28] sm:$0xff] }
 0x235   :  { %3203 = vmatpush1.bf16.msra.mxu0 %v10547_v23  ;;  %3244 = vmatpush1.bf16.msra.mxu1 %v10675_v5  ;;  %v1711_v38 = vld [vmem:[#allocation16 + $0x408] sm:$0xff]  ;;  %v10500_v51 = vcombine.high %v1583_v36, %v1587_v37  ;;  %v10499_v60 = vcombine.low %v1583_v36, %v1587_v37 }
 0x236   :  { %3204 = vmatprep.subr.bf16.mxu0 %v10540_v3  ;;  %3245 = vmatprep.subr.bf16.mxu1 %v10668_v6  ;;  %v1715_v47 = vld [vmem:[#allocation16 + $0x428] sm:$0xff] }
 0x237   :  { %v10628_v54 = vcombine.high %v1711_v38, %v1715_v47  ;;  %v1707_v61 = vld [vmem:[#allocation16 + $0x3e8] sm:$0xff]  ;;  %v10627_v1 = vcombine.low %v1711_v38, %v1715_v47 }
 0x238   :  { %v1831_v62 = vld [vmem:[#allocation16 + $0x7c8] sm:$0xff]  ;;  %v10620_v23 = vcombine.high %v1703_v53, %v1707_v61  ;;  %v10619_v9 = vcombine.low %v1703_v53, %v1707_v61 }
 0x239   :  { %3205 = vmatpush1.bf16.msra.mxu0 %v10539_v39  ;;  %3246 = vmatpush1.bf16.msra.mxu1 %v10667_v40  ;;  %v1835_v59 = vld [vmem:[#allocation16 + $0x7e8] sm:$0xff]  ;;  %v10740_v40 = vcombine.high %v1823_v7, %v1827_v8 }
 0x23a   :  { %3206 = vmatprep.subr.bf16.mxu0 %v10532_v41  ;;  %3247 = vmatprep.subr.bf16.mxu1 %v10660_v43  ;;  %v10748_v5 = vcombine.high %v1831_v62, %v1835_v59  ;;  %v1695_v3 = vld [vmem:[#allocation16 + $0x388] sm:$0xff]  ;;  %v10747_v10 = vcombine.low %v1831_v62, %v1835_v59 }
 0x23b   :  { %v1699_v6 = vld [vmem:[#allocation16 + $0x3a8] sm:$0xff] }
 0x23c   :  { %v10612_v39 = vcombine.high %v1695_v3, %v1699_v6  ;;  %v1687_v41 = vld [vmem:[#allocation16 + $0x348] sm:$0xff]  ;;  %v10611_v4 = vcombine.low %v1695_v3, %v1699_v6 }
 0x23d   :  { %3207 = vmatpush1.bf16.msra.mxu0 %v10531_v12  ;;  %3248 = vmatpush1.bf16.msra.mxu1 %v10659_v13  ;;  %v1691_v43 = vld [vmem:[#allocation16 + $0x368] sm:$0xff] }
 0x23e   :  { %3208 = vmatprep.subr.bf16.mxu0 %v10524_v17  ;;  %3249 = vmatprep.subr.bf16.mxu1 %v10652_v14  ;;  %v1815_v44 = vld [vmem:[#allocation16 + $0x748] sm:$0xff]  ;;  %v10604_v12 = vcombine.high %v1687_v41, %v1691_v43  ;;  %v10603_v16 = vcombine.low %v1687_v41, %v1691_v43  ;;  %v1768_v41 = vld [vmem:[#allocation16 + $0x5d0] sm:$0xff] }
 0x23f   :  { %v1819_v45 = vld [vmem:[#allocation16 + $0x768] sm:$0xff]  ;;  %v1772_v43 = vld [vmem:[#allocation16 + $0x5f0] sm:$0xff] }
 0x240   :  { %v10732_v13 = vcombine.high %v1815_v44, %v1819_v45  ;;  %v1679_v17 = vld [vmem:[#allocation16 + $0x308] sm:$0xff]  ;;  %v10731_v20 = vcombine.low %v1815_v44, %v1819_v45 }
 0x241   :  { %3209 = vmatpush1.bf16.msra.mxu0 %v10523_v21  ;;  %3250 = vmatpush1.bf16.msra.mxu1 %v10651_v22  ;;  %v1683_v14 = vld [vmem:[#allocation16 + $0x328] sm:$0xff] }
 0x242   :  { %3210 = vmatprep.subr.bf16.mxu0 %v10516_v25  ;;  %3251 = vmatprep.subr.bf16.mxu1 %v10644_v26  ;;  %v1807_v15 = vld [vmem:[#allocation16 + $0x708] sm:$0xff]  ;;  %v10596_v21 = vcombine.high %v1679_v17, %v1683_v14  ;;  %v10595_v30 = vcombine.low %v1679_v17, %v1683_v14  ;;  %v1760_v17 = vld [vmem:[#allocation16 + $0x590] sm:$0xff] }
 0x243   :  { %v1811_v18 = vld [vmem:[#allocation16 + $0x728] sm:$0xff]  ;;  %v1764_v14 = vld [vmem:[#allocation16 + $0x5b0] sm:$0xff] }
 0x244   :  { %v10724_v22 = vcombine.high %v1807_v15, %v1811_v18  ;;  %v1671_v25 = vld [vmem:[#allocation16 + $0x2c8] sm:$0xff]  ;;  %v10723_v31 = vcombine.low %v1807_v15, %v1811_v18  ;;  %v10685_v18 = vcombine.low %v1768_v41, %v1772_v43 }
 0x245   :  { %3211 = vmatpush1.bf16.msra.mxu0 %v10515_v32  ;;  %3252 = vmatpush1.bf16.msra.mxu1 %v10643_v33  ;;  %v1675_v26 = vld [vmem:[#allocation16 + $0x2e8] sm:$0xff] }
 0x246   :  { %3212 = vmatprep.subr.bf16.mxu0 %v10508_v34  ;;  %3253 = vmatprep.subr.bf16.mxu1 %v10636_v35  ;;  %v1799_v27 = vld [vmem:[#allocation16 + $0x6c8] sm:$0xff]  ;;  %v10588_v32 = vcombine.high %v1671_v25, %v1675_v26  ;;  %v10587_v38 = vcombine.low %v1671_v25, %v1675_v26  ;;  %v1752_v25 = vld [vmem:[#allocation16 + $0x550] sm:$0xff] }
 0x247   :  { %v1803_v29 = vld [vmem:[#allocation16 + $0x6e8] sm:$0xff]  ;;  %v1756_v26 = vld [vmem:[#allocation16 + $0x570] sm:$0xff] }
 0x248   :  { %v10716_v33 = vcombine.high %v1799_v27, %v1803_v29  ;;  %v1663_v34 = vld [vmem:[#allocation16 + $0x288] sm:$0xff]  ;;  %v10715_v47 = vcombine.low %v1799_v27, %v1803_v29  ;;  %v10677_v29 = vcombine.low %v1760_v17, %v1764_v14 }
 0x249   :  { %3213 = vmatpush1.bf16.msra.mxu0 %v10507_v49  ;;  %3254 = vmatpush1.bf16.msra.mxu1 %v10635_v50  ;;  %v1667_v35 = vld [vmem:[#allocation16 + $0x2a8] sm:$0xff] }
 0x24a   :  { %3214 = vmatprep.subr.bf16.mxu0 %v10500_v51  ;;  %3255 = vmatprep.subr.bf16.mxu1 %v10628_v54  ;;  %v1791_v36 = vld [vmem:[#allocation16 + $0x688] sm:$0xff]  ;;  %v10580_v49 = vcombine.high %v1663_v34, %v1667_v35  ;;  %v10579_v62 = vcombine.low %v1663_v34, %v1667_v35  ;;  %v1744_v34 = vld [vmem:[#allocation16 + $0x510] sm:$0xff] }
 0x24b   :  { %v1795_v37 = vld [vmem:[#allocation16 + $0x6a8] sm:$0xff]  ;;  %v1748_v35 = vld [vmem:[#allocation16 + $0x530] sm:$0xff] }
 0x24c   :  { %v10708_v50 = vcombine.high %v1791_v36, %v1795_v37  ;;  %v1655_v51 = vld [vmem:[#allocation16 + $0x248] sm:$0xff]  ;;  %v10707_v59 = vcombine.low %v1791_v36, %v1795_v37  ;;  %v10669_v37 = vcombine.low %v1752_v25, %v1756_v26 }
 0x24d   :  { %3215 = vmatpush1.bf16.msra.mxu0 %v10499_v60  ;;  %3256 = vmatpush1.bf16.msra.mxu1 %v10627_v1  ;;  %v1659_v54 = vld [vmem:[#allocation16 + $0x268] sm:$0xff] }
 0x24e   :  { %3216 = vmatprep.subr.bf16.mxu0 %v10620_v23  ;;  %3257 = vmatprep.subr.bf16.mxu1 %v10748_v5  ;;  %v1783_v53 = vld [vmem:[#allocation16 + $0x648] sm:$0xff]  ;;  %v10572_v60 = vcombine.high %v1655_v51, %v1659_v54  ;;  %v10571_v7 = vcombine.low %v1655_v51, %v1659_v54  ;;  %v1736_v51 = vld [vmem:[#allocation16 + $0x4d0] sm:$0xff] }
 0x24f   :  { %v1787_v61 = vld [vmem:[#allocation16 + $0x668] sm:$0xff]  ;;  %v1740_v54 = vld [vmem:[#allocation16 + $0x4f0] sm:$0xff] }
 0x250   :  { %v10700_v1 = vcombine.high %v1783_v53, %v1787_v61  ;;  %v1647_v23 = vld [vmem:[#allocation16 + $0x208] sm:$0xff]  ;;  %v10699_v8 = vcombine.low %v1783_v53, %v1787_v61  ;;  %v10661_v61 = vcombine.low %v1744_v34, %v1748_v35 }
 0x251   :  { %3217 = vmatpush2.bf16.msra.mxu0 %v10619_v9  ;;  %3258 = vmatpush2.bf16.msra.mxu1 %v10747_v10  ;;  %v1651_v5 = vld [vmem:[#allocation16 + $0x228] sm:$0xff] }
 0x252   :  { %3218 = vmatprep.subr.bf16.mxu0 %v10612_v39  ;;  %3259 = vmatprep.subr.bf16.mxu1 %v10740_v40  ;;  %v1775_v3 = vld [vmem:[#allocation16 + $0x608] sm:$0xff]  ;;  %v10564_v9 = vcombine.high %v1647_v23, %v1651_v5  ;;  %v1640_v39 = vld [vmem:[#allocation16 + $0x1d0] sm:$0xff]  ;;  %v10563_v44 = vcombine.low %v1647_v23, %v1651_v5 }
 0x253   :  { %v1779_v6 = vld [vmem:[#allocation16 + $0x628] sm:$0xff]  ;;  %v1644_v40 = vld [vmem:[#allocation16 + $0x1f0] sm:$0xff] }
 0x254   :  { %v10692_v10 = vcombine.high %v1775_v3, %v1779_v6  ;;  %v10691_v45 = vcombine.low %v1775_v3, %v1779_v6  ;;  %v10557_v15 = vcombine.low %v1640_v39, %v1644_v40  ;;  %v1728_v23 = vld [vmem:[#allocation16 + $0x490] sm:$0xff]  ;;  %v10653_v6 = vcombine.low %v1736_v51, %v1740_v54 }
 0x255   :  { %3219 = vmatpush2.bf16.msra.mxu0 %v10611_v4  ;;  %3260 = vmatpush2.bf16.msra.mxu1 %v10739_v11  ;;  %v10558_v4 = vcombine.high %v1640_v39, %v1644_v40  ;;  %v10686_v11 = vcombine.high %v1768_v41, %v1772_v43  ;;  %v1732_v5 = vld [vmem:[#allocation16 + $0x4b0] sm:$0xff] }
 0x256   :  { %3220 = vmatprep.subr.bf16.mxu0 %v10604_v12  ;;  %3261 = vmatprep.subr.bf16.mxu1 %v10732_v13  ;;  %v1632_v12 = vld [vmem:[#allocation16 + $0x190] sm:$0xff]  ;;  %v10645_v43 = vcombine.low %v1728_v23, %v1732_v5 }
 0x257   :  { %v1636_v13 = vld [vmem:[#allocation16 + $0x1b0] sm:$0xff] }
 0x258   :  { %v10549_v27 = vcombine.low %v1632_v12, %v1636_v13  ;;  %v1720_v39 = vld [vmem:[#allocation16 + $0x450] sm:$0xff] }
 0x259   :  { %3221 = vmatpush2.bf16.msra.mxu0 %v10603_v16  ;;  %3262 = vmatpush2.bf16.msra.mxu1 %v10731_v20  ;;  %v10550_v16 = vcombine.high %v1632_v12, %v1636_v13  ;;  %v10678_v20 = vcombine.high %v1760_v17, %v1764_v14  ;;  %v1724_v40 = vld [vmem:[#allocation16 + $0x470] sm:$0xff] }
 0x25a   :  { %3222 = vmatprep.subr.bf16.mxu0 %v10596_v21  ;;  %3263 = vmatprep.subr.bf16.mxu1 %v10724_v22  ;;  %v1624_v21 = vld [vmem:[#allocation16 + $0x150] sm:$0xff]  ;;  %v10637_v14 = vcombine.low %v1720_v39, %v1724_v40 }
 0x25b   :  { %v1628_v22 = vld [vmem:[#allocation16 + $0x170] sm:$0xff] }
 0x25c   :  { %v10541_v36 = vcombine.low %v1624_v21, %v1628_v22  ;;  %v1712_v12 = vld [vmem:[#allocation16 + $0x410] sm:$0xff] }
 0x25d   :  { %3223 = vmatpush2.bf16.msra.mxu0 %v10595_v30  ;;  %3264 = vmatpush2.bf16.msra.mxu1 %v10723_v31  ;;  %v10542_v30 = vcombine.high %v1624_v21, %v1628_v22  ;;  %v10670_v31 = vcombine.high %v1752_v25, %v1756_v26  ;;  %v1716_v13 = vld [vmem:[#allocation16 + $0x430] sm:$0xff] }
 0x25e   :  { %3224 = vmatprep.subr.bf16.mxu0 %v10588_v32  ;;  %3265 = vmatprep.subr.bf16.mxu1 %v10716_v33  ;;  %v1616_v32 = vld [vmem:[#allocation16 + $0x110] sm:$0xff]  ;;  %v10629_v26 = vcombine.low %v1712_v12, %v1716_v13 }
 0x25f   :  { %v1620_v33 = vld [vmem:[#allocation16 + $0x130] sm:$0xff] }
 0x260   :  { %v10533_v53 = vcombine.low %v1616_v32, %v1620_v33  ;;  %v1832_v21 = vld [vmem:[#allocation16 + $0x7d0] sm:$0xff] }
 0x261   :  { %3225 = vmatpush2.bf16.msra.mxu0 %v10587_v38  ;;  %3266 = vmatpush2.bf16.msra.mxu1 %v10715_v47  ;;  %v10534_v38 = vcombine.high %v1616_v32, %v1620_v33  ;;  %v10662_v47 = vcombine.high %v1744_v34, %v1748_v35  ;;  %v1836_v22 = vld [vmem:[#allocation16 + $0x7f0] sm:$0xff] }
 0x262   :  { %3226 = vmatprep.subr.bf16.mxu0 %v10580_v49  ;;  %3267 = vmatprep.subr.bf16.mxu1 %v10708_v50  ;;  %v1608_v49 = vld [vmem:[#allocation16 + $0xd0] sm:$0xff]  ;;  %v10749_v35 = vcombine.low %v1832_v21, %v1836_v22 }
 0x263   :  { %v1612_v50 = vld [vmem:[#allocation16 + $0xf0] sm:$0xff] }
 0x264   :  { %v10525_v3 = vcombine.low %v1608_v49, %v1612_v50  ;;  %v1824_v32 = vld [vmem:[#allocation16 + $0x790] sm:$0xff] }
 0x265   :  { %3227 = vmatpush2.bf16.msra.mxu0 %v10579_v62  ;;  %3268 = vmatpush2.bf16.msra.mxu1 %v10707_v59  ;;  %v10526_v62 = vcombine.high %v1608_v49, %v1612_v50  ;;  %v10654_v59 = vcombine.high %v1736_v51, %v1740_v54  ;;  %v1828_v33 = vld [vmem:[#allocation16 + $0x7b0] sm:$0xff] }
 0x266   :  { %3228 = vmatprep.subr.bf16.mxu0 %v10572_v60  ;;  %3269 = vmatprep.subr.bf16.mxu1 %v10700_v1  ;;  %v1600_v60 = vld [vmem:[#allocation16 + $0x90] sm:$0xff]  ;;  %v10741_v54 = vcombine.low %v1824_v32, %v1828_v33 }
 0x267   :  { %v1604_v1 = vld [vmem:[#allocation16 + $0xb0] sm:$0xff] }
 0x268   :  { %v10517_v41 = vcombine.low %v1600_v60, %v1604_v1  ;;  %v1816_v49 = vld [vmem:[#allocation16 + $0x750] sm:$0xff] }
 0x269   :  { %3229 = vmatpush2.bf16.msra.mxu0 %v10571_v7  ;;  %3270 = vmatpush2.bf16.msra.mxu1 %v10699_v8  ;;  %v10518_v7 = vcombine.high %v1600_v60, %v1604_v1  ;;  %v10646_v8 = vcombine.high %v1728_v23, %v1732_v5  ;;  %v1820_v50 = vld [vmem:[#allocation16 + $0x770] sm:$0xff] }
 0x26a   :  { %3230 = vmatprep.subr.bf16.mxu0 %v10564_v9  ;;  %3271 = vmatprep.subr.bf16.mxu1 %v10692_v10  ;;  %v1592_v9 = vld [vmem:[#allocation16 + $0x50] sm:$0xff]  ;;  %v10733_v5 = vcombine.low %v1816_v49, %v1820_v50 }
 0x26b   :  { %v1596_v10 = vld [vmem:[#allocation16 + $0x70] sm:$0xff] }
 0x26c   :  { %v10509_v17 = vcombine.low %v1592_v9, %v1596_v10  ;;  %v1808_v60 = vld [vmem:[#allocation16 + $0x710] sm:$0xff] }
 0x26d   :  { %3231 = vmatpush2.bf16.msra.mxu0 %v10563_v44  ;;  %3272 = vmatpush2.bf16.msra.mxu1 %v10691_v45  ;;  %v10510_v44 = vcombine.high %v1592_v9, %v1596_v10  ;;  %v10638_v45 = vcombine.high %v1720_v39, %v1724_v40  ;;  %v1812_v1 = vld [vmem:[#allocation16 + $0x730] sm:$0xff] }
 0x26e   :  { %3282 = vmatprep.subr.bf16.mxu0 %v10558_v4  ;;  %3323 = vmatprep.subr.bf16.mxu1 %v10686_v11  ;;  %v1584_v4 = vld [vmem:[#allocation16 + $0x10] sm:$0xff]  ;;  %v10725_v40 = vcombine.low %v1808_v60, %v1812_v1 }
 0x26f   :  { %v1588_v11 = vld [vmem:[#allocation16 + $0x30] sm:$0xff] }
 0x270   :  { %3233 = vmatmul.mubr.bf16.vlgmr.msra.gmra.mxu0 %v12712_v57  ;;  %3274 = vmatmul.mubr.bf16.vlgmr.msra.gmra.mxu1 %v12714_v52  ;;  %v10501_v25 = vcombine.low %v1584_v4, %v1588_v11  ;;  %v1800_v9 = vld [vmem:[#allocation16 + $0x6d0] sm:$0xff] }
 0x271   :  { %3283 = vmatpush1.bf16.msra.mxu0 %v10557_v15  ;;  %3314 = vmatprep.mubr.bf16.mxu0 %v12708_v58  ;;  %v10502_v15 = vcombine.high %v1584_v4, %v1588_v11  ;;  %v1804_v10 = vld [vmem:[#allocation16 + $0x6f0] sm:$0xff] }
 0x272   :  { %3324 = vmatpush1.bf16.msra.mxu1 %v10685_v18  ;;  %3355 = vmatprep.mubr.bf16.mxu1 %v12710_v63  ;;  %v10630_v18 = vcombine.high %v1712_v12, %v1716_v13  ;;  %v1792_v4 = vld [vmem:[#allocation16 + $0x690] sm:$0xff]  ;;  %v10717_v13 = vcombine.low %v1800_v9, %v1804_v10 }
 0x273   :  { %3284 = vmatprep.subr.bf16.mxu0 %v10550_v16  ;;  %3325 = vmatprep.subr.bf16.mxu1 %v10678_v20  ;;  %v1704_v16 = vld [vmem:[#allocation16 + $0x3d0] sm:$0xff] }
 0x274   :  { %v1708_v20 = vld [vmem:[#allocation16 + $0x3f0] sm:$0xff] }
 0x275   :  { %3285 = vmatpush1.bf16.msra.mxu0 %v10549_v27  ;;  %v10622_v27 = vcombine.high %v1704_v16, %v1708_v20  ;;  %v10621_v34 = vcombine.low %v1704_v16, %v1708_v20  ;;  %v1796_v11 = vld [vmem:[#allocation16 + $0x6b0] sm:$0xff] }
 0x276   :  { %3326 = vmatpush1.bf16.msra.mxu1 %v10677_v29  ;;  %3286 = vmatprep.subr.bf16.mxu0 %v10542_v30  ;;  %v10750_v29 = vcombine.high %v1832_v21, %v1836_v22  ;;  %v1696_v30 = vld [vmem:[#allocation16 + $0x390] sm:$0xff]  ;;  %v10709_v22 = vcombine.low %v1792_v4, %v1796_v11 }
 0x277   :  { %3327 = vmatprep.subr.bf16.mxu1 %v10670_v31  ;;  %v1700_v31 = vld [vmem:[#allocation16 + $0x3b0] sm:$0xff] }
 0x278   :  { %v10613_v51 = vcombine.low %v1696_v30, %v1700_v31  ;;  %v1784_v16 = vld [vmem:[#allocation16 + $0x650] sm:$0xff] }
 0x279   :  { %3287 = vmatpush1.bf16.msra.mxu0 %v10541_v36  ;;  %v10614_v36 = vcombine.high %v1696_v30, %v1700_v31  ;;  %v1788_v20 = vld [vmem:[#allocation16 + $0x670] sm:$0xff] }
 0x27a   :  { %3328 = vmatpush1.bf16.msra.mxu1 %v10669_v37  ;;  %3288 = vmatprep.subr.bf16.mxu0 %v10534_v38  ;;  %v10742_v37 = vcombine.high %v1824_v32, %v1828_v33  ;;  %v1688_v38 = vld [vmem:[#allocation16 + $0x350] sm:$0xff]  ;;  %v10701_v33 = vcombine.low %v1784_v16, %v1788_v20 }
 0x27b   :  { %3329 = vmatprep.subr.bf16.mxu1 %v10662_v47  ;;  %v1692_v47 = vld [vmem:[#allocation16 + $0x370] sm:$0xff] }
 0x27c   :  { %v10605_v23 = vcombine.low %v1688_v38, %v1692_v47  ;;  %v1776_v30 = vld [vmem:[#allocation16 + $0x610] sm:$0xff] }
 0x27d   :  { %3289 = vmatpush1.bf16.msra.mxu0 %v10533_v53  ;;  %v10606_v53 = vcombine.high %v1688_v38, %v1692_v47  ;;  %v1780_v31 = vld [vmem:[#allocation16 + $0x630] sm:$0xff]  ;;  %v1769_v38 = vld [vmem:[#allocation16 + $0x5d8] sm:$0xff] }
 0x27e   :  { %3330 = vmatpush1.bf16.msra.mxu1 %v10661_v61  ;;  %3290 = vmatprep.subr.bf16.mxu0 %v10526_v62  ;;  %v10734_v61 = vcombine.high %v1816_v49, %v1820_v50  ;;  %v1680_v62 = vld [vmem:[#allocation16 + $0x310] sm:$0xff]  ;;  %v1773_v47 = vld [vmem:[#allocation16 + $0x5f8] sm:$0xff]  ;;  %v10693_v50 = vcombine.low %v1776_v30, %v1780_v31 }
 0x27f   :  { %3331 = vmatprep.subr.bf16.mxu1 %v10654_v59  ;;  %v1684_v59 = vld [vmem:[#allocation16 + $0x330] sm:$0xff] }
 0x280   :  { %v10597_v39 = vcombine.low %v1680_v62, %v1684_v59 }
 0x281   :  { %3291 = vmatpush1.bf16.msra.mxu0 %v10525_v3  ;;  %v10598_v3 = vcombine.high %v1680_v62, %v1684_v59  ;;  %v1761_v59 = vld [vmem:[#allocation16 + $0x598] sm:$0xff] }
 0x282   :  { %3332 = vmatpush1.bf16.msra.mxu1 %v10653_v6  ;;  %3292 = vmatprep.subr.bf16.mxu0 %v10518_v7  ;;  %v10726_v6 = vcombine.high %v1808_v60, %v1812_v1  ;;  %v1672_v7 = vld [vmem:[#allocation16 + $0x2d0] sm:$0xff]  ;;  %v1765_v60 = vld [vmem:[#allocation16 + $0x5b8] sm:$0xff]  ;;  %v10687_v1 = vcombine.low %v1769_v38, %v1773_v47 }
 0x283   :  { %3333 = vmatprep.subr.bf16.mxu1 %v10646_v8  ;;  %v1676_v8 = vld [vmem:[#allocation16 + $0x2f0] sm:$0xff] }
 0x284   :  { %v10589_v12 = vcombine.low %v1672_v7, %v1676_v8 }
 0x285   :  { %3293 = vmatpush1.bf16.msra.mxu0 %v10517_v41  ;;  %v10590_v41 = vcombine.high %v1672_v7, %v1676_v8  ;;  %v1753_v7 = vld [vmem:[#allocation16 + $0x558] sm:$0xff] }
 0x286   :  { %3334 = vmatpush1.bf16.msra.mxu1 %v10645_v43  ;;  %3294 = vmatprep.subr.bf16.mxu0 %v10510_v44  ;;  %v10718_v43 = vcombine.high %v1800_v9, %v1804_v10  ;;  %v1664_v44 = vld [vmem:[#allocation16 + $0x290] sm:$0xff]  ;;  %v1757_v8 = vld [vmem:[#allocation16 + $0x578] sm:$0xff]  ;;  %v10679_v10 = vcombine.low %v1761_v59, %v1765_v60 }
 0x287   :  { %3335 = vmatprep.subr.bf16.mxu1 %v10638_v45  ;;  %v1668_v45 = vld [vmem:[#allocation16 + $0x2b0] sm:$0xff] }
 0x288   :  { %v10581_v21 = vcombine.low %v1664_v44, %v1668_v45 }
 0x289   :  { %3295 = vmatpush1.bf16.msra.mxu0 %v10509_v17  ;;  %v10582_v17 = vcombine.high %v1664_v44, %v1668_v45  ;;  %v1745_v44 = vld [vmem:[#allocation16 + $0x518] sm:$0xff] }
 0x28a   :  { %3336 = vmatpush1.bf16.msra.mxu1 %v10637_v14  ;;  %3296 = vmatprep.subr.bf16.mxu0 %v10502_v15  ;;  %v10710_v14 = vcombine.high %v1792_v4, %v1796_v11  ;;  %v1656_v15 = vld [vmem:[#allocation16 + $0x250] sm:$0xff]  ;;  %v1749_v45 = vld [vmem:[#allocation16 + $0x538] sm:$0xff]  ;;  %v10671_v11 = vcombine.low %v1753_v7, %v1757_v8 }
 0x28b   :  { %3337 = vmatprep.subr.bf16.mxu1 %v10630_v18  ;;  %v1660_v18 = vld [vmem:[#allocation16 + $0x270] sm:$0xff] }
 0x28c   :  { %v10573_v32 = vcombine.low %v1656_v15, %v1660_v18 }
 0x28d   :  { %3297 = vmatpush1.bf16.msra.mxu0 %v10501_v25  ;;  %v10574_v25 = vcombine.high %v1656_v15, %v1660_v18  ;;  %v1741_v15 = vld [vmem:[#allocation16 + $0x4f8] sm:$0xff]  ;;  %v10663_v18 = vcombine.low %v1745_v44, %v1749_v45 }
 0x28e   :  { %3338 = vmatpush1.bf16.msra.mxu1 %v10629_v26  ;;  %3298 = vmatprep.subr.bf16.mxu0 %v10622_v27  ;;  %v10702_v26 = vcombine.high %v1784_v16, %v1788_v20  ;;  %v1648_v27 = vld [vmem:[#allocation16 + $0x210] sm:$0xff] }
 0x28f   :  { %3339 = vmatprep.subr.bf16.mxu1 %v10750_v29  ;;  %v1652_v29 = vld [vmem:[#allocation16 + $0x230] sm:$0xff] }
 0x290   :  { %v10565_v49 = vcombine.low %v1648_v27, %v1652_v29 }
 0x291   :  { %3299 = vmatpush2.bf16.msra.mxu0 %v10621_v34  ;;  %v10566_v34 = vcombine.high %v1648_v27, %v1652_v29 }
 0x292   :  { %3340 = vmatpush2.bf16.msra.mxu1 %v10749_v35  ;;  %3300 = vmatprep.subr.bf16.mxu0 %v10614_v36  ;;  %v10694_v35 = vcombine.high %v1776_v30, %v1780_v31  ;;  %v1641_v36 = vld [vmem:[#allocation16 + $0x1d8] sm:$0xff] }
 0x293   :  { %3341 = vmatprep.subr.bf16.mxu1 %v10742_v37  ;;  %v1645_v37 = vld [vmem:[#allocation16 + $0x1f8] sm:$0xff] }
 0x294   :  { %v10559_v62 = vcombine.low %v1641_v36, %v1645_v37 }
 0x295   :  { %3301 = vmatpush2.bf16.msra.mxu0 %v10613_v51  ;;  %v10560_v51 = vcombine.high %v1641_v36, %v1645_v37 }
 0x296   :  { %3342 = vmatpush2.bf16.msra.mxu1 %v10741_v54  ;;  %3302 = vmatprep.subr.bf16.mxu0 %v10606_v53  ;;  %v10688_v54 = vcombine.high %v1769_v38, %v1773_v47  ;;  %v1633_v53 = vld [vmem:[#allocation16 + $0x198] sm:$0xff] }
 0x297   :  { %3343 = vmatprep.subr.bf16.mxu1 %v10734_v61  ;;  %v1637_v61 = vld [vmem:[#allocation16 + $0x1b8] sm:$0xff] }
 0x298   :  { %v10551_v9 = vcombine.low %v1633_v53, %v1637_v61 }
 0x299   :  { %3303 = vmatpush2.bf16.msra.mxu0 %v10605_v23  ;;  %v10552_v23 = vcombine.high %v1633_v53, %v1637_v61 }
 0x29a   :  { %3344 = vmatpush2.bf16.msra.mxu1 %v10733_v5  ;;  %3304 = vmatprep.subr.bf16.mxu0 %v10598_v3  ;;  %v1625_v5 = vld [vmem:[#allocation16 + $0x158] sm:$0xff] }
 0x29b   :  { %3345 = vmatprep.subr.bf16.mxu1 %v10726_v6  ;;  %v1629_v3 = vld [vmem:[#allocation16 + $0x178] sm:$0xff]  ;;  %v10680_v6 = vcombine.high %v1761_v59, %v1765_v60 }
 0x29c   :  { %v10543_v4 = vcombine.low %v1625_v5, %v1629_v3  ;;  %v1705_v60 = vld [vmem:[#allocation16 + $0x3d8] sm:$0xff] }
 0x29d   :  { %3305 = vmatpush2.bf16.msra.mxu0 %v10597_v39  ;;  %v10544_v39 = vcombine.high %v1625_v5, %v1629_v3  ;;  %v1837_v5 = vld [vmem:[#allocation16 + $0x7f8] sm:$0xff] }
 0x29e   :  { %3346 = vmatpush2.bf16.msra.mxu1 %v10725_v40  ;;  %3306 = vmatprep.subr.bf16.mxu0 %v10590_v41  ;;  %v10672_v40 = vcombine.high %v1753_v7, %v1757_v8  ;;  %v1617_v41 = vld [vmem:[#allocation16 + $0x118] sm:$0xff] }
 0x29f   :  { %3347 = vmatprep.subr.bf16.mxu1 %v10718_v43  ;;  %v1621_v43 = vld [vmem:[#allocation16 + $0x138] sm:$0xff] }
 0x2a1   :  { %3307 = vmatpush2.bf16.msra.mxu0 %v10589_v12  ;;  %v10536_v12 = vcombine.high %v1617_v41, %v1621_v43 }
 0x2a2   :  { %3348 = vmatpush2.bf16.msra.mxu1 %v10717_v13  ;;  %3308 = vmatprep.subr.bf16.mxu0 %v10582_v17  ;;  %v1609_v13 = vld [vmem:[#allocation16 + $0xd8] sm:$0xff] }
 0x2a3   :  { %3349 = vmatprep.subr.bf16.mxu1 %v10710_v14  ;;  %v1613_v17 = vld [vmem:[#allocation16 + $0xf8] sm:$0xff] }
 0x2a4   :  { %v1737_v14 = vld [vmem:[#allocation16 + $0x4d8] sm:$0xff]  ;;  %v10528_v16 = vcombine.high %v1609_v13, %v1613_v17  ;;  %v10527_v27 = vcombine.low %v1609_v13, %v1613_v17 }
 0x2a5   :  { %3309 = vmatpush2.bf16.msra.mxu0 %v10581_v21  ;;  %v10656_v20 = vcombine.high %v1737_v14, %v1741_v15  ;;  %v1601_v21 = vld [vmem:[#allocation16 + $0x98] sm:$0xff]  ;;  %v10655_v29 = vcombine.low %v1737_v14, %v1741_v15 }
 0x2a6   :  { %3350 = vmatpush2.bf16.msra.mxu1 %v10709_v22  ;;  %3310 = vmatprep.subr.bf16.mxu0 %v10574_v25  ;;  %v1605_v22 = vld [vmem:[#allocation16 + $0xb8] sm:$0xff] }
 0x2a7   :  { %3351 = vmatprep.subr.bf16.mxu1 %v10702_v26  ;;  %v1729_v25 = vld [vmem:[#allocation16 + $0x498] sm:$0xff]  ;;  %v10520_v30 = vcombine.high %v1601_v21, %v1605_v22  ;;  %v10519_v36 = vcombine.low %v1601_v21, %v1605_v22 }
 0x2a8   :  { %v1733_v26 = vld [vmem:[#allocation16 + $0x4b8] sm:$0xff] }
 0x2a9   :  { %3311 = vmatpush2.bf16.msra.mxu0 %v10573_v32  ;;  %v10648_v31 = vcombine.high %v1729_v25, %v1733_v26  ;;  %v1593_v32 = vld [vmem:[#allocation16 + $0x58] sm:$0xff]  ;;  %v10647_v37 = vcombine.low %v1729_v25, %v1733_v26 }
 0x2aa   :  { %3352 = vmatpush2.bf16.msra.mxu1 %v10701_v33  ;;  %3312 = vmatprep.subr.bf16.mxu0 %v10566_v34  ;;  %v1597_v33 = vld [vmem:[#allocation16 + $0x78] sm:$0xff] }
 0x2ab   :  { %3353 = vmatprep.subr.bf16.mxu1 %v10694_v35  ;;  %v1721_v34 = vld [vmem:[#allocation16 + $0x458] sm:$0xff]  ;;  %v10512_v38 = vcombine.high %v1593_v32, %v1597_v33  ;;  %v10511_v53 = vcombine.low %v1593_v32, %v1597_v33 }
 0x2ac   :  { %v1725_v35 = vld [vmem:[#allocation16 + $0x478] sm:$0xff] }
 0x2ad   :  { %3313 = vmatpush2.bf16.msra.mxu0 %v10565_v49  ;;  %v10640_v47 = vcombine.high %v1721_v34, %v1725_v35  ;;  %v1585_v49 = vld [vmem:[#allocation16 + $0x18] sm:$0xff]  ;;  %v10639_v61 = vcombine.low %v1721_v34, %v1725_v35 }
 0x2ae   :  { %3354 = vmatpush2.bf16.msra.mxu1 %v10693_v50  ;;  %3364 = vmatprep.subr.bf16.mxu0 %v10560_v51  ;;  %v1589_v50 = vld [vmem:[#allocation16 + $0x38] sm:$0xff] }
 0x2af   :  { %3405 = vmatprep.subr.bf16.mxu1 %v10688_v54  ;;  %v1713_v51 = vld [vmem:[#allocation16 + $0x418] sm:$0xff]  ;;  %v10503_v3 = vcombine.low %v1585_v49, %v1589_v50 }
 0x2b0   :  { %3315 = vmatmul.mubr.bf16.vlgmr.msra.gmra.mxu0 %v12712_v57  ;;  %v1717_v54 = vld [vmem:[#allocation16 + $0x438] sm:$0xff] }
 0x2b1   :  { %3356 = vmatmul.mubr.bf16.vlgmr.msra.gmra.mxu1 %v12714_v52  ;;  %3365 = vmatpush1.bf16.msra.mxu0 %v10559_v62  ;;  %v10504_v62 = vcombine.high %v1585_v49, %v1589_v50  ;;  %v10632_v59 = vcombine.high %v1713_v51, %v1717_v54 }
 0x2b2   :  { %3396 = vmatprep.mubr.bf16.mxu0 %v12708_v58  ;;  %3406 = vmatpush1.bf16.msra.mxu1 %v10687_v1  ;;  %v10664_v58 = vcombine.high %v1745_v44, %v1749_v45  ;;  %v1709_v1 = vld [vmem:[#allocation16 + $0x3f8] sm:$0xff] }
 0x2b3   :  { %3437 = vmatprep.mubr.bf16.mxu1 %v12710_v63  ;;  %3366 = vmatprep.subr.bf16.mxu0 %v10552_v23  ;;  %v10535_v63 = vcombine.low %v1617_v41, %v1621_v43  ;;  %v1833_v23 = vld [vmem:[#allocation16 + $0x7d8] sm:$0xff]  ;;  %v10624_v7 = vcombine.high %v1705_v60, %v1709_v1  ;;  %v10623_v41 = vcombine.low %v1705_v60, %v1709_v1  ;;  %v12736_v60 = vld [vmem:[#allocation8] sm:$0xf] }
 0x2b4   :  { %3407 = vmatprep.subr.bf16.mxu1 %v10680_v6  ;;  %v10631_v6 = vcombine.low %v1713_v51, %v1717_v54  ;;  %v10752_v8 = vcombine.high %v1833_v23, %v1837_v5  ;;  %v10751_v43 = vcombine.low %v1833_v23, %v1837_v5 }
 0x2b5   :  { %3367 = vmatpush1.bf16.msra.mxu0 %v10551_v9  ;;  %v1697_v9 = vld [vmem:[#allocation16 + $0x398] sm:$0xff] }
 0x2b6   :  { %3408 = vmatpush1.bf16.msra.mxu1 %v10679_v10  ;;  %3368 = vmatprep.subr.bf16.mxu0 %v10544_v39  ;;  %v1701_v10 = vld [vmem:[#allocation16 + $0x3b8] sm:$0xff] }
 0x2b7   :  { %3409 = vmatprep.subr.bf16.mxu1 %v10672_v40  ;;  %v1825_v39 = vld [vmem:[#allocation16 + $0x798] sm:$0xff]  ;;  %v10616_v44 = vcombine.high %v1697_v9, %v1701_v10  ;;  %v10615_v13 = vcombine.low %v1697_v9, %v1701_v10  ;;  %v863_v10 = vrot.slane %v12736_v60, %v12669_v28 }
 0x2b8   :  { %v1829_v40 = vld [vmem:[#allocation16 + $0x7b8] sm:$0xff] }
 0x2b9   :  { %3369 = vmatpush1.bf16.msra.mxu0 %v10543_v4  ;;  %v10744_v45 = vcombine.high %v1825_v39, %v1829_v40  ;;  %v1689_v4 = vld [vmem:[#allocation16 + $0x358] sm:$0xff]  ;;  %v10743_v17 = vcombine.low %v1825_v39, %v1829_v40  ;;  %v871_v39 = vrot.slane %v12736_v60, %v12665_v19 }
 0x2ba   :  { %3410 = vmatpush1.bf16.msra.mxu1 %v10671_v11  ;;  %3370 = vmatprep.subr.bf16.mxu0 %v10536_v12  ;;  %v1693_v11 = vld [vmem:[#allocation16 + $0x378] sm:$0xff] }
 0x2bb   :  { %3411 = vmatprep.subr.bf16.mxu1 %v10664_v58  ;;  %v1817_v12 = vld [vmem:[#allocation16 + $0x758] sm:$0xff]  ;;  %v10608_v14 = vcombine.high %v1689_v4, %v1693_v11  ;;  %v10607_v21 = vcombine.low %v1689_v4, %v1693_v11  ;;  %v1382_v4 = vld [vmem:[#allocation14 + $0x1e0] sm:$0xff] }
 0x2bc   :  { %v1821_v58 = vld [vmem:[#allocation16 + $0x778] sm:$0xff]  ;;  %v1506_v11 = vld [vmem:[#allocation14 + $0x5c0] sm:$0xff] }
 0x2bd   :  { %3371 = vmatpush1.bf16.msra.mxu0 %v10535_v63  ;;  %v10736_v15 = vcombine.high %v1817_v12, %v1821_v58  ;;  %v1681_v63 = vld [vmem:[#allocation16 + $0x318] sm:$0xff]  ;;  %v10735_v22 = vcombine.low %v1817_v12, %v1821_v58  ;;  %v1510_v12 = vld [vmem:[#allocation14 + $0x5e0] sm:$0xff]  ;;  %v877_v58 = vadd.f32 %v863_v10, %v12680_v55 }
 0x2be   :  { %3412 = vmatpush1.bf16.msra.mxu1 %v10663_v18  ;;  %3372 = vmatprep.subr.bf16.mxu0 %v10528_v16  ;;  %v1685_v18 = vld [vmem:[#allocation16 + $0x338] sm:$0xff]  ;;  %v10937_v55 = vcombine.low %v1506_v11, %v1510_v12  ;;  %v1350_v10 = vld [vmem:[#allocation14 + $0xe0] sm:$0xff] }
 0x2bf   :  { %3413 = vmatprep.subr.bf16.mxu1 %v10656_v20  ;;  %v1809_v16 = vld [vmem:[#allocation16 + $0x718] sm:$0xff]  ;;  %v10600_v25 = vcombine.high %v1681_v63, %v1685_v18  ;;  %v10599_v32 = vcombine.low %v1681_v63, %v1685_v18  ;;  %v10938_v63 = vcombine.high %v1506_v11, %v1510_v12  ;;  %v881_v18 = vmax.f32 %v877_v58, 0.0  ;;  %v1342_v11 = vld [vmem:[#allocation14 + $0xa0] sm:$0xff] }
 0x2c0   :  { %v1813_v20 = vld [vmem:[#allocation16 + $0x738] sm:$0xff]  ;;  %v1466_v12 = vld [vmem:[#allocation14 + $0x480] sm:$0xff] }
 0x2c1   :  { %3373 = vmatpush1.bf16.msra.mxu0 %v10527_v27  ;;  %v10728_v26 = vcombine.high %v1809_v16, %v1813_v20  ;;  %v1673_v27 = vld [vmem:[#allocation16 + $0x2d8] sm:$0xff]  ;;  %v10727_v33 = vcombine.low %v1809_v16, %v1813_v20  ;;  %v1370_v16 = vld [vmem:[#allocation14 + $0x180] sm:$0xff] }
 0x2c2   :  { %3414 = vmatpush1.bf16.msra.mxu1 %v10655_v29  ;;  %3374 = vmatprep.subr.bf16.mxu0 %v10520_v30  ;;  %v1677_v29 = vld [vmem:[#allocation16 + $0x2f8] sm:$0xff]  ;;  %v1374_v20 = vld [vmem:[#allocation14 + $0x1a0] sm:$0xff] }
 0x2c3   :  { %3415 = vmatprep.subr.bf16.mxu1 %v10648_v31  ;;  %v1801_v30 = vld [vmem:[#allocation16 + $0x6d8] sm:$0xff]  ;;  %v10592_v34 = vcombine.high %v1673_v27, %v1677_v29  ;;  %v10591_v49 = vcombine.low %v1673_v27, %v1677_v29  ;;  %v1362_v27 = vld [vmem:[#allocation14 + $0x140] sm:$0xff] }
 0x2c4   :  { %v1805_v31 = vld [vmem:[#allocation16 + $0x6f8] sm:$0xff]  ;;  %v1366_v29 = vld [vmem:[#allocation14 + $0x160] sm:$0xff] }
 0x2c5   :  { %3375 = vmatpush1.bf16.msra.mxu0 %v10519_v36  ;;  %v10720_v35 = vcombine.high %v1801_v30, %v1805_v31  ;;  %v1665_v36 = vld [vmem:[#allocation16 + $0x298] sm:$0xff]  ;;  %v10719_v50 = vcombine.low %v1801_v30, %v1805_v31  ;;  %v1470_v58 = vld [vmem:[#allocation14 + $0x4a0] sm:$0xff] }
 0x2c6   :  { %3416 = vmatpush1.bf16.msra.mxu1 %v10647_v37  ;;  %3376 = vmatprep.subr.bf16.mxu0 %v10512_v38  ;;  %v1669_v37 = vld [vmem:[#allocation16 + $0x2b8] sm:$0xff] }
 0x2c7   :  { %3417 = vmatprep.subr.bf16.mxu1 %v10640_v47  ;;  %v1793_v38 = vld [vmem:[#allocation16 + $0x698] sm:$0xff]  ;;  %v10584_v51 = vcombine.high %v1665_v36, %v1669_v37  ;;  %v10583_v1 = vcombine.low %v1665_v36, %v1669_v37 }
 0x2c8   :  { %v1797_v47 = vld [vmem:[#allocation16 + $0x6b8] sm:$0xff] }
 0x2c9   :  { %3377 = vmatpush1.bf16.msra.mxu0 %v10511_v53  ;;  %v10712_v54 = vcombine.high %v1793_v38, %v1797_v47  ;;  %v1657_v53 = vld [vmem:[#allocation16 + $0x258] sm:$0xff]  ;;  %v10711_v23 = vcombine.low %v1793_v38, %v1797_v47  ;;  %v10801_v38 = vcombine.low %v1370_v16, %v1374_v20 }
 0x2ca   :  { %3418 = vmatpush1.bf16.msra.mxu1 %v10639_v61  ;;  %3378 = vmatprep.subr.bf16.mxu0 %v10504_v62  ;;  %v1661_v61 = vld [vmem:[#allocation16 + $0x278] sm:$0xff] }
 0x2cb   :  { %3419 = vmatprep.subr.bf16.mxu1 %v10632_v59  ;;  %v1785_v62 = vld [vmem:[#allocation16 + $0x658] sm:$0xff]  ;;  %v10576_v5 = vcombine.high %v1657_v53, %v1661_v61  ;;  %v10575_v40 = vcombine.low %v1657_v53, %v1661_v61  ;;  %v1358_v53 = vld [vmem:[#allocation14 + $0x120] sm:$0xff] }
 0x2cc   :  { %v1789_v59 = vld [vmem:[#allocation16 + $0x678] sm:$0xff] }
 0x2cd   :  { %3379 = vmatpush1.bf16.msra.mxu0 %v10503_v3  ;;  %v10704_v3 = vcombine.high %v1785_v62, %v1789_v59  ;;  %v1781_v9 = vld [vmem:[#allocation16 + $0x638] sm:$0xff] }
 0x2ce   :  { %3420 = vmatpush1.bf16.msra.mxu1 %v10631_v6  ;;  %3380 = vmatprep.subr.bf16.mxu0 %v10624_v7  ;;  %v1649_v6 = vld [vmem:[#allocation16 + $0x218] sm:$0xff] }
 0x2cf   :  { %3421 = vmatprep.subr.bf16.mxu1 %v10752_v8  ;;  %v1653_v7 = vld [vmem:[#allocation16 + $0x238] sm:$0xff] }
 0x2d0   :  { %v1777_v8 = vld [vmem:[#allocation16 + $0x618] sm:$0xff] }
 0x2d1   :  { %3381 = vmatpush2.bf16.msra.mxu0 %v10623_v41  ;;  %v10703_v41 = vcombine.low %v1785_v62, %v1789_v59  ;;  %v1482_v59 = vld [vmem:[#allocation14 + $0x500] sm:$0xff] }
 0x2d2   :  { %3422 = vmatpush2.bf16.msra.mxu1 %v10751_v43  ;;  %3382 = vmatprep.subr.bf16.mxu0 %v10616_v44  ;;  %v10568_v43 = vcombine.high %v1649_v6, %v1653_v7  ;;  %v10696_v44 = vcombine.high %v1777_v8, %v1781_v9 }
 0x2d3   :  { %3423 = vmatprep.subr.bf16.mxu1 %v10744_v45  ;;  %v1378_v45 = vld [vmem:[#allocation14 + $0x1c0] sm:$0xff] }
 0x2d5   :  { %3383 = vmatpush2.bf16.msra.mxu0 %v10615_v13  ;;  %v879_v13 = vadd.f32 %v871_v39, %v12677_v48  ;;  %v10802_v48 = vcombine.high %v1370_v16, %v1374_v20  ;;  %v1474_v39 = vld [vmem:[#allocation14 + $0x4c0] sm:$0xff] }
 0x2d6   :  { %3424 = vmatpush2.bf16.msra.mxu1 %v10743_v17  ;;  %3384 = vmatprep.subr.bf16.mxu0 %v10608_v14  ;;  %v10567_v17 = vcombine.low %v1649_v6, %v1653_v7  ;;  %v10695_v14 = vcombine.low %v1777_v8, %v1781_v9  ;;  %v1346_v9 = vld [vmem:[#allocation14 + $0xc0] sm:$0xff] }
 0x2d7   :  { %3425 = vmatprep.subr.bf16.mxu1 %v10736_v15  ;;  %v10810_v15 = vcombine.high %v1378_v45, %v1382_v4  ;;  %v1458_v16 = vld [vmem:[#allocation14 + $0x440] sm:$0xff] }
 0x2d8   :  { %v1462_v20 = vld [vmem:[#allocation14 + $0x460] sm:$0xff] }
 0x2d9   :  { %3385 = vmatpush2.bf16.msra.mxu0 %v10607_v21  ;;  %v10809_v21 = vcombine.low %v1378_v45, %v1382_v4  ;;  %v1338_v4 = vld [vmem:[#allocation14 + $0x80] sm:$0xff] }
 0x2da   :  { %3426 = vmatpush2.bf16.msra.mxu1 %v10735_v22  ;;  %3386 = vmatprep.subr.bf16.mxu0 %v10600_v25  ;;  %v883_v22 = vmax.f32 %v879_v13, 0.0  ;;  %v1498_v25 = vld [vmem:[#allocation14 + $0x580] sm:$0xff]  ;;  %v10777_v13 = vcombine.low %v1346_v9, %v1350_v10 }
 0x2db   :  { %3427 = vmatprep.subr.bf16.mxu1 %v10728_v26  ;;  %v1502_v26 = vld [vmem:[#allocation14 + $0x5a0] sm:$0xff] }
 0x2dc   :  { %v12750_v37 = vpack.c.bf16 %v883_v22, %v883_v22  ;;  %v10897_v22 = vcombine.low %v1466_v12, %v1470_v58 }
 0x2dd   :  { %3387 = vmatpush2.bf16.msra.mxu0 %v10599_v32  ;;  %v12745_v32 = vpack.c.bf16 %v881_v18, %v881_v18  ;;  %v1334_v18 = vld [vmem:[#allocation14 + $0x60] sm:$0xff] }
 0x2de   :  { %3428 = vmatpush2.bf16.msra.mxu1 %v10727_v33  ;;  %3388 = vmatprep.subr.bf16.mxu0 %v10592_v34  ;;  %v10930_v33 = vcombine.high %v1498_v25, %v1502_v26  ;;  %v1490_v34 = vld [vmem:[#allocation14 + $0x540] sm:$0xff] }
 0x2df   :  { %3429 = vmatprep.subr.bf16.mxu1 %v10720_v35  ;;  %v1494_v35 = vld [vmem:[#allocation14 + $0x560] sm:$0xff] }
 0x2e0   :  { %v10921_v6 = vcombine.low %v1490_v34, %v1494_v35 }
 0x2e1   :  { %3389 = vmatpush2.bf16.msra.mxu0 %v10591_v49  ;;  %v10929_v49 = vcombine.low %v1498_v25, %v1502_v26  ;;  %v10890_v26 = vcombine.high %v1458_v16, %v1462_v20 }
 0x2e2   :  { %3430 = vmatpush2.bf16.msra.mxu1 %v10719_v50  ;;  %3390 = vmatprep.subr.bf16.mxu0 %v10584_v51  ;;  %v10794_v50 = vcombine.high %v1362_v27, %v1366_v29 }
 0x2e3   :  { %3431 = vmatprep.subr.bf16.mxu1 %v10712_v54  ;;  %v10922_v54 = vcombine.high %v1490_v34, %v1494_v35  ;;  %v1442_v35 = vld [vmem:[#allocation14 + $0x3c0] sm:$0xff] }
 0x2e5   :  { %3391 = vmatpush2.bf16.msra.mxu0 %v10583_v1  ;;  %v1486_v1 = vld [vmem:[#allocation14 + $0x520] sm:$0xff] }
 0x2e6   :  { %3432 = vmatpush2.bf16.msra.mxu1 %v10711_v23  ;;  %3392 = vmatprep.subr.bf16.mxu0 %v10576_v5  ;;  %v10793_v23 = vcombine.low %v1362_v27, %v1366_v29  ;;  %v10914_v8 = vcombine.high %v1482_v59, %v1486_v1  ;;  %v1450_v27 = vld [vmem:[#allocation14 + $0x400] sm:$0xff] }
 0x2e7   :  { %3433 = vmatprep.subr.bf16.mxu1 %v10704_v3  ;;  %v1454_v29 = vld [vmem:[#allocation14 + $0x420] sm:$0xff] }
 0x2e8   :  { %v10882_v34 = vcombine.high %v1450_v27, %v1454_v29 }
 0x2e9   :  { %3393 = vmatpush2.bf16.msra.mxu0 %v10575_v40  ;;  %v1478_v40 = vld [vmem:[#allocation14 + $0x4e0] sm:$0xff] }
 0x2ea   :  { %3434 = vmatpush2.bf16.msra.mxu1 %v10703_v41  ;;  %3394 = vmatprep.subr.bf16.mxu0 %v10568_v43  ;;  %v10913_v43 = vcombine.low %v1482_v59, %v1486_v1  ;;  %v10906_v45 = vcombine.high %v1474_v39, %v1478_v40  ;;  %v1566_v59 = vld [vmem:[#allocation14 + $0x7a0] sm:$0xff] }
 0x2eb   :  { %3435 = vmatprep.subr.bf16.mxu1 %v10696_v44  ;;  %v10778_v44 = vcombine.high %v1346_v9, %v1350_v10  ;;  %v1558_v9 = vld [vmem:[#allocation14 + $0x760] sm:$0xff] }
 0x2ed   :  { %3395 = vmatpush2.bf16.msra.mxu0 %v10567_v17  ;;  %v10905_v17 = vcombine.low %v1474_v39, %v1478_v40 }
 0x2ee   :  { %3436 = vmatpush2.bf16.msra.mxu1 %v10695_v14  ;;  %4726 = vmatprep.subr.bf16.mxu0 %v10810_v15  ;;  %v10770_v14 = vcombine.high %v1338_v4, %v1342_v11  ;;  %v10898_v15 = vcombine.high %v1466_v12, %v1470_v58 }
 0x2ef   :  { %4767 = vmatprep.subr.bf16.mxu1 %v10938_v63  ;;  %v1330_v63 = vld [vmem:[#allocation14 + $0x40] sm:$0xff] }
 0x2f0   :  { %3397 = vmatmul.mubr.bf16.vlgmr.msra.gmra.mxu0 %v12712_v57  ;;  %v3152_v30 = vpop.f32.mrf.mxu0  ;;  %v3193_v31 = vpop.f32.mrf.mxu1  ;;  %v10762_v25 = vcombine.high %v1330_v63, %v1334_v18 }
 0x2f1   :  { %3438 = vmatmul.mubr.bf16.vlgmr.msra.gmra.mxu1 %v12714_v52  ;;  %v12748_v36 = vadd.f32 %v3193_v31, %v3152_v30  ;;  %4727 = vmatpush1.bf16.msra.mxu0 %v10809_v21  ;;  %v1354_v52 = vld [vmem:[#allocation14 + $0x100] sm:$0xff]  ;;  %v10769_v21 = vcombine.low %v1338_v4, %v1342_v11  ;;  %v10761_v30 = vcombine.low %v1330_v63, %v1334_v18 }
 0x2f2   :  { %4758 = vmatprep.mubr.bf16.mxu0 %v12745_v32  ;;  %4768 = vmatpush1.bf16.msra.mxu1 %v10937_v55  ;;  %v3154_v47 = vpop.f32.mrf.mxu0  ;;  %v3195_v57 = vpop.f32.mrf.mxu1  ;;  %v10786_v7 = vcombine.high %v1354_v52, %v1358_v53  ;;  %v10785_v41 = vcombine.low %v1354_v52, %v1358_v53  ;;  %v1322_v55 = vld [vmem:[#allocation14] sm:$0xff]  ;;  %v10889_v31 = vcombine.low %v1458_v16, %v1462_v20 }
 0x2f3   :  { %4799 = vmatprep.mubr.bf16.mxu1 %v12750_v37  ;;  %v12754_v51 = vadd.f32 %v3195_v57, %v3154_v47  ;;  %4728 = vmatprep.subr.bf16.mxu0 %v10802_v48  ;;  %v1326_v48 = vld [vmem:[#allocation14 + $0x20] sm:$0xff] }
 0x2f4   :  { %4769 = vmatprep.subr.bf16.mxu1 %v10930_v33  ;;  %v3156_v61 = vpop.f32.mrf.mxu0  ;;  %v3197_v62 = vpop.f32.mrf.mxu1  ;;  %v10754_v33 = vcombine.high %v1322_v55, %v1326_v48  ;;  %v1570_v47 = vld [vmem:[#allocation14 + $0x7c0] sm:$0xff] }
 0x2f5   :  { %4729 = vmatpush1.bf16.msra.mxu0 %v10801_v38  ;;  %v1446_v38 = vld [vmem:[#allocation14 + $0x3e0] sm:$0xff] }
 0x2f6   :  { %4770 = vmatpush1.bf16.msra.mxu1 %v10929_v49  ;;  %v3157_v5 = vpop.f32.mrf.mxu0  ;;  %v3198_v3 = vpop.f32.mrf.mxu1  ;;  %4730 = vmatprep.subr.bf16.mxu0 %v10794_v50  ;;  %v1574_v57 = vld [vmem:[#allocation14 + $0x7e0] sm:$0xff]  ;;  %v10753_v49 = vcombine.low %v1322_v55, %v1326_v48  ;;  %v10881_v50 = vcombine.low %v1450_v27, %v1454_v29  ;;  %v10873_v1 = vcombine.low %v1442_v35, %v1446_v38 }
 0x2f7   :  { %4771 = vmatprep.subr.bf16.mxu1 %v10922_v54  ;;  %v10874_v54 = vcombine.high %v1442_v35, %v1446_v38  ;;  %v11002_v52 = vcombine.high %v1570_v47, %v1574_v57  ;;  %v1434_v53 = vld [vmem:[#allocation14 + $0x380] sm:$0xff] }
 0x2f8   :  { %v1438_v61 = vld [vmem:[#allocation14 + $0x3a0] sm:$0xff] }
 0x2f9   :  { %4731 = vmatpush1.bf16.msra.mxu0 %v10793_v23  ;;  %v1562_v62 = vld [vmem:[#allocation14 + $0x780] sm:$0xff]  ;;  %v11001_v23 = vcombine.low %v1570_v47, %v1574_v57  ;;  %v10866_v5 = vcombine.high %v1434_v53, %v1438_v61  ;;  %v10865_v10 = vcombine.low %v1434_v53, %v1438_v61  ;;  %v867_v53 = vrot.slane %v12736_v60, %v12683_v0 }
 0x2fa   :  { %4772 = vmatpush1.bf16.msra.mxu1 %v10921_v6  ;;  %4732 = vmatprep.subr.bf16.mxu0 %v10786_v7  ;;  %v10994_v3 = vcombine.high %v1562_v62, %v1566_v59  ;;  %v1426_v6 = vld [vmem:[#allocation14 + $0x340] sm:$0xff]  ;;  %v10993_v39 = vcombine.low %v1562_v62, %v1566_v59 }
 0x2fb   :  { %4773 = vmatprep.subr.bf16.mxu1 %v10914_v8  ;;  %v1430_v7 = vld [vmem:[#allocation14 + $0x360] sm:$0xff] }
 0x2fc   :  { %v1554_v8 = vld [vmem:[#allocation14 + $0x740] sm:$0xff]  ;;  %v10858_v40 = vcombine.high %v1426_v6, %v1430_v7  ;;  %v10857_v11 = vcombine.low %v1426_v6, %v1430_v7  ;;  %v878_v6 = vadd.f32 %v867_v53, %v12691_v2  ;;  %v1379_v7 = vld [vmem:[#allocation14 + $0x1c8] sm:$0xff] }
 0x2fd   :  { %4733 = vmatpush1.bf16.msra.mxu0 %v10785_v41  ;;  %v10986_v41 = vcombine.high %v1554_v8, %v1558_v9  ;;  %v1550_v4 = vld [vmem:[#allocation14 + $0x720] sm:$0xff]  ;;  %v10985_v12 = vcombine.low %v1554_v8, %v1558_v9  ;;  %v1383_v8 = vld [vmem:[#allocation14 + $0x1e8] sm:$0xff] }
 0x2fe   :  { %4774 = vmatpush1.bf16.msra.mxu1 %v10913_v43  ;;  %4734 = vmatprep.subr.bf16.mxu0 %v10778_v44  ;;  %v1418_v43 = vld [vmem:[#allocation14 + $0x300] sm:$0xff]  ;;  %v1507_v9 = vld [vmem:[#allocation14 + $0x5c8] sm:$0xff] }
 0x2ff   :  { %4775 = vmatprep.subr.bf16.mxu1 %v10906_v45  ;;  %v1422_v44 = vld [vmem:[#allocation14 + $0x320] sm:$0xff]  ;;  %v1503_v2 = vld [vmem:[#allocation14 + $0x5a8] sm:$0xff] }
 0x300   :  { %v1546_v45 = vld [vmem:[#allocation14 + $0x700] sm:$0xff]  ;;  %v10850_v58 = vcombine.high %v1418_v43, %v1422_v44  ;;  %v10849_v18 = vcombine.low %v1418_v43, %v1422_v44  ;;  %v882_v43 = vmax.f32 %v878_v6, 0.0 }
 0x301   :  { %4735 = vmatpush1.bf16.msra.mxu0 %v10777_v13  ;;  %v10978_v13 = vcombine.high %v1546_v45, %v1550_v4  ;;  %v1542_v63 = vld [vmem:[#allocation14 + $0x6e0] sm:$0xff]  ;;  %v10977_v16 = vcombine.low %v1546_v45, %v1550_v4  ;;  %v1371_v45 = vld [vmem:[#allocation14 + $0x188] sm:$0xff]  ;;  %v10811_v4 = vcombine.low %v1379_v7, %v1383_v8 }
 0x302   :  { %4776 = vmatpush1.bf16.msra.mxu1 %v10905_v17  ;;  %4736 = vmatprep.subr.bf16.mxu0 %v10770_v14  ;;  %v1410_v17 = vld [vmem:[#allocation14 + $0x2c0] sm:$0xff] }
 0x303   :  { %4777 = vmatprep.subr.bf16.mxu1 %v10898_v15  ;;  %v1414_v14 = vld [vmem:[#allocation14 + $0x2e0] sm:$0xff] }
 0x304   :  { %v1538_v15 = vld [vmem:[#allocation14 + $0x6c0] sm:$0xff]  ;;  %v10842_v20 = vcombine.high %v1410_v17, %v1414_v14  ;;  %v10841_v48 = vcombine.low %v1410_v17, %v1414_v14  ;;  %v1363_v14 = vld [vmem:[#allocation14 + $0x148] sm:$0xff] }
 0x305   :  { %4737 = vmatpush1.bf16.msra.mxu0 %v10769_v21  ;;  %v10970_v21 = vcombine.high %v1538_v15, %v1542_v63  ;;  %v1534_v55 = vld [vmem:[#allocation14 + $0x6a0] sm:$0xff]  ;;  %v10969_v27 = vcombine.low %v1538_v15, %v1542_v63  ;;  %v1367_v15 = vld [vmem:[#allocation14 + $0x168] sm:$0xff] }
 0x306   :  { %4778 = vmatpush1.bf16.msra.mxu1 %v10897_v22  ;;  %4738 = vmatprep.subr.bf16.mxu0 %v10762_v25  ;;  %v1402_v22 = vld [vmem:[#allocation14 + $0x280] sm:$0xff] }
 0x307   :  { %4779 = vmatprep.subr.bf16.mxu1 %v10890_v26  ;;  %v1406_v25 = vld [vmem:[#allocation14 + $0x2a0] sm:$0xff] }
 0x308   :  { %v1530_v26 = vld [vmem:[#allocation14 + $0x680] sm:$0xff]  ;;  %v10834_v29 = vcombine.high %v1402_v22, %v1406_v25  ;;  %v10833_v38 = vcombine.low %v1402_v22, %v1406_v25 }
 0x309   :  { %4739 = vmatpush1.bf16.msra.mxu0 %v10761_v30  ;;  %v10962_v30 = vcombine.high %v1530_v26, %v1534_v55  ;;  %v1526_v35 = vld [vmem:[#allocation14 + $0x660] sm:$0xff]  ;;  %v10961_v47 = vcombine.low %v1530_v26, %v1534_v55 }
 0x30a   :  { %4780 = vmatpush1.bf16.msra.mxu1 %v10889_v31  ;;  %4740 = vmatprep.subr.bf16.mxu0 %v10754_v33  ;;  %v1394_v31 = vld [vmem:[#allocation14 + $0x240] sm:$0xff] }
 0x30b   :  { %4781 = vmatprep.subr.bf16.mxu1 %v10882_v34  ;;  %v1398_v33 = vld [vmem:[#allocation14 + $0x260] sm:$0xff] }
 0x30c   :  { %v1522_v34 = vld [vmem:[#allocation14 + $0x640] sm:$0xff]  ;;  %v10826_v57 = vcombine.high %v1394_v31, %v1398_v33  ;;  %v10825_v59 = vcombine.low %v1394_v31, %v1398_v33  ;;  %v1355_v31 = vld [vmem:[#allocation14 + $0x108] sm:$0xff] }
 0x30d   :  { %4741 = vmatpush1.bf16.msra.mxu0 %v10753_v49  ;;  %v859_v49 = vrot.slane %v12736_v60, %v12673_v46  ;;  %v1514_v61 = vld [vmem:[#allocation14 + $0x600] sm:$0xff]  ;;  %v1359_v33 = vld [vmem:[#allocation14 + $0x128] sm:$0xff] }
 0x30e   :  { %4782 = vmatpush1.bf16.msra.mxu1 %v10881_v50  ;;  %4742 = vmatprep.subr.bf16.mxu0 %v10874_v54  ;;  %v10954_v50 = vcombine.high %v1522_v34, %v1526_v35  ;;  %v1386_v54 = vld [vmem:[#allocation14 + $0x200] sm:$0xff] }
 0x30f   :  { %4783 = vmatprep.subr.bf16.mxu1 %v11002_v52  ;;  %v1390_v52 = vld [vmem:[#allocation14 + $0x220] sm:$0xff] }
 0x310   :  { %v1518_v62 = vld [vmem:[#allocation14 + $0x620] sm:$0xff]  ;;  %v10817_v60 = vcombine.low %v1386_v54, %v1390_v52 }
 0x311   :  { %4743 = vmatpush2.bf16.msra.mxu0 %v10873_v1  ;;  %v10953_v1 = vcombine.low %v1522_v34, %v1526_v35 }
 0x312   :  { %4784 = vmatpush2.bf16.msra.mxu1 %v11001_v23  ;;  %4744 = vmatprep.subr.bf16.mxu0 %v10866_v5  ;;  %v10818_v23 = vcombine.high %v1386_v54, %v1390_v52  ;;  %v876_v5 = vadd.f32 %v859_v49, %v12687_v24  ;;  %v1375_v24 = vld [vmem:[#allocation14 + $0x1a8] sm:$0xff]  ;;  %v10788_v52 = vcombine.high %v1355_v31, %v1359_v33 }
 0x313   :  { %4785 = vmatprep.subr.bf16.mxu1 %v10994_v3  ;;  %v10946_v3 = vcombine.high %v1514_v61, %v1518_v62  ;;  %v10804_v17 = vcombine.high %v1371_v45, %v1375_v24  ;;  %v10803_v25 = vcombine.low %v1371_v45, %v1375_v24  ;;  %v1459_v45 = vld [vmem:[#allocation14 + $0x448] sm:$0xff] }
 0x314   :  { %v1463_v24 = vld [vmem:[#allocation14 + $0x468] sm:$0xff] }
 0x315   :  { %4745 = vmatpush2.bf16.msra.mxu0 %v10865_v10  ;;  %v1511_v10 = vld [vmem:[#allocation14 + $0x5e8] sm:$0xff] }
 0x316   :  { %4786 = vmatpush2.bf16.msra.mxu1 %v10993_v39  ;;  %4746 = vmatprep.subr.bf16.mxu0 %v10858_v40  ;;  %v10945_v39 = vcombine.low %v1514_v61, %v1518_v62  ;;  %v880_v40 = vmax.f32 %v876_v5, 0.0  ;;  %v10940_v44 = vcombine.high %v1507_v9, %v1511_v10  ;;  %v1347_v61 = vld [vmem:[#allocation14 + $0xc8] sm:$0xff] }
 0x317   :  { %4787 = vmatprep.subr.bf16.mxu1 %v10986_v41  ;;  %v10812_v41 = vcombine.high %v1379_v7, %v1383_v8  ;;  %v1351_v62 = vld [vmem:[#allocation14 + $0xe8] sm:$0xff] }
 0x318   :  { %v1339_v7 = vld [vmem:[#allocation14 + $0x88] sm:$0xff] }
 0x319   :  { %4747 = vmatpush2.bf16.msra.mxu0 %v10857_v11  ;;  %v1499_v11 = vld [vmem:[#allocation14 + $0x588] sm:$0xff] }
 0x31a   :  { %4788 = vmatpush2.bf16.msra.mxu1 %v10985_v12  ;;  %4748 = vmatprep.subr.bf16.mxu0 %v10850_v58  ;;  %v12762_v12 = vpack.c.bf16 %v880_v40, %v880_v40  ;;  %v10939_v58 = vcombine.low %v1507_v9, %v1511_v10  ;;  %v1343_v8 = vld [vmem:[#allocation14 + $0xa8] sm:$0xff] }
 0x31b   :  { %4789 = vmatprep.subr.bf16.mxu1 %v10978_v13  ;;  %v12764_v13 = vpack.c.bf16 %v882_v43, %v882_v43  ;;  %v1467_v9 = vld [vmem:[#allocation14 + $0x488] sm:$0xff]  ;;  %v10772_v40 = vcombine.high %v1339_v7, %v1343_v8 }
 0x31c   :  { %v1471_v10 = vld [vmem:[#allocation14 + $0x4a8] sm:$0xff] }
 0x31d   :  { %4749 = vmatpush2.bf16.msra.mxu0 %v10849_v18  ;;  %v1331_v43 = vld [vmem:[#allocation14 + $0x48] sm:$0xff] }
 0x31e   :  { %4790 = vmatpush2.bf16.msra.mxu1 %v10977_v16  ;;  %4750 = vmatprep.subr.bf16.mxu0 %v10842_v20  ;;  %v10932_v16 = vcombine.high %v1499_v11, %v1503_v2  ;;  %v1491_v20 = vld [vmem:[#allocation14 + $0x548] sm:$0xff] }
 0x31f   :  { %4791 = vmatprep.subr.bf16.mxu1 %v10970_v21  ;;  %v1495_v21 = vld [vmem:[#allocation14 + $0x568] sm:$0xff] }
 0x320   :  { %v10923_v54 = vcombine.low %v1491_v20, %v1495_v21 }
 0x321   :  { %4751 = vmatpush2.bf16.msra.mxu0 %v10841_v48  ;;  %v10931_v48 = vcombine.low %v1499_v11, %v1503_v2  ;;  %v10899_v11 = vcombine.low %v1467_v9, %v1471_v10 }
 0x322   :  { %4792 = vmatpush2.bf16.msra.mxu1 %v10969_v27  ;;  %4752 = vmatprep.subr.bf16.mxu0 %v10834_v29  ;;  %v10796_v27 = vcombine.high %v1363_v14, %v1367_v15 }
 0x323   :  { %4793 = vmatprep.subr.bf16.mxu1 %v10962_v30  ;;  %v10924_v30 = vcombine.high %v1491_v20, %v1495_v21 }
 0x325   :  { %4753 = vmatpush2.bf16.msra.mxu0 %v10833_v38  ;;  %v1483_v38 = vld [vmem:[#allocation14 + $0x508] sm:$0xff] }
 0x326   :  { %4794 = vmatpush2.bf16.msra.mxu1 %v10961_v47  ;;  %4754 = vmatprep.subr.bf16.mxu0 %v10826_v57  ;;  %v1487_v47 = vld [vmem:[#allocation14 + $0x528] sm:$0xff]  ;;  %v10795_v57 = vcombine.low %v1363_v14, %v1367_v15 }
 0x327   :  { %4795 = vmatprep.subr.bf16.mxu1 %v10954_v50  ;;  %v10916_v53 = vcombine.high %v1483_v38, %v1487_v47  ;;  %v10915_v5 = vcombine.low %v1483_v38, %v1487_v47  ;;  %v1327_v14 = vld [vmem:[#allocation14 + $0x28] sm:$0xff] }
 0x328   :  { %v1451_v15 = vld [vmem:[#allocation14 + $0x408] sm:$0xff] }
 0x329   :  { %4755 = vmatpush2.bf16.msra.mxu0 %v10825_v59  ;;  %v1475_v59 = vld [vmem:[#allocation14 + $0x4c8] sm:$0xff] }
 0x32a   :  { %4796 = vmatpush2.bf16.msra.mxu1 %v10953_v1  ;;  %4756 = vmatprep.subr.bf16.mxu0 %v10818_v23  ;;  %v1479_v1 = vld [vmem:[#allocation14 + $0x4e8] sm:$0xff]  ;;  %v10787_v23 = vcombine.low %v1355_v31, %v1359_v33 }
 0x32b   :  { %4797 = vmatprep.subr.bf16.mxu1 %v10946_v3  ;;  %v10780_v3 = vcombine.high %v1347_v61, %v1351_v62  ;;  %v10908_v6 = vcombine.high %v1475_v59, %v1479_v1  ;;  %v1563_v38 = vld [vmem:[#allocation14 + $0x788] sm:$0xff] }
 0x32c   :  { %v1567_v47 = vld [vmem:[#allocation14 + $0x7a8] sm:$0xff] }
 0x32d   :  { %4757 = vmatpush2.bf16.msra.mxu0 %v10817_v60  ;;  %v10779_v60 = vcombine.low %v1347_v61, %v1351_v62  ;;  %v1555_v61 = vld [vmem:[#allocation14 + $0x748] sm:$0xff] }
 0x32e   :  { %4798 = vmatpush2.bf16.msra.mxu1 %v10945_v39  ;;  %4808 = vmatprep.subr.bf16.mxu0 %v10812_v41  ;;  %v10907_v39 = vcombine.low %v1475_v59, %v1479_v1  ;;  %v10900_v41 = vcombine.high %v1467_v9, %v1471_v10  ;;  %v1559_v62 = vld [vmem:[#allocation14 + $0x768] sm:$0xff]  ;;  %v10995_v1 = vcombine.low %v1563_v38, %v1567_v47 }
 0x32f   :  { %4849 = vmatprep.subr.bf16.mxu1 %v10940_v44  ;;  %v1335_v44 = vld [vmem:[#allocation14 + $0x68] sm:$0xff]  ;;  %v10987_v10 = vcombine.low %v1555_v61, %v1559_v62 }
 0x330   :  { %v3234_v63 = vpop.f32.mrf.mxu0  ;;  %v3275_v18 = vpop.f32.mrf.mxu1  ;;  %4759 = vmatmul.mubr.bf16.vlgmr.msra.gmra.mxu0 %v12762_v12  ;;  %v10764_v2 = vcombine.high %v1331_v43, %v1335_v44 }
 0x331   :  { %v12767_v22 = vadd.f32 %v3275_v18, %v3234_v63  ;;  %4800 = vmatmul.mubr.bf16.vlgmr.msra.gmra.mxu1 %v12764_v13  ;;  %4809 = vmatpush1.bf16.msra.mxu0 %v10811_v4  ;;  %v10771_v4 = vcombine.low %v1339_v7, %v1343_v8  ;;  %v1455_v63 = vld [vmem:[#allocation14 + $0x428] sm:$0xff]  ;;  %v10763_v18 = vcombine.low %v1331_v43, %v1335_v44 }
 0x332   :  { %4840 = vmatprep.mubr.bf16.mxu0 %v12745_v32  ;;  %4850 = vmatpush1.bf16.msra.mxu1 %v10939_v58  ;;  %v3236_v26 = vpop.f32.mrf.mxu0  ;;  %v3277_v55 = vpop.f32.mrf.mxu1  ;;  %v10892_v58 = vcombine.high %v1459_v45, %v1463_v24  ;;  %v10884_v21 = vcombine.high %v1451_v15, %v1455_v63  ;;  %v1547_v7 = vld [vmem:[#allocation14 + $0x708] sm:$0xff] }
 0x333   :  { %4881 = vmatprep.mubr.bf16.mxu1 %v12750_v37  ;;  %v12772_v29 = vadd.f32 %v3277_v55, %v3236_v26  ;;  %4810 = vmatprep.subr.bf16.mxu0 %v10804_v17  ;;  %v1323_v17 = vld [vmem:[#allocation14 + $0x8] sm:$0xff] }
 0x334   :  { %v3238_v34 = vpop.f32.mrf.mxu0  ;;  %v3279_v35 = vpop.f32.mrf.mxu1  ;;  %4851 = vmatprep.subr.bf16.mxu1 %v10932_v16  ;;  %v10891_v16 = vcombine.low %v1459_v45, %v1463_v24  ;;  %v10756_v20 = vcombine.high %v1323_v17, %v1327_v14  ;;  %v1447_v26 = vld [vmem:[#allocation14 + $0x3e8] sm:$0xff] }
 0x335   :  { %4811 = vmatpush1.bf16.msra.mxu0 %v10803_v25  ;;  %v1443_v25 = vld [vmem:[#allocation14 + $0x3c8] sm:$0xff] }
 0x336   :  { %4852 = vmatpush1.bf16.msra.mxu1 %v10931_v48  ;;  %v3239_v49 = vpop.f32.mrf.mxu0  ;;  %v3280_v50 = vpop.f32.mrf.mxu1  ;;  %4812 = vmatprep.subr.bf16.mxu0 %v10796_v27  ;;  %v1571_v55 = vld [vmem:[#allocation14 + $0x7c8] sm:$0xff]  ;;  %v10755_v27 = vcombine.low %v1323_v17, %v1327_v14  ;;  %v10876_v31 = vcombine.high %v1443_v25, %v1447_v26 }
 0x337   :  { %4853 = vmatprep.subr.bf16.mxu1 %v10924_v30  ;;  %v1575_v48 = vld [vmem:[#allocation14 + $0x7e8] sm:$0xff]  ;;  %v10883_v30 = vcombine.low %v1451_v15, %v1455_v63 }
 0x338   :  { %v11004_v33 = vcombine.high %v1571_v55, %v1575_v48  ;;  %v1435_v34 = vld [vmem:[#allocation14 + $0x388] sm:$0xff]  ;;  %v11003_v49 = vcombine.low %v1571_v55, %v1575_v48 }
 0x339   :  { %4813 = vmatpush1.bf16.msra.mxu0 %v10795_v57  ;;  %v1439_v35 = vld [vmem:[#allocation14 + $0x3a8] sm:$0xff]  ;;  %v10875_v57 = vcombine.low %v1443_v25, %v1447_v26 }
 0x33a   :  { %4854 = vmatpush1.bf16.msra.mxu1 %v10923_v54  ;;  %4814 = vmatprep.subr.bf16.mxu0 %v10788_v52  ;;  %v10868_v50 = vcombine.high %v1435_v34, %v1439_v35  ;;  %v10996_v54 = vcombine.high %v1563_v38, %v1567_v47  ;;  %v1427_v52 = vld [vmem:[#allocation14 + $0x348] sm:$0xff]  ;;  %v10867_v59 = vcombine.low %v1435_v34, %v1439_v35 }
 0x33b   :  { %4855 = vmatprep.subr.bf16.mxu1 %v10916_v53  ;;  %v1431_v53 = vld [vmem:[#allocation14 + $0x368] sm:$0xff] }
 0x33c   :  { %v1551_v8 = vld [vmem:[#allocation14 + $0x728] sm:$0xff]  ;;  %v10859_v9 = vcombine.low %v1427_v52, %v1431_v53 }
 0x33d   :  { %4815 = vmatpush1.bf16.msra.mxu0 %v10787_v23  ;;  %v10860_v23 = vcombine.high %v1427_v52, %v1431_v53  ;;  %v1539_v43 = vld [vmem:[#allocation14 + $0x6c8] sm:$0xff]  ;;  %v10979_v24 = vcombine.low %v1547_v7, %v1551_v8  ;;  %v1508_v52 = vld [vmem:[#allocation14 + $0x5d0] sm:$0xff] }
 0x33e   :  { %4856 = vmatpush1.bf16.msra.mxu1 %v10915_v5  ;;  %4816 = vmatprep.subr.bf16.mxu0 %v10780_v3  ;;  %v10988_v5 = vcombine.high %v1555_v61, %v1559_v62  ;;  %v1419_v3 = vld [vmem:[#allocation14 + $0x308] sm:$0xff]  ;;  %v1512_v53 = vld [vmem:[#allocation14 + $0x5f0] sm:$0xff] }
 0x33f   :  { %4857 = vmatprep.subr.bf16.mxu1 %v10908_v6  ;;  %v1423_v6 = vld [vmem:[#allocation14 + $0x328] sm:$0xff] }
 0x340   :  { %v1543_v44 = vld [vmem:[#allocation14 + $0x6e8] sm:$0xff]  ;;  %v10851_v45 = vcombine.low %v1419_v3, %v1423_v6 }
 0x341   :  { %4817 = vmatpush1.bf16.msra.mxu0 %v10779_v60  ;;  %v10852_v60 = vcombine.high %v1419_v3, %v1423_v6  ;;  %v1531_v17 = vld [vmem:[#allocation14 + $0x688] sm:$0xff]  ;;  %v10971_v63 = vcombine.low %v1539_v43, %v1543_v44  ;;  %v1500_v6 = vld [vmem:[#allocation14 + $0x590] sm:$0xff] }
 0x342   :  { %4858 = vmatpush1.bf16.msra.mxu1 %v10907_v39  ;;  %4818 = vmatprep.subr.bf16.mxu0 %v10772_v40  ;;  %v10980_v39 = vcombine.high %v1547_v7, %v1551_v8  ;;  %v1411_v40 = vld [vmem:[#allocation14 + $0x2c8] sm:$0xff]  ;;  %v1504_v7 = vld [vmem:[#allocation14 + $0x5b0] sm:$0xff]  ;;  %v10941_v8 = vcombine.low %v1508_v52, %v1512_v53 }
 0x343   :  { %4859 = vmatprep.subr.bf16.mxu1 %v10900_v41  ;;  %v1415_v41 = vld [vmem:[#allocation14 + $0x2e8] sm:$0xff] }
 0x344   :  { %v1535_v14 = vld [vmem:[#allocation14 + $0x6a8] sm:$0xff]  ;;  %v10843_v15 = vcombine.low %v1411_v40, %v1415_v41 }
 0x345   :  { %4819 = vmatpush1.bf16.msra.mxu0 %v10771_v4  ;;  %v10844_v4 = vcombine.high %v1411_v40, %v1415_v41  ;;  %v1523_v25 = vld [vmem:[#allocation14 + $0x648] sm:$0xff]  ;;  %v10963_v48 = vcombine.low %v1531_v17, %v1535_v14  ;;  %v10934_v40 = vcombine.high %v1500_v6, %v1504_v7  ;;  %v1492_v41 = vld [vmem:[#allocation14 + $0x550] sm:$0xff] }
 0x346   :  { %4860 = vmatpush1.bf16.msra.mxu1 %v10899_v11  ;;  %4820 = vmatprep.subr.bf16.mxu0 %v10764_v2  ;;  %v10972_v11 = vcombine.high %v1539_v43, %v1543_v44  ;;  %v1403_v2 = vld [vmem:[#allocation14 + $0x288] sm:$0xff]  ;;  %v1496_v43 = vld [vmem:[#allocation14 + $0x570] sm:$0xff] }
 0x347   :  { %4861 = vmatprep.subr.bf16.mxu1 %v10892_v58  ;;  %v1407_v58 = vld [vmem:[#allocation14 + $0x2a8] sm:$0xff] }
 0x348   :  { %v1527_v26 = vld [vmem:[#allocation14 + $0x668] sm:$0xff]  ;;  %v10835_v55 = vcombine.low %v1403_v2, %v1407_v58 }
 0x349   :  { %4821 = vmatpush1.bf16.msra.mxu0 %v10763_v18  ;;  %v10836_v18 = vcombine.high %v1403_v2, %v1407_v58  ;;  %v1515_v34 = vld [vmem:[#allocation14 + $0x608] sm:$0xff]  ;;  %v10955_v47 = vcombine.low %v1523_v25, %v1527_v26 }
 0x34a   :  { %4862 = vmatpush1.bf16.msra.mxu1 %v10891_v16  ;;  %4822 = vmatprep.subr.bf16.mxu0 %v10756_v20  ;;  %v10964_v16 = vcombine.high %v1531_v17, %v1535_v14  ;;  %v1395_v20 = vld [vmem:[#allocation14 + $0x248] sm:$0xff]  ;;  %v10926_v17 = vcombine.high %v1492_v41, %v1496_v43  ;;  %v1356_v14 = vld [vmem:[#allocation14 + $0x110] sm:$0xff] }
 0x34b   :  { %4863 = vmatprep.subr.bf16.mxu1 %v10884_v21  ;;  %v1399_v21 = vld [vmem:[#allocation14 + $0x268] sm:$0xff] }
 0x34c   :  { %v1519_v35 = vld [vmem:[#allocation14 + $0x628] sm:$0xff]  ;;  %v10827_v38 = vcombine.low %v1395_v20, %v1399_v21 }
 0x34d   :  { %4823 = vmatpush1.bf16.msra.mxu0 %v10755_v27  ;;  %v10828_v27 = vcombine.high %v1395_v20, %v1399_v21  ;;  %v10947_v62 = vcombine.low %v1515_v34, %v1519_v35  ;;  %v1488_v20 = vld [vmem:[#allocation14 + $0x530] sm:$0xff] }
 0x34e   :  { %4864 = vmatpush1.bf16.msra.mxu1 %v10883_v30  ;;  %4824 = vmatprep.subr.bf16.mxu0 %v10876_v31  ;;  %v10956_v30 = vcombine.high %v1523_v25, %v1527_v26  ;;  %v1387_v31 = vld [vmem:[#allocation14 + $0x208] sm:$0xff] }
 0x34f   :  { %4865 = vmatprep.subr.bf16.mxu1 %v11004_v33  ;;  %v1391_v33 = vld [vmem:[#allocation14 + $0x228] sm:$0xff] }
 0x350   :  { %v10819_v61 = vcombine.low %v1387_v31, %v1391_v33 }
 0x351   :  { %4825 = vmatpush2.bf16.msra.mxu0 %v10875_v57  ;;  %v10820_v57 = vcombine.high %v1387_v31, %v1391_v33  ;;  %v1348_v31 = vld [vmem:[#allocation14 + $0xd0] sm:$0xff] }
 0x352   :  { %4866 = vmatpush2.bf16.msra.mxu1 %v11003_v49  ;;  %4826 = vmatprep.subr.bf16.mxu0 %v10868_v50  ;;  %v10948_v49 = vcombine.high %v1515_v34, %v1519_v35  ;;  %v1380_v50 = vld [vmem:[#allocation14 + $0x1d0] sm:$0xff] }
 0x353   :  { %4867 = vmatprep.subr.bf16.mxu1 %v10996_v54  ;;  %v1384_v54 = vld [vmem:[#allocation14 + $0x1f0] sm:$0xff] }
 0x354   :  { %v10813_v3 = vcombine.low %v1380_v50, %v1384_v54  ;;  %v1352_v33 = vld [vmem:[#allocation14 + $0xf0] sm:$0xff] }
 0x355   :  { %4827 = vmatpush2.bf16.msra.mxu0 %v10867_v59  ;;  %v10814_v59 = vcombine.high %v1380_v50, %v1384_v54  ;;  %v1476_v34 = vld [vmem:[#allocation14 + $0x4d0] sm:$0xff] }
 0x356   :  { %4868 = vmatpush2.bf16.msra.mxu1 %v10995_v1  ;;  %4828 = vmatprep.subr.bf16.mxu0 %v10860_v23  ;;  %v10942_v1 = vcombine.high %v1508_v52, %v1512_v53  ;;  %v1372_v23 = vld [vmem:[#allocation14 + $0x190] sm:$0xff] }
 0x357   :  { %4869 = vmatprep.subr.bf16.mxu1 %v10988_v5  ;;  %v1376_v5 = vld [vmem:[#allocation14 + $0x1b0] sm:$0xff] }
 0x358   :  { %v1480_v35 = vld [vmem:[#allocation14 + $0x4f0] sm:$0xff] }
 0x359   :  { %4829 = vmatpush2.bf16.msra.mxu0 %v10859_v9  ;;  %v10806_v9 = vcombine.high %v1372_v23, %v1376_v5  ;;  %v1340_v50 = vld [vmem:[#allocation14 + $0x90] sm:$0xff] }
 0x35a   :  { %4870 = vmatpush2.bf16.msra.mxu1 %v10987_v10  ;;  %4830 = vmatprep.subr.bf16.mxu0 %v10852_v60  ;;  %v1364_v10 = vld [vmem:[#allocation14 + $0x150] sm:$0xff] }
 0x35b   :  { %4871 = vmatprep.subr.bf16.mxu1 %v10980_v39  ;;  %v1368_v60 = vld [vmem:[#allocation14 + $0x170] sm:$0xff] }
 0x35c   :  { %v10798_v2 = vcombine.high %v1364_v10, %v1368_v60  ;;  %v10797_v25 = vcombine.low %v1364_v10, %v1368_v60  ;;  %v1344_v54 = vld [vmem:[#allocation14 + $0xb0] sm:$0xff] }
 0x35d   :  { %4831 = vmatpush2.bf16.msra.mxu0 %v10851_v45  ;;  %v10805_v45 = vcombine.low %v1372_v23, %v1376_v5  ;;  %v1468_v52 = vld [vmem:[#allocation14 + $0x490] sm:$0xff] }
 0x35e   :  { %4872 = vmatpush2.bf16.msra.mxu1 %v10979_v24  ;;  %4832 = vmatprep.subr.bf16.mxu0 %v10844_v4  ;;  %v1472_v53 = vld [vmem:[#allocation14 + $0x4b0] sm:$0xff] }
 0x35f   :  { %4873 = vmatprep.subr.bf16.mxu1 %v10972_v11  ;;  %v10933_v11 = vcombine.low %v1500_v6, %v1504_v7  ;;  %v1332_v23 = vld [vmem:[#allocation14 + $0x50] sm:$0xff]  ;;  %v10773_v7 = vcombine.low %v1340_v50, %v1344_v54 }
 0x360   :  { %v1336_v5 = vld [vmem:[#allocation14 + $0x70] sm:$0xff] }
 0x361   :  { %4833 = vmatpush2.bf16.msra.mxu0 %v10843_v15  ;;  %v1360_v15 = vld [vmem:[#allocation14 + $0x130] sm:$0xff] }
 0x362   :  { %4874 = vmatpush2.bf16.msra.mxu1 %v10971_v63  ;;  %4834 = vmatprep.subr.bf16.mxu0 %v10836_v18  ;;  %v1464_v6 = vld [vmem:[#allocation14 + $0x470] sm:$0xff] }
 0x363   :  { %4875 = vmatprep.subr.bf16.mxu1 %v10964_v16  ;;  %v1484_v16 = vld [vmem:[#allocation14 + $0x510] sm:$0xff] }
 0x364   :  { %v1324_v60 = vld [vmem:[#allocation14 + $0x10] sm:$0xff] }
 0x365   :  { %4835 = vmatpush2.bf16.msra.mxu0 %v10835_v55  ;;  %v10925_v55 = vcombine.low %v1492_v41, %v1496_v43  ;;  %v1456_v41 = vld [vmem:[#allocation14 + $0x430] sm:$0xff]  ;;  %v10765_v43 = vcombine.low %v1332_v23, %v1336_v5 }
 0x366   :  { %4876 = vmatpush2.bf16.msra.mxu1 %v10963_v48  ;;  %4836 = vmatprep.subr.bf16.mxu0 %v10828_v27  ;;  %v10790_v48 = vcombine.high %v1356_v14, %v1360_v15 }
 0x367   :  { %4877 = vmatprep.subr.bf16.mxu1 %v10956_v30  ;;  %v10918_v30 = vcombine.high %v1484_v16, %v1488_v20 }
 0x369   :  { %4837 = vmatpush2.bf16.msra.mxu0 %v10827_v38  ;;  %v10789_v38 = vcombine.low %v1356_v14, %v1360_v15 }
 0x36a   :  { %4878 = vmatpush2.bf16.msra.mxu1 %v10955_v47  ;;  %4838 = vmatprep.subr.bf16.mxu0 %v10820_v57  ;;  %v10917_v47 = vcombine.low %v1484_v16, %v1488_v20  ;;  %v10782_v57 = vcombine.high %v1348_v31, %v1352_v33  ;;  %v1436_v20 = vld [vmem:[#allocation14 + $0x390] sm:$0xff] }
 0x36b   :  { %4879 = vmatprep.subr.bf16.mxu1 %v10948_v49  ;;  %v10910_v49 = vcombine.high %v1476_v34, %v1480_v35 }
 0x36d   :  { %4839 = vmatpush2.bf16.msra.mxu0 %v10819_v61  ;;  %v10781_v61 = vcombine.low %v1348_v31, %v1352_v33  ;;  %v1428_v31 = vld [vmem:[#allocation14 + $0x350] sm:$0xff] }
 0x36e   :  { %4880 = vmatpush2.bf16.msra.mxu1 %v10947_v62  ;;  %4890 = vmatprep.subr.bf16.mxu0 %v10814_v59  ;;  %v10909_v62 = vcombine.low %v1476_v34, %v1480_v35  ;;  %v10774_v59 = vcombine.high %v1340_v50, %v1344_v54  ;;  %v1432_v33 = vld [vmem:[#allocation14 + $0x370] sm:$0xff] }
 0x36f   :  { %4931 = vmatprep.subr.bf16.mxu1 %v10942_v1  ;;  %v10902_v1 = vcombine.high %v1468_v52, %v1472_v53  ;;  %v1556_v34 = vld [vmem:[#allocation14 + $0x750] sm:$0xff] }
 0x370   :  { %v3316_v39 = vpop.f32.mrf.mxu0  ;;  %4841 = vmatmul.mubr.bf16.vlgmr.msra.gmra.mxu0 %v12762_v12  ;;  %v1560_v35 = vld [vmem:[#allocation14 + $0x770] sm:$0xff] }
 0x371   :  { %v3357_v44 = vpop.f32.mrf.mxu1  ;;  %4882 = vmatmul.mubr.bf16.vlgmr.msra.gmra.mxu1 %v12764_v13  ;;  %4891 = vmatpush1.bf16.msra.mxu0 %v10813_v3  ;;  %v1460_v3 = vld [vmem:[#allocation14 + $0x450] sm:$0xff] }
 0x372   :  { %v12776_v24 = vadd.f32 %v3357_v44, %v3316_v39  ;;  %4922 = vmatprep.mubr.bf16.mxu0 %v12745_v32  ;;  %4932 = vmatpush1.bf16.msra.mxu1 %v10941_v8  ;;  %v3318_v4 = vpop.f32.mrf.mxu0  ;;  %v10901_v8 = vcombine.low %v1468_v52, %v1472_v53  ;;  %v10894_v10 = vcombine.high %v1460_v3, %v1464_v6  ;;  %v1328_v39 = vld [vmem:[#allocation14 + $0x30] sm:$0xff] }
 0x373   :  { %4963 = vmatprep.mubr.bf16.mxu1 %v12750_v37  ;;  %v3359_v58 = vpop.f32.mrf.mxu1  ;;  %4892 = vmatprep.subr.bf16.mxu0 %v10806_v9  ;;  %v10766_v9 = vcombine.high %v1332_v23, %v1336_v5  ;;  %v10893_v44 = vcombine.low %v1460_v3, %v1464_v6  ;;  %v10757_v14 = vcombine.low %v1324_v60, %v1328_v39  ;;  %v1420_v50 = vld [vmem:[#allocation14 + $0x310] sm:$0xff] }
 0x374   :  { %v12780_v63 = vadd.f32 %v3359_v58, %v3318_v4  ;;  %v3320_v18 = vpop.f32.mrf.mxu0  ;;  %4933 = vmatprep.subr.bf16.mxu1 %v10934_v40  ;;  %v1452_v40 = vld [vmem:[#allocation14 + $0x410] sm:$0xff] }
 0x375   :  { %v3361_v21 = vpop.f32.mrf.mxu1  ;;  %4893 = vmatpush1.bf16.msra.mxu0 %v10805_v45  ;;  %v10758_v45 = vcombine.high %v1324_v60, %v1328_v39  ;;  %v10886_v4 = vcombine.high %v1452_v40, %v1456_v41  ;;  %v1572_v58 = vld [vmem:[#allocation14 + $0x7d0] sm:$0xff]  ;;  %v10885_v15 = vcombine.low %v1452_v40, %v1456_v41 }
 0x376   :  { %4934 = vmatpush1.bf16.msra.mxu1 %v10933_v11  ;;  %v3321_v26 = vpop.f32.mrf.mxu0  ;;  %4894 = vmatprep.subr.bf16.mxu0 %v10798_v2  ;;  %v1444_v11 = vld [vmem:[#allocation14 + $0x3d0] sm:$0xff] }
 0x377   :  { %v3362_v27 = vpop.f32.mrf.mxu1  ;;  %4935 = vmatprep.subr.bf16.mxu1 %v10926_v17  ;;  %v1448_v2 = vld [vmem:[#allocation14 + $0x3f0] sm:$0xff] }
 0x378   :  { %v1576_v17 = vld [vmem:[#allocation14 + $0x7f0] sm:$0xff]  ;;  %v10878_v18 = vcombine.high %v1444_v11, %v1448_v2 }
 0x379   :  { %4895 = vmatpush1.bf16.msra.mxu0 %v10797_v25  ;;  %v11006_v16 = vcombine.high %v1572_v58, %v1576_v17  ;;  %v1440_v21 = vld [vmem:[#allocation14 + $0x3b0] sm:$0xff] }
 0x37a   :  { %4936 = vmatpush1.bf16.msra.mxu1 %v10925_v55  ;;  %4896 = vmatprep.subr.bf16.mxu0 %v10790_v48  ;;  %v1564_v25 = vld [vmem:[#allocation14 + $0x790] sm:$0xff]  ;;  %v10877_v55 = vcombine.low %v1444_v11, %v1448_v2  ;;  %v11005_v48 = vcombine.low %v1572_v58, %v1576_v17  ;;  %v10870_v27 = vcombine.high %v1436_v20, %v1440_v21 }
 0x37b   :  { %4937 = vmatprep.subr.bf16.mxu1 %v10918_v30  ;;  %v1568_v26 = vld [vmem:[#allocation14 + $0x7b0] sm:$0xff] }
 0x37c   :  { %v10998_v30 = vcombine.high %v1564_v25, %v1568_v26  ;;  %v1424_v54 = vld [vmem:[#allocation14 + $0x330] sm:$0xff] }
 0x37d   :  { %4897 = vmatpush1.bf16.msra.mxu0 %v10789_v38  ;;  %v10869_v38 = vcombine.low %v1436_v20, %v1440_v21  ;;  %v1548_v52 = vld [vmem:[#allocation14 + $0x710] sm:$0xff] }
 0x37e   :  { %4938 = vmatpush1.bf16.msra.mxu1 %v10917_v47  ;;  %4898 = vmatprep.subr.bf16.mxu0 %v10782_v57  ;;  %v10997_v47 = vcombine.low %v1564_v25, %v1568_v26  ;;  %v10862_v57 = vcombine.high %v1428_v31, %v1432_v33  ;;  %v1552_v53 = vld [vmem:[#allocation14 + $0x730] sm:$0xff] }
 0x37f   :  { %4939 = vmatprep.subr.bf16.mxu1 %v10910_v49  ;;  %v10990_v49 = vcombine.high %v1556_v34, %v1560_v35  ;;  %v1412_v23 = vld [vmem:[#allocation14 + $0x2d0] sm:$0xff] }
 0x380   :  { %v1416_v5 = vld [vmem:[#allocation14 + $0x2f0] sm:$0xff] }
 0x381   :  { %4899 = vmatpush1.bf16.msra.mxu0 %v10781_v61  ;;  %v10861_v61 = vcombine.low %v1428_v31, %v1432_v33  ;;  %v1540_v3 = vld [vmem:[#allocation14 + $0x6d0] sm:$0xff]  ;;  %v1381_v31 = vld [vmem:[#allocation14 + $0x1d8] sm:$0xff] }
 0x382   :  { %4940 = vmatpush1.bf16.msra.mxu1 %v10909_v62  ;;  %4900 = vmatprep.subr.bf16.mxu0 %v10774_v59  ;;  %v10989_v62 = vcombine.low %v1556_v34, %v1560_v35  ;;  %v10854_v59 = vcombine.high %v1420_v50, %v1424_v54  ;;  %v1544_v6 = vld [vmem:[#allocation14 + $0x6f0] sm:$0xff]  ;;  %v1385_v33 = vld [vmem:[#allocation14 + $0x1f8] sm:$0xff] }
 0x383   :  { %4941 = vmatprep.subr.bf16.mxu1 %v10902_v1  ;;  %v10982_v1 = vcombine.high %v1548_v52, %v1552_v53  ;;  %v1404_v60 = vld [vmem:[#allocation14 + $0x290] sm:$0xff]  ;;  %v1509_v34 = vld [vmem:[#allocation14 + $0x5d8] sm:$0xff] }
 0x384   :  { %v1408_v39 = vld [vmem:[#allocation14 + $0x2b0] sm:$0xff]  ;;  %v1513_v35 = vld [vmem:[#allocation14 + $0x5f8] sm:$0xff] }
 0x385   :  { %4901 = vmatpush1.bf16.msra.mxu0 %v10773_v7  ;;  %v10853_v7 = vcombine.low %v1420_v50, %v1424_v54  ;;  %v1532_v40 = vld [vmem:[#allocation14 + $0x690] sm:$0xff]  ;;  %v1373_v50 = vld [vmem:[#allocation14 + $0x198] sm:$0xff] }
 0x386   :  { %4942 = vmatpush1.bf16.msra.mxu1 %v10901_v8  ;;  %4902 = vmatprep.subr.bf16.mxu0 %v10766_v9  ;;  %v10981_v8 = vcombine.low %v1548_v52, %v1552_v53  ;;  %v10846_v9 = vcombine.high %v1412_v23, %v1416_v5  ;;  %v1536_v41 = vld [vmem:[#allocation14 + $0x6b0] sm:$0xff]  ;;  %v1377_v54 = vld [vmem:[#allocation14 + $0x1b8] sm:$0xff]  ;;  %v10815_v52 = vcombine.low %v1381_v31, %v1385_v33 }
 0x387   :  { %4943 = vmatprep.subr.bf16.mxu1 %v10894_v10  ;;  %v10974_v10 = vcombine.high %v1540_v3, %v1544_v6  ;;  %v1396_v11 = vld [vmem:[#allocation14 + $0x250] sm:$0xff]  ;;  %v1501_v53 = vld [vmem:[#allocation14 + $0x598] sm:$0xff] }
 0x388   :  { %v1400_v2 = vld [vmem:[#allocation14 + $0x270] sm:$0xff] }
 0x389   :  { %4903 = vmatpush1.bf16.msra.mxu0 %v10765_v43  ;;  %v10845_v43 = vcombine.low %v1412_v23, %v1416_v5  ;;  %v1524_v58 = vld [vmem:[#allocation14 + $0x650] sm:$0xff]  ;;  %v1369_v23 = vld [vmem:[#allocation14 + $0x178] sm:$0xff] }
 0x38a   :  { %4944 = vmatpush1.bf16.msra.mxu1 %v10893_v44  ;;  %4904 = vmatprep.subr.bf16.mxu0 %v10758_v45  ;;  %v10973_v44 = vcombine.low %v1540_v3, %v1544_v6  ;;  %v10838_v45 = vcombine.high %v1404_v60, %v1408_v39  ;;  %v1528_v17 = vld [vmem:[#allocation14 + $0x670] sm:$0xff]  ;;  %v1493_v6 = vld [vmem:[#allocation14 + $0x558] sm:$0xff] }
 0x38b   :  { %4945 = vmatprep.subr.bf16.mxu1 %v10886_v4  ;;  %v10966_v4 = vcombine.high %v1532_v40, %v1536_v41  ;;  %v1388_v20 = vld [vmem:[#allocation14 + $0x210] sm:$0xff] }
 0x38c   :  { %v1392_v21 = vld [vmem:[#allocation14 + $0x230] sm:$0xff] }
 0x38d   :  { %4905 = vmatpush1.bf16.msra.mxu0 %v10757_v14  ;;  %v10837_v14 = vcombine.low %v1404_v60, %v1408_v39  ;;  %v1516_v25 = vld [vmem:[#allocation14 + $0x610] sm:$0xff] }
 0x38e   :  { %4946 = vmatpush1.bf16.msra.mxu1 %v10885_v15  ;;  %4906 = vmatprep.subr.bf16.mxu0 %v10878_v18  ;;  %v10965_v15 = vcombine.low %v1532_v40, %v1536_v41  ;;  %v10830_v18 = vcombine.high %v1396_v11, %v1400_v2  ;;  %v1520_v26 = vld [vmem:[#allocation14 + $0x630] sm:$0xff] }
 0x38f   :  { %4947 = vmatprep.subr.bf16.mxu1 %v11006_v16  ;;  %v10958_v16 = vcombine.high %v1524_v58, %v1528_v17 }
 0x391   :  { %4907 = vmatpush2.bf16.msra.mxu0 %v10877_v55  ;;  %v10829_v55 = vcombine.low %v1396_v11, %v1400_v2  ;;  %v1485_v2 = vld [vmem:[#allocation14 + $0x518] sm:$0xff] }
 0x392   :  { %4948 = vmatpush2.bf16.msra.mxu1 %v11005_v48  ;;  %4908 = vmatprep.subr.bf16.mxu0 %v10870_v27  ;;  %v10957_v48 = vcombine.low %v1524_v58, %v1528_v17  ;;  %v10822_v27 = vcombine.high %v1388_v20, %v1392_v21  ;;  %v1489_v58 = vld [vmem:[#allocation14 + $0x538] sm:$0xff] }
 0x393   :  { %4949 = vmatprep.subr.bf16.mxu1 %v10998_v30  ;;  %v10950_v30 = vcombine.high %v1516_v25, %v1520_v26 }
 0x395   :  { %4909 = vmatpush2.bf16.msra.mxu0 %v10869_v38  ;;  %v10821_v38 = vcombine.low %v1388_v20, %v1392_v21  ;;  %v1349_v20 = vld [vmem:[#allocation14 + $0xd8] sm:$0xff] }
 0x396   :  { %4950 = vmatpush2.bf16.msra.mxu1 %v10997_v47  ;;  %4910 = vmatprep.subr.bf16.mxu0 %v10862_v57  ;;  %v10949_v47 = vcombine.low %v1516_v25, %v1520_v26  ;;  %v10816_v57 = vcombine.high %v1381_v31, %v1385_v33  ;;  %v1353_v21 = vld [vmem:[#allocation14 + $0xf8] sm:$0xff] }
 0x397   :  { %4951 = vmatprep.subr.bf16.mxu1 %v10990_v49  ;;  %v10944_v49 = vcombine.high %v1509_v34, %v1513_v35  ;;  %v1477_v25 = vld [vmem:[#allocation14 + $0x4d8] sm:$0xff] }
 0x398   :  { %v1481_v26 = vld [vmem:[#allocation14 + $0x4f8] sm:$0xff] }
 0x399   :  { %4911 = vmatpush2.bf16.msra.mxu0 %v10861_v61  ;;  %v1505_v61 = vld [vmem:[#allocation14 + $0x5b8] sm:$0xff] }
 0x39a   :  { %4952 = vmatpush2.bf16.msra.mxu1 %v10989_v62  ;;  %4912 = vmatprep.subr.bf16.mxu0 %v10854_v59  ;;  %v10943_v62 = vcombine.low %v1509_v34, %v1513_v35  ;;  %v10808_v59 = vcombine.high %v1373_v50, %v1377_v54  ;;  %v10936_v3 = vcombine.high %v1501_v53, %v1505_v61  ;;  %v1341_v31 = vld [vmem:[#allocation14 + $0x98] sm:$0xff] }
 0x39b   :  { %4953 = vmatprep.subr.bf16.mxu1 %v10982_v1  ;;  %v1365_v1 = vld [vmem:[#allocation14 + $0x158] sm:$0xff]  ;;  %v10935_v39 = vcombine.low %v1501_v53, %v1505_v61 }
 0x39c   :  { %v10800_v40 = vcombine.high %v1365_v1, %v1369_v23  ;;  %v1345_v33 = vld [vmem:[#allocation14 + $0xb8] sm:$0xff] }
 0x39d   :  { %4913 = vmatpush2.bf16.msra.mxu0 %v10853_v7  ;;  %v1497_v7 = vld [vmem:[#allocation14 + $0x578] sm:$0xff]  ;;  %v10775_v61 = vcombine.low %v1341_v31, %v1345_v33 }
 0x39e   :  { %4954 = vmatpush2.bf16.msra.mxu1 %v10981_v8  ;;  %4914 = vmatprep.subr.bf16.mxu0 %v10846_v9  ;;  %v10807_v9 = vcombine.low %v1373_v50, %v1377_v54  ;;  %v1469_v34 = vld [vmem:[#allocation14 + $0x498] sm:$0xff] }
 0x39f   :  { %4955 = vmatprep.subr.bf16.mxu1 %v10974_v10  ;;  %v1473_v35 = vld [vmem:[#allocation14 + $0x4b8] sm:$0xff] }
 0x3a0   :  { %v1333_v50 = vld [vmem:[#allocation14 + $0x58] sm:$0xff] }
 0x3a1   :  { %4915 = vmatpush2.bf16.msra.mxu0 %v10845_v43  ;;  %v10928_v43 = vcombine.high %v1493_v6, %v1497_v7  ;;  %v1337_v54 = vld [vmem:[#allocation14 + $0x78] sm:$0xff] }
 0x3a2   :  { %4956 = vmatpush2.bf16.msra.mxu1 %v10973_v44  ;;  %4916 = vmatprep.subr.bf16.mxu0 %v10838_v45  ;;  %v1357_v44 = vld [vmem:[#allocation14 + $0x118] sm:$0xff] }
 0x3a3   :  { %4957 = vmatprep.subr.bf16.mxu1 %v10966_v4  ;;  %v1361_v45 = vld [vmem:[#allocation14 + $0x138] sm:$0xff] }
 0x3a4   :  { %v1465_v53 = vld [vmem:[#allocation14 + $0x478] sm:$0xff] }
 0x3a5   :  { %4917 = vmatpush2.bf16.msra.mxu0 %v10837_v14 }
 0x3a6   :  { %4958 = vmatpush2.bf16.msra.mxu1 %v10965_v15  ;;  %4918 = vmatprep.subr.bf16.mxu0 %v10830_v18  ;;  %v10927_v15 = vcombine.low %v1493_v6, %v1497_v7  ;;  %v10792_v18 = vcombine.high %v1357_v44, %v1361_v45  ;;  %v1457_v6 = vld [vmem:[#allocation14 + $0x438] sm:$0xff]  ;;  %v10767_v7 = vcombine.low %v1333_v50, %v1337_v54 }
 0x3a7   :  { %4959 = vmatprep.subr.bf16.mxu1 %v10958_v16  ;;  %v10920_v16 = vcombine.high %v1485_v2, %v1489_v58 }
 0x3a9   :  { %4919 = vmatpush2.bf16.msra.mxu0 %v10829_v55  ;;  %v10791_v55 = vcombine.low %v1357_v44, %v1361_v45 }
 0x3aa   :  { %4960 = vmatpush2.bf16.msra.mxu1 %v10957_v48  ;;  %4920 = vmatprep.subr.bf16.mxu0 %v10822_v27  ;;  %v10919_v48 = vcombine.low %v1485_v2, %v1489_v58  ;;  %v10784_v27 = vcombine.high %v1349_v20, %v1353_v21  ;;  %v1437_v58 = vld [vmem:[#allocation14 + $0x398] sm:$0xff] }
 0x3ab   :  { %4961 = vmatprep.subr.bf16.mxu1 %v10950_v30  ;;  %v10912_v30 = vcombine.high %v1477_v25, %v1481_v26 }
 0x3ad   :  { %4921 = vmatpush2.bf16.msra.mxu0 %v10821_v38  ;;  %v10783_v38 = vcombine.low %v1349_v20, %v1353_v21  ;;  %v1429_v20 = vld [vmem:[#allocation14 + $0x358] sm:$0xff] }
 0x3ae   :  { %4962 = vmatpush2.bf16.msra.mxu1 %v10949_v47  ;;  %4972 = vmatprep.subr.bf16.mxu0 %v10816_v57  ;;  %v10911_v47 = vcombine.low %v1477_v25, %v1481_v26  ;;  %v10776_v57 = vcombine.high %v1341_v31, %v1345_v33  ;;  %v1433_v21 = vld [vmem:[#allocation14 + $0x378] sm:$0xff] }
 0x3af   :  { %5013 = vmatprep.subr.bf16.mxu1 %v10944_v49  ;;  %v10904_v49 = vcombine.high %v1469_v34, %v1473_v35  ;;  %v1557_v25 = vld [vmem:[#allocation14 + $0x758] sm:$0xff] }
 0x3b0   :  { %v3398_v5 = vpop.f32.mrf.mxu0  ;;  %4923 = vmatmul.mubr.bf16.vlgmr.msra.gmra.mxu0 %v12762_v12  ;;  %v1561_v26 = vld [vmem:[#allocation14 + $0x778] sm:$0xff] }
 0x3b1   :  { %v3439_v8 = vpop.f32.mrf.mxu1  ;;  %4964 = vmatmul.mubr.bf16.vlgmr.msra.gmra.mxu1 %v12764_v13  ;;  %4973 = vmatpush1.bf16.msra.mxu0 %v10815_v52  ;;  %v1461_v52 = vld [vmem:[#allocation14 + $0x458] sm:$0xff] }
 0x3b2   :  { %v12784_v10 = vadd.f32 %v3439_v8, %v3398_v5  ;;  %5004 = vmatprep.mubr.bf16.mxu0 %v12745_v32  ;;  %5014 = vmatpush1.bf16.msra.mxu1 %v10943_v62  ;;  %v3400_v60 = vpop.f32.mrf.mxu0  ;;  %v10799_v32 = vcombine.low %v1365_v1, %v1369_v23  ;;  %v10903_v62 = vcombine.low %v1469_v34, %v1473_v35  ;;  %v1325_v23 = vld [vmem:[#allocation14 + $0x18] sm:$0xff] }
 0x3b3   :  { %5045 = vmatprep.mubr.bf16.mxu1 %v12750_v37  ;;  %v3441_v41 = vpop.f32.mrf.mxu1  ;;  %4974 = vmatprep.subr.bf16.mxu0 %v10808_v59  ;;  %v10768_v59 = vcombine.high %v1333_v50, %v1337_v54  ;;  %v10896_v1 = vcombine.high %v1461_v52, %v1465_v53  ;;  %v1329_v5 = vld [vmem:[#allocation14 + $0x38] sm:$0xff]  ;;  %v10895_v8 = vcombine.low %v1461_v52, %v1465_v53 }
 0x3b4   :  { %v12788_v4 = vadd.f32 %v3441_v41, %v3400_v60  ;;  %v3402_v11 = vpop.f32.mrf.mxu0  ;;  %5015 = vmatprep.subr.bf16.mxu1 %v10936_v3  ;;  %v1453_v3 = vld [vmem:[#allocation14 + $0x418] sm:$0xff]  ;;  %v10759_v44 = vcombine.low %v1325_v23, %v1329_v5 }
 0x3b5   :  { %v3443_v17 = vpop.f32.mrf.mxu1  ;;  %4975 = vmatpush1.bf16.msra.mxu0 %v10807_v9  ;;  %v10760_v9 = vcombine.high %v1325_v23, %v1329_v5  ;;  %v10888_v60 = vcombine.high %v1453_v3, %v1457_v6  ;;  %v1573_v41 = vld [vmem:[#allocation14 + $0x7d8] sm:$0xff]  ;;  %v10887_v45 = vcombine.low %v1453_v3, %v1457_v6 }
 0x3b6   :  { %5016 = vmatpush1.bf16.msra.mxu1 %v10935_v39  ;;  %v3403_v14 = vpop.f32.mrf.mxu0  ;;  %4976 = vmatprep.subr.bf16.mxu0 %v10800_v40  ;;  %v1445_v39 = vld [vmem:[#allocation14 + $0x3d8] sm:$0xff] }
 0x3b7   :  { %v3444_v37 = vpop.f32.mrf.mxu1  ;;  %5017 = vmatprep.subr.bf16.mxu1 %v10928_v43  ;;  %v1449_v40 = vld [vmem:[#allocation14 + $0x3f8] sm:$0xff] }
 0x3b8   :  { %v1577_v43 = vld [vmem:[#allocation14 + $0x7f8] sm:$0xff]  ;;  %v10880_v11 = vcombine.high %v1445_v39, %v1449_v40 }
 0x3b9   :  { %4977 = vmatpush1.bf16.msra.mxu0 %v10799_v32  ;;  %v11008_v2 = vcombine.high %v1573_v41, %v1577_v43  ;;  %v1441_v17 = vld [vmem:[#allocation14 + $0x3b8] sm:$0xff] }
 0x3ba   :  { %5018 = vmatpush1.bf16.msra.mxu1 %v10927_v15  ;;  %4978 = vmatprep.subr.bf16.mxu0 %v10792_v18  ;;  %v1565_v32 = vld [vmem:[#allocation14 + $0x798] sm:$0xff]  ;;  %v10879_v15 = vcombine.low %v1445_v39, %v1449_v40  ;;  %v11007_v18 = vcombine.low %v1573_v41, %v1577_v43  ;;  %v10872_v37 = vcombine.high %v1437_v58, %v1441_v17 }
 0x3bb   :  { %5019 = vmatprep.subr.bf16.mxu1 %v10920_v16  ;;  %v1569_v14 = vld [vmem:[#allocation14 + $0x7b8] sm:$0xff] }
 0x3bc   :  { %v11000_v16 = vcombine.high %v1565_v32, %v1569_v14  ;;  %v1421_v31 = vld [vmem:[#allocation14 + $0x318] sm:$0xff] }
 0x3bd   :  { %4979 = vmatpush1.bf16.msra.mxu0 %v10791_v55  ;;  %v10871_v55 = vcombine.low %v1437_v58, %v1441_v17  ;;  %v1425_v33 = vld [vmem:[#allocation14 + $0x338] sm:$0xff] }
 0x3be   :  { %5020 = vmatpush1.bf16.msra.mxu1 %v10919_v48  ;;  %4980 = vmatprep.subr.bf16.mxu0 %v10784_v27  ;;  %v10999_v48 = vcombine.low %v1565_v32, %v1569_v14  ;;  %v10864_v27 = vcombine.high %v1429_v20, %v1433_v21  ;;  %v1549_v34 = vld [vmem:[#allocation14 + $0x718] sm:$0xff] }
 0x3bf   :  { %5021 = vmatprep.subr.bf16.mxu1 %v10912_v30  ;;  %v10992_v30 = vcombine.high %v1557_v25, %v1561_v26  ;;  %v1553_v35 = vld [vmem:[#allocation14 + $0x738] sm:$0xff] }
 0x3c0   :  { %v1413_v50 = vld [vmem:[#allocation14 + $0x2d8] sm:$0xff] }
 0x3c1   :  { %4981 = vmatpush1.bf16.msra.mxu0 %v10783_v38  ;;  %v10863_v38 = vcombine.low %v1429_v20, %v1433_v21  ;;  %v1417_v54 = vld [vmem:[#allocation14 + $0x2f8] sm:$0xff] }
 0x3c2   :  { %5022 = vmatpush1.bf16.msra.mxu1 %v10911_v47  ;;  %4982 = vmatprep.subr.bf16.mxu0 %v10776_v57  ;;  %v10991_v47 = vcombine.low %v1557_v25, %v1561_v26  ;;  %v10856_v57 = vcombine.high %v1421_v31, %v1425_v33  ;;  %v1541_v52 = vld [vmem:[#allocation14 + $0x6d8] sm:$0xff] }
 0x3c3   :  { %5023 = vmatprep.subr.bf16.mxu1 %v10904_v49  ;;  %v10984_v49 = vcombine.high %v1549_v34, %v1553_v35  ;;  %v1545_v53 = vld [vmem:[#allocation14 + $0x6f8] sm:$0xff] }
 0x3c4   :  { %v1405_v23 = vld [vmem:[#allocation14 + $0x298] sm:$0xff] }
 0x3c5   :  { %4983 = vmatpush1.bf16.msra.mxu0 %v10775_v61  ;;  %v10855_v61 = vcombine.low %v1421_v31, %v1425_v33  ;;  %v1409_v5 = vld [vmem:[#allocation14 + $0x2b8] sm:$0xff] }
 0x3c6   :  { %5024 = vmatpush1.bf16.msra.mxu1 %v10903_v62  ;;  %4984 = vmatprep.subr.bf16.mxu0 %v10768_v59  ;;  %v10983_v62 = vcombine.low %v1549_v34, %v1553_v35  ;;  %v10848_v59 = vcombine.high %v1413_v50, %v1417_v54  ;;  %v1533_v3 = vld [vmem:[#allocation14 + $0x698] sm:$0xff] }
 0x3c7   :  { %5025 = vmatprep.subr.bf16.mxu1 %v10896_v1  ;;  %v10976_v1 = vcombine.high %v1541_v52, %v1545_v53  ;;  %v1537_v6 = vld [vmem:[#allocation14 + $0x6b8] sm:$0xff] }
 0x3c8   :  { %v1397_v39 = vld [vmem:[#allocation14 + $0x258] sm:$0xff] }
 0x3c9   :  { %4985 = vmatpush1.bf16.msra.mxu0 %v10767_v7  ;;  %v10847_v7 = vcombine.low %v1413_v50, %v1417_v54  ;;  %v1401_v40 = vld [vmem:[#allocation14 + $0x278] sm:$0xff] }
 0x3ca   :  { %5026 = vmatpush1.bf16.msra.mxu1 %v10895_v8  ;;  %4986 = vmatprep.subr.bf16.mxu0 %v10760_v9  ;;  %v10975_v8 = vcombine.low %v1541_v52, %v1545_v53  ;;  %v10840_v9 = vcombine.high %v1405_v23, %v1409_v5  ;;  %v1525_v41 = vld [vmem:[#allocation14 + $0x658] sm:$0xff] }
 0x3cb   :  { %5027 = vmatprep.subr.bf16.mxu1 %v10888_v60  ;;  %v10968_v60 = vcombine.high %v1533_v3, %v1537_v6  ;;  %v1529_v43 = vld [vmem:[#allocation14 + $0x678] sm:$0xff] }
 0x3cc   :  { %v1389_v58 = vld [vmem:[#allocation14 + $0x218] sm:$0xff] }
 0x3cd   :  { %4987 = vmatpush1.bf16.msra.mxu0 %v10759_v44  ;;  %v10839_v44 = vcombine.low %v1405_v23, %v1409_v5  ;;  %v1393_v17 = vld [vmem:[#allocation14 + $0x238] sm:$0xff] }
 0x3ce   :  { %5028 = vmatpush1.bf16.msra.mxu1 %v10887_v45  ;;  %4988 = vmatprep.subr.bf16.mxu0 %v10880_v11  ;;  %v10967_v45 = vcombine.low %v1533_v3, %v1537_v6  ;;  %v10832_v11 = vcombine.high %v1397_v39, %v1401_v40  ;;  %v1517_v32 = vld [vmem:[#allocation14 + $0x618] sm:$0xff]  ;;  %v10823_v20 = vcombine.low %v1389_v58, %v1393_v17 }
 0x3cf   :  { %5029 = vmatprep.subr.bf16.mxu1 %v11008_v2  ;;  %v10960_v2 = vcombine.high %v1525_v41, %v1529_v43  ;;  %v1521_v14 = vld [vmem:[#allocation14 + $0x638] sm:$0xff] }
 0x3d0   :  { %v10951_v21 = vcombine.low %v1517_v32, %v1521_v14 }
 0x3d1   :  { %4989 = vmatpush2.bf16.msra.mxu0 %v10879_v15  ;;  %v10831_v15 = vcombine.low %v1397_v39, %v1401_v40 }
 0x3d2   :  { %5030 = vmatpush2.bf16.msra.mxu1 %v11007_v18  ;;  %4990 = vmatprep.subr.bf16.mxu0 %v10872_v37  ;;  %v10959_v18 = vcombine.low %v1525_v41, %v1529_v43  ;;  %v10824_v37 = vcombine.high %v1389_v58, %v1393_v17 }
 0x3d3   :  { %5031 = vmatprep.subr.bf16.mxu1 %v11000_v16  ;;  %v10952_v16 = vcombine.high %v1517_v32, %v1521_v14 }
 0x3d5   :  { %4991 = vmatpush2.bf16.msra.mxu0 %v10871_v55 }
 0x3d6   :  { %5032 = vmatpush2.bf16.msra.mxu1 %v10999_v48  ;;  %4992 = vmatprep.subr.bf16.mxu0 %v10864_v27 }
 0x3d7   :  { %5033 = vmatprep.subr.bf16.mxu1 %v10992_v30 }
 0x3d9   :  { %4993 = vmatpush2.bf16.msra.mxu0 %v10863_v38 }
 0x3da   :  { %5034 = vmatpush2.bf16.msra.mxu1 %v10991_v47  ;;  %4994 = vmatprep.subr.bf16.mxu0 %v10856_v57 }
 0x3db   :  { %5035 = vmatprep.subr.bf16.mxu1 %v10984_v49 }
 0x3dd   :  { %4995 = vmatpush2.bf16.msra.mxu0 %v10855_v61 }
 0x3de   :  { %5036 = vmatpush2.bf16.msra.mxu1 %v10983_v62  ;;  %4996 = vmatprep.subr.bf16.mxu0 %v10848_v59 }
 0x3df   :  { %5037 = vmatprep.subr.bf16.mxu1 %v10976_v1 }
 0x3e1   :  { %4997 = vmatpush2.bf16.msra.mxu0 %v10847_v7 }
 0x3e2   :  { %5038 = vmatpush2.bf16.msra.mxu1 %v10975_v8  ;;  %4998 = vmatprep.subr.bf16.mxu0 %v10840_v9 }
 0x3e3   :  { %5039 = vmatprep.subr.bf16.mxu1 %v10968_v60 }
 0x3e5   :  { %4999 = vmatpush2.bf16.msra.mxu0 %v10839_v44 }
 0x3e6   :  { %5040 = vmatpush2.bf16.msra.mxu1 %v10967_v45  ;;  %5000 = vmatprep.subr.bf16.mxu0 %v10832_v11 }
 0x3e7   :  { %5041 = vmatprep.subr.bf16.mxu1 %v10960_v2 }
 0x3e9   :  { %5001 = vmatpush2.bf16.msra.mxu0 %v10831_v15 }
 0x3ea   :  { %5042 = vmatpush2.bf16.msra.mxu1 %v10959_v18  ;;  %5002 = vmatprep.subr.bf16.mxu0 %v10824_v37 }
 0x3eb   :  { %5043 = vmatprep.subr.bf16.mxu1 %v10952_v16 }
 0x3ed   :  { %5003 = vmatpush2.bf16.msra.mxu0 %v10823_v20 }
 0x3ee   :  { %5044 = vmatpush2.bf16.msra.mxu1 %v10951_v21 }
 0x3f0   :  { %v4760_v25 = vpop.f32.mrf.mxu0  ;;  %5005 = vmatmul.mubr.bf16.vlgmr.msra.gmra.mxu0 %v12762_v12 }
 0x3f1   :  { %v4761_v26 = vadd.f32 %v4760_v25, %v12748_v36  ;;  %v4801_v55 = vpop.f32.mrf.mxu1  ;;  %5046 = vmatmul.mubr.bf16.vlgmr.msra.gmra.mxu1 %v12764_v13 }
 0x3f2   :  { %v4762_v48 = vpop.f32.mrf.mxu0 }
 0x3f3   :  { %v4802_v27 = vadd.f32 %v4801_v55, %v4761_v26  ;;  %v4763_v30 = vadd.f32 %v4762_v48, %v12754_v51  ;;  %v4803_v31 = vpop.f32.mrf.mxu1 }
 0x3f4   :  { %v4764_v33 = vpop.f32.mrf.mxu0 }
 0x3f5   :  { %v5056_v34 = vrot.slane %v4802_v27, 4  ;;  %v4804_v35 = vadd.f32 %v4803_v31, %v4763_v30  ;;  %v4805_v38 = vpop.f32.mrf.mxu1 }
 0x3f6   :  { %v4765_v47 = vpop.f32.mrf.mxu0 }
 0x3f7   :  { %v5057_v57 = vadd.f32 %v5056_v34, %v4802_v27  ;;  %v5062_v49 = vrot.slane %v4804_v35, 4  ;;  %v4806_v50 = vpop.f32.mrf.mxu1 }
 0x3f9   :  { %v5058_v54 = vrot.slane %v5057_v57, 2  ;;  %v5063_v12 = vadd.f32 %v5062_v49, %v4804_v35 }
 0x3fb   :  { %v5059_v52 = vadd.f32 %v5058_v54, %v5057_v57  ;;  %v5064_v36 = vrot.slane %v5063_v12, 2 }
 0x3fd   :  { %v5060_v53 = vrot.slane %v5059_v52, 1  ;;  %v5065_v61 = vadd.f32 %v5064_v36, %v5063_v12 }
 0x3ff   :  { %v5061_v13 = vadd.f32 %v5060_v53, %v5059_v52  ;;  %v5066_v62 = vrot.slane %v5065_v61, 1 }
 0x401   :  { %v5104_v59 = vmul.f32 0.125, %v5061_v13  ;;  %v5067_v1 = vadd.f32 %v5066_v62, %v5065_v61  ;;  %v5433_v13 = vld [vmem:[#allocation20 + $0x1e0] sm:$0xff] }
 0x402   :  { %v5557_v62 = vld [vmem:[#allocation20 + $0x5c0] sm:$0xff] }
 0x403   :  { %v12794_v51 = vsub.f32 %v4802_v27, %v5104_v59  ;;  %v5105_v23 = vmul.f32 0.125, %v5067_v1  ;;  %v5561_v1 = vld [vmem:[#allocation20 + $0x5e0] sm:$0xff] }
 0x405   :  { %v5120_v5 = vmul.f32 %v12794_v51, %v12794_v51  ;;  %v12798_v3 = vsub.f32 %v4804_v35, %v5105_v23 }
 0x407   :  { %v5128_v6 = vrot.slane %v5120_v5, 4  ;;  %v5121_v7 = vmul.f32 %v12798_v3, %v12798_v3 }
 0x409   :  { %v5129_v8 = vadd.f32 %v5128_v6, %v5120_v5  ;;  %v5134_v9 = vrot.slane %v5121_v7, 4 }
 0x40b   :  { %v5130_v60 = vrot.slane %v5129_v8, 2  ;;  %v5135_v39 = vadd.f32 %v5134_v9, %v5121_v7  ;;  %v11193_v7 = vcombine.low %v5557_v62, %v5561_v1 }
 0x40d   :  { %v5131_v40 = vadd.f32 %v5130_v60, %v5129_v8  ;;  %v5136_v41 = vrot.slane %v5135_v39, 2  ;;  %v11194_v8 = vcombine.high %v5557_v62, %v5561_v1 }
 0x40f   :  { %v5132_v43 = vrot.slane %v5131_v40, 1  ;;  %v5137_v44 = vadd.f32 %v5136_v41, %v5135_v39  ;;  %v5421_v39 = vld [vmem:[#allocation20 + $0x180] sm:$0xff]  ;;  %8486 = vmatprep.subr.bf16.mxu1 %v11194_v8 }
 0x410   :  { %v5549_v41 = vld [vmem:[#allocation20 + $0x580] sm:$0xff]  ;;  %8487 = vmatpush1.bf16.msra.mxu1 %v11193_v7 }
 0x411   :  { %v5133_v45 = vadd.f32 %v5132_v43, %v5131_v40  ;;  %v5138_v11 = vrot.slane %v5137_v44, 1  ;;  %v5425_v40 = vld [vmem:[#allocation20 + $0x1a0] sm:$0xff] }
 0x412   :  { %v11058_v43 = vcombine.high %v5421_v39, %v5425_v40 }
 0x413   :  { %v5176_v2 = vmul.f32 0.125, %v5133_v45  ;;  %v5139_v58 = vadd.f32 %v5138_v11, %v5137_v44  ;;  %v5553_v44 = vld [vmem:[#allocation20 + $0x5a0] sm:$0xff] }
 0x415   :  { %v5184_v17 = vadd.f32 1e-05, %v5176_v2  ;;  %v5177_v32 = vmul.f32 0.125, %v5139_v58  ;;  %v11057_v2 = vcombine.low %v5421_v39, %v5425_v40  ;;  %v11185_v58 = vcombine.low %v5549_v41, %v5553_v44  ;;  %v5389_v40 = vld [vmem:[#allocation20 + $0x80] sm:$0xff] }
 0x417   :  { %v5185_v14 = vadd.f32 1e-05, %v5177_v32  ;;  %12028 = vrsqrt.f32 %v5184_v17  ;;  %v11186_v17 = vcombine.high %v5549_v41, %v5553_v44  ;;  %v5393_v41 = vld [vmem:[#allocation20 + $0xa0] sm:$0xff] }
 0x418   :  { %v11026_v44 = vcombine.high %v5389_v40, %v5393_v41 }
 0x419   :  { %12030 = vrsqrt.f32 %v5185_v14  ;;  %8488 = vmatprep.subr.bf16.mxu1 %v11186_v17 }
 0x41a   :  { %8489 = vmatpush1.bf16.msra.mxu1 %v11185_v58 }
 0x424   :  { %v12802_v15 = vpop.eup %12028 }
 0x426   :  { %v12804_v18 = vpop.eup %12030 }
 0x427   :  { %v5208_v37 = vcombine.low %v12802_v15, %v12804_v18  ;;  %v5469_v15 = vld [vmem:[#allocation20 + $0x300] sm:$0xff] }
 0x428   :  { %v5473_v18 = vld [vmem:[#allocation20 + $0x320] sm:$0xff] }
 0x430   :  { %v4842_v16 = vpop.f32.mrf.mxu0 }
 0x431   :  { %v4843_v20 = vadd.f32 %v4842_v16, %v12767_v22  ;;  %v4883_v21 = vpop.f32.mrf.mxu1  ;;  %v5413_v16 = vld [vmem:[#allocation20 + $0x140] sm:$0xff] }
 0x432   :  { %v4844_v25 = vpop.f32.mrf.mxu0 }
 0x433   :  { %v4884_v26 = vadd.f32 %v4883_v21, %v4843_v20  ;;  %v4845_v55 = vadd.f32 %v4844_v25, %v12772_v29  ;;  %v4885_v48 = vpop.f32.mrf.mxu1  ;;  %v5429_v29 = vld [vmem:[#allocation20 + $0x1c0] sm:$0xff] }
 0x434   :  { %v4846_v27 = vpop.f32.mrf.mxu0  ;;  %v11066_v59 = vcombine.high %v5429_v29, %v5433_v13  ;;  %v11065_v6 = vcombine.low %v5429_v29, %v5433_v13  ;;  %v5417_v20 = vld [vmem:[#allocation20 + $0x160] sm:$0xff] }
 0x435   :  { %v5068_v30 = vrot.slane %v4884_v26, 4  ;;  %v4886_v31 = vadd.f32 %v4885_v48, %v4845_v55  ;;  %v4887_v33 = vpop.f32.mrf.mxu1  ;;  %v5541_v21 = vld [vmem:[#allocation20 + $0x540] sm:$0xff]  ;;  %v11050_v25 = vcombine.high %v5413_v16, %v5417_v20  ;;  %v11049_v27 = vcombine.low %v5413_v16, %v5417_v20 }
 0x436   :  { %v4847_v34 = vpop.f32.mrf.mxu0  ;;  %8445 = vmatprep.subr.bf16.mxu0 %v11066_v59  ;;  %v5401_v29 = vld [vmem:[#allocation20 + $0xe0] sm:$0xff] }
 0x437   :  { %v5069_v35 = vadd.f32 %v5068_v30, %v4884_v26  ;;  %v5074_v38 = vrot.slane %v4886_v31, 4  ;;  %v4888_v47 = vpop.f32.mrf.mxu1  ;;  %8446 = vmatpush1.bf16.msra.mxu0 %v11065_v6  ;;  %v5525_v13 = vld [vmem:[#allocation20 + $0x4c0] sm:$0xff] }
 0x438   :  { %8447 = vmatprep.subr.bf16.mxu0 %v11058_v43  ;;  %v5533_v47 = vld [vmem:[#allocation20 + $0x500] sm:$0xff] }
 0x439   :  { %v5070_v57 = vrot.slane %v5069_v35, 2  ;;  %v5075_v49 = vadd.f32 %v5074_v38, %v4886_v31  ;;  %v5409_v38 = vld [vmem:[#allocation20 + $0x120] sm:$0xff] }
 0x43a   :  { %v5529_v59 = vld [vmem:[#allocation20 + $0x4e0] sm:$0xff] }
 0x43b   :  { %v5071_v50 = vadd.f32 %v5070_v57, %v5069_v35  ;;  %v5076_v54 = vrot.slane %v5075_v49, 2  ;;  %8448 = vmatpush1.bf16.msra.mxu0 %v11057_v2  ;;  %v5405_v35 = vld [vmem:[#allocation20 + $0x100] sm:$0xff]  ;;  %v11161_v7 = vcombine.low %v5525_v13, %v5529_v59  ;;  %v11162_v8 = vcombine.high %v5525_v13, %v5529_v59 }
 0x43c   :  { %8449 = vmatprep.subr.bf16.mxu0 %v11050_v25  ;;  %v11042_v57 = vcombine.high %v5405_v35, %v5409_v38  ;;  %v5517_v43 = vld [vmem:[#allocation20 + $0x480] sm:$0xff]  ;;  %v11025_v2 = vcombine.low %v5389_v40, %v5393_v41 }
 0x43d   :  { %v5072_v12 = vrot.slane %v5071_v50, 1  ;;  %v5077_v22 = vadd.f32 %v5076_v54, %v5075_v49  ;;  %v5537_v49 = vld [vmem:[#allocation20 + $0x520] sm:$0xff] }
 0x43e   :  { %v5509_v16 = vld [vmem:[#allocation20 + $0x440] sm:$0xff] }
 0x43f   :  { %v5073_v52 = vadd.f32 %v5072_v12, %v5071_v50  ;;  %v5078_v36 = vrot.slane %v5077_v22, 1  ;;  %8450 = vmatpush1.bf16.msra.mxu0 %v11049_v27  ;;  %v11041_v12 = vcombine.low %v5405_v35, %v5409_v38  ;;  %v5377_v27 = vld [vmem:[#allocation20 + $0x20] sm:$0xff] }
 0x440   :  { %8451 = vmatprep.subr.bf16.mxu0 %v11042_v57  ;;  %v5497_v57 = vld [vmem:[#allocation20 + $0x3e0] sm:$0xff] }
 0x441   :  { %v5106_v53 = vmul.f32 0.125, %v5073_v52  ;;  %v5079_v61 = vadd.f32 %v5078_v36, %v5077_v22  ;;  %v11169_v22 = vcombine.low %v5533_v47, %v5537_v49  ;;  %v11170_v52 = vcombine.high %v5533_v47, %v5537_v49  ;;  %v5493_v47 = vld [vmem:[#allocation20 + $0x3c0] sm:$0xff] }
 0x442   :  { %v5621_v49 = vld [vmem:[#allocation20 + $0x7c0] sm:$0xff] }
 0x443   :  { %v12810_v23 = vsub.f32 %v4884_v26, %v5106_v53  ;;  %v5107_v5 = vmul.f32 0.125, %v5079_v61  ;;  %v5545_v26 = vld [vmem:[#allocation20 + $0x560] sm:$0xff]  ;;  %8452 = vmatpush1.bf16.msra.mxu0 %v11041_v12  ;;  %v11129_v12 = vcombine.low %v5493_v47, %v5497_v57 }
 0x444   :  { %v11177_v30 = vcombine.low %v5541_v21, %v5545_v26  ;;  %v5397_v61 = vld [vmem:[#allocation20 + $0xc0] sm:$0xff] }
 0x445   :  { %v5122_v9 = vmul.f32 %v12810_v23, %v12810_v23  ;;  %v12814_v60 = vsub.f32 %v4886_v31, %v5107_v5  ;;  %v11178_v31 = vcombine.high %v5541_v21, %v5545_v26  ;;  %v11034_v62 = vcombine.high %v5397_v61, %v5401_v29  ;;  %v5513_v21 = vld [vmem:[#allocation20 + $0x460] sm:$0xff] }
 0x446   :  { %v11033_v6 = vcombine.low %v5397_v61, %v5401_v29  ;;  %v11145_v26 = vcombine.low %v5509_v16, %v5513_v21  ;;  %v5489_v61 = vld [vmem:[#allocation20 + $0x3a0] sm:$0xff] }
 0x447   :  { %v5140_v45 = vrot.slane %v5122_v9, 4  ;;  %v5123_v11 = vmul.f32 %v12814_v60, %v12814_v60  ;;  %8490 = vmatprep.subr.bf16.mxu1 %v11178_v31  ;;  %8453 = vmatprep.subr.bf16.mxu0 %v11034_v62  ;;  %v5613_v29 = vld [vmem:[#allocation20 + $0x780] sm:$0xff] }
 0x448   :  { %8491 = vmatpush1.bf16.msra.mxu1 %v11177_v30  ;;  %8454 = vmatpush1.bf16.msra.mxu0 %v11033_v6  ;;  %v5501_v30 = vld [vmem:[#allocation20 + $0x400] sm:$0xff] }
 0x449   :  { %v5141_v32 = vadd.f32 %v5140_v45, %v5122_v9  ;;  %v5146_v14 = vrot.slane %v5123_v11, 4  ;;  %8492 = vmatprep.subr.bf16.mxu1 %v11170_v52  ;;  %v5521_v45 = vld [vmem:[#allocation20 + $0x4a0] sm:$0xff]  ;;  %8455 = vmatprep.subr.bf16.mxu0 %v11026_v44 }
 0x44a   :  { %v11153_v58 = vcombine.low %v5517_v43, %v5521_v45  ;;  %v11154_v17 = vcombine.high %v5517_v43, %v5521_v45  ;;  %v5617_v59 = vld [vmem:[#allocation20 + $0x7a0] sm:$0xff] }
 0x44b   :  { %v5142_v55 = vrot.slane %v5141_v32, 2  ;;  %v5147_v48 = vadd.f32 %v5146_v14, %v5123_v11  ;;  %v5385_v14 = vld [vmem:[#allocation20 + $0x60] sm:$0xff]  ;;  %v11249_v6 = vcombine.low %v5613_v29, %v5617_v59 }
 0x44c   :  { %8493 = vmatpush1.bf16.msra.mxu1 %v11169_v22  ;;  %8456 = vmatpush1.bf16.msra.mxu0 %v11025_v2  ;;  %v5481_v40 = vld [vmem:[#allocation20 + $0x360] sm:$0xff] }
 0x44d   :  { %v5143_v33 = vadd.f32 %v5142_v55, %v5141_v32  ;;  %v5148_v34 = vrot.slane %v5147_v48, 2  ;;  %8494 = vmatprep.subr.bf16.mxu1 %v11162_v8  ;;  %v5381_v32 = vld [vmem:[#allocation20 + $0x40] sm:$0xff]  ;;  %v11146_v55 = vcombine.high %v5509_v16, %v5513_v21  ;;  %v12822_v8 = vrot.slane %v5208_v37, %v12648_v56 }
 0x44e   :  { %v11018_v20 = vcombine.high %v5381_v32, %v5385_v14  ;;  %v11017_v25 = vcombine.low %v5381_v32, %v5385_v14  ;;  %v5605_v41 = vld [vmem:[#allocation20 + $0x740] sm:$0xff]  ;;  %v11105_v14 = vcombine.low %v5469_v15, %v5473_v18 }
 0x44f   :  { %v5144_v50 = vrot.slane %v5143_v33, 1  ;;  %v5149_v54 = vadd.f32 %v5148_v34, %v5147_v48  ;;  %v5373_v48 = vld [vmem:[#allocation20] sm:$0xff] }
 0x450   :  { %8495 = vmatpush1.bf16.msra.mxu1 %v11161_v7  ;;  %8457 = vmatprep.subr.bf16.mxu0 %v11018_v20  ;;  %v11010_v31 = vcombine.high %v5373_v48, %v5377_v27  ;;  %v11009_v34 = vcombine.low %v5373_v48, %v5377_v27  ;;  %v11250_v7 = vcombine.high %v5613_v29, %v5617_v59  ;;  %v5609_v44 = vld [vmem:[#allocation20 + $0x760] sm:$0xff] }
 0x451   :  { %v5145_v36 = vadd.f32 %v5144_v50, %v5143_v33  ;;  %v5150_v53 = vrot.slane %v5149_v54, 1  ;;  %8496 = vmatprep.subr.bf16.mxu1 %v11154_v17  ;;  %8458 = vmatpush1.bf16.msra.mxu0 %v11017_v25  ;;  %v5505_v33 = vld [vmem:[#allocation20 + $0x420] sm:$0xff]  ;;  %v11130_v50 = vcombine.high %v5493_v47, %v5497_v57  ;;  %v11241_v2 = vcombine.low %v5605_v41, %v5609_v44 }
 0x452   :  { %v11137_v35 = vcombine.low %v5501_v30, %v5505_v33  ;;  %v11138_v38 = vcombine.high %v5501_v30, %v5505_v33  ;;  %8459 = vmatprep.subr.bf16.mxu0 %v11010_v31  ;;  %v5597_v37 = vld [vmem:[#allocation20 + $0x700] sm:$0xff]  ;;  %v11106_v17 = vcombine.high %v5469_v15, %v5473_v18 }
 0x453   :  { %v5178_v1 = vmul.f32 0.125, %v5145_v36  ;;  %v5151_v5 = vadd.f32 %v5150_v53, %v5149_v54  ;;  %v5625_v54 = vld [vmem:[#allocation20 + $0x7e0] sm:$0xff] }
 0x454   :  { %8497 = vmatpush1.bf16.msra.mxu1 %v11153_v58  ;;  %v11257_v22 = vcombine.low %v5621_v49, %v5625_v54  ;;  %v11258_v52 = vcombine.high %v5621_v49, %v5625_v54  ;;  %v5485_v53 = vld [vmem:[#allocation20 + $0x380] sm:$0xff]  ;;  %v11242_v58 = vcombine.high %v5605_v41, %v5609_v44 }
 0x455   :  { %v5186_v9 = vadd.f32 1e-05, %v5178_v1  ;;  %v5179_v39 = vmul.f32 0.125, %v5151_v5  ;;  %8498 = vmatprep.subr.bf16.mxu1 %v11146_v55  ;;  %8460 = vmatpush1.bf16.msra.mxu0 %v11009_v34  ;;  %v11122_v62 = vcombine.high %v5485_v53, %v5489_v61  ;;  %v11121_v5 = vcombine.low %v5485_v53, %v5489_v61  ;;  %v5601_v32 = vld [vmem:[#allocation20 + $0x720] sm:$0xff] }
 0x456   :  { %8461 = vmatprep.subr.bf16.mxu0 %v11130_v50  ;;  %v11233_v16 = vcombine.low %v5597_v37, %v5601_v32  ;;  %v11234_v20 = vcombine.high %v5597_v37, %v5601_v32  ;;  %v5461_v55 = vld [vmem:[#allocation20 + $0x2c0] sm:$0xff] }
 0x457   :  { %v5187_v11 = vadd.f32 1e-05, %v5179_v39  ;;  %12032 = vrsqrt.f32 %v5186_v9  ;;  %v5477_v39 = vld [vmem:[#allocation20 + $0x340] sm:$0xff] }
 0x458   :  { %8499 = vmatpush1.bf16.msra.mxu1 %v11145_v26  ;;  %v11114_v43 = vcombine.high %v5477_v39, %v5481_v40  ;;  %v5465_v48 = vld [vmem:[#allocation20 + $0x2e0] sm:$0xff] }
 0x459   :  { %12034 = vrsqrt.f32 %v5187_v11  ;;  %8500 = vmatprep.subr.bf16.mxu1 %v11138_v38  ;;  %8462 = vmatpush2.bf16.msra.mxu0 %v11129_v12  ;;  %v11113_v11 = vcombine.low %v5477_v39, %v5481_v40  ;;  %v5589_v27 = vld [vmem:[#allocation20 + $0x6c0] sm:$0xff]  ;;  %v11098_v31 = vcombine.high %v5461_v55, %v5465_v48  ;;  %v11097_v47 = vcombine.low %v5461_v55, %v5465_v48 }
 0x45a   :  { %8463 = vmatprep.subr.bf16.mxu0 %v11122_v62  ;;  %v5593_v33 = vld [vmem:[#allocation20 + $0x6e0] sm:$0xff] }
 0x45b   :  { %v11225_v57 = vcombine.low %v5589_v27, %v5593_v33  ;;  %v5453_v12 = vld [vmem:[#allocation20 + $0x280] sm:$0xff] }
 0x45c   :  { %8501 = vmatpush1.bf16.msra.mxu1 %v11137_v35  ;;  %v5585_v29 = vld [vmem:[#allocation20 + $0x6a0] sm:$0xff] }
 0x45d   :  { %8502 = vmatprep.subr.bf16.mxu1 %v11258_v52  ;;  %8464 = vmatpush2.bf16.msra.mxu0 %v11121_v5  ;;  %v5581_v52 = vld [vmem:[#allocation20 + $0x680] sm:$0xff] }
 0x45e   :  { %8465 = vmatprep.subr.bf16.mxu0 %v11114_v43  ;;  %v11217_v59 = vcombine.low %v5581_v52, %v5585_v29  ;;  %v5573_v5 = vld [vmem:[#allocation20 + $0x640] sm:$0xff] }
 0x45f   :  { %v5441_v41 = vld [vmem:[#allocation20 + $0x220] sm:$0xff] }
 0x460   :  { %8503 = vmatpush2.bf16.msra.mxu1 %v11257_v22  ;;  %v5457_v22 = vld [vmem:[#allocation20 + $0x2a0] sm:$0xff] }
 0x461   :  { %8504 = vmatprep.subr.bf16.mxu1 %v11250_v7  ;;  %8466 = vmatpush2.bf16.msra.mxu0 %v11113_v11  ;;  %v11089_v53 = vcombine.low %v5453_v12, %v5457_v22  ;;  %v11090_v61 = vcombine.high %v5453_v12, %v5457_v22  ;;  %v5437_v7 = vld [vmem:[#allocation20 + $0x200] sm:$0xff] }
 0x462   :  { %8467 = vmatprep.subr.bf16.mxu0 %v11106_v17  ;;  %v5565_v44 = vld [vmem:[#allocation20 + $0x600] sm:$0xff]  ;;  %v11073_v18 = vcombine.low %v5437_v7, %v5441_v41 }
 0x463   :  { %v5569_v11 = vld [vmem:[#allocation20 + $0x620] sm:$0xff] }
 0x464   :  { %v12033_v36 = vpop.eup %12032  ;;  %8505 = vmatpush2.bf16.msra.mxu1 %v11249_v6  ;;  %v5577_v6 = vld [vmem:[#allocation20 + $0x660] sm:$0xff]  ;;  %v11202_v15 = vcombine.high %v5565_v44, %v5569_v11 }
 0x465   :  { %8506 = vmatprep.subr.bf16.mxu1 %v11242_v58  ;;  %8468 = vmatpush2.bf16.msra.mxu0 %v11105_v14  ;;  %v11210_v40 = vcombine.high %v5573_v5, %v5577_v6  ;;  %v11209_v58 = vcombine.low %v5573_v5, %v5577_v6  ;;  %v12835_v37 = vld [vmem:[#allocation20 + $0x9c0] sm:$0xff] }
 0x466   :  { %v12035_v13 = vpop.eup %12034  ;;  %8469 = vmatprep.subr.bf16.mxu0 %v11098_v31  ;;  %v12837_v17 = vld [vmem:[#allocation20 + $0x9e0] sm:$0xff] }
 0x467   :  { %v5209_v1 = vcombine.low %v12033_v36, %v12035_v13  ;;  %v5449_v13 = vld [vmem:[#allocation20 + $0x260] sm:$0xff]  ;;  %v11321_v14 = vcombine.low %v12835_v37, %v12837_v17 }
 0x468   :  { %8507 = vmatpush2.bf16.msra.mxu1 %v11241_v2  ;;  %v11074_v2 = vcombine.high %v5437_v7, %v5441_v41  ;;  %v12839_v32 = vld [vmem:[#allocation20 + $0xdc0] sm:$0xff] }
 0x469   :  { %v12825_v9 = vrot.slane %v5209_v1, %v12648_v56  ;;  %8508 = vmatprep.subr.bf16.mxu1 %v11234_v20  ;;  %8470 = vmatpush2.bf16.msra.mxu0 %v11097_v47  ;;  %v11218_v1 = vcombine.high %v5581_v52, %v5585_v29  ;;  %v12845_v20 = vld [vmem:[#allocation20 + $0xde0] sm:$0xff] }
 0x46a   :  { %8471 = vmatprep.subr.bf16.mxu0 %v11090_v61 }
 0x46b   :  { %v5240_v45 = vcombine.low %v12822_v8, %v12825_v9 }
 0x46c   :  { %8509 = vmatpush2.bf16.msra.mxu1 %v11233_v16  ;;  %v11322_v16 = vcombine.high %v12835_v37, %v12837_v17 }
 0x46d   :  { %8472 = vmatpush2.bf16.msra.mxu0 %v11089_v53 }
 0x470   :  { %v4924_v21 = vpop.f32.mrf.mxu0 }
 0x471   :  { %v4925_v25 = vadd.f32 %v4924_v21, %v12776_v24  ;;  %v4965_v26 = vpop.f32.mrf.mxu1  ;;  %v11226_v24 = vcombine.high %v5589_v27, %v5593_v33  ;;  %v11201_v21 = vcombine.low %v5565_v44, %v5569_v11 }
 0x472   :  { %v4926_v30 = vpop.f32.mrf.mxu0 }
 0x473   :  { %v12830_v34 = vadd.f32 %v4965_v26, %v4925_v25  ;;  %v4927_v35 = vadd.f32 %v4926_v30, %v12780_v63  ;;  %v4967_v38 = vpop.f32.mrf.mxu1  ;;  %8510 = vmatprep.subr.bf16.mxu1 %v11226_v24  ;;  %v5445_v63 = vld [vmem:[#allocation20 + $0x240] sm:$0xff]  ;;  %v11449_v25 = vcombine.low %v12839_v32, %v12845_v20  ;;  %v11450_v26 = vcombine.high %v12839_v32, %v12845_v20 }
 0x474   :  { %v4928_v49 = vpop.f32.mrf.mxu0  ;;  %8511 = vmatpush2.bf16.msra.mxu1 %v11225_v57  ;;  %v11082_v39 = vcombine.high %v5445_v63, %v5449_v13  ;;  %v11081_v43 = vcombine.low %v5445_v63, %v5449_v13  ;;  %v5653_v20 = vld [vmem:[#allocation20 + $0x8c0] sm:$0xff] }
 0x475   :  { %v12833_v50 = vadd.f32 %v4967_v38, %v4927_v35  ;;  %v4969_v54 = vpop.f32.mrf.mxu1  ;;  %8512 = vmatprep.subr.bf16.mxu1 %v11218_v1  ;;  %v5080_v48 = vrot.slane %v12830_v34, 4 }
 0x476   :  { %v4929_v36 = vpop.f32.mrf.mxu0  ;;  %8473 = vmatprep.subr.bf16.mxu0 %v11082_v39 }
 0x477   :  { %v4970_v62 = vpop.f32.mrf.mxu1  ;;  %8474 = vmatpush2.bf16.msra.mxu0 %v11081_v43  ;;  %v5086_v55 = vrot.slane %v12833_v50, 4  ;;  %v5081_v30 = vadd.f32 %v5080_v48, %v12830_v34 }
 0x478   :  { %8513 = vmatpush2.bf16.msra.mxu1 %v11217_v59  ;;  %8475 = vmatprep.subr.bf16.mxu0 %v11074_v2 }
 0x479   :  { %8514 = vmatprep.subr.bf16.mxu1 %v11210_v40  ;;  %v5087_v27 = vadd.f32 %v5086_v55, %v12833_v50  ;;  %v5082_v33 = vrot.slane %v5081_v30, 2 }
 0x47b   :  { %8476 = vmatpush2.bf16.msra.mxu0 %v11073_v18  ;;  %v5088_v31 = vrot.slane %v5087_v27, 2  ;;  %v5083_v38 = vadd.f32 %v5082_v33, %v5081_v30 }
 0x47c   :  { %8515 = vmatpush2.bf16.msra.mxu1 %v11209_v58  ;;  %8527 = vmatprep.subr.bf16.mxu0 %v11322_v16 }
 0x47d   :  { %8516 = vmatprep.subr.bf16.mxu1 %v11202_v15  ;;  %v5089_v35 = vadd.f32 %v5088_v31, %v5087_v27  ;;  %v5084_v57 = vrot.slane %v5083_v38, 1 }
 0x47f   :  { %v5090_v47 = vrot.slane %v5089_v35, 1  ;;  %v5085_v24 = vadd.f32 %v5084_v57, %v5083_v38 }
 0x480   :  { %8517 = vmatpush2.bf16.msra.mxu1 %v11201_v21 }
 0x481   :  { %8568 = vmatprep.subr.bf16.mxu1 %v11450_v26  ;;  %v5091_v49 = vadd.f32 %v5090_v47, %v5089_v35  ;;  %v5108_v12 = vmul.f32 0.125, %v5085_v24 }
 0x483   :  { %v5109_v54 = vmul.f32 0.125, %v5091_v49  ;;  %v12859_v52 = vsub.f32 %v12830_v34, %v5108_v12 }
 0x485   :  { %v12856_v22 = vsub.f32 %v12833_v50, %v5109_v54  ;;  %v5124_v13 = vmul.f32 %v12859_v52, %v12859_v52 }
 0x487   :  { %v5125_v53 = vmul.f32 %v12856_v22, %v12856_v22  ;;  %v5152_v40 = vrot.slane %v5124_v13, 4 }
 0x489   :  { %v5158_v5 = vrot.slane %v5125_v53, 4  ;;  %v5153_v58 = vadd.f32 %v5152_v40, %v5124_v13 }
 0x48b   :  { %v5154_v26 = vrot.slane %v5153_v58, 2 }
 0x48d   :  { %v5155_v33 = vadd.f32 %v5154_v26, %v5153_v58 }
 0x48f   :  { %v5156_v24 = vrot.slane %v5155_v33, 1 }
 0x4b0   :  { %v5006_v36 = vpop.f32.mrf.mxu0 }
 0x4b1   :  { %v5007_v61 = vadd.f32 %v5006_v36, %v12784_v10  ;;  %v5047_v29 = vpop.f32.mrf.mxu1  ;;  %v5159_v10 = vadd.f32 %v5158_v5, %v5125_v53 }
 0x4b2   :  { %v5008_v63 = vpop.f32.mrf.mxu0 }
 0x4b3   :  { %v5048_v62 = vadd.f32 %v5047_v29, %v5007_v61  ;;  %v5009_v59 = vadd.f32 %v5008_v63, %v12788_v4  ;;  %v5049_v1 = vpop.f32.mrf.mxu1  ;;  %v5160_v16 = vrot.slane %v5159_v10, 2  ;;  %v5157_v29 = vadd.f32 %v5156_v24, %v5155_v33 }
 0x4b4   :  { %v5010_v50 = vpop.f32.mrf.mxu0  ;;  %v12890_v24 = vsub.s32 4, %v12641_v42 }
 0x4b5   :  { %v5092_v6 = vrot.slane %v5048_v62, 4  ;;  %v5050_v34 = vadd.f32 %v5049_v1, %v5009_v59  ;;  %v5051_v7 = vpop.f32.mrf.mxu1  ;;  %v5161_v27 = vadd.f32 %v5160_v16, %v5159_v10  ;;  %v5180_v50 = vmul.f32 0.125, %v5157_v29 }
 0x4b6   :  { %v5011_v39 = vpop.f32.mrf.mxu0 }
 0x4b7   :  { %v5093_v41 = vadd.f32 %v5092_v6, %v5048_v62  ;;  %v5098_v43 = vrot.slane %v5050_v34, 4  ;;  %v5052_v44 = vpop.f32.mrf.mxu1  ;;  %v5162_v47 = vrot.slane %v5161_v27, 1  ;;  %v5188_v40 = vadd.f32 1e-05, %v5180_v50 }
 0x4b9   :  { %v5094_v11 = vrot.slane %v5093_v41, 2  ;;  %v5099_v2 = vadd.f32 %v5098_v43, %v5050_v34  ;;  %v5163_v36 = vadd.f32 %v5162_v47, %v5161_v27 }
 0x4bb   :  { %v5095_v15 = vadd.f32 %v5094_v11, %v5093_v41  ;;  %v5100_v18 = vrot.slane %v5099_v2, 2 }
 0x4bd   :  { %v5096_v21 = vrot.slane %v5095_v15, 1  ;;  %v5101_v4 = vadd.f32 %v5100_v18, %v5099_v2 }
 0x4bf   :  { %v5097_v55 = vadd.f32 %v5096_v21, %v5095_v15  ;;  %v5102_v48 = vrot.slane %v5101_v4, 1 }
 0x4c1   :  { %v5110_v30 = vmul.f32 0.125, %v5097_v55  ;;  %v5103_v31 = vadd.f32 %v5102_v48, %v5101_v4  ;;  %v5248_v48 = vrot.slane %v5240_v45, %v12648_v56 }
 0x4c3   :  { %v12867_v35 = vsub.f32 %v5048_v62, %v5110_v30  ;;  %v5111_v38 = vmul.f32 0.125, %v5103_v31  ;;  %v5181_v62 = vmul.f32 0.125, %v5163_v36  ;;  %v5055_v30 = vld [vmem:[#allocation19] sm:$0xff]  ;;  %v5054_v31 = vld [vmem:[#allocation17] sm:$0xff] }
 0x4c4   :  { %v5316_v47 = vrot.slane %v5055_v30, %v12669_v28  ;;  %v5324_v9 = vrot.slane %v5055_v30, %v12665_v19  ;;  %v5312_v45 = vrot.slane %v5055_v30, %v12673_v46 }
 0x4c5   :  { %v5126_v57 = vmul.f32 %v12867_v35, %v12867_v35  ;;  %v12871_v49 = vsub.f32 %v5050_v34, %v5111_v38  ;;  %v5189_v7 = vadd.f32 1e-05, %v5181_v62  ;;  %v12883_v38 = vsub.s32 7, %v12641_v42 }
 0x4c7   :  { %v5164_v54 = vrot.slane %v5126_v57, 4  ;;  %v5127_v12 = vmul.f32 %v12871_v49, %v12871_v49  ;;  %12036 = vrsqrt.f32 %v5189_v7 }
 0x4c8   :  { %12038 = vrsqrt.f32 %v5188_v40 }
 0x4c9   :  { %v5165_v53 = vadd.f32 %v5164_v54, %v5126_v57  ;;  %v5170_v61 = vrot.slane %v5127_v12, 4  ;;  %v12887_v57 = vsub.s32 5, %v12641_v42  ;;  %v12893_v54 = vsub.s32 6, %v12641_v42 }
 0x4cb   :  { %v5166_v63 = vrot.slane %v5165_v53, 2  ;;  %v5171_v13 = vadd.f32 %v5170_v61, %v5127_v12  ;;  %v5320_v12 = vrot.slane %v5055_v30, %v12683_v0  ;;  %v5332_v36 = vrot.slane %v5055_v30, %v12887_v57 }
 0x4cc   :  { %v5328_v61 = vrot.slane %v5055_v30, %v12890_v24  ;;  %v5336_v29 = vrot.slane %v5055_v30, %v12893_v54 }
 0x4cd   :  { %v5167_v59 = vadd.f32 %v5166_v63, %v5165_v53  ;;  %v5172_v1 = vrot.slane %v5171_v13, 2  ;;  %v5340_v53 = vrot.slane %v5055_v30, %v12883_v38 }
 0x4cf   :  { %v5168_v5 = vrot.slane %v5167_v59, 1  ;;  %v5173_v6 = vadd.f32 %v5172_v1, %v5171_v13 }
 0x4d1   :  { %v5169_v34 = vadd.f32 %v5168_v5, %v5167_v59  ;;  %v5174_v39 = vrot.slane %v5173_v6, 1 }
 0x4d3   :  { %v5182_v41 = vmul.f32 0.125, %v5169_v34  ;;  %v5175_v43 = vadd.f32 %v5174_v39, %v5173_v6 }
 0x4d4   :  { %v12037_v2 = vpop.eup %12036 }
 0x4d5   :  { %v5190_v44 = vadd.f32 1e-05, %v5182_v41  ;;  %v5183_v10 = vmul.f32 0.125, %v5175_v43  ;;  %v12039_v58 = vpop.eup %12038 }
 0x4d6   :  { %v5210_v18 = vcombine.low %v12039_v58, %v12037_v2 }
 0x4d7   :  { %v5191_v11 = vadd.f32 1e-05, %v5183_v10  ;;  %12040 = vrsqrt.f32 %v5190_v44 }
 0x4d8   :  { %v5232_v4 = vrot.slane %v5210_v18, %v12648_v56 }
 0x4d9   :  { %12042 = vrsqrt.f32 %v5191_v11 }
 0x4e4   :  { %v12041_v15 = vpop.eup %12040 }
 0x4e6   :  { %v12043_v16 = vpop.eup %12042 }
 0x4e7   :  { %v5211_v21 = vcombine.low %v12041_v15, %v12043_v16 }
 0x4e9   :  { %v5239_v26 = vrot.slane %v5211_v21, %v12648_v56 }
 0x4eb   :  { %v5241_v55 = vcombine.low %v5232_v4, %v5239_v26  ;;  %v5805_v26 = vld [vmem:[#allocation20 + $0xd80] sm:$0xff] }
 0x4ed   :  { %v5255_v27 = vrot.slane %v5241_v55, %v12648_v56 }
 0x4ef   :  { %v5256_v33 = vcombine.low %v5248_v48, %v5255_v27 }
 0x4f1   :  { %v5258_v8 = vmul.f32 %v5256_v33, %v5054_v31  ;;  %v5669_v31 = vld [vmem:[#allocation20 + $0x940] sm:$0xff] }
 0x4f3   :  { %v5291_v63 = vrot.slane %v5258_v8, %v12883_v38  ;;  %v5267_v42 = vrot.slane %v5258_v8, %v12669_v28  ;;  %v5275_v13 = vrot.slane %v5258_v8, %v12665_v19  ;;  %v5263_v62 = vrot.slane %v5258_v8, %v12673_v46 }
 0x4f4   :  { %v5271_v59 = vrot.slane %v5258_v8, %v12683_v0  ;;  %v5283_v1 = vrot.slane %v5258_v8, %v12887_v57  ;;  %v5279_v50 = vrot.slane %v5258_v8, %v12890_v24  ;;  %v5287_v5 = vrot.slane %v5258_v8, %v12893_v54  ;;  %v5673_v8 = vld [vmem:[#allocation20 + $0x960] sm:$0xff] }
 0x4f5   :  { %v5307_v6 = vmul.f32 %v5291_v63, %v12871_v49  ;;  %v5301_v7 = vmul.f32 %v5267_v42, %v12798_v3  ;;  %v5303_v34 = vmul.f32 %v5275_v13, %v12814_v60  ;;  %v5300_v39 = vmul.f32 %v5263_v62, %v12794_v51  ;;  %v5661_v42 = vld [vmem:[#allocation20 + $0x900] sm:$0xff] }
 0x4f6   :  { %v5302_v40 = vmul.f32 %v5271_v59, %v12810_v23  ;;  %v5305_v41 = vmul.f32 %v5283_v1, %v12856_v22  ;;  %v5304_v43 = vmul.f32 %v5279_v50, %v12859_v52  ;;  %v5306_v44 = vmul.f32 %v5287_v5, %v12867_v35  ;;  %v5677_v23 = vld [vmem:[#allocation20 + $0x980] sm:$0xff] }
 0x4f7   :  { %v5350_v10 = vadd.f32 %v5316_v47, %v5301_v7  ;;  %v5352_v11 = vadd.f32 %v5324_v9, %v5303_v34  ;;  %v5349_v2 = vadd.f32 %v5312_v45, %v5300_v39  ;;  %v5356_v58 = vadd.f32 %v5340_v53, %v5307_v6  ;;  %v5681_v52 = vld [vmem:[#allocation20 + $0x9a0] sm:$0xff] }
 0x4f8   :  { %v5351_v15 = vadd.f32 %v5320_v12, %v5302_v40  ;;  %v5354_v49 = vadd.f32 %v5332_v36, %v5305_v41  ;;  %v12918_v18 = vadd.f32 %v5328_v61, %v5304_v43  ;;  %v12920_v3 = vadd.f32 %v5336_v29, %v5306_v44  ;;  %v5809_v35 = vld [vmem:[#allocation20 + $0xda0] sm:$0xff] }
 0x4f9   :  { %v5358_v60 = vmax.f32 %v5350_v10, 0.0  ;;  %v5360_v51 = vmax.f32 %v5352_v11, 0.0  ;;  %v5357_v16 = vmax.f32 %v5349_v2, 0.0  ;;  %v5364_v4 = vmax.f32 %v5356_v58, 0.0  ;;  %v5797_v9 = vld [vmem:[#allocation20 + $0xd40] sm:$0xff] }
 0x4fa   :  { %v5359_v21 = vmax.f32 %v5351_v15, 0.0  ;;  %v5362_v22 = vmax.f32 %v5354_v49, 0.0  ;;  %v11314_v33 = vcombine.high %v5677_v23, %v5681_v52  ;;  %v11442_v47 = vcombine.high %v5805_v26, %v5809_v35  ;;  %v5801_v45 = vld [vmem:[#allocation20 + $0xd60] sm:$0xff] }
 0x4fb   :  { %v12922_v55 = vpack.c.bf16 %v5358_v60, %v5358_v60  ;;  %v12924_v48 = vpack.c.bf16 %v5360_v51, %v5360_v51  ;;  %v12926_v27 = vpack.c.bf16 %v5357_v16, %v5357_v16  ;;  %v12936_v36 = vpack.c.bf16 %v5364_v4, %v5364_v4  ;;  %v5665_v13 = vld [vmem:[#allocation20 + $0x920] sm:$0xff] }
 0x4fc   :  { %v12928_v30 = vpack.c.bf16 %v5359_v21, %v5359_v21  ;;  %v12934_v12 = vpack.c.bf16 %v5362_v22, %v5362_v22  ;;  %v11313_v53 = vcombine.low %v5677_v23, %v5681_v52  ;;  %v11441_v61 = vcombine.low %v5805_v26, %v5809_v35  ;;  %v5789_v62 = vld [vmem:[#allocation20 + $0xd00] sm:$0xff] }
 0x4fd   :  { %8477 = vmatprep.mubr.bf16.mxu0 %v12922_v55  ;;  %8518 = vmatprep.mubr.bf16.mxu1 %v12924_v48  ;;  %v11306_v29 = vcombine.high %v5669_v31, %v5673_v8  ;;  %v11434_v63 = vcombine.high %v5797_v9, %v5801_v45  ;;  %v5793_v59 = vld [vmem:[#allocation20 + $0xd20] sm:$0xff]  ;;  %v11305_v37 = vcombine.low %v5669_v31, %v5673_v8 }
 0x4fe   :  { %8478 = vmatmul.mubr.bf16.vlgmr.msra.gmra.mxu0 %v12926_v27  ;;  %8519 = vmatmul.mubr.bf16.vlgmr.msra.gmra.mxu1 %v12928_v30  ;;  %v11433_v17 = vcombine.low %v5797_v9, %v5801_v45  ;;  %v11298_v32 = vcombine.high %v5661_v42, %v5665_v13  ;;  %v5781_v1 = vld [vmem:[#allocation20 + $0xcc0] sm:$0xff]  ;;  %v11297_v5 = vcombine.low %v5661_v42, %v5665_v13 }
 0x4ff   :  { %8528 = vmatpush1.bf16.msra.mxu0 %v11321_v14  ;;  %8569 = vmatpush1.bf16.msra.mxu1 %v11449_v25  ;;  %v11426_v14 = vcombine.high %v5789_v62, %v5793_v59  ;;  %v5657_v25 = vld [vmem:[#allocation20 + $0x8e0] sm:$0xff]  ;;  %v11425_v6 = vcombine.low %v5789_v62, %v5793_v59 }
 0x500   :  { %8559 = vmatprep.mubr.bf16.mxu0 %v12934_v12  ;;  %8600 = vmatprep.mubr.bf16.mxu1 %v12936_v36  ;;  %v5785_v50 = vld [vmem:[#allocation20 + $0xce0] sm:$0xff]  ;;  %v11290_v7 = vcombine.high %v5653_v20, %v5657_v25  ;;  %v11289_v44 = vcombine.low %v5653_v20, %v5657_v25 }
 0x501   :  { %8529 = vmatprep.subr.bf16.mxu0 %v11314_v33  ;;  %8570 = vmatprep.subr.bf16.mxu1 %v11442_v47  ;;  %v11418_v34 = vcombine.high %v5781_v1, %v5785_v50  ;;  %v5645_v39 = vld [vmem:[#allocation20 + $0x880] sm:$0xff]  ;;  %v11417_v10 = vcombine.low %v5781_v1, %v5785_v50 }
 0x502   :  { %v5649_v40 = vld [vmem:[#allocation20 + $0x8a0] sm:$0xff] }
 0x503   :  { %8530 = vmatpush1.bf16.msra.mxu0 %v11313_v53  ;;  %8571 = vmatpush1.bf16.msra.mxu1 %v11441_v61  ;;  %v5773_v41 = vld [vmem:[#allocation20 + $0xc80] sm:$0xff]  ;;  %v11282_v11 = vcombine.high %v5645_v39, %v5649_v40  ;;  %v11281_v51 = vcombine.low %v5645_v39, %v5649_v40 }
 0x504   :  { %8531 = vmatprep.subr.bf16.mxu0 %v11306_v29  ;;  %8572 = vmatprep.subr.bf16.mxu1 %v11434_v63  ;;  %v5777_v43 = vld [vmem:[#allocation20 + $0xca0] sm:$0xff] }
 0x505   :  { %v11410_v2 = vcombine.high %v5773_v41, %v5777_v43  ;;  %v5637_v58 = vld [vmem:[#allocation20 + $0x840] sm:$0xff]  ;;  %v11409_v16 = vcombine.low %v5773_v41, %v5777_v43 }
 0x506   :  { %v5641_v15 = vld [vmem:[#allocation20 + $0x860] sm:$0xff] }
 0x507   :  { %8532 = vmatpush1.bf16.msra.mxu0 %v11305_v37  ;;  %8573 = vmatpush1.bf16.msra.mxu1 %v11433_v17  ;;  %v5765_v49 = vld [vmem:[#allocation20 + $0xc40] sm:$0xff]  ;;  %v11274_v23 = vcombine.high %v5637_v58, %v5641_v15  ;;  %v11273_v35 = vcombine.low %v5637_v58, %v5641_v15 }
 0x508   :  { %8533 = vmatprep.subr.bf16.mxu0 %v11298_v32  ;;  %8574 = vmatprep.subr.bf16.mxu1 %v11426_v14  ;;  %v5769_v60 = vld [vmem:[#allocation20 + $0xc60] sm:$0xff] }
 0x509   :  { %v11402_v21 = vcombine.high %v5765_v49, %v5769_v60  ;;  %v5629_v22 = vld [vmem:[#allocation20 + $0x800] sm:$0xff]  ;;  %v11401_v31 = vcombine.low %v5765_v49, %v5769_v60 }
 0x50a   :  { %v5633_v4 = vld [vmem:[#allocation20 + $0x820] sm:$0xff] }
 0x50b   :  { %8534 = vmatpush1.bf16.msra.mxu0 %v11297_v5  ;;  %8575 = vmatpush1.bf16.msra.mxu1 %v11425_v6  ;;  %v5757_v52 = vld [vmem:[#allocation20 + $0xc00] sm:$0xff]  ;;  %v11266_v33 = vcombine.high %v5629_v22, %v5633_v4  ;;  %v11265_v61 = vcombine.low %v5629_v22, %v5633_v4 }
 0x50c   :  { %8535 = vmatprep.subr.bf16.mxu0 %v11290_v7  ;;  %8576 = vmatprep.subr.bf16.mxu1 %v11418_v34  ;;  %v5761_v26 = vld [vmem:[#allocation20 + $0xc20] sm:$0xff] }
 0x50d   :  { %v11394_v47 = vcombine.high %v5757_v52, %v5761_v26  ;;  %v5749_v8 = vld [vmem:[#allocation20 + $0xbc0] sm:$0xff]  ;;  %v11393_v29 = vcombine.low %v5757_v52, %v5761_v26 }
 0x50e   :  { %v5753_v9 = vld [vmem:[#allocation20 + $0xbe0] sm:$0xff] }
 0x50f   :  { %8536 = vmatpush1.bf16.msra.mxu0 %v11289_v44  ;;  %8577 = vmatpush1.bf16.msra.mxu1 %v11417_v10  ;;  %v5877_v45 = vld [vmem:[#allocation20 + $0xfc0] sm:$0xff]  ;;  %v11386_v63 = vcombine.high %v5749_v8, %v5753_v9  ;;  %v11385_v17 = vcombine.low %v5749_v8, %v5753_v9 }
 0x510   :  { %8537 = vmatprep.subr.bf16.mxu0 %v11282_v11  ;;  %8578 = vmatprep.subr.bf16.mxu1 %v11410_v2  ;;  %v5881_v53 = vld [vmem:[#allocation20 + $0xfe0] sm:$0xff] }
 0x511   :  { %v11514_v42 = vcombine.high %v5877_v45, %v5881_v53  ;;  %v5741_v13 = vld [vmem:[#allocation20 + $0xb80] sm:$0xff]  ;;  %v11513_v32 = vcombine.low %v5877_v45, %v5881_v53 }
 0x512   :  { %v5745_v62 = vld [vmem:[#allocation20 + $0xba0] sm:$0xff] }
 0x513   :  { %8538 = vmatpush1.bf16.msra.mxu0 %v11281_v51  ;;  %8579 = vmatpush1.bf16.msra.mxu1 %v11409_v16  ;;  %v5869_v59 = vld [vmem:[#allocation20 + $0xf80] sm:$0xff]  ;;  %v11378_v14 = vcombine.high %v5741_v13, %v5745_v62  ;;  %v11377_v6 = vcombine.low %v5741_v13, %v5745_v62 }
 0x514   :  { %8539 = vmatprep.subr.bf16.mxu0 %v11274_v23  ;;  %8580 = vmatprep.subr.bf16.mxu1 %v11402_v21  ;;  %v5873_v37 = vld [vmem:[#allocation20 + $0xfa0] sm:$0xff] }
 0x515   :  { %v11506_v20 = vcombine.high %v5869_v59, %v5873_v37  ;;  %v5733_v25 = vld [vmem:[#allocation20 + $0xb40] sm:$0xff]  ;;  %v11505_v7 = vcombine.low %v5869_v59, %v5873_v37 }
 0x516   :  { %v5737_v1 = vld [vmem:[#allocation20 + $0xb60] sm:$0xff] }
 0x517   :  { %8540 = vmatpush1.bf16.msra.mxu0 %v11273_v35  ;;  %8581 = vmatpush1.bf16.msra.mxu1 %v11401_v31  ;;  %v5861_v50 = vld [vmem:[#allocation20 + $0xf40] sm:$0xff]  ;;  %v11370_v34 = vcombine.high %v5733_v25, %v5737_v1  ;;  %v11369_v10 = vcombine.low %v5733_v25, %v5737_v1  ;;  %v5430_v1 = vld [vmem:[#allocation20 + $0x1c8] sm:$0xff] }
 0x518   :  { %8541 = vmatprep.subr.bf16.mxu0 %v11266_v33  ;;  %8582 = vmatprep.subr.bf16.mxu1 %v11394_v47  ;;  %v5865_v5 = vld [vmem:[#allocation20 + $0xf60] sm:$0xff] }
 0x519   :  { %v11498_v39 = vcombine.high %v5861_v50, %v5865_v5  ;;  %v5725_v40 = vld [vmem:[#allocation20 + $0xb00] sm:$0xff]  ;;  %v11497_v11 = vcombine.low %v5861_v50, %v5865_v5  ;;  %v5434_v50 = vld [vmem:[#allocation20 + $0x1e8] sm:$0xff] }
 0x51a   :  { %v5729_v41 = vld [vmem:[#allocation20 + $0xb20] sm:$0xff]  ;;  %v5558_v5 = vld [vmem:[#allocation20 + $0x5c8] sm:$0xff] }
 0x51b   :  { %8542 = vmatpush1.bf16.msra.mxu0 %v11265_v61  ;;  %8583 = vmatpush1.bf16.msra.mxu1 %v11393_v29  ;;  %v5853_v43 = vld [vmem:[#allocation20 + $0xf00] sm:$0xff]  ;;  %v11362_v2 = vcombine.high %v5725_v40, %v5729_v41  ;;  %v11361_v16 = vcombine.low %v5725_v40, %v5729_v41  ;;  %v5363_v40 = vmax.f32 %v12920_v3, 0.0  ;;  %v11068_v41 = vcombine.high %v5430_v1, %v5434_v50  ;;  %v5418_v3 = vld [vmem:[#allocation20 + $0x168] sm:$0xff] }
 0x51c   :  { %8543 = vmatprep.subr.bf16.mxu0 %v11386_v63  ;;  %8584 = vmatprep.subr.bf16.mxu1 %v11514_v42  ;;  %v5857_v44 = vld [vmem:[#allocation20 + $0xf20] sm:$0xff] }
 0x51d   :  { %v11490_v58 = vcombine.high %v5853_v43, %v5857_v44  ;;  %v5717_v15 = vld [vmem:[#allocation20 + $0xac0] sm:$0xff]  ;;  %v11489_v23 = vcombine.low %v5853_v43, %v5857_v44  ;;  %v5422_v44 = vld [vmem:[#allocation20 + $0x188] sm:$0xff] }
 0x51e   :  { %v5721_v49 = vld [vmem:[#allocation20 + $0xae0] sm:$0xff] }
 0x51f   :  { %8544 = vmatpush2.bf16.msra.mxu0 %v11385_v17  ;;  %8585 = vmatpush2.bf16.msra.mxu1 %v11513_v32  ;;  %v5845_v60 = vld [vmem:[#allocation20 + $0xec0] sm:$0xff]  ;;  %v11354_v21 = vcombine.high %v5717_v15, %v5721_v49  ;;  %v11353_v31 = vcombine.low %v5717_v15, %v5721_v49  ;;  %v12950_v49 = vpack.c.bf16 %v5363_v40, %v5363_v40 }
 0x520   :  { %8545 = vmatprep.subr.bf16.mxu0 %v11378_v14  ;;  %8586 = vmatprep.subr.bf16.mxu1 %v11506_v20  ;;  %v5849_v51 = vld [vmem:[#allocation20 + $0xee0] sm:$0xff] }
 0x521   :  { %v11482_v22 = vcombine.high %v5845_v60, %v5849_v51  ;;  %v5709_v4 = vld [vmem:[#allocation20 + $0xa80] sm:$0xff]  ;;  %v11481_v33 = vcombine.low %v5845_v60, %v5849_v51 }
 0x522   :  { %v5713_v52 = vld [vmem:[#allocation20 + $0xaa0] sm:$0xff] }
 0x523   :  { %8546 = vmatpush2.bf16.msra.mxu0 %v11377_v6  ;;  %8587 = vmatpush2.bf16.msra.mxu1 %v11505_v7  ;;  %v5837_v26 = vld [vmem:[#allocation20 + $0xe80] sm:$0xff]  ;;  %v11346_v47 = vcombine.high %v5709_v4, %v5713_v52  ;;  %v11345_v29 = vcombine.low %v5709_v4, %v5713_v52  ;;  %v5562_v6 = vld [vmem:[#allocation20 + $0x5e8] sm:$0xff] }
 0x524   :  { %8547 = vmatprep.subr.bf16.mxu0 %v11370_v34  ;;  %8588 = vmatprep.subr.bf16.mxu1 %v11498_v39  ;;  %v5841_v35 = vld [vmem:[#allocation20 + $0xea0] sm:$0xff]  ;;  %v5361_v39 = vmax.f32 %v12918_v18, 0.0  ;;  %v11196_v43 = vcombine.high %v5558_v5, %v5562_v6  ;;  %v11195_v60 = vcombine.low %v5558_v5, %v5562_v6  ;;  %v5382_v6 = vld [vmem:[#allocation20 + $0x48] sm:$0xff] }
 0x525   :  { %v11474_v8 = vcombine.high %v5837_v26, %v5841_v35  ;;  %v5701_v9 = vld [vmem:[#allocation20 + $0xa40] sm:$0xff]  ;;  %v11473_v63 = vcombine.low %v5837_v26, %v5841_v35  ;;  %v5406_v35 = vld [vmem:[#allocation20 + $0x108] sm:$0xff] }
 0x526   :  { %v5705_v45 = vld [vmem:[#allocation20 + $0xa60] sm:$0xff]  ;;  %v12948_v15 = vpack.c.bf16 %v5361_v39, %v5361_v39  ;;  %v5514_v39 = vld [vmem:[#allocation20 + $0x468] sm:$0xff] }
 0x527   :  { %8548 = vmatpush2.bf16.msra.mxu0 %v11369_v10  ;;  %8589 = vmatpush2.bf16.msra.mxu1 %v11497_v11  ;;  %v5829_v53 = vld [vmem:[#allocation20 + $0xe40] sm:$0xff]  ;;  %v11338_v42 = vcombine.high %v5701_v9, %v5705_v45  ;;  %v11337_v32 = vcombine.low %v5701_v9, %v5705_v45  ;;  %v5426_v10 = vld [vmem:[#allocation20 + $0x1a8] sm:$0xff] }
 0x528   :  { %8549 = vmatprep.subr.bf16.mxu0 %v11362_v2  ;;  %8590 = vmatprep.subr.bf16.mxu1 %v11490_v58  ;;  %v5833_v61 = vld [vmem:[#allocation20 + $0xe60] sm:$0xff]  ;;  %v5550_v11 = vld [vmem:[#allocation20 + $0x588] sm:$0xff]  ;;  %v11067_v58 = vcombine.low %v5430_v1, %v5434_v50  ;;  %v11060_v51 = vcombine.high %v5422_v44, %v5426_v10 }
 0x529   :  { %v11466_v13 = vcombine.high %v5829_v53, %v5833_v61  ;;  %v5693_v62 = vld [vmem:[#allocation20 + $0xa00] sm:$0xff]  ;;  %v11465_v14 = vcombine.low %v5829_v53, %v5833_v61  ;;  %v5554_v2 = vld [vmem:[#allocation20 + $0x5a8] sm:$0xff] }
 0x52a   :  { %v5697_v59 = vld [vmem:[#allocation20 + $0xa20] sm:$0xff]  ;;  %v11188_v18 = vcombine.high %v5550_v11, %v5554_v2  ;;  %v11187_v4 = vcombine.low %v5550_v11, %v5554_v2  ;;  %v5398_v61 = vld [vmem:[#allocation20 + $0xc8] sm:$0xff] }
 0x52b   :  { %8550 = vmatpush2.bf16.msra.mxu0 %v11361_v16  ;;  %8591 = vmatpush2.bf16.msra.mxu1 %v11489_v23  ;;  %v5821_v37 = vld [vmem:[#allocation20 + $0xe00] sm:$0xff]  ;;  %v11330_v20 = vcombine.high %v5693_v62, %v5697_v59  ;;  %v11329_v7 = vcombine.low %v5693_v62, %v5697_v59  ;;  %v5414_v16 = vld [vmem:[#allocation20 + $0x148] sm:$0xff] }
 0x52c   :  { %8551 = vmatprep.subr.bf16.mxu0 %v11354_v21  ;;  %8592 = vmatprep.subr.bf16.mxu1 %v11482_v22  ;;  %v5825_v17 = vld [vmem:[#allocation20 + $0xe20] sm:$0xff]  ;;  %v5542_v23 = vld [vmem:[#allocation20 + $0x548] sm:$0xff]  ;;  %v11059_v22 = vcombine.low %v5422_v44, %v5426_v10  ;;  %v11052_v52 = vcombine.high %v5414_v16, %v5418_v3 }
 0x52d   :  { %v11458_v25 = vcombine.high %v5821_v37, %v5825_v17  ;;  %v11457_v34 = vcombine.low %v5821_v37, %v5825_v17  ;;  %v5546_v21 = vld [vmem:[#allocation20 + $0x568] sm:$0xff] }
 0x52e   :  { %v11180_v26 = vcombine.high %v5542_v23, %v5546_v21  ;;  %v11179_v9 = vcombine.low %v5542_v23, %v5546_v21  ;;  %v5390_v17 = vld [vmem:[#allocation20 + $0x88] sm:$0xff] }
 0x52f   :  { %8552 = vmatpush2.bf16.msra.mxu0 %v11353_v31  ;;  %8593 = vmatpush2.bf16.msra.mxu1 %v11481_v33  ;;  %v5410_v31 = vld [vmem:[#allocation20 + $0x128] sm:$0xff] }
 0x530   :  { %8553 = vmatprep.subr.bf16.mxu0 %v11346_v47  ;;  %8594 = vmatprep.subr.bf16.mxu1 %v11474_v8  ;;  %v5534_v33 = vld [vmem:[#allocation20 + $0x508] sm:$0xff]  ;;  %v11051_v8 = vcombine.low %v5414_v16, %v5418_v3  ;;  %v11044_v45 = vcombine.high %v5406_v35, %v5410_v31 }
 0x531   :  { %v5538_v47 = vld [vmem:[#allocation20 + $0x528] sm:$0xff] }
 0x532   :  { %v11172_v53 = vcombine.high %v5534_v33, %v5538_v47  ;;  %v11171_v62 = vcombine.low %v5534_v33, %v5538_v47  ;;  %v5374_v10 = vld [vmem:[#allocation20 + $0x8] sm:$0xff] }
 0x533   :  { %8554 = vmatpush2.bf16.msra.mxu0 %v11345_v29  ;;  %8595 = vmatpush2.bf16.msra.mxu1 %v11473_v63  ;;  %v5402_v29 = vld [vmem:[#allocation20 + $0xe8] sm:$0xff] }
 0x534   :  { %8555 = vmatprep.subr.bf16.mxu0 %v11338_v42  ;;  %8596 = vmatprep.subr.bf16.mxu1 %v11466_v13  ;;  %v5526_v63 = vld [vmem:[#allocation20 + $0x4c8] sm:$0xff]  ;;  %v11043_v13 = vcombine.low %v5406_v35, %v5410_v31  ;;  %v11036_v59 = vcombine.high %v5398_v61, %v5402_v29 }
 0x535   :  { %v5530_v42 = vld [vmem:[#allocation20 + $0x4e8] sm:$0xff] }
 0x536   :  { %v11164_v37 = vcombine.high %v5526_v63, %v5530_v42  ;;  %v11163_v1 = vcombine.low %v5526_v63, %v5530_v42  ;;  %v5378_v11 = vld [vmem:[#allocation20 + $0x28] sm:$0xff] }
 0x537   :  { %8556 = vmatpush2.bf16.msra.mxu0 %v11337_v32  ;;  %8597 = vmatpush2.bf16.msra.mxu1 %v11465_v14  ;;  %v5394_v32 = vld [vmem:[#allocation20 + $0xa8] sm:$0xff] }
 0x538   :  { %8557 = vmatprep.subr.bf16.mxu0 %v11330_v20  ;;  %8598 = vmatprep.subr.bf16.mxu1 %v11458_v25  ;;  %v5518_v14 = vld [vmem:[#allocation20 + $0x488] sm:$0xff]  ;;  %v11035_v25 = vcombine.low %v5398_v61, %v5402_v29  ;;  %v11028_v50 = vcombine.high %v5390_v17, %v5394_v32  ;;  %v11027_v40 = vcombine.low %v5390_v17, %v5394_v32 }
 0x539   :  { %v5522_v20 = vld [vmem:[#allocation20 + $0x4a8] sm:$0xff] }
 0x53a   :  { %v11156_v5 = vcombine.high %v5518_v14, %v5522_v20  ;;  %v5502_v2 = vld [vmem:[#allocation20 + $0x408] sm:$0xff] }
 0x53b   :  { %8558 = vmatpush2.bf16.msra.mxu0 %v11329_v7  ;;  %8599 = vmatpush2.bf16.msra.mxu1 %v11457_v34  ;;  %v5386_v7 = vld [vmem:[#allocation20 + $0x68] sm:$0xff] }
 0x53c   :  { %8609 = vmatprep.subr.bf16.mxu0 %v11068_v41  ;;  %8650 = vmatprep.subr.bf16.mxu1 %v11196_v43  ;;  %v5510_v34 = vld [vmem:[#allocation20 + $0x448] sm:$0xff]  ;;  %v11155_v41 = vcombine.low %v5518_v14, %v5522_v20  ;;  %v11020_v43 = vcombine.high %v5382_v6, %v5386_v7 }
 0x53d   :  { %v11148_v44 = vcombine.high %v5510_v34, %v5514_v39  ;;  %v5494_v3 = vld [vmem:[#allocation20 + $0x3c8] sm:$0xff] }
 0x53e   :  { %8560 = vmatmul.mubr.bf16.vlgmr.msra.gmra.mxu0 %v12948_v15  ;;  %8601 = vmatmul.mubr.bf16.vlgmr.msra.gmra.mxu1 %v12950_v49  ;;  %v5498_v23 = vld [vmem:[#allocation20 + $0x3e8] sm:$0xff] }
 0x53f   :  { %8610 = vmatpush1.bf16.msra.mxu0 %v11067_v58  ;;  %8641 = vmatprep.mubr.bf16.mxu0 %v12922_v55  ;;  %v5506_v58 = vld [vmem:[#allocation20 + $0x428] sm:$0xff] }
 0x540   :  { %8651 = vmatpush1.bf16.msra.mxu1 %v11195_v60  ;;  %8682 = vmatprep.mubr.bf16.mxu1 %v12924_v48  ;;  %v11019_v60 = vcombine.low %v5382_v6, %v5386_v7  ;;  %v11140_v16 = vcombine.high %v5502_v2, %v5506_v58  ;;  %v5622_v21 = vld [vmem:[#allocation20 + $0x7c8] sm:$0xff] }
 0x541   :  { %8611 = vmatprep.subr.bf16.mxu0 %v11060_v51  ;;  %8652 = vmatprep.subr.bf16.mxu1 %v11188_v18  ;;  %v11147_v51 = vcombine.low %v5510_v34, %v5514_v39  ;;  %v11012_v18 = vcombine.high %v5374_v10, %v5378_v11  ;;  %v5486_v31 = vld [vmem:[#allocation20 + $0x388] sm:$0xff] }
 0x542   :  { %v5490_v33 = vld [vmem:[#allocation20 + $0x3a8] sm:$0xff] }
 0x543   :  { %8612 = vmatpush1.bf16.msra.mxu0 %v11059_v22  ;;  %v5626_v22 = vld [vmem:[#allocation20 + $0x7e8] sm:$0xff] }
 0x544   :  { %8653 = vmatpush1.bf16.msra.mxu1 %v11187_v4  ;;  %8613 = vmatprep.subr.bf16.mxu0 %v11052_v52  ;;  %v11011_v4 = vcombine.low %v5374_v10, %v5378_v11  ;;  %v11139_v52 = vcombine.low %v5502_v2, %v5506_v58  ;;  %v11260_v35 = vcombine.high %v5622_v21, %v5626_v22  ;;  %v5614_v47 = vld [vmem:[#allocation20 + $0x788] sm:$0xff] }
 0x545   :  { %8654 = vmatprep.subr.bf16.mxu1 %v11180_v26  ;;  %v11132_v26 = vcombine.high %v5494_v3, %v5498_v23  ;;  %v5478_v29 = vld [vmem:[#allocation20 + $0x348] sm:$0xff] }
 0x546   :  { %v5482_v63 = vld [vmem:[#allocation20 + $0x368] sm:$0xff] }
 0x547   :  { %8614 = vmatpush1.bf16.msra.mxu0 %v11051_v8  ;;  %v5618_v8 = vld [vmem:[#allocation20 + $0x7a8] sm:$0xff] }
 0x548   :  { %8655 = vmatpush1.bf16.msra.mxu1 %v11179_v9  ;;  %8615 = vmatprep.subr.bf16.mxu0 %v11044_v45  ;;  %v11131_v9 = vcombine.low %v5494_v3, %v5498_v23  ;;  %v11259_v45 = vcombine.low %v5622_v21, %v5626_v22  ;;  %v11252_v61 = vcombine.high %v5614_v47, %v5618_v8  ;;  %v5606_v42 = vld [vmem:[#allocation20 + $0x748] sm:$0xff] }
 0x549   :  { %8656 = vmatprep.subr.bf16.mxu1 %v11172_v53  ;;  %v11124_v53 = vcombine.high %v5486_v31, %v5490_v33  ;;  %v5470_v32 = vld [vmem:[#allocation20 + $0x308] sm:$0xff] }
 0x54a   :  { %v5474_v14 = vld [vmem:[#allocation20 + $0x328] sm:$0xff] }
 0x54b   :  { %8616 = vmatpush1.bf16.msra.mxu0 %v11043_v13  ;;  %v5610_v13 = vld [vmem:[#allocation20 + $0x768] sm:$0xff] }
 0x54c   :  { %8657 = vmatpush1.bf16.msra.mxu1 %v11171_v62  ;;  %8617 = vmatprep.subr.bf16.mxu0 %v11036_v59  ;;  %v11123_v62 = vcombine.low %v5486_v31, %v5490_v33  ;;  %v11251_v59 = vcombine.low %v5614_v47, %v5618_v8  ;;  %v11244_v17 = vcombine.high %v5606_v42, %v5610_v13  ;;  %v5598_v20 = vld [vmem:[#allocation20 + $0x708] sm:$0xff] }
 0x54d   :  { %8658 = vmatprep.subr.bf16.mxu1 %v11164_v37  ;;  %v11116_v37 = vcombine.high %v5478_v29, %v5482_v63  ;;  %v5462_v7 = vld [vmem:[#allocation20 + $0x2c8] sm:$0xff] }
 0x54e   :  { %v5466_v34 = vld [vmem:[#allocation20 + $0x2e8] sm:$0xff] }
 0x54f   :  { %8618 = vmatpush1.bf16.msra.mxu0 %v11035_v25  ;;  %v5602_v25 = vld [vmem:[#allocation20 + $0x728] sm:$0xff] }
 0x550   :  { %8659 = vmatpush1.bf16.msra.mxu1 %v11163_v1  ;;  %8619 = vmatprep.subr.bf16.mxu0 %v11028_v50  ;;  %v11115_v1 = vcombine.low %v5478_v29, %v5482_v63  ;;  %v11243_v50 = vcombine.low %v5606_v42, %v5610_v13  ;;  %v11236_v6 = vcombine.high %v5598_v20, %v5602_v25  ;;  %v5590_v39 = vld [vmem:[#allocation20 + $0x6c8] sm:$0xff] }
 0x551   :  { %8660 = vmatprep.subr.bf16.mxu1 %v11156_v5  ;;  %v11108_v5 = vcombine.high %v5470_v32, %v5474_v14  ;;  %v5454_v11 = vld [vmem:[#allocation20 + $0x288] sm:$0xff] }
 0x552   :  { %v5458_v2 = vld [vmem:[#allocation20 + $0x2a8] sm:$0xff] }
 0x553   :  { %8620 = vmatpush1.bf16.msra.mxu0 %v11027_v40  ;;  %v5594_v40 = vld [vmem:[#allocation20 + $0x6e8] sm:$0xff] }
 0x554   :  { %8661 = vmatpush1.bf16.msra.mxu1 %v11155_v41  ;;  %8621 = vmatprep.subr.bf16.mxu0 %v11020_v43  ;;  %v11107_v41 = vcombine.low %v5470_v32, %v5474_v14  ;;  %v11235_v43 = vcombine.low %v5598_v20, %v5602_v25  ;;  %v11228_v10 = vcombine.high %v5590_v39, %v5594_v40  ;;  %v5582_v58 = vld [vmem:[#allocation20 + $0x688] sm:$0xff] }
 0x555   :  { %8662 = vmatprep.subr.bf16.mxu1 %v11148_v44  ;;  %v11100_v44 = vcombine.high %v5462_v7, %v5466_v34  ;;  %v5446_v23 = vld [vmem:[#allocation20 + $0x248] sm:$0xff] }
 0x556   :  { %v5450_v21 = vld [vmem:[#allocation20 + $0x268] sm:$0xff] }
 0x557   :  { %8622 = vmatpush1.bf16.msra.mxu0 %v11019_v60  ;;  %v5586_v60 = vld [vmem:[#allocation20 + $0x6a8] sm:$0xff] }
 0x558   :  { %8663 = vmatpush1.bf16.msra.mxu1 %v11147_v51  ;;  %8623 = vmatprep.subr.bf16.mxu0 %v11012_v18  ;;  %v11099_v51 = vcombine.low %v5462_v7, %v5466_v34  ;;  %v11227_v18 = vcombine.low %v5590_v39, %v5594_v40  ;;  %v11220_v3 = vcombine.high %v5582_v58, %v5586_v60  ;;  %v5574_v22 = vld [vmem:[#allocation20 + $0x648] sm:$0xff] }
 0x559   :  { %8664 = vmatprep.subr.bf16.mxu1 %v11140_v16  ;;  %v11092_v16 = vcombine.high %v5454_v11, %v5458_v2  ;;  %v5438_v33 = vld [vmem:[#allocation20 + $0x208] sm:$0xff] }
 0x55a   :  { %v5442_v47 = vld [vmem:[#allocation20 + $0x228] sm:$0xff] }
 0x55b   :  { %8624 = vmatpush1.bf16.msra.mxu0 %v11011_v4  ;;  %v5578_v4 = vld [vmem:[#allocation20 + $0x668] sm:$0xff] }
 0x55c   :  { %8665 = vmatpush1.bf16.msra.mxu1 %v11139_v52  ;;  %8625 = vmatprep.subr.bf16.mxu0 %v11132_v26  ;;  %v11091_v52 = vcombine.low %v5454_v11, %v5458_v2  ;;  %v11219_v26 = vcombine.low %v5582_v58, %v5586_v60  ;;  %v11212_v31 = vcombine.high %v5574_v22, %v5578_v4  ;;  %v5566_v8 = vld [vmem:[#allocation20 + $0x608] sm:$0xff] }
 0x55d   :  { %8666 = vmatprep.subr.bf16.mxu1 %v11260_v35  ;;  %v11084_v35 = vcombine.high %v5446_v23, %v5450_v21  ;;  %v5686_v63 = vld [vmem:[#allocation20 + $0x9c8] sm:$0xff] }
 0x55e   :  { %v5690_v42 = vld [vmem:[#allocation20 + $0x9e8] sm:$0xff] }
 0x55f   :  { %8626 = vmatpush2.bf16.msra.mxu0 %v11131_v9  ;;  %v5570_v9 = vld [vmem:[#allocation20 + $0x628] sm:$0xff]  ;;  %v11323_v25 = vcombine.low %v5686_v63, %v5690_v42 }
 0x560   :  { %8667 = vmatpush2.bf16.msra.mxu1 %v11259_v45  ;;  %8627 = vmatprep.subr.bf16.mxu0 %v11124_v53  ;;  %v11083_v45 = vcombine.low %v5446_v23, %v5450_v21  ;;  %v11211_v53 = vcombine.low %v5574_v22, %v5578_v4  ;;  %v11204_v29 = vcombine.high %v5566_v8, %v5570_v9  ;;  %v5814_v13 = vld [vmem:[#allocation20 + $0xdc8] sm:$0xff] }
 0x561   :  { %8668 = vmatprep.subr.bf16.mxu1 %v11252_v61  ;;  %v11076_v61 = vcombine.high %v5438_v33, %v5442_v47  ;;  %v5678_v14 = vld [vmem:[#allocation20 + $0x988] sm:$0xff] }
 0x562   :  { %v5682_v20 = vld [vmem:[#allocation20 + $0x9a8] sm:$0xff] }
 0x563   :  { %8628 = vmatpush2.bf16.msra.mxu0 %v11123_v62  ;;  %v5818_v62 = vld [vmem:[#allocation20 + $0xde8] sm:$0xff] }
 0x564   :  { %8669 = vmatpush2.bf16.msra.mxu1 %v11251_v59  ;;  %8629 = vmatprep.subr.bf16.mxu0 %v11116_v37  ;;  %v11075_v59 = vcombine.low %v5438_v33, %v5442_v47  ;;  %v11203_v37 = vcombine.low %v5566_v8, %v5570_v9  ;;  %v11452_v32 = vcombine.high %v5814_v13, %v5818_v62  ;;  %v5670_v7 = vld [vmem:[#allocation20 + $0x948] sm:$0xff] }
 0x565   :  { %8670 = vmatprep.subr.bf16.mxu1 %v11244_v17  ;;  %v11324_v17 = vcombine.high %v5686_v63, %v5690_v42  ;;  %v5674_v34 = vld [vmem:[#allocation20 + $0x968] sm:$0xff] }
 0x566   :  { %v5798_v40 = vld [vmem:[#allocation20 + $0xd48] sm:$0xff] }
 0x567   :  { %8630 = vmatpush2.bf16.msra.mxu0 %v11115_v1  ;;  %v5806_v1 = vld [vmem:[#allocation20 + $0xd88] sm:$0xff] }
 0x568   :  { %8671 = vmatpush2.bf16.msra.mxu1 %v11243_v50  ;;  %8631 = vmatprep.subr.bf16.mxu0 %v11108_v5  ;;  %v5810_v50 = vld [vmem:[#allocation20 + $0xda8] sm:$0xff]  ;;  %v11451_v5 = vcombine.low %v5814_v13, %v5818_v62 }
 0x569   :  { %8672 = vmatprep.subr.bf16.mxu1 %v11236_v6  ;;  %v11316_v6 = vcombine.high %v5678_v14, %v5682_v20  ;;  %v11444_v39 = vcombine.high %v5806_v1, %v5810_v50  ;;  %v5662_v2 = vld [vmem:[#allocation20 + $0x908] sm:$0xff] }
 0x56a   :  { %v5666_v58 = vld [vmem:[#allocation20 + $0x928] sm:$0xff] }
 0x56b   :  { %8632 = vmatpush2.bf16.msra.mxu0 %v11107_v41  ;;  %v5802_v41 = vld [vmem:[#allocation20 + $0xd68] sm:$0xff] }
 0x56c   :  { %8673 = vmatpush2.bf16.msra.mxu1 %v11235_v43  ;;  %8633 = vmatprep.subr.bf16.mxu0 %v11100_v44  ;;  %v11315_v43 = vcombine.low %v5678_v14, %v5682_v20  ;;  %v11443_v44 = vcombine.low %v5806_v1, %v5810_v50  ;;  %v11436_v11 = vcombine.high %v5798_v40, %v5802_v41  ;;  %v5790_v60 = vld [vmem:[#allocation20 + $0xd08] sm:$0xff] }
 0x56d   :  { %8674 = vmatprep.subr.bf16.mxu1 %v11228_v10  ;;  %v11308_v10 = vcombine.high %v5670_v7, %v5674_v34  ;;  %v5654_v21 = vld [vmem:[#allocation20 + $0x8c8] sm:$0xff] }
 0x56e   :  { %v5658_v22 = vld [vmem:[#allocation20 + $0x8e8] sm:$0xff] }
 0x56f   :  { %8634 = vmatpush2.bf16.msra.mxu0 %v11099_v51  ;;  %v5794_v51 = vld [vmem:[#allocation20 + $0xd28] sm:$0xff] }
 0x570   :  { %8675 = vmatpush2.bf16.msra.mxu1 %v11227_v18  ;;  %8635 = vmatprep.subr.bf16.mxu0 %v11092_v16  ;;  %v11307_v18 = vcombine.low %v5670_v7, %v5674_v34  ;;  %v11435_v16 = vcombine.low %v5798_v40, %v5802_v41  ;;  %v11428_v23 = vcombine.high %v5790_v60, %v5794_v51  ;;  %v5782_v4 = vld [vmem:[#allocation20 + $0xcc8] sm:$0xff] }
 0x571   :  { %8676 = vmatprep.subr.bf16.mxu1 %v11220_v3  ;;  %v11300_v3 = vcombine.high %v5662_v2, %v5666_v58  ;;  %v5646_v47 = vld [vmem:[#allocation20 + $0x888] sm:$0xff] }
 0x572   :  { %v5650_v8 = vld [vmem:[#allocation20 + $0x8a8] sm:$0xff] }
 0x573   :  { %8636 = vmatpush2.bf16.msra.mxu0 %v11091_v52  ;;  %v5786_v52 = vld [vmem:[#allocation20 + $0xce8] sm:$0xff] }
 0x574   :  { %8677 = vmatpush2.bf16.msra.mxu1 %v11219_v26  ;;  %8637 = vmatprep.subr.bf16.mxu0 %v11084_v35  ;;  %v11299_v26 = vcombine.low %v5662_v2, %v5666_v58  ;;  %v11427_v35 = vcombine.low %v5790_v60, %v5794_v51  ;;  %v11420_v33 = vcombine.high %v5782_v4, %v5786_v52  ;;  %v5774_v9 = vld [vmem:[#allocation20 + $0xc88] sm:$0xff] }
 0x575   :  { %8678 = vmatprep.subr.bf16.mxu1 %v11212_v31  ;;  %v11292_v31 = vcombine.high %v5654_v21, %v5658_v22  ;;  %v5638_v42 = vld [vmem:[#allocation20 + $0x848] sm:$0xff] }
 0x576   :  { %v5642_v13 = vld [vmem:[#allocation20 + $0x868] sm:$0xff] }
 0x577   :  { %8638 = vmatpush2.bf16.msra.mxu0 %v11083_v45  ;;  %v5778_v45 = vld [vmem:[#allocation20 + $0xca8] sm:$0xff] }
 0x578   :  { %8679 = vmatpush2.bf16.msra.mxu1 %v11211_v53  ;;  %8639 = vmatprep.subr.bf16.mxu0 %v11076_v61  ;;  %v11291_v53 = vcombine.low %v5654_v21, %v5658_v22  ;;  %v11419_v61 = vcombine.low %v5782_v4, %v5786_v52  ;;  %v11412_v63 = vcombine.high %v5774_v9, %v5778_v45  ;;  %v5766_v62 = vld [vmem:[#allocation20 + $0xc48] sm:$0xff] }
 0x579   :  { %8680 = vmatprep.subr.bf16.mxu1 %v11204_v29  ;;  %v11284_v29 = vcombine.high %v5646_v47, %v5650_v8  ;;  %v5630_v20 = vld [vmem:[#allocation20 + $0x808] sm:$0xff] }
 0x57a   :  { %v5758_v1 = vld [vmem:[#allocation20 + $0xc08] sm:$0xff] }
 0x57b   :  { %8640 = vmatpush2.bf16.msra.mxu0 %v11075_v59  ;;  %v5770_v59 = vld [vmem:[#allocation20 + $0xc68] sm:$0xff] }
 0x57c   :  { %8681 = vmatpush2.bf16.msra.mxu1 %v11203_v37  ;;  %8691 = vmatprep.subr.bf16.mxu0 %v11324_v17  ;;  %v11283_v37 = vcombine.low %v5646_v47, %v5650_v8  ;;  %v11411_v17 = vcombine.low %v5774_v9, %v5778_v45  ;;  %v11404_v14 = vcombine.high %v5766_v62, %v5770_v59  ;;  %v5762_v50 = vld [vmem:[#allocation20 + $0xc28] sm:$0xff] }
 0x57d   :  { %8732 = vmatprep.subr.bf16.mxu1 %v11452_v32  ;;  %v11276_v32 = vcombine.high %v5638_v42, %v5642_v13  ;;  %v11396_v34 = vcombine.high %v5758_v1, %v5762_v50  ;;  %v5754_v40 = vld [vmem:[#allocation20 + $0xbe8] sm:$0xff] }
 0x57e   :  { %8642 = vmatmul.mubr.bf16.vlgmr.msra.gmra.mxu0 %v12926_v27  ;;  %v5878_v41 = vld [vmem:[#allocation20 + $0xfc8] sm:$0xff] }
 0x57f   :  { %8683 = vmatmul.mubr.bf16.vlgmr.msra.gmra.mxu1 %v12928_v30  ;;  %8692 = vmatpush1.bf16.msra.mxu0 %v11323_v25  ;;  %v5634_v25 = vld [vmem:[#allocation20 + $0x828] sm:$0xff] }
 0x580   :  { %8723 = vmatprep.mubr.bf16.mxu0 %v12934_v12  ;;  %8733 = vmatpush1.bf16.msra.mxu1 %v11451_v5  ;;  %v11275_v5 = vcombine.low %v5638_v42, %v5642_v13  ;;  %v11268_v7 = vcombine.high %v5630_v20, %v5634_v25  ;;  %v5742_v58 = vld [vmem:[#allocation20 + $0xb88] sm:$0xff] }
 0x581   :  { %8764 = vmatprep.mubr.bf16.mxu1 %v12936_v36  ;;  %8693 = vmatprep.subr.bf16.mxu0 %v11316_v6  ;;  %v11403_v6 = vcombine.low %v5766_v62, %v5770_v59  ;;  %v5746_v60 = vld [vmem:[#allocation20 + $0xba8] sm:$0xff] }
 0x582   :  { %8734 = vmatprep.subr.bf16.mxu1 %v11444_v39  ;;  %v5750_v39 = vld [vmem:[#allocation20 + $0xbc8] sm:$0xff] }
 0x583   :  { %8694 = vmatpush1.bf16.msra.mxu0 %v11315_v43  ;;  %v5882_v43 = vld [vmem:[#allocation20 + $0xfe8] sm:$0xff] }
 0x584   :  { %8735 = vmatpush1.bf16.msra.mxu1 %v11443_v44  ;;  %8695 = vmatprep.subr.bf16.mxu0 %v11308_v10  ;;  %v11267_v44 = vcombine.low %v5630_v20, %v5634_v25  ;;  %v11395_v10 = vcombine.low %v5758_v1, %v5762_v50  ;;  %v11516_v2 = vcombine.high %v5878_v41, %v5882_v43  ;;  %v5870_v51 = vld [vmem:[#allocation20 + $0xf88] sm:$0xff] }
 0x585   :  { %8736 = vmatprep.subr.bf16.mxu1 %v11436_v11  ;;  %v11388_v11 = vcombine.high %v5750_v39, %v5754_v40  ;;  %v5734_v22 = vld [vmem:[#allocation20 + $0xb48] sm:$0xff] }
 0x586   :  { %v5738_v4 = vld [vmem:[#allocation20 + $0xb68] sm:$0xff] }
 0x587   :  { %8696 = vmatpush1.bf16.msra.mxu0 %v11307_v18  ;;  %v5874_v18 = vld [vmem:[#allocation20 + $0xfa8] sm:$0xff] }
 0x588   :  { %8737 = vmatpush1.bf16.msra.mxu1 %v11435_v16  ;;  %8697 = vmatprep.subr.bf16.mxu0 %v11300_v3  ;;  %v11387_v16 = vcombine.low %v5750_v39, %v5754_v40  ;;  %v11515_v3 = vcombine.low %v5878_v41, %v5882_v43  ;;  %v11508_v21 = vcombine.high %v5870_v51, %v5874_v18  ;;  %v5862_v52 = vld [vmem:[#allocation20 + $0xf48] sm:$0xff] }
 0x589   :  { %8738 = vmatprep.subr.bf16.mxu1 %v11428_v23  ;;  %v11380_v23 = vcombine.high %v5742_v58, %v5746_v60  ;;  %v5726_v8 = vld [vmem:[#allocation20 + $0xb08] sm:$0xff] }
 0x58a   :  { %v5730_v9 = vld [vmem:[#allocation20 + $0xb28] sm:$0xff] }
 0x58b   :  { %8698 = vmatpush1.bf16.msra.mxu0 %v11299_v26  ;;  %v5866_v26 = vld [vmem:[#allocation20 + $0xf68] sm:$0xff] }
 0x58c   :  { %8739 = vmatpush1.bf16.msra.mxu1 %v11427_v35  ;;  %8699 = vmatprep.subr.bf16.mxu0 %v11292_v31  ;;  %v11379_v35 = vcombine.low %v5742_v58, %v5746_v60  ;;  %v11507_v31 = vcombine.low %v5870_v51, %v5874_v18  ;;  %v11500_v47 = vcombine.high %v5862_v52, %v5866_v26  ;;  %v5854_v45 = vld [vmem:[#allocation20 + $0xf08] sm:$0xff] }
 0x58d   :  { %8740 = vmatprep.subr.bf16.mxu1 %v11420_v33  ;;  %v11372_v33 = vcombine.high %v5734_v22, %v5738_v4  ;;  %v5718_v13 = vld [vmem:[#allocation20 + $0xac8] sm:$0xff] }
 0x58e   :  { %v5722_v62 = vld [vmem:[#allocation20 + $0xae8] sm:$0xff] }
 0x58f   :  { %8700 = vmatpush1.bf16.msra.mxu0 %v11291_v53  ;;  %v5858_v53 = vld [vmem:[#allocation20 + $0xf28] sm:$0xff] }
 0x590   :  { %8741 = vmatpush1.bf16.msra.mxu1 %v11419_v61  ;;  %8701 = vmatprep.subr.bf16.mxu0 %v11284_v29  ;;  %v11371_v61 = vcombine.low %v5734_v22, %v5738_v4  ;;  %v11499_v29 = vcombine.low %v5862_v52, %v5866_v26  ;;  %v11492_v42 = vcombine.high %v5854_v45, %v5858_v53  ;;  %v5846_v59 = vld [vmem:[#allocation20 + $0xec8] sm:$0xff]  ;;  %v5431_v4 = vld [vmem:[#allocation20 + $0x1d0] sm:$0xff] }
 0x591   :  { %8742 = vmatprep.subr.bf16.mxu1 %v11412_v63  ;;  %v11364_v63 = vcombine.high %v5726_v8, %v5730_v9  ;;  %v5710_v25 = vld [vmem:[#allocation20 + $0xa88] sm:$0xff]  ;;  %v5435_v52 = vld [vmem:[#allocation20 + $0x1f0] sm:$0xff] }
 0x592   :  { %v5714_v1 = vld [vmem:[#allocation20 + $0xaa8] sm:$0xff]  ;;  %v5559_v26 = vld [vmem:[#allocation20 + $0x5d0] sm:$0xff] }
 0x593   :  { %8702 = vmatpush1.bf16.msra.mxu0 %v11283_v37  ;;  %v5850_v37 = vld [vmem:[#allocation20 + $0xee8] sm:$0xff] }
 0x594   :  { %8743 = vmatpush1.bf16.msra.mxu1 %v11411_v17  ;;  %8703 = vmatprep.subr.bf16.mxu0 %v11276_v32  ;;  %v11363_v17 = vcombine.low %v5726_v8, %v5730_v9  ;;  %v11491_v32 = vcombine.low %v5854_v45, %v5858_v53  ;;  %v11484_v20 = vcombine.high %v5846_v59, %v5850_v37  ;;  %v5838_v50 = vld [vmem:[#allocation20 + $0xe88] sm:$0xff]  ;;  %v5423_v9 = vld [vmem:[#allocation20 + $0x190] sm:$0xff] }
 0x595   :  { %8744 = vmatprep.subr.bf16.mxu1 %v11404_v14  ;;  %v11356_v14 = vcombine.high %v5718_v13, %v5722_v62  ;;  %v5702_v40 = vld [vmem:[#allocation20 + $0xa48] sm:$0xff]  ;;  %v5427_v45 = vld [vmem:[#allocation20 + $0x1b0] sm:$0xff]  ;;  %v11069_v53 = vcombine.low %v5431_v4, %v5435_v52 }
 0x596   :  { %v5706_v41 = vld [vmem:[#allocation20 + $0xa68] sm:$0xff] }
 0x597   :  { %8704 = vmatpush1.bf16.msra.mxu0 %v11275_v5  ;;  %v5842_v5 = vld [vmem:[#allocation20 + $0xea8] sm:$0xff] }
 0x598   :  { %8745 = vmatpush1.bf16.msra.mxu1 %v11403_v6  ;;  %8705 = vmatprep.subr.bf16.mxu0 %v11268_v7  ;;  %v11355_v6 = vcombine.low %v5718_v13, %v5722_v62  ;;  %v11483_v7 = vcombine.low %v5846_v59, %v5850_v37  ;;  %v11476_v39 = vcombine.high %v5838_v50, %v5842_v5  ;;  %v5830_v43 = vld [vmem:[#allocation20 + $0xe48] sm:$0xff]  ;;  %v5415_v13 = vld [vmem:[#allocation20 + $0x150] sm:$0xff] }
 0x599   :  { %8746 = vmatprep.subr.bf16.mxu1 %v11396_v34  ;;  %v11348_v34 = vcombine.high %v5710_v25, %v5714_v1  ;;  %v5694_v60 = vld [vmem:[#allocation20 + $0xa08] sm:$0xff]  ;;  %v5419_v62 = vld [vmem:[#allocation20 + $0x170] sm:$0xff] }
 0x59a   :  { %v5698_v51 = vld [vmem:[#allocation20 + $0xa28] sm:$0xff] }
 0x59b   :  { %8706 = vmatpush1.bf16.msra.mxu0 %v11267_v44  ;;  %v5834_v44 = vld [vmem:[#allocation20 + $0xe68] sm:$0xff] }
 0x59c   :  { %8747 = vmatpush1.bf16.msra.mxu1 %v11395_v10  ;;  %8707 = vmatprep.subr.bf16.mxu0 %v11388_v11  ;;  %v11347_v10 = vcombine.low %v5710_v25, %v5714_v1  ;;  %v11475_v11 = vcombine.low %v5838_v50, %v5842_v5  ;;  %v11468_v58 = vcombine.high %v5830_v43, %v5834_v44  ;;  %v5822_v18 = vld [vmem:[#allocation20 + $0xe08] sm:$0xff] }
 0x59d   :  { %8748 = vmatprep.subr.bf16.mxu1 %v11516_v2  ;;  %v11340_v2 = vcombine.high %v5702_v40, %v5706_v41  ;;  %v11061_v25 = vcombine.low %v5423_v9, %v5427_v45 }
 0x59f   :  { %8708 = vmatpush2.bf16.msra.mxu0 %v11387_v16  ;;  %v5826_v16 = vld [vmem:[#allocation20 + $0xe28] sm:$0xff] }
 0x5a0   :  { %8749 = vmatpush2.bf16.msra.mxu1 %v11515_v3  ;;  %8709 = vmatprep.subr.bf16.mxu0 %v11380_v23  ;;  %v11339_v3 = vcombine.low %v5702_v40, %v5706_v41  ;;  %v11467_v23 = vcombine.low %v5830_v43, %v5834_v44  ;;  %v11460_v22 = vcombine.high %v5822_v18, %v5826_v16  ;;  %v5411_v40 = vld [vmem:[#allocation20 + $0x130] sm:$0xff] }
 0x5a1   :  { %8750 = vmatprep.subr.bf16.mxu1 %v11508_v21  ;;  %v11332_v21 = vcombine.high %v5694_v60, %v5698_v51  ;;  %v5535_v44 = vld [vmem:[#allocation20 + $0x510] sm:$0xff] }
 0x5a3   :  { %8710 = vmatpush2.bf16.msra.mxu0 %v11379_v35  ;;  %v5563_v35 = vld [vmem:[#allocation20 + $0x5f0] sm:$0xff] }
 0x5a4   :  { %8751 = vmatpush2.bf16.msra.mxu1 %v11507_v31  ;;  %8711 = vmatprep.subr.bf16.mxu0 %v11372_v33  ;;  %v11331_v31 = vcombine.low %v5694_v60, %v5698_v51  ;;  %v11459_v33 = vcombine.low %v5822_v18, %v5826_v16  ;;  %v11198_v8 = vcombine.high %v5559_v26, %v5563_v35  ;;  %v5399_v16 = vld [vmem:[#allocation20 + $0xd0] sm:$0xff] }
 0x5a5   :  { %8752 = vmatprep.subr.bf16.mxu1 %v11500_v47  ;;  %v11070_v47 = vcombine.high %v5431_v4, %v5435_v52 }
 0x5a7   :  { %8712 = vmatpush2.bf16.msra.mxu0 %v11371_v61  ;;  %v5551_v61 = vld [vmem:[#allocation20 + $0x590] sm:$0xff] }
 0x5a8   :  { %8753 = vmatpush2.bf16.msra.mxu1 %v11499_v29  ;;  %8713 = vmatprep.subr.bf16.mxu0 %v11364_v63  ;;  %v5555_v29 = vld [vmem:[#allocation20 + $0x5b0] sm:$0xff]  ;;  %v11197_v63 = vcombine.low %v5559_v26, %v5563_v35 }
 0x5a9   :  { %8754 = vmatprep.subr.bf16.mxu1 %v11492_v42  ;;  %v11062_v42 = vcombine.high %v5423_v9, %v5427_v45  ;;  %v11189_v5 = vcombine.low %v5551_v61, %v5555_v29  ;;  %v5391_v35 = vld [vmem:[#allocation20 + $0x90] sm:$0xff] }
 0x5ab   :  { %8714 = vmatpush2.bf16.msra.mxu0 %v11363_v17  ;;  %v11190_v17 = vcombine.high %v5551_v61, %v5555_v29  ;;  %v5383_v61 = vld [vmem:[#allocation20 + $0x50] sm:$0xff] }
 0x5ac   :  { %8755 = vmatpush2.bf16.msra.mxu1 %v11491_v32  ;;  %8715 = vmatprep.subr.bf16.mxu0 %v11356_v14  ;;  %v5543_v32 = vld [vmem:[#allocation20 + $0x550] sm:$0xff] }
 0x5ad   :  { %8756 = vmatprep.subr.bf16.mxu1 %v11484_v20  ;;  %v5547_v14 = vld [vmem:[#allocation20 + $0x570] sm:$0xff] }
 0x5ae   :  { %v11181_v60 = vcombine.low %v5543_v32, %v5547_v14  ;;  %v5387_v29 = vld [vmem:[#allocation20 + $0x70] sm:$0xff] }
 0x5af   :  { %8716 = vmatpush2.bf16.msra.mxu0 %v11355_v6  ;;  %v11054_v6 = vcombine.high %v5415_v13, %v5419_v62 }
 0x5b0   :  { %8757 = vmatpush2.bf16.msra.mxu1 %v11483_v7  ;;  %8717 = vmatprep.subr.bf16.mxu0 %v11348_v34  ;;  %v11182_v34 = vcombine.high %v5543_v32, %v5547_v14  ;;  %v5379_v32 = vld [vmem:[#allocation20 + $0x30] sm:$0xff] }
 0x5b1   :  { %8758 = vmatprep.subr.bf16.mxu1 %v11476_v39  ;;  %v5407_v39 = vld [vmem:[#allocation20 + $0x110] sm:$0xff] }
 0x5b2   :  { %v11046_v51 = vcombine.high %v5407_v39, %v5411_v40  ;;  %v5503_v14 = vld [vmem:[#allocation20 + $0x410] sm:$0xff] }
 0x5b3   :  { %8718 = vmatpush2.bf16.msra.mxu0 %v11347_v10  ;;  %v5539_v10 = vld [vmem:[#allocation20 + $0x530] sm:$0xff] }
 0x5b4   :  { %8759 = vmatpush2.bf16.msra.mxu1 %v11475_v11  ;;  %8719 = vmatprep.subr.bf16.mxu0 %v11340_v2  ;;  %v11053_v11 = vcombine.low %v5415_v13, %v5419_v62  ;;  %v11174_v18 = vcombine.high %v5535_v44, %v5539_v10  ;;  %v11173_v4 = vcombine.low %v5535_v44, %v5539_v10 }
 0x5b5   :  { %8760 = vmatprep.subr.bf16.mxu1 %v11468_v58 }
 0x5b7   :  { %8720 = vmatpush2.bf16.msra.mxu0 %v11339_v3  ;;  %v5403_v3 = vld [vmem:[#allocation20 + $0xf0] sm:$0xff] }
 0x5b8   :  { %8761 = vmatpush2.bf16.msra.mxu1 %v11467_v23  ;;  %8721 = vmatprep.subr.bf16.mxu0 %v11332_v21  ;;  %v5527_v23 = vld [vmem:[#allocation20 + $0x4d0] sm:$0xff]  ;;  %v11038_v52 = vcombine.high %v5399_v16, %v5403_v3 }
 0x5b9   :  { %8762 = vmatprep.subr.bf16.mxu1 %v11460_v22  ;;  %v5531_v21 = vld [vmem:[#allocation20 + $0x4f0] sm:$0xff]  ;;  %v11045_v22 = vcombine.low %v5407_v39, %v5411_v40 }
 0x5ba   :  { %v11166_v26 = vcombine.high %v5527_v23, %v5531_v21  ;;  %v11165_v9 = vcombine.low %v5527_v23, %v5531_v21  ;;  %v5499_v39 = vld [vmem:[#allocation20 + $0x3f0] sm:$0xff] }
 0x5bb   :  { %8722 = vmatpush2.bf16.msra.mxu0 %v11331_v31  ;;  %v5395_v31 = vld [vmem:[#allocation20 + $0xb0] sm:$0xff] }
 0x5bc   :  { %8763 = vmatpush2.bf16.msra.mxu1 %v11459_v33  ;;  %8773 = vmatprep.subr.bf16.mxu0 %v11070_v47  ;;  %v5519_v33 = vld [vmem:[#allocation20 + $0x490] sm:$0xff]  ;;  %v11030_v45 = vcombine.high %v5391_v35, %v5395_v31  ;;  %v11029_v13 = vcombine.low %v5391_v35, %v5395_v31 }
 0x5bd   :  { %8814 = vmatprep.subr.bf16.mxu1 %v11198_v8  ;;  %v5523_v47 = vld [vmem:[#allocation20 + $0x4b0] sm:$0xff]  ;;  %v11037_v8 = vcombine.low %v5399_v16, %v5403_v3 }
 0x5be   :  { %8724 = vmatmul.mubr.bf16.vlgmr.msra.gmra.mxu0 %v12948_v15  ;;  %v8479_v59 = vpop.f32.mrf.mxu0  ;;  %v8520_v37 = vpop.f32.mrf.mxu1  ;;  %v11157_v62 = vcombine.low %v5519_v33, %v5523_v47  ;;  %v5623_v40 = vld [vmem:[#allocation20 + $0x7d0] sm:$0xff] }
 0x5bf   :  { %8765 = vmatmul.mubr.bf16.vlgmr.msra.gmra.mxu1 %v12950_v49  ;;  %v12962_v20 = vadd.f32 %v8520_v37, %v8479_v59  ;;  %8774 = vmatpush1.bf16.msra.mxu0 %v11069_v53  ;;  %v11158_v53 = vcombine.high %v5519_v33, %v5523_v47  ;;  %v11022_v59 = vcombine.high %v5383_v61, %v5387_v29  ;;  %v5479_v21 = vld [vmem:[#allocation20 + $0x350] sm:$0xff] }
 0x5c0   :  { %8805 = vmatprep.mubr.bf16.mxu0 %v12922_v55  ;;  %8815 = vmatpush1.bf16.msra.mxu1 %v11197_v63  ;;  %v8481_v1 = vpop.f32.mrf.mxu0  ;;  %v8522_v50 = vpop.f32.mrf.mxu1  ;;  %v5511_v63 = vld [vmem:[#allocation20 + $0x450] sm:$0xff] }
 0x5c1   :  { %8846 = vmatprep.mubr.bf16.mxu1 %v12924_v48  ;;  %v12966_v7 = vadd.f32 %v8522_v50, %v8481_v1  ;;  %8775 = vmatprep.subr.bf16.mxu0 %v11062_v42  ;;  %v5515_v42 = vld [vmem:[#allocation20 + $0x470] sm:$0xff]  ;;  %v11021_v1 = vcombine.low %v5383_v61, %v5387_v29 }
 0x5c2   :  { %8816 = vmatprep.subr.bf16.mxu1 %v11190_v17  ;;  %v8483_v41 = vpop.f32.mrf.mxu0  ;;  %v8524_v43 = vpop.f32.mrf.mxu1  ;;  %v11150_v37 = vcombine.high %v5511_v63, %v5515_v42  ;;  %v5375_v17 = vld [vmem:[#allocation20 + $0x10] sm:$0xff]  ;;  %v11149_v50 = vcombine.low %v5511_v63, %v5515_v42 }
 0x5c3   :  { %8776 = vmatpush1.bf16.msra.mxu0 %v11061_v25  ;;  %v5507_v25 = vld [vmem:[#allocation20 + $0x430] sm:$0xff]  ;;  %v11013_v43 = vcombine.low %v5375_v17, %v5379_v32 }
 0x5c4   :  { %8817 = vmatpush1.bf16.msra.mxu1 %v11189_v5  ;;  %v8484_v2 = vpop.f32.mrf.mxu0  ;;  %v8525_v58 = vpop.f32.mrf.mxu1  ;;  %8777 = vmatprep.subr.bf16.mxu0 %v11054_v6  ;;  %v11014_v5 = vcombine.high %v5375_v17, %v5379_v32  ;;  %v11142_v6 = vcombine.high %v5503_v14, %v5507_v25  ;;  %v5627_v41 = vld [vmem:[#allocation20 + $0x7f0] sm:$0xff]  ;;  %v11141_v44 = vcombine.low %v5503_v14, %v5507_v25 }
 0x5c5   :  { %8818 = vmatprep.subr.bf16.mxu1 %v11182_v34  ;;  %v5495_v34 = vld [vmem:[#allocation20 + $0x3d0] sm:$0xff]  ;;  %v11261_v16 = vcombine.low %v5623_v40, %v5627_v41 }
 0x5c6   :  { %v11134_v10 = vcombine.high %v5495_v34, %v5499_v39  ;;  %v5487_v2 = vld [vmem:[#allocation20 + $0x390] sm:$0xff] }
 0x5c7   :  { %8778 = vmatpush1.bf16.msra.mxu0 %v11053_v11  ;;  %v11262_v11 = vcombine.high %v5623_v40, %v5627_v41  ;;  %v5491_v58 = vld [vmem:[#allocation20 + $0x3b0] sm:$0xff] }
 0x5c8   :  { %8819 = vmatpush1.bf16.msra.mxu1 %v11181_v60  ;;  %8779 = vmatprep.subr.bf16.mxu0 %v11046_v51  ;;  %v5615_v60 = vld [vmem:[#allocation20 + $0x790] sm:$0xff]  ;;  %v11126_v3 = vcombine.high %v5487_v2, %v5491_v58 }
 0x5c9   :  { %8820 = vmatprep.subr.bf16.mxu1 %v11174_v18  ;;  %v5619_v51 = vld [vmem:[#allocation20 + $0x7b0] sm:$0xff]  ;;  %v11133_v18 = vcombine.low %v5495_v34, %v5499_v39 }
 0x5ca   :  { %v11254_v23 = vcombine.high %v5615_v60, %v5619_v51  ;;  %v11253_v35 = vcombine.low %v5615_v60, %v5619_v51  ;;  %v5471_v47 = vld [vmem:[#allocation20 + $0x310] sm:$0xff] }
 0x5cb   :  { %8780 = vmatpush1.bf16.msra.mxu0 %v11045_v22  ;;  %v5483_v22 = vld [vmem:[#allocation20 + $0x370] sm:$0xff] }
 0x5cc   :  { %8821 = vmatpush1.bf16.msra.mxu1 %v11173_v4  ;;  %8781 = vmatprep.subr.bf16.mxu0 %v11038_v52  ;;  %v5607_v4 = vld [vmem:[#allocation20 + $0x750] sm:$0xff]  ;;  %v11118_v31 = vcombine.high %v5479_v21, %v5483_v22 }
 0x5cd   :  { %8822 = vmatprep.subr.bf16.mxu1 %v11166_v26  ;;  %v5611_v52 = vld [vmem:[#allocation20 + $0x770] sm:$0xff]  ;;  %v11125_v26 = vcombine.low %v5487_v2, %v5491_v58 }
 0x5ce   :  { %v11246_v33 = vcombine.high %v5607_v4, %v5611_v52  ;;  %v11245_v61 = vcombine.low %v5607_v4, %v5611_v52  ;;  %v5463_v42 = vld [vmem:[#allocation20 + $0x2d0] sm:$0xff] }
 0x5cf   :  { %8782 = vmatpush1.bf16.msra.mxu0 %v11037_v8  ;;  %v5475_v8 = vld [vmem:[#allocation20 + $0x330] sm:$0xff] }
 0x5d0   :  { %8823 = vmatpush1.bf16.msra.mxu1 %v11165_v9  ;;  %8783 = vmatprep.subr.bf16.mxu0 %v11030_v45  ;;  %v5599_v9 = vld [vmem:[#allocation20 + $0x710] sm:$0xff]  ;;  %v11110_v29 = vcombine.high %v5471_v47, %v5475_v8 }
 0x5d1   :  { %8824 = vmatprep.subr.bf16.mxu1 %v11158_v53  ;;  %v5603_v45 = vld [vmem:[#allocation20 + $0x730] sm:$0xff]  ;;  %v11117_v53 = vcombine.low %v5479_v21, %v5483_v22 }
 0x5d2   :  { %v11238_v63 = vcombine.high %v5599_v9, %v5603_v45  ;;  %v11237_v17 = vcombine.low %v5599_v9, %v5603_v45  ;;  %v5455_v25 = vld [vmem:[#allocation20 + $0x290] sm:$0xff] }
 0x5d3   :  { %8784 = vmatpush1.bf16.msra.mxu0 %v11029_v13  ;;  %v5467_v13 = vld [vmem:[#allocation20 + $0x2f0] sm:$0xff] }
 0x5d4   :  { %8825 = vmatpush1.bf16.msra.mxu1 %v11157_v62  ;;  %8785 = vmatprep.subr.bf16.mxu0 %v11022_v59  ;;  %v5591_v62 = vld [vmem:[#allocation20 + $0x6d0] sm:$0xff]  ;;  %v11102_v32 = vcombine.high %v5463_v42, %v5467_v13 }
 0x5d5   :  { %8826 = vmatprep.subr.bf16.mxu1 %v11150_v37  ;;  %v5595_v59 = vld [vmem:[#allocation20 + $0x6f0] sm:$0xff]  ;;  %v11109_v37 = vcombine.low %v5471_v47, %v5475_v8 }
 0x5d6   :  { %v11230_v14 = vcombine.high %v5591_v62, %v5595_v59  ;;  %v11229_v34 = vcombine.low %v5591_v62, %v5595_v59  ;;  %v5447_v41 = vld [vmem:[#allocation20 + $0x250] sm:$0xff] }
 0x5d7   :  { %8786 = vmatpush1.bf16.msra.mxu0 %v11021_v1  ;;  %v5459_v1 = vld [vmem:[#allocation20 + $0x2b0] sm:$0xff] }
 0x5d8   :  { %8827 = vmatpush1.bf16.msra.mxu1 %v11149_v50  ;;  %8787 = vmatprep.subr.bf16.mxu0 %v11014_v5  ;;  %v5583_v50 = vld [vmem:[#allocation20 + $0x690] sm:$0xff]  ;;  %v11094_v39 = vcombine.high %v5455_v25, %v5459_v1 }
 0x5d9   :  { %8828 = vmatprep.subr.bf16.mxu1 %v11142_v6  ;;  %v5587_v5 = vld [vmem:[#allocation20 + $0x6b0] sm:$0xff]  ;;  %v11101_v6 = vcombine.low %v5463_v42, %v5467_v13 }
 0x5da   :  { %v11222_v40 = vcombine.high %v5583_v50, %v5587_v5  ;;  %v11221_v2 = vcombine.low %v5583_v50, %v5587_v5  ;;  %v5439_v51 = vld [vmem:[#allocation20 + $0x210] sm:$0xff] }
 0x5db   :  { %8788 = vmatpush1.bf16.msra.mxu0 %v11013_v43  ;;  %v5451_v43 = vld [vmem:[#allocation20 + $0x270] sm:$0xff] }
 0x5dc   :  { %8829 = vmatpush1.bf16.msra.mxu1 %v11141_v44  ;;  %8789 = vmatprep.subr.bf16.mxu0 %v11134_v10  ;;  %v5575_v44 = vld [vmem:[#allocation20 + $0x650] sm:$0xff]  ;;  %v11086_v58 = vcombine.high %v5447_v41, %v5451_v43 }
 0x5dd   :  { %8830 = vmatprep.subr.bf16.mxu1 %v11262_v11  ;;  %v5579_v10 = vld [vmem:[#allocation20 + $0x670] sm:$0xff]  ;;  %v11093_v11 = vcombine.low %v5455_v25, %v5459_v1 }
 0x5de   :  { %v11214_v60 = vcombine.high %v5575_v44, %v5579_v10  ;;  %v11213_v21 = vcombine.low %v5575_v44, %v5579_v10  ;;  %v5687_v52 = vld [vmem:[#allocation20 + $0x9d0] sm:$0xff] }
 0x5df   :  { %8790 = vmatpush2.bf16.msra.mxu0 %v11133_v18  ;;  %v5443_v18 = vld [vmem:[#allocation20 + $0x230] sm:$0xff] }
 0x5e0   :  { %8831 = vmatpush2.bf16.msra.mxu1 %v11261_v16  ;;  %8791 = vmatprep.subr.bf16.mxu0 %v11126_v3  ;;  %v5567_v16 = vld [vmem:[#allocation20 + $0x610] sm:$0xff]  ;;  %v11078_v22 = vcombine.high %v5439_v51, %v5443_v18 }
 0x5e1   :  { %8832 = vmatprep.subr.bf16.mxu1 %v11254_v23  ;;  %v5571_v3 = vld [vmem:[#allocation20 + $0x630] sm:$0xff]  ;;  %v11085_v23 = vcombine.low %v5447_v41, %v5451_v43 }
 0x5e2   :  { %v11206_v4 = vcombine.high %v5567_v16, %v5571_v3  ;;  %v11205_v47 = vcombine.low %v5567_v16, %v5571_v3  ;;  %v5679_v45 = vld [vmem:[#allocation20 + $0x990] sm:$0xff] }
 0x5e3   :  { %8792 = vmatpush2.bf16.msra.mxu0 %v11125_v26  ;;  %v5691_v26 = vld [vmem:[#allocation20 + $0x9f0] sm:$0xff] }
 0x5e4   :  { %8833 = vmatpush2.bf16.msra.mxu1 %v11253_v35  ;;  %8793 = vmatprep.subr.bf16.mxu0 %v11118_v31  ;;  %v5815_v35 = vld [vmem:[#allocation20 + $0xdd0] sm:$0xff]  ;;  %v11326_v8 = vcombine.high %v5687_v52, %v5691_v26 }
 0x5e5   :  { %8834 = vmatprep.subr.bf16.mxu1 %v11246_v33  ;;  %v5819_v31 = vld [vmem:[#allocation20 + $0xdf0] sm:$0xff]  ;;  %v11077_v33 = vcombine.low %v5439_v51, %v5443_v18 }
 0x5e6   :  { %v11454_v9 = vcombine.high %v5815_v35, %v5819_v31  ;;  %v11453_v42 = vcombine.low %v5815_v35, %v5819_v31  ;;  %v5671_v62 = vld [vmem:[#allocation20 + $0x950] sm:$0xff] }
 0x5e7   :  { %8794 = vmatpush2.bf16.msra.mxu0 %v11117_v53  ;;  %v5683_v53 = vld [vmem:[#allocation20 + $0x9b0] sm:$0xff] }
 0x5e8   :  { %8835 = vmatpush2.bf16.msra.mxu1 %v11245_v61  ;;  %8795 = vmatprep.subr.bf16.mxu0 %v11110_v29  ;;  %v11325_v61 = vcombine.low %v5687_v52, %v5691_v26  ;;  %v5807_v29 = vld [vmem:[#allocation20 + $0xd90] sm:$0xff]  ;;  %v11318_v13 = vcombine.high %v5679_v45, %v5683_v53  ;;  %v11317_v50 = vcombine.low %v5679_v45, %v5683_v53 }
 0x5e9   :  { %8836 = vmatprep.subr.bf16.mxu1 %v11238_v63  ;;  %v5811_v63 = vld [vmem:[#allocation20 + $0xdb0] sm:$0xff] }
 0x5ea   :  { %v5675_v59 = vld [vmem:[#allocation20 + $0x970] sm:$0xff] }
 0x5eb   :  { %8796 = vmatpush2.bf16.msra.mxu0 %v11109_v37  ;;  %v5803_v25 = vld [vmem:[#allocation20 + $0xd70] sm:$0xff]  ;;  %v11309_v18 = vcombine.low %v5671_v62, %v5675_v59 }
 0x5ec   :  { %8837 = vmatpush2.bf16.msra.mxu1 %v11237_v17  ;;  %8797 = vmatprep.subr.bf16.mxu0 %v11102_v32  ;;  %v11446_v32 = vcombine.high %v5807_v29, %v5811_v63  ;;  %v5667_v44 = vld [vmem:[#allocation20 + $0x930] sm:$0xff] }
 0x5ed   :  { %8838 = vmatprep.subr.bf16.mxu1 %v11230_v14  ;;  %v5799_v14 = vld [vmem:[#allocation20 + $0xd50] sm:$0xff] }
 0x5ee   :  { %v11438_v43 = vcombine.high %v5799_v14, %v5803_v25  ;;  %v5655_v52 = vld [vmem:[#allocation20 + $0x8d0] sm:$0xff] }
 0x5ef   :  { %8798 = vmatpush2.bf16.msra.mxu0 %v11101_v6  ;;  %v5659_v26 = vld [vmem:[#allocation20 + $0x8f0] sm:$0xff] }
 0x5f0   :  { %8839 = vmatpush2.bf16.msra.mxu1 %v11229_v34  ;;  %8799 = vmatprep.subr.bf16.mxu0 %v11094_v39  ;;  %v11445_v34 = vcombine.low %v5807_v29, %v5811_v63  ;;  %v11310_v39 = vcombine.high %v5671_v62, %v5675_v59  ;;  %v5783_v35 = vld [vmem:[#allocation20 + $0xcd0] sm:$0xff]  ;;  %v11294_v45 = vcombine.high %v5655_v52, %v5659_v26 }
 0x5f1   :  { %8840 = vmatprep.subr.bf16.mxu1 %v11222_v40  ;;  %v5787_v31 = vld [vmem:[#allocation20 + $0xcf0] sm:$0xff] }
 0x5f2   :  { %v11422_v29 = vcombine.high %v5783_v35, %v5787_v31  ;;  %v5647_v63 = vld [vmem:[#allocation20 + $0x890] sm:$0xff] }
 0x5f3   :  { %8800 = vmatpush2.bf16.msra.mxu0 %v11093_v11  ;;  %v5779_v62 = vld [vmem:[#allocation20 + $0xcb0] sm:$0xff] }
 0x5f4   :  { %8841 = vmatpush2.bf16.msra.mxu1 %v11221_v2  ;;  %8801 = vmatprep.subr.bf16.mxu0 %v11086_v58  ;;  %v5791_v2 = vld [vmem:[#allocation20 + $0xd10] sm:$0xff] }
 0x5f5   :  { %8842 = vmatprep.subr.bf16.mxu1 %v11214_v60  ;;  %v5795_v58 = vld [vmem:[#allocation20 + $0xd30] sm:$0xff] }
 0x5f7   :  { %8802 = vmatpush2.bf16.msra.mxu0 %v11085_v23 }
 0x5f8   :  { %8843 = vmatpush2.bf16.msra.mxu1 %v11213_v21  ;;  %8803 = vmatprep.subr.bf16.mxu0 %v11078_v22 }
 0x5f9   :  { %8844 = vmatprep.subr.bf16.mxu1 %v11206_v4  ;;  %v11430_v4 = vcombine.high %v5791_v2, %v5795_v58 }
 0x5fb   :  { %8804 = vmatpush2.bf16.msra.mxu0 %v11077_v33 }
 0x5fc   :  { %8845 = vmatpush2.bf16.msra.mxu1 %v11205_v47  ;;  %8855 = vmatprep.subr.bf16.mxu0 %v11326_v8 }
 0x5fd   :  { %8896 = vmatprep.subr.bf16.mxu1 %v11454_v9  ;;  %v11429_v9 = vcombine.low %v5791_v2, %v5795_v58 }
 0x5fe   :  { %v8561_v37 = vpop.f32.mrf.mxu0  ;;  %v8602_v17 = vpop.f32.mrf.mxu1  ;;  %8806 = vmatmul.mubr.bf16.vlgmr.msra.gmra.mxu0 %v12926_v27 }
 0x5ff   :  { %v8562_v1 = vadd.f32 %v8561_v37, %v12962_v20  ;;  %8847 = vmatmul.mubr.bf16.vlgmr.msra.gmra.mxu1 %v12928_v30  ;;  %8856 = vmatpush1.bf16.msra.mxu0 %v11325_v61  ;;  %v5663_v20 = vld [vmem:[#allocation20 + $0x910] sm:$0xff] }
 0x600   :  { %8887 = vmatprep.mubr.bf16.mxu0 %v12934_v12  ;;  %8897 = vmatpush1.bf16.msra.mxu1 %v11453_v42  ;;  %v8563_v5 = vpop.f32.mrf.mxu0  ;;  %v8604_v6 = vpop.f32.mrf.mxu1  ;;  %v11302_v23 = vcombine.high %v5663_v20, %v5667_v44  ;;  %v11301_v8 = vcombine.low %v5663_v20, %v5667_v44  ;;  %v5651_v42 = vld [vmem:[#allocation20 + $0x8b0] sm:$0xff] }
 0x601   :  { %v12972_v40 = vadd.f32 %v8602_v17, %v8562_v1  ;;  %8928 = vmatprep.mubr.bf16.mxu1 %v12936_v36  ;;  %v8564_v41 = vadd.f32 %v8563_v5, %v12966_v7  ;;  %8857 = vmatprep.subr.bf16.mxu0 %v11318_v13  ;;  %v11437_v7 = vcombine.low %v5799_v14, %v5803_v25  ;;  %v5775_v13 = vld [vmem:[#allocation20 + $0xc90] sm:$0xff] }
 0x602   :  { %v8565_v10 = vpop.f32.mrf.mxu0  ;;  %v8606_v11 = vpop.f32.mrf.mxu1  ;;  %8898 = vmatprep.subr.bf16.mxu1 %v11446_v32  ;;  %v11293_v17 = vcombine.low %v5655_v52, %v5659_v26  ;;  %v11421_v32 = vcombine.low %v5783_v35, %v5787_v31  ;;  %v11286_v14 = vcombine.high %v5647_v63, %v5651_v42  ;;  %v5639_v5 = vld [vmem:[#allocation20 + $0x850] sm:$0xff]  ;;  %v11285_v20 = vcombine.low %v5647_v63, %v5651_v42 }
 0x603   :  { %v9103_v60 = vrot.slane %v12972_v40, 4  ;;  %v12977_v51 = vadd.f32 %v8604_v6, %v8564_v41  ;;  %8858 = vmatpush1.bf16.msra.mxu0 %v11317_v50  ;;  %v11414_v50 = vcombine.high %v5775_v13, %v5779_v62  ;;  %v5643_v6 = vld [vmem:[#allocation20 + $0x870] sm:$0xff]  ;;  %v11413_v44 = vcombine.low %v5775_v13, %v5779_v62 }
 0x604   :  { %8899 = vmatpush1.bf16.msra.mxu1 %v11445_v34  ;;  %v8566_v16 = vpop.f32.mrf.mxu0  ;;  %v8607_v3 = vpop.f32.mrf.mxu1  ;;  %8859 = vmatprep.subr.bf16.mxu0 %v11310_v39  ;;  %v5767_v34 = vld [vmem:[#allocation20 + $0xc50] sm:$0xff]  ;;  %v11278_v10 = vcombine.high %v5639_v5, %v5643_v6 }
 0x605   :  { %v9104_v21 = vadd.f32 %v9103_v60, %v12972_v40  ;;  %v9109_v22 = vrot.slane %v12977_v51, 4  ;;  %8900 = vmatprep.subr.bf16.mxu1 %v11438_v43  ;;  %v5771_v39 = vld [vmem:[#allocation20 + $0xc70] sm:$0xff] }
 0x606   :  { %v11406_v58 = vcombine.high %v5767_v34, %v5771_v39  ;;  %v5631_v60 = vld [vmem:[#allocation20 + $0x810] sm:$0xff] }
 0x607   :  { %v9105_v33 = vrot.slane %v9104_v21, 2  ;;  %v9110_v47 = vadd.f32 %v9109_v22, %v12977_v51  ;;  %8860 = vmatpush1.bf16.msra.mxu0 %v11309_v18  ;;  %v5635_v18 = vld [vmem:[#allocation20 + $0x830] sm:$0xff]  ;;  %v11405_v22 = vcombine.low %v5767_v34, %v5771_v39 }
 0x608   :  { %8901 = vmatpush1.bf16.msra.mxu1 %v11437_v7  ;;  %8861 = vmatprep.subr.bf16.mxu0 %v11302_v23  ;;  %v5759_v16 = vld [vmem:[#allocation20 + $0xc10] sm:$0xff] }
 0x609   :  { %v9106_v53 = vadd.f32 %v9105_v33, %v9104_v21  ;;  %v9111_v61 = vrot.slane %v9110_v47, 2  ;;  %8902 = vmatprep.subr.bf16.mxu1 %v11430_v4  ;;  %v5763_v3 = vld [vmem:[#allocation20 + $0xc30] sm:$0xff]  ;;  %v11277_v21 = vcombine.low %v5639_v5, %v5643_v6 }
 0x60a   :  { %v11398_v26 = vcombine.high %v5759_v16, %v5763_v3  ;;  %v5751_v35 = vld [vmem:[#allocation20 + $0xbd0] sm:$0xff] }
 0x60b   :  { %v9107_v59 = vrot.slane %v9106_v53, 1  ;;  %v9112_v37 = vadd.f32 %v9111_v61, %v9110_v47  ;;  %8862 = vmatpush1.bf16.msra.mxu0 %v11301_v8  ;;  %v5755_v31 = vld [vmem:[#allocation20 + $0xbf0] sm:$0xff] }
 0x60c   :  { %8903 = vmatpush1.bf16.msra.mxu1 %v11429_v9  ;;  %8863 = vmatprep.subr.bf16.mxu0 %v11294_v45  ;;  %v5879_v33 = vld [vmem:[#allocation20 + $0xfd0] sm:$0xff]  ;;  %v11397_v45 = vcombine.low %v5759_v16, %v5763_v3 }
 0x60d   :  { %v9108_v25 = vadd.f32 %v9107_v59, %v9106_v53  ;;  %v9113_v1 = vrot.slane %v9112_v37, 1  ;;  %8904 = vmatprep.subr.bf16.mxu1 %v11422_v29  ;;  %v5883_v47 = vld [vmem:[#allocation20 + $0xff0] sm:$0xff]  ;;  %v11390_v53 = vcombine.high %v5751_v35, %v5755_v31 }
 0x60e   :  { %v11518_v63 = vcombine.high %v5879_v33, %v5883_v47  ;;  %v5743_v42 = vld [vmem:[#allocation20 + $0xb90] sm:$0xff] }
 0x60f   :  { %v9151_v41 = vmul.f32 0.125, %v9108_v25  ;;  %v9114_v43 = vadd.f32 %v9113_v1, %v9112_v37  ;;  %8864 = vmatpush1.bf16.msra.mxu0 %v11293_v17  ;;  %v5747_v13 = vld [vmem:[#allocation20 + $0xbb0] sm:$0xff] }
 0x610   :  { %8905 = vmatpush1.bf16.msra.mxu1 %v11421_v32  ;;  %8865 = vmatprep.subr.bf16.mxu0 %v11286_v14  ;;  %v5871_v62 = vld [vmem:[#allocation20 + $0xf90] sm:$0xff]  ;;  %v11389_v32 = vcombine.low %v5751_v35, %v5755_v31  ;;  %v11517_v14 = vcombine.low %v5879_v33, %v5883_v47  ;;  %v11382_v25 = vcombine.high %v5743_v42, %v5747_v13 }
 0x611   :  { %v12983_v11 = vsub.f32 %v12972_v40, %v9151_v41  ;;  %v9152_v2 = vmul.f32 0.125, %v9114_v43  ;;  %8906 = vmatprep.subr.bf16.mxu1 %v11414_v50  ;;  %v11270_v40 = vcombine.high %v5631_v60, %v5635_v18  ;;  %v5875_v59 = vld [vmem:[#allocation20 + $0xfb0] sm:$0xff] }
 0x612   :  { %v11510_v5 = vcombine.high %v5871_v62, %v5875_v59  ;;  %v5735_v6 = vld [vmem:[#allocation20 + $0xb50] sm:$0xff] }
 0x613   :  { %v9167_v7 = vmul.f32 %v12983_v11, %v12983_v11  ;;  %v12988_v23 = vsub.f32 %v12977_v51, %v9152_v2  ;;  %8866 = vmatpush1.bf16.msra.mxu0 %v11285_v20  ;;  %v11269_v51 = vcombine.low %v5631_v60, %v5635_v18  ;;  %v5739_v34 = vld [vmem:[#allocation20 + $0xb70] sm:$0xff] }
 0x614   :  { %8907 = vmatpush1.bf16.msra.mxu1 %v11413_v44  ;;  %8867 = vmatprep.subr.bf16.mxu0 %v11278_v10  ;;  %v5863_v39 = vld [vmem:[#allocation20 + $0xf50] sm:$0xff]  ;;  %v11381_v44 = vcombine.low %v5743_v42, %v5747_v13  ;;  %v11509_v10 = vcombine.low %v5871_v62, %v5875_v59  ;;  %v11374_v2 = vcombine.high %v5735_v6, %v5739_v34 }
 0x615   :  { %v9175_v4 = vrot.slane %v9167_v7, 4  ;;  %v9168_v52 = vmul.f32 %v12988_v23, %v12988_v23  ;;  %8908 = vmatprep.subr.bf16.mxu1 %v11406_v58  ;;  %v5867_v41 = vld [vmem:[#allocation20 + $0xf70] sm:$0xff] }
 0x616   :  { %v11502_v18 = vcombine.high %v5863_v39, %v5867_v41  ;;  %v5727_v16 = vld [vmem:[#allocation20 + $0xb10] sm:$0xff] }
 0x617   :  { %v9176_v8 = vadd.f32 %v9175_v4, %v9167_v7  ;;  %v9181_v9 = vrot.slane %v9168_v52, 4  ;;  %8868 = vmatpush1.bf16.msra.mxu0 %v11277_v21  ;;  %v5731_v3 = vld [vmem:[#allocation20 + $0xb30] sm:$0xff]  ;;  %v11373_v4 = vcombine.low %v5735_v6, %v5739_v34 }
 0x618   :  { %8909 = vmatpush1.bf16.msra.mxu1 %v11405_v22  ;;  %8869 = vmatprep.subr.bf16.mxu0 %v11270_v40  ;;  %v5855_v7 = vld [vmem:[#allocation20 + $0xf10] sm:$0xff] }
 0x619   :  { %v9177_v61 = vrot.slane %v9176_v8, 2  ;;  %v9182_v29 = vadd.f32 %v9181_v9, %v9168_v52  ;;  %8910 = vmatprep.subr.bf16.mxu1 %v11398_v26  ;;  %v5859_v21 = vld [vmem:[#allocation20 + $0xf30] sm:$0xff]  ;;  %v11501_v52 = vcombine.low %v5863_v39, %v5867_v41  ;;  %v11366_v26 = vcombine.high %v5727_v16, %v5731_v3 }
 0x61a   :  { %v11494_v31 = vcombine.high %v5855_v7, %v5859_v21  ;;  %v5719_v33 = vld [vmem:[#allocation20 + $0xad0] sm:$0xff] }
 0x61b   :  { %v9178_v37 = vadd.f32 %v9177_v61, %v9176_v8  ;;  %v9183_v17 = vrot.slane %v9182_v29, 2  ;;  %8870 = vmatpush1.bf16.msra.mxu0 %v11269_v51  ;;  %v5723_v47 = vld [vmem:[#allocation20 + $0xaf0] sm:$0xff]  ;;  %v11365_v51 = vcombine.low %v5727_v16, %v5731_v3  ;;  %v5432_v3 = vld [vmem:[#allocation20 + $0x1d8] sm:$0xff] }
 0x61c   :  { %8911 = vmatpush1.bf16.msra.mxu1 %v11397_v45  ;;  %8871 = vmatprep.subr.bf16.mxu0 %v11390_v53  ;;  %v5847_v8 = vld [vmem:[#allocation20 + $0xed0] sm:$0xff]  ;;  %v11493_v45 = vcombine.low %v5855_v7, %v5859_v21  ;;  %v11358_v53 = vcombine.high %v5719_v33, %v5723_v47  ;;  %v11357_v62 = vcombine.low %v5719_v33, %v5723_v47  ;;  %v5436_v7 = vld [vmem:[#allocation20 + $0x1f8] sm:$0xff] }
 0x61d   :  { %v9179_v1 = vrot.slane %v9178_v37, 1  ;;  %v9184_v50 = vadd.f32 %v9183_v17, %v9182_v29  ;;  %8912 = vmatprep.subr.bf16.mxu1 %v11518_v63  ;;  %v5851_v9 = vld [vmem:[#allocation20 + $0xef0] sm:$0xff]  ;;  %v5560_v21 = vld [vmem:[#allocation20 + $0x5d8] sm:$0xff]  ;;  %v11071_v33 = vcombine.low %v5432_v3, %v5436_v7 }
 0x61e   :  { %v11486_v61 = vcombine.high %v5847_v8, %v5851_v9  ;;  %v5711_v29 = vld [vmem:[#allocation20 + $0xa90] sm:$0xff]  ;;  %v11485_v59 = vcombine.low %v5847_v8, %v5851_v9  ;;  %v5552_v47 = vld [vmem:[#allocation20 + $0x598] sm:$0xff] }
 0x61f   :  { %v9180_v43 = vadd.f32 %v9179_v1, %v9178_v37  ;;  %v9185_v20 = vrot.slane %v9184_v50, 1  ;;  %8872 = vmatpush2.bf16.msra.mxu0 %v11389_v32  ;;  %v5715_v63 = vld [vmem:[#allocation20 + $0xab0] sm:$0xff]  ;;  %v5556_v8 = vld [vmem:[#allocation20 + $0x5b8] sm:$0xff] }
 0x620   :  { %8913 = vmatpush2.bf16.msra.mxu1 %v11517_v14  ;;  %8873 = vmatprep.subr.bf16.mxu0 %v11382_v25  ;;  %v5839_v42 = vld [vmem:[#allocation20 + $0xe90] sm:$0xff]  ;;  %v11350_v37 = vcombine.high %v5711_v29, %v5715_v63 }
 0x621   :  { %v9223_v58 = vmul.f32 0.125, %v9180_v43  ;;  %v9186_v60 = vadd.f32 %v9185_v20, %v9184_v50  ;;  %8914 = vmatprep.subr.bf16.mxu1 %v11510_v5  ;;  %v5843_v13 = vld [vmem:[#allocation20 + $0xeb0] sm:$0xff]  ;;  %v11349_v50 = vcombine.low %v5711_v29, %v5715_v63  ;;  %v11192_v29 = vcombine.high %v5552_v47, %v5556_v8  ;;  %v5544_v63 = vld [vmem:[#allocation20 + $0x558] sm:$0xff] }
 0x622   :  { %v11478_v17 = vcombine.high %v5839_v42, %v5843_v13  ;;  %v5703_v32 = vld [vmem:[#allocation20 + $0xa50] sm:$0xff]  ;;  %v11477_v5 = vcombine.low %v5839_v42, %v5843_v13  ;;  %v5548_v42 = vld [vmem:[#allocation20 + $0x578] sm:$0xff] }
 0x623   :  { %v9231_v22 = vadd.f32 1e-05, %v9223_v58  ;;  %v9224_v40 = vmul.f32 0.125, %v9186_v60  ;;  %8874 = vmatpush2.bf16.msra.mxu0 %v11381_v44  ;;  %v5707_v14 = vld [vmem:[#allocation20 + $0xa70] sm:$0xff] }
 0x624   :  { %8915 = vmatpush2.bf16.msra.mxu1 %v11509_v10  ;;  %8875 = vmatprep.subr.bf16.mxu0 %v11374_v2  ;;  %v5831_v25 = vld [vmem:[#allocation20 + $0xe50] sm:$0xff]  ;;  %v11342_v6 = vcombine.high %v5703_v32, %v5707_v14  ;;  %v11341_v10 = vcombine.low %v5703_v32, %v5707_v14 }
 0x625   :  { %v9232_v35 = vadd.f32 1e-05, %v9224_v40  ;;  %8916 = vmatprep.subr.bf16.mxu1 %v11502_v18  ;;  %12044 = vrsqrt.f32 %v9231_v22  ;;  %v5835_v1 = vld [vmem:[#allocation20 + $0xe70] sm:$0xff]  ;;  %v5564_v22 = vld [vmem:[#allocation20 + $0x5f8] sm:$0xff] }
 0x626   :  { %v11470_v34 = vcombine.high %v5831_v25, %v5835_v1  ;;  %v5695_v39 = vld [vmem:[#allocation20 + $0xa10] sm:$0xff]  ;;  %v11469_v58 = vcombine.low %v5831_v25, %v5835_v1  ;;  %v11199_v9 = vcombine.low %v5560_v21, %v5564_v22  ;;  %v11184_v25 = vcombine.high %v5544_v63, %v5548_v42  ;;  %v5408_v1 = vld [vmem:[#allocation20 + $0x118] sm:$0xff] }
 0x627   :  { %12046 = vrsqrt.f32 %v9232_v35  ;;  %8876 = vmatpush2.bf16.msra.mxu0 %v11373_v4  ;;  %v5699_v41 = vld [vmem:[#allocation20 + $0xa30] sm:$0xff]  ;;  %v5424_v35 = vld [vmem:[#allocation20 + $0x198] sm:$0xff] }
 0x628   :  { %8917 = vmatpush2.bf16.msra.mxu1 %v11501_v52  ;;  %8877 = vmatprep.subr.bf16.mxu0 %v11366_v26  ;;  %v5823_v43 = vld [vmem:[#allocation20 + $0xe10] sm:$0xff]  ;;  %v11334_v60 = vcombine.high %v5695_v39, %v5699_v41  ;;  %v11333_v40 = vcombine.low %v5695_v39, %v5699_v41  ;;  %v11072_v52 = vcombine.high %v5432_v3, %v5436_v7  ;;  %v5540_v39 = vld [vmem:[#allocation20 + $0x538] sm:$0xff] }
 0x629   :  { %8918 = vmatprep.subr.bf16.mxu1 %v11494_v31  ;;  %v5827_v20 = vld [vmem:[#allocation20 + $0xe30] sm:$0xff]  ;;  %v11200_v26 = vcombine.high %v5560_v21, %v5564_v22  ;;  %v5428_v31 = vld [vmem:[#allocation20 + $0x1b8] sm:$0xff] }
 0x62a   :  { %v11462_v16 = vcombine.high %v5823_v43, %v5827_v20  ;;  %v11461_v4 = vcombine.low %v5823_v43, %v5827_v20  ;;  %v11183_v20 = vcombine.low %v5544_v63, %v5548_v42  ;;  %v5528_v3 = vld [vmem:[#allocation20 + $0x4d8] sm:$0xff] }
 0x62b   :  { %8878 = vmatpush2.bf16.msra.mxu0 %v11365_v51  ;;  %v11064_v51 = vcombine.high %v5424_v35, %v5428_v31  ;;  %v5532_v7 = vld [vmem:[#allocation20 + $0x4f8] sm:$0xff] }
 0x62c   :  { %8919 = vmatpush2.bf16.msra.mxu1 %v11493_v45  ;;  %8879 = vmatprep.subr.bf16.mxu0 %v11358_v53  ;;  %v5416_v45 = vld [vmem:[#allocation20 + $0x158] sm:$0xff] }
 0x62d   :  { %8920 = vmatprep.subr.bf16.mxu1 %v11486_v61  ;;  %v5420_v53 = vld [vmem:[#allocation20 + $0x178] sm:$0xff] }
 0x62e   :  { %v11056_v32 = vcombine.high %v5416_v45, %v5420_v53 }
 0x62f   :  { %8880 = vmatpush2.bf16.msra.mxu0 %v11357_v62  ;;  %v11063_v62 = vcombine.low %v5424_v35, %v5428_v31  ;;  %v5520_v35 = vld [vmem:[#allocation20 + $0x498] sm:$0xff] }
 0x630   :  { %8921 = vmatpush2.bf16.msra.mxu1 %v11485_v59  ;;  %8881 = vmatprep.subr.bf16.mxu0 %v11350_v37  ;;  %v5524_v31 = vld [vmem:[#allocation20 + $0x4b8] sm:$0xff] }
 0x631   :  { %8922 = vmatprep.subr.bf16.mxu1 %v11478_v17  ;;  %v11191_v17 = vcombine.low %v5552_v47, %v5556_v8  ;;  %v11167_v47 = vcombine.low %v5528_v3, %v5532_v7  ;;  %v11159_v63 = vcombine.low %v5520_v35, %v5524_v31 }
 0x632   :  { %v12992_v44 = vpop.eup %12044 }
 0x633   :  { %8882 = vmatpush2.bf16.msra.mxu0 %v11349_v50  ;;  %v5412_v50 = vld [vmem:[#allocation20 + $0x138] sm:$0xff] }
 0x634   :  { %v12994_v2 = vpop.eup %12046  ;;  %8923 = vmatpush2.bf16.msra.mxu1 %v11477_v5  ;;  %8883 = vmatprep.subr.bf16.mxu0 %v11342_v6  ;;  %v11047_v21 = vcombine.low %v5408_v1, %v5412_v50 }
 0x635   :  { %v9255_v18 = vcombine.low %v12992_v44, %v12994_v2  ;;  %8924 = vmatprep.subr.bf16.mxu1 %v11470_v34  ;;  %v5536_v34 = vld [vmem:[#allocation20 + $0x518] sm:$0xff] }
 0x636   :  { %v11175_v22 = vcombine.low %v5536_v34, %v5540_v39 }
 0x637   :  { %8884 = vmatpush2.bf16.msra.mxu0 %v11341_v10  ;;  %v11048_v10 = vcombine.high %v5408_v1, %v5412_v50 }
 0x638   :  { %8925 = vmatpush2.bf16.msra.mxu1 %v11469_v58  ;;  %8885 = vmatprep.subr.bf16.mxu0 %v11334_v60  ;;  %v11176_v58 = vcombine.high %v5536_v34, %v5540_v39  ;;  %v5400_v60 = vld [vmem:[#allocation20 + $0xd8] sm:$0xff] }
 0x639   :  { %8926 = vmatprep.subr.bf16.mxu1 %v11462_v16  ;;  %v5404_v16 = vld [vmem:[#allocation20 + $0xf8] sm:$0xff] }
 0x63a   :  { %v5500_v34 = vld [vmem:[#allocation20 + $0x3f8] sm:$0xff] }
 0x63b   :  { %8886 = vmatpush2.bf16.msra.mxu0 %v11333_v40  ;;  %v11040_v40 = vcombine.high %v5400_v60, %v5404_v16  ;;  %v5624_v39 = vld [vmem:[#allocation20 + $0x7d8] sm:$0xff] }
 0x63c   :  { %8927 = vmatpush2.bf16.msra.mxu1 %v11461_v4  ;;  %8937 = vmatprep.subr.bf16.mxu0 %v11072_v52  ;;  %v11168_v4 = vcombine.high %v5528_v3, %v5532_v7  ;;  %v5392_v52 = vld [vmem:[#allocation20 + $0x98] sm:$0xff] }
 0x63d   :  { %8978 = vmatprep.subr.bf16.mxu1 %v11200_v26  ;;  %v5396_v26 = vld [vmem:[#allocation20 + $0xb8] sm:$0xff] }
 0x63e   :  { %v8643_v61 = vpop.f32.mrf.mxu0  ;;  %8888 = vmatmul.mubr.bf16.vlgmr.msra.gmra.mxu0 %v12948_v15  ;;  %v11032_v8 = vcombine.high %v5392_v52, %v5396_v26 }
 0x63f   :  { %v8684_v13 = vpop.f32.mrf.mxu1  ;;  %8929 = vmatmul.mubr.bf16.vlgmr.msra.gmra.mxu1 %v12950_v49  ;;  %8938 = vmatpush1.bf16.msra.mxu0 %v11071_v33  ;;  %v11039_v33 = vcombine.low %v5400_v60, %v5404_v16  ;;  %v5616_v60 = vld [vmem:[#allocation20 + $0x798] sm:$0xff] }
 0x640   :  { %v13000_v59 = vadd.f32 %v8684_v13, %v8643_v61  ;;  %8969 = vmatprep.mubr.bf16.mxu0 %v12922_v55  ;;  %8979 = vmatpush1.bf16.msra.mxu1 %v11199_v9  ;;  %v8645_v37 = vpop.f32.mrf.mxu0  ;;  %v11055_v55 = vcombine.low %v5416_v45, %v5420_v53  ;;  %v11160_v9 = vcombine.high %v5520_v35, %v5524_v31  ;;  %v5388_v45 = vld [vmem:[#allocation20 + $0x78] sm:$0xff] }
 0x641   :  { %9010 = vmatprep.mubr.bf16.mxu1 %v12924_v48  ;;  %v8686_v14 = vpop.f32.mrf.mxu1  ;;  %8939 = vmatprep.subr.bf16.mxu0 %v11064_v51  ;;  %v5384_v51 = vld [vmem:[#allocation20 + $0x58] sm:$0xff] }
 0x642   :  { %v13004_v5 = vadd.f32 %v8686_v14, %v8645_v37  ;;  %v8647_v6 = vpop.f32.mrf.mxu0  ;;  %8980 = vmatprep.subr.bf16.mxu1 %v11192_v29  ;;  %v5512_v53 = vld [vmem:[#allocation20 + $0x458] sm:$0xff]  ;;  %v11031_v29 = vcombine.low %v5392_v52, %v5396_v26  ;;  %v11024_v42 = vcombine.high %v5384_v51, %v5388_v45  ;;  %v11023_v14 = vcombine.low %v5384_v51, %v5388_v45 }
 0x643   :  { %v8688_v41 = vpop.f32.mrf.mxu1  ;;  %8940 = vmatpush1.bf16.msra.mxu0 %v11063_v62  ;;  %v5516_v61 = vld [vmem:[#allocation20 + $0x478] sm:$0xff] }
 0x644   :  { %8981 = vmatpush1.bf16.msra.mxu1 %v11191_v17  ;;  %v8648_v43 = vpop.f32.mrf.mxu0  ;;  %8941 = vmatprep.subr.bf16.mxu0 %v11056_v32  ;;  %v11152_v13 = vcombine.high %v5512_v53, %v5516_v61  ;;  %v5376_v62 = vld [vmem:[#allocation20 + $0x18] sm:$0xff] }
 0x645   :  { %v8689_v48 = vpop.f32.mrf.mxu1  ;;  %8982 = vmatprep.subr.bf16.mxu1 %v11184_v25  ;;  %v5380_v37 = vld [vmem:[#allocation20 + $0x38] sm:$0xff]  ;;  %v11151_v25 = vcombine.low %v5512_v53, %v5516_v61 }
 0x646   :  { %v5504_v17 = vld [vmem:[#allocation20 + $0x418] sm:$0xff]  ;;  %v11016_v1 = vcombine.high %v5376_v62, %v5380_v37 }
 0x647   :  { %8942 = vmatpush1.bf16.msra.mxu0 %v11055_v55  ;;  %v5508_v32 = vld [vmem:[#allocation20 + $0x438] sm:$0xff]  ;;  %v11015_v55 = vcombine.low %v5376_v62, %v5380_v37 }
 0x648   :  { %8983 = vmatpush1.bf16.msra.mxu1 %v11183_v20  ;;  %8943 = vmatprep.subr.bf16.mxu0 %v11048_v10  ;;  %v11144_v50 = vcombine.high %v5504_v17, %v5508_v32  ;;  %v5496_v6 = vld [vmem:[#allocation20 + $0x3d8] sm:$0xff]  ;;  %v11143_v43 = vcombine.low %v5504_v17, %v5508_v32 }
 0x649   :  { %8984 = vmatprep.subr.bf16.mxu1 %v11176_v58  ;;  %v5628_v41 = vld [vmem:[#allocation20 + $0x7f8] sm:$0xff]  ;;  %v11136_v20 = vcombine.high %v5496_v6, %v5500_v34  ;;  %v11135_v3 = vcombine.low %v5496_v6, %v5500_v34 }
 0x64a   :  { %v11264_v10 = vcombine.high %v5624_v39, %v5628_v41  ;;  %v5488_v48 = vld [vmem:[#allocation20 + $0x398] sm:$0xff]  ;;  %v11263_v7 = vcombine.low %v5624_v39, %v5628_v41 }
 0x64b   :  { %8944 = vmatpush1.bf16.msra.mxu0 %v11047_v21  ;;  %v5492_v58 = vld [vmem:[#allocation20 + $0x3b8] sm:$0xff] }
 0x64c   :  { %8985 = vmatpush1.bf16.msra.mxu1 %v11175_v22  ;;  %8945 = vmatprep.subr.bf16.mxu0 %v11040_v40  ;;  %v5620_v16 = vld [vmem:[#allocation20 + $0x7b8] sm:$0xff]  ;;  %v11128_v21 = vcombine.high %v5488_v48, %v5492_v58  ;;  %v11127_v35 = vcombine.low %v5488_v48, %v5492_v58 }
 0x64d   :  { %8986 = vmatprep.subr.bf16.mxu1 %v11168_v4  ;;  %v11256_v22 = vcombine.high %v5616_v60, %v5620_v16  ;;  %v5480_v40 = vld [vmem:[#allocation20 + $0x358] sm:$0xff]  ;;  %v11255_v31 = vcombine.low %v5616_v60, %v5620_v16 }
 0x64e   :  { %v5484_v4 = vld [vmem:[#allocation20 + $0x378] sm:$0xff] }
 0x64f   :  { %8946 = vmatpush1.bf16.msra.mxu0 %v11039_v33  ;;  %v5608_v52 = vld [vmem:[#allocation20 + $0x758] sm:$0xff]  ;;  %v11120_v33 = vcombine.high %v5480_v40, %v5484_v4  ;;  %v11119_v53 = vcombine.low %v5480_v40, %v5484_v4 }
 0x650   :  { %8987 = vmatpush1.bf16.msra.mxu1 %v11167_v47  ;;  %8947 = vmatprep.subr.bf16.mxu0 %v11032_v8  ;;  %v5612_v26 = vld [vmem:[#allocation20 + $0x778] sm:$0xff] }
 0x651   :  { %8988 = vmatprep.subr.bf16.mxu1 %v11160_v9  ;;  %v11248_v47 = vcombine.high %v5608_v52, %v5612_v26  ;;  %v5472_v8 = vld [vmem:[#allocation20 + $0x318] sm:$0xff]  ;;  %v11247_v61 = vcombine.low %v5608_v52, %v5612_v26 }
 0x652   :  { %v5476_v9 = vld [vmem:[#allocation20 + $0x338] sm:$0xff] }
 0x653   :  { %8948 = vmatpush1.bf16.msra.mxu0 %v11031_v29  ;;  %v5600_v51 = vld [vmem:[#allocation20 + $0x718] sm:$0xff]  ;;  %v11112_v29 = vcombine.high %v5472_v8, %v5476_v9  ;;  %v11111_v17 = vcombine.low %v5472_v8, %v5476_v9 }
 0x654   :  { %8989 = vmatpush1.bf16.msra.mxu1 %v11159_v63  ;;  %8949 = vmatprep.subr.bf16.mxu0 %v11024_v42  ;;  %v5604_v45 = vld [vmem:[#allocation20 + $0x738] sm:$0xff] }
 0x655   :  { %8990 = vmatprep.subr.bf16.mxu1 %v11152_v13  ;;  %v11240_v63 = vcombine.high %v5600_v51, %v5604_v45  ;;  %v5464_v42 = vld [vmem:[#allocation20 + $0x2d8] sm:$0xff]  ;;  %v11239_v32 = vcombine.low %v5600_v51, %v5604_v45 }
 0x656   :  { %v5468_v13 = vld [vmem:[#allocation20 + $0x2f8] sm:$0xff] }
 0x657   :  { %8950 = vmatpush1.bf16.msra.mxu0 %v11023_v14  ;;  %v5592_v62 = vld [vmem:[#allocation20 + $0x6d8] sm:$0xff]  ;;  %v11104_v14 = vcombine.high %v5464_v42, %v5468_v13  ;;  %v11103_v39 = vcombine.low %v5464_v42, %v5468_v13 }
 0x658   :  { %8991 = vmatpush1.bf16.msra.mxu1 %v11151_v25  ;;  %8951 = vmatprep.subr.bf16.mxu0 %v11016_v1  ;;  %v5596_v37 = vld [vmem:[#allocation20 + $0x6f8] sm:$0xff] }
 0x659   :  { %8992 = vmatprep.subr.bf16.mxu1 %v11144_v50  ;;  %v11232_v25 = vcombine.high %v5592_v62, %v5596_v37  ;;  %v5456_v1 = vld [vmem:[#allocation20 + $0x298] sm:$0xff]  ;;  %v11231_v41 = vcombine.low %v5592_v62, %v5596_v37 }
 0x65a   :  { %v5460_v50 = vld [vmem:[#allocation20 + $0x2b8] sm:$0xff] }
 0x65b   :  { %8952 = vmatpush1.bf16.msra.mxu0 %v11015_v55  ;;  %v5584_v6 = vld [vmem:[#allocation20 + $0x698] sm:$0xff]  ;;  %v11096_v55 = vcombine.high %v5456_v1, %v5460_v50  ;;  %v11095_v60 = vcombine.low %v5456_v1, %v5460_v50 }
 0x65c   :  { %8993 = vmatpush1.bf16.msra.mxu1 %v11143_v43  ;;  %8953 = vmatprep.subr.bf16.mxu0 %v11136_v20  ;;  %v5588_v34 = vld [vmem:[#allocation20 + $0x6b8] sm:$0xff] }
 0x65d   :  { %8994 = vmatprep.subr.bf16.mxu1 %v11264_v10  ;;  %v11224_v43 = vcombine.high %v5584_v6, %v5588_v34  ;;  %v5448_v20 = vld [vmem:[#allocation20 + $0x258] sm:$0xff]  ;;  %v11223_v16 = vcombine.low %v5584_v6, %v5588_v34 }
 0x65e   :  { %v5452_v10 = vld [vmem:[#allocation20 + $0x278] sm:$0xff] }
 0x65f   :  { %8954 = vmatpush2.bf16.msra.mxu0 %v11135_v3  ;;  %v5576_v48 = vld [vmem:[#allocation20 + $0x658] sm:$0xff]  ;;  %v11088_v3 = vcombine.high %v5448_v20, %v5452_v10  ;;  %v11087_v52 = vcombine.low %v5448_v20, %v5452_v10 }
 0x660   :  { %8995 = vmatpush2.bf16.msra.mxu1 %v11263_v7  ;;  %8955 = vmatprep.subr.bf16.mxu0 %v11128_v21  ;;  %v5580_v58 = vld [vmem:[#allocation20 + $0x678] sm:$0xff] }
 0x661   :  { %8996 = vmatprep.subr.bf16.mxu1 %v11256_v22  ;;  %v11216_v7 = vcombine.high %v5576_v48, %v5580_v58  ;;  %v5440_v21 = vld [vmem:[#allocation20 + $0x218] sm:$0xff]  ;;  %v11215_v26 = vcombine.low %v5576_v48, %v5580_v58 }
 0x662   :  { %v5444_v22 = vld [vmem:[#allocation20 + $0x238] sm:$0xff] }
 0x663   :  { %8956 = vmatpush2.bf16.msra.mxu0 %v11127_v35  ;;  %v5568_v40 = vld [vmem:[#allocation20 + $0x618] sm:$0xff]  ;;  %v11080_v35 = vcombine.high %v5440_v21, %v5444_v22  ;;  %v11079_v51 = vcombine.low %v5440_v21, %v5444_v22 }
 0x664   :  { %8997 = vmatpush2.bf16.msra.mxu1 %v11255_v31  ;;  %8957 = vmatprep.subr.bf16.mxu0 %v11120_v33  ;;  %v5572_v4 = vld [vmem:[#allocation20 + $0x638] sm:$0xff] }
 0x665   :  { %8998 = vmatprep.subr.bf16.mxu1 %v11248_v47  ;;  %v11208_v31 = vcombine.high %v5568_v40, %v5572_v4  ;;  %v5688_v33 = vld [vmem:[#allocation20 + $0x9d8] sm:$0xff]  ;;  %v11207_v45 = vcombine.low %v5568_v40, %v5572_v4 }
 0x666   :  { %v5692_v47 = vld [vmem:[#allocation20 + $0x9f8] sm:$0xff] }
 0x667   :  { %8958 = vmatpush2.bf16.msra.mxu0 %v11119_v53  ;;  %v5816_v8 = vld [vmem:[#allocation20 + $0xdd8] sm:$0xff]  ;;  %v11328_v53 = vcombine.high %v5688_v33, %v5692_v47  ;;  %v11327_v42 = vcombine.low %v5688_v33, %v5692_v47 }
 0x668   :  { %8999 = vmatpush2.bf16.msra.mxu1 %v11247_v61  ;;  %8959 = vmatprep.subr.bf16.mxu0 %v11112_v29  ;;  %v5820_v9 = vld [vmem:[#allocation20 + $0xdf8] sm:$0xff] }
 0x669   :  { %9000 = vmatprep.subr.bf16.mxu1 %v11240_v63  ;;  %v11456_v61 = vcombine.high %v5816_v8, %v5820_v9  ;;  %v5680_v29 = vld [vmem:[#allocation20 + $0x998] sm:$0xff]  ;;  %v11455_v37 = vcombine.low %v5816_v8, %v5820_v9 }
 0x66a   :  { %v5684_v63 = vld [vmem:[#allocation20 + $0x9b8] sm:$0xff] }
 0x66b   :  { %8960 = vmatpush2.bf16.msra.mxu0 %v11111_v17  ;;  %v5808_v13 = vld [vmem:[#allocation20 + $0xd98] sm:$0xff]  ;;  %v11320_v17 = vcombine.high %v5680_v29, %v5684_v63 }
 0x66c   :  { %9001 = vmatpush2.bf16.msra.mxu1 %v11239_v32  ;;  %8961 = vmatprep.subr.bf16.mxu0 %v11104_v14  ;;  %v5812_v62 = vld [vmem:[#allocation20 + $0xdb8] sm:$0xff] }
 0x66d   :  { %9002 = vmatprep.subr.bf16.mxu1 %v11232_v25  ;;  %v5672_v32 = vld [vmem:[#allocation20 + $0x958] sm:$0xff]  ;;  %v11448_v1 = vcombine.high %v5808_v13, %v5812_v62 }
 0x66e   :  { %v5676_v14 = vld [vmem:[#allocation20 + $0x978] sm:$0xff] }
 0x66f   :  { %8962 = vmatpush2.bf16.msra.mxu0 %v11103_v39  ;;  %v5800_v50 = vld [vmem:[#allocation20 + $0xd58] sm:$0xff]  ;;  %v11312_v20 = vcombine.high %v5672_v32, %v5676_v14  ;;  %v11311_v22 = vcombine.low %v5672_v32, %v5676_v14 }
 0x670   :  { %9003 = vmatpush2.bf16.msra.mxu1 %v11231_v41  ;;  %8963 = vmatprep.subr.bf16.mxu0 %v11096_v55  ;;  %v5804_v6 = vld [vmem:[#allocation20 + $0xd78] sm:$0xff]  ;;  %v11319_v41 = vcombine.low %v5680_v29, %v5684_v63 }
 0x671   :  { %9004 = vmatprep.subr.bf16.mxu1 %v11224_v43  ;;  %v11447_v43 = vcombine.low %v5808_v13, %v5812_v62  ;;  %v5664_v58 = vld [vmem:[#allocation20 + $0x918] sm:$0xff] }
 0x672   :  { %v5660_v33 = vld [vmem:[#allocation20 + $0x8f8] sm:$0xff] }
 0x673   :  { %8964 = vmatpush2.bf16.msra.mxu0 %v11095_v60  ;;  %v5668_v60 = vld [vmem:[#allocation20 + $0x938] sm:$0xff] }
 0x674   :  { %9005 = vmatpush2.bf16.msra.mxu1 %v11223_v16  ;;  %8965 = vmatprep.subr.bf16.mxu0 %v11088_v3  ;;  %v5792_v16 = vld [vmem:[#allocation20 + $0xd18] sm:$0xff]  ;;  %v11304_v40 = vcombine.high %v5664_v58, %v5668_v60 }
 0x675   :  { %9006 = vmatprep.subr.bf16.mxu1 %v11216_v7  ;;  %v5796_v3 = vld [vmem:[#allocation20 + $0xd38] sm:$0xff] }
 0x676   :  { %v5784_v47 = vld [vmem:[#allocation20 + $0xcd8] sm:$0xff] }
 0x677   :  { %8966 = vmatpush2.bf16.msra.mxu0 %v11087_v52  ;;  %v5788_v8 = vld [vmem:[#allocation20 + $0xcf8] sm:$0xff] }
 0x678   :  { %9007 = vmatpush2.bf16.msra.mxu1 %v11215_v26  ;;  %8967 = vmatprep.subr.bf16.mxu0 %v11080_v35  ;;  %v11432_v35 = vcombine.high %v5792_v16, %v5796_v3  ;;  %v5648_v13 = vld [vmem:[#allocation20 + $0x898] sm:$0xff] }
 0x679   :  { %9008 = vmatprep.subr.bf16.mxu1 %v11208_v31  ;;  %v5656_v31 = vld [vmem:[#allocation20 + $0x8d8] sm:$0xff] }
 0x67a   :  { %v5652_v62 = vld [vmem:[#allocation20 + $0x8b8] sm:$0xff] }
 0x67b   :  { %8968 = vmatpush2.bf16.msra.mxu0 %v11079_v51 }
 0x67c   :  { %9009 = vmatpush2.bf16.msra.mxu1 %v11207_v45  ;;  %9019 = vmatprep.subr.bf16.mxu0 %v11328_v53  ;;  %v11303_v45 = vcombine.low %v5664_v58, %v5668_v60  ;;  %v11431_v53 = vcombine.low %v5792_v16, %v5796_v3 }
 0x67d   :  { %9060 = vmatprep.subr.bf16.mxu1 %v11456_v61  ;;  %v11296_v61 = vcombine.high %v5656_v31, %v5660_v33 }
 0x67e   :  { %v8725_v25 = vpop.f32.mrf.mxu0  ;;  %8970 = vmatmul.mubr.bf16.vlgmr.msra.gmra.mxu0 %v12926_v27 }
 0x67f   :  { %v8726_v34 = vadd.f32 %v8725_v25, %v13000_v59  ;;  %v8766_v39 = vpop.f32.mrf.mxu1  ;;  %9011 = vmatmul.mubr.bf16.vlgmr.msra.gmra.mxu1 %v12928_v30  ;;  %9020 = vmatpush1.bf16.msra.mxu0 %v11327_v42  ;;  %v11440_v59 = vcombine.high %v5800_v50, %v5804_v6  ;;  %v11424_v42 = vcombine.high %v5784_v47, %v5788_v8 }
 0x680   :  { %9051 = vmatprep.mubr.bf16.mxu0 %v12934_v12  ;;  %9061 = vmatpush1.bf16.msra.mxu1 %v11455_v37  ;;  %v8727_v55 = vpop.f32.mrf.mxu0  ;;  %v5776_v37 = vld [vmem:[#allocation20 + $0xc98] sm:$0xff]  ;;  %v11295_v25 = vcombine.low %v5656_v31, %v5660_v33 }
 0x681   :  { %v13010_v10 = vadd.f32 %v8766_v39, %v8726_v34  ;;  %9092 = vmatprep.mubr.bf16.mxu1 %v12936_v36  ;;  %v8728_v27 = vadd.f32 %v8727_v55, %v13004_v5  ;;  %v8768_v48 = vpop.f32.mrf.mxu1  ;;  %9021 = vmatprep.subr.bf16.mxu0 %v11320_v17  ;;  %v11439_v5 = vcombine.low %v5800_v50, %v5804_v6  ;;  %v5780_v17 = vld [vmem:[#allocation20 + $0xcb8] sm:$0xff] }
 0x682   :  { %v8729_v30 = vpop.f32.mrf.mxu0  ;;  %9062 = vmatprep.subr.bf16.mxu1 %v11448_v1  ;;  %v11423_v1 = vcombine.low %v5784_v47, %v5788_v8  ;;  %v11288_v50 = vcombine.high %v5648_v13, %v5652_v62  ;;  %v11416_v39 = vcombine.high %v5776_v37, %v5780_v17  ;;  %v5644_v55 = vld [vmem:[#allocation20 + $0x878] sm:$0xff]  ;;  %v11415_v58 = vcombine.low %v5776_v37, %v5780_v17 }
 0x683   :  { %v9115_v12 = vrot.slane %v13010_v10, 4  ;;  %v13015_v7 = vadd.f32 %v8768_v48, %v8728_v27  ;;  %v8770_v21 = vpop.f32.mrf.mxu1  ;;  %9022 = vmatpush1.bf16.msra.mxu0 %v11319_v41  ;;  %v5640_v41 = vld [vmem:[#allocation20 + $0x858] sm:$0xff] }
 0x684   :  { %9063 = vmatpush1.bf16.msra.mxu1 %v11447_v43  ;;  %v8730_v36 = vpop.f32.mrf.mxu0  ;;  %9023 = vmatprep.subr.bf16.mxu0 %v11312_v20  ;;  %v5768_v43 = vld [vmem:[#allocation20 + $0xc58] sm:$0xff]  ;;  %v11280_v60 = vcombine.high %v5640_v41, %v5644_v55 }
 0x685   :  { %v9116_v4 = vadd.f32 %v9115_v12, %v13010_v10  ;;  %v9121_v52 = vrot.slane %v13015_v7, 4  ;;  %v8771_v26 = vpop.f32.mrf.mxu1  ;;  %9064 = vmatprep.subr.bf16.mxu1 %v11440_v59  ;;  %v5772_v20 = vld [vmem:[#allocation20 + $0xc78] sm:$0xff]  ;;  %v11287_v59 = vcombine.low %v5648_v13, %v5652_v62 }
 0x686   :  { %v11408_v3 = vcombine.high %v5768_v43, %v5772_v20  ;;  %v5632_v12 = vld [vmem:[#allocation20 + $0x818] sm:$0xff] }
 0x687   :  { %v9117_v9 = vrot.slane %v9116_v4, 2  ;;  %v9122_v51 = vadd.f32 %v9121_v52, %v13015_v7  ;;  %9024 = vmatpush1.bf16.msra.mxu0 %v11311_v22  ;;  %v5636_v21 = vld [vmem:[#allocation20 + $0x838] sm:$0xff]  ;;  %v11407_v52 = vcombine.low %v5768_v43, %v5772_v20 }
 0x688   :  { %9065 = vmatpush1.bf16.msra.mxu1 %v11439_v5  ;;  %9025 = vmatprep.subr.bf16.mxu0 %v11304_v40  ;;  %v5760_v22 = vld [vmem:[#allocation20 + $0xc18] sm:$0xff] }
 0x689   :  { %v9118_v29 = vadd.f32 %v9117_v9, %v9116_v4  ;;  %v9123_v63 = vrot.slane %v9122_v51, 2  ;;  %9066 = vmatprep.subr.bf16.mxu1 %v11432_v35  ;;  %v5764_v36 = vld [vmem:[#allocation20 + $0xc38] sm:$0xff]  ;;  %v11279_v4 = vcombine.low %v5640_v41, %v5644_v55 }
 0x68a   :  { %v11400_v31 = vcombine.high %v5760_v22, %v5764_v36  ;;  %v5752_v33 = vld [vmem:[#allocation20 + $0xbd8] sm:$0xff] }
 0x68b   :  { %v9119_v32 = vrot.slane %v9118_v29, 1  ;;  %v9124_v14 = vadd.f32 %v9123_v63, %v9122_v51  ;;  %9026 = vmatpush1.bf16.msra.mxu0 %v11303_v45  ;;  %v5756_v47 = vld [vmem:[#allocation20 + $0xbf8] sm:$0xff] }
 0x68c   :  { %9067 = vmatpush1.bf16.msra.mxu1 %v11431_v53  ;;  %9027 = vmatprep.subr.bf16.mxu0 %v11296_v61  ;;  %v5880_v8 = vld [vmem:[#allocation20 + $0xfd8] sm:$0xff]  ;;  %v11399_v53 = vcombine.low %v5760_v22, %v5764_v36  ;;  %v11392_v61 = vcombine.high %v5752_v33, %v5756_v47 }
 0x68d   :  { %v9120_v6 = vadd.f32 %v9119_v32, %v9118_v29  ;;  %v9125_v34 = vrot.slane %v9124_v14, 1  ;;  %9068 = vmatprep.subr.bf16.mxu1 %v11424_v42  ;;  %v5884_v9 = vld [vmem:[#allocation20 + $0xff8] sm:$0xff] }
 0x68e   :  { %v11520_v42 = vcombine.high %v5880_v8, %v5884_v9  ;;  %v5744_v13 = vld [vmem:[#allocation20 + $0xb98] sm:$0xff] }
 0x68f   :  { %v9153_v27 = vmul.f32 0.125, %v9120_v6  ;;  %v9126_v48 = vadd.f32 %v9125_v34, %v9124_v14  ;;  %9028 = vmatpush1.bf16.msra.mxu0 %v11295_v25  ;;  %v5748_v62 = vld [vmem:[#allocation20 + $0xbb8] sm:$0xff]  ;;  %v11391_v25 = vcombine.low %v5752_v33, %v5756_v47 }
 0x690   :  { %9069 = vmatpush1.bf16.msra.mxu1 %v11423_v1  ;;  %9029 = vmatprep.subr.bf16.mxu0 %v11288_v50  ;;  %v5872_v37 = vld [vmem:[#allocation20 + $0xf98] sm:$0xff]  ;;  %v11519_v1 = vcombine.low %v5880_v8, %v5884_v9  ;;  %v11384_v50 = vcombine.high %v5744_v13, %v5748_v62 }
 0x691   :  { %v13021_v30 = vsub.f32 %v13010_v10, %v9153_v27  ;;  %v9154_v16 = vmul.f32 0.125, %v9126_v48  ;;  %9070 = vmatprep.subr.bf16.mxu1 %v11416_v39  ;;  %v11272_v10 = vcombine.high %v5632_v12, %v5636_v21  ;;  %v5876_v17 = vld [vmem:[#allocation20 + $0xfb8] sm:$0xff] }
 0x692   :  { %v11512_v39 = vcombine.high %v5872_v37, %v5876_v17  ;;  %v5736_v41 = vld [vmem:[#allocation20 + $0xb58] sm:$0xff] }
 0x693   :  { %v9169_v5 = vmul.f32 %v13021_v30, %v13021_v30  ;;  %v13026_v40 = vsub.f32 %v13015_v7, %v9154_v16  ;;  %9030 = vmatpush1.bf16.msra.mxu0 %v11287_v59  ;;  %v11271_v7 = vcombine.low %v5632_v12, %v5636_v21  ;;  %v5740_v55 = vld [vmem:[#allocation20 + $0xb78] sm:$0xff]  ;;  %v11383_v59 = vcombine.low %v5744_v13, %v5748_v62 }
 0x694   :  { %9071 = vmatpush1.bf16.msra.mxu1 %v11415_v58  ;;  %9031 = vmatprep.subr.bf16.mxu0 %v11280_v60  ;;  %v5864_v43 = vld [vmem:[#allocation20 + $0xf58] sm:$0xff]  ;;  %v11511_v58 = vcombine.low %v5872_v37, %v5876_v17  ;;  %v11376_v60 = vcombine.high %v5736_v41, %v5740_v55 }
 0x695   :  { %v9187_v26 = vrot.slane %v9169_v5, 4  ;;  %v9170_v35 = vmul.f32 %v13026_v40, %v13026_v40  ;;  %9072 = vmatprep.subr.bf16.mxu1 %v11408_v3  ;;  %v5868_v20 = vld [vmem:[#allocation20 + $0xf78] sm:$0xff] }
 0x696   :  { %v11504_v12 = vcombine.high %v5864_v43, %v5868_v20  ;;  %v5728_v21 = vld [vmem:[#allocation20 + $0xb18] sm:$0xff] }
 0x697   :  { %v9188_v51 = vadd.f32 %v9187_v26, %v9169_v5  ;;  %v9193_v45 = vrot.slane %v9170_v35, 4  ;;  %9032 = vmatpush1.bf16.msra.mxu0 %v11279_v4  ;;  %v5732_v22 = vld [vmem:[#allocation20 + $0xb38] sm:$0xff]  ;;  %v11503_v26 = vcombine.low %v5864_v43, %v5868_v20 }
 0x698   :  { %9073 = vmatpush1.bf16.msra.mxu1 %v11407_v52  ;;  %9033 = vmatprep.subr.bf16.mxu0 %v11272_v10  ;;  %v5856_v36 = vld [vmem:[#allocation20 + $0xf18] sm:$0xff]  ;;  %v11375_v10 = vcombine.low %v5736_v41, %v5740_v55 }
 0x699   :  { %v9189_v29 = vrot.slane %v9188_v51, 2  ;;  %v9194_v63 = vadd.f32 %v9193_v45, %v9170_v35  ;;  %9074 = vmatprep.subr.bf16.mxu1 %v11400_v31  ;;  %v5860_v5 = vld [vmem:[#allocation20 + $0xf38] sm:$0xff]  ;;  %v11368_v35 = vcombine.high %v5728_v21, %v5732_v22  ;;  %v11367_v45 = vcombine.low %v5728_v21, %v5732_v22 }
 0x69a   :  { %v11496_v33 = vcombine.high %v5856_v36, %v5860_v5  ;;  %v5720_v47 = vld [vmem:[#allocation20 + $0xad8] sm:$0xff]  ;;  %v13034_v21 = vrot.slane %v9255_v18, %v12648_v56 }
 0x69b   :  { %v9190_v32 = vadd.f32 %v9189_v29, %v9188_v51  ;;  %v9195_v14 = vrot.slane %v9194_v63, 2  ;;  %9034 = vmatpush1.bf16.msra.mxu0 %v11271_v7  ;;  %v5724_v8 = vld [vmem:[#allocation20 + $0xaf8] sm:$0xff]  ;;  %v11495_v7 = vcombine.low %v5856_v36, %v5860_v5 }
 0x69c   :  { %9075 = vmatpush1.bf16.msra.mxu1 %v11399_v53  ;;  %9035 = vmatprep.subr.bf16.mxu0 %v11392_v61  ;;  %v5848_v9 = vld [vmem:[#allocation20 + $0xed8] sm:$0xff]  ;;  %v11360_v53 = vcombine.high %v5720_v47, %v5724_v8  ;;  %v11359_v62 = vcombine.low %v5720_v47, %v5724_v8 }
 0x69d   :  { %v9191_v6 = vrot.slane %v9190_v32, 1  ;;  %v9196_v34 = vadd.f32 %v9195_v14, %v9194_v63  ;;  %9076 = vmatprep.subr.bf16.mxu1 %v11520_v42  ;;  %v5852_v51 = vld [vmem:[#allocation20 + $0xef8] sm:$0xff] }
 0x69e   :  { %v11488_v61 = vcombine.high %v5848_v9, %v5852_v51  ;;  %v5712_v29 = vld [vmem:[#allocation20 + $0xa98] sm:$0xff]  ;;  %v11487_v37 = vcombine.low %v5848_v9, %v5852_v51 }
 0x69f   :  { %v9192_v27 = vadd.f32 %v9191_v6, %v9190_v32  ;;  %v9197_v48 = vrot.slane %v9196_v34, 1  ;;  %9036 = vmatpush2.bf16.msra.mxu0 %v11391_v25  ;;  %v5716_v63 = vld [vmem:[#allocation20 + $0xab8] sm:$0xff] }
 0x6a0   :  { %9077 = vmatpush2.bf16.msra.mxu1 %v11519_v1  ;;  %9037 = vmatprep.subr.bf16.mxu0 %v11384_v50  ;;  %v5840_v42 = vld [vmem:[#allocation20 + $0xe98] sm:$0xff]  ;;  %v11352_v17 = vcombine.high %v5712_v29, %v5716_v63  ;;  %v11351_v6 = vcombine.low %v5712_v29, %v5716_v63 }
 0x6a1   :  { %v9225_v16 = vmul.f32 0.125, %v9192_v27  ;;  %v9198_v3 = vadd.f32 %v9197_v48, %v9196_v34  ;;  %9078 = vmatprep.subr.bf16.mxu1 %v11512_v39  ;;  %v5844_v13 = vld [vmem:[#allocation20 + $0xeb8] sm:$0xff] }
 0x6a2   :  { %v11480_v32 = vcombine.high %v5840_v42, %v5844_v13  ;;  %v5704_v14 = vld [vmem:[#allocation20 + $0xa58] sm:$0xff]  ;;  %v11479_v34 = vcombine.low %v5840_v42, %v5844_v13  ;;  %v11822_v13 = vld [vmem:[#allocation25 + $0x74] ss:$8 sps:$4 sm:$0xff]  }
 0x6a3   :  { %v9233_v4 = vadd.f32 1e-05, %v9225_v16  ;;  %v9226_v52 = vmul.f32 0.125, %v9198_v3  ;;  %9038 = vmatpush2.bf16.msra.mxu0 %v11383_v59  ;;  %v5708_v25 = vld [vmem:[#allocation20 + $0xa78] sm:$0xff] }
 0x6a4   :  { %9079 = vmatpush2.bf16.msra.mxu1 %v11511_v58  ;;  %9039 = vmatprep.subr.bf16.mxu0 %v11376_v60  ;;  %v5832_v1 = vld [vmem:[#allocation20 + $0xe58] sm:$0xff]  ;;  %v11344_v39 = vcombine.high %v5704_v14, %v5708_v25  ;;  %v11343_v59 = vcombine.low %v5704_v14, %v5708_v25 }
 0x6a5   :  { %v9234_v31 = vadd.f32 1e-05, %v9226_v52  ;;  %9080 = vmatprep.subr.bf16.mxu1 %v11504_v12  ;;  %12048 = vrsqrt.f32 %v9233_v4  ;;  %v5836_v50 = vld [vmem:[#allocation20 + $0xe78] sm:$0xff] }
 0x6a6   :  { %v11472_v41 = vcombine.high %v5832_v1, %v5836_v50  ;;  %v5696_v55 = vld [vmem:[#allocation20 + $0xa18] sm:$0xff]  ;;  %v11471_v60 = vcombine.low %v5832_v1, %v5836_v50  ;;  %v11834_v50 = vld [vmem:[#allocation25 + $0x54] ss:$8 sps:$4 sm:$0xff]  }
 0x6a7   :  { %12050 = vrsqrt.f32 %v9234_v31  ;;  %9040 = vmatpush2.bf16.msra.mxu0 %v11375_v10  ;;  %v5700_v43 = vld [vmem:[#allocation20 + $0xa38] sm:$0xff] }
 0x6a8   :  { %9081 = vmatpush2.bf16.msra.mxu1 %v11503_v26  ;;  %9041 = vmatprep.subr.bf16.mxu0 %v11368_v35  ;;  %v5824_v20 = vld [vmem:[#allocation20 + $0xe18] sm:$0xff]  ;;  %v11336_v16 = vcombine.high %v5696_v55, %v5700_v43  ;;  %v11335_v36 = vcombine.low %v5696_v55, %v5700_v43 }
 0x6a9   :  { %9082 = vmatprep.subr.bf16.mxu1 %v11496_v33  ;;  %v5828_v27 = vld [vmem:[#allocation20 + $0xe38] sm:$0xff] }
 0x6aa   :  { %v11464_v12 = vcombine.high %v5824_v20, %v5828_v27  ;;  %v11463_v5 = vcombine.low %v5824_v20, %v5828_v27  ;;  %v11831_v14 = vld [vmem:[#allocation25 + $0x164] ss:$8 sps:$4 sm:$0xff]   ;;  %v11826_v25 = vld [vmem:[#allocation25 + $0x60] ss:$8 sps:$4 sm:$0xff]   ;;  %v11846_v27 = vld [vmem:[#allocation25 + $0x34] ss:$8 sps:$4 sm:$0xff]  }
 0x6ab   :  { %9042 = vmatpush2.bf16.msra.mxu0 %v11367_v45  ;;  %v11829_v1 = vld [vmem:[#allocation25 + $0x160] ss:$8 sps:$4 sm:$0xff]   ;;  %v11843_v55 = vld [vmem:[#allocation25 + $0x144] ss:$8 sps:$4 sm:$0xff]  }
 0x6ac   :  { %9083 = vmatpush2.bf16.msra.mxu1 %v11495_v7  ;;  %9043 = vmatprep.subr.bf16.mxu0 %v11360_v53  ;;  %v11838_v43 = vld [vmem:[#allocation25 + $0x40] ss:$8 sps:$4 sm:$0xff]  }
 0x6ad   :  { %9084 = vmatprep.subr.bf16.mxu1 %v11488_v61  ;;  %v11841_v20 = vld [vmem:[#allocation25 + $0x140] ss:$8 sps:$4 sm:$0xff]  }
 0x6af   :  { %9044 = vmatpush2.bf16.msra.mxu0 %v11359_v62  ;;  %v11825_v62 = vld [vmem:[#allocation25 + $0x174] ss:$8 sps:$4 sm:$0xff]  }
 0x6b0   :  { %9085 = vmatpush2.bf16.msra.mxu1 %v11487_v37  ;;  %9045 = vmatprep.subr.bf16.mxu0 %v11352_v17  ;;  %v11820_v37 = vld [vmem:[#allocation25 + $0x70] ss:$8 sps:$4 sm:$0xff]  }
 0x6b1   :  { %9086 = vmatprep.subr.bf16.mxu1 %v11480_v32  ;;  %v11823_v17 = vld [vmem:[#allocation25 + $0x170] ss:$8 sps:$4 sm:$0xff]   ;;  %v11828_v32 = vld [vmem:[#allocation25 + $0x64] ss:$8 sps:$4 sm:$0xff]  }
 0x6b2   :  { %v12049_v48 = vpop.eup %12048 }
 0x6b3   :  { %9046 = vmatpush2.bf16.msra.mxu0 %v11351_v6  ;;  %v11837_v6 = vld [vmem:[#allocation25 + $0x154] ss:$8 sps:$4 sm:$0xff]  }
 0x6b4   :  { %v12051_v58 = vpop.eup %12050  ;;  %9087 = vmatpush2.bf16.msra.mxu1 %v11479_v34  ;;  %9047 = vmatprep.subr.bf16.mxu0 %v11344_v39  ;;  %v11832_v34 = vld [vmem:[#allocation25 + $0x50] ss:$8 sps:$4 sm:$0xff]  }
 0x6b5   :  { %v9256_v3 = vcombine.low %v12049_v48, %v12051_v58  ;;  %9088 = vmatprep.subr.bf16.mxu1 %v11472_v41  ;;  %v11835_v39 = vld [vmem:[#allocation25 + $0x150] ss:$8 sps:$4 sm:$0xff]   ;;  %v11840_v41 = vld [vmem:[#allocation25 + $0x44] ss:$8 sps:$4 sm:$0xff]   ;;  %v11849_v48 = vld [vmem:[#allocation25 + $0x134] ss:$8 sps:$4 sm:$0xff]  }
 0x6b6   :  { %v11847_v58 = vld [vmem:[#allocation25 + $0x130] ss:$8 sps:$4 sm:$0xff]  }
 0x6b7   :  { %v13037_v22 = vrot.slane %v9256_v3, %v12648_v56  ;;  %9048 = vmatpush2.bf16.msra.mxu0 %v11343_v59  ;;  %v11844_v59 = vld [vmem:[#allocation25 + $0x30] ss:$8 sps:$4 sm:$0xff]   ;;  %v11853_v3 = vld [vmem:[#allocation25 + $0x120] ss:$8 sps:$4 sm:$0xff]  }
 0x6b8   :  { %9089 = vmatpush2.bf16.msra.mxu1 %v11471_v60  ;;  %9049 = vmatprep.subr.bf16.mxu0 %v11336_v16  ;;  %v11852_v60 = vld [vmem:[#allocation25 + $0x24] ss:$8 sps:$4 sm:$0xff]   ;;  %v11850_v16 = vld [vmem:[#allocation25 + $0x20] ss:$8 sps:$4 sm:$0xff]  }
 0x6b9   :  { %v9287_v4 = vcombine.low %v13034_v21, %v13037_v22  ;;  %9090 = vmatprep.subr.bf16.mxu1 %v11464_v12  ;;  %v11855_v12 = vld [vmem:[#allocation25 + $0x124] ss:$8 sps:$4 sm:$0xff]  }
 0x6bb   :  { %9050 = vmatpush2.bf16.msra.mxu0 %v11335_v36  ;;  %v11858_v36 = vld [vmem:[#allocation25 + $0x14] ss:$8 sps:$4 sm:$0xff]  }
 0x6bc   :  { %9091 = vmatpush2.bf16.msra.mxu1 %v11463_v5  ;;  %10200 = vmatprep.subr.bf16.mxu0 %v11822_v13  ;;  %v11861_v5 = vld [vmem:[#allocation25 + $0x114] ss:$8 sps:$4 sm:$0xff]   ;;  %v11886_v13 = vld [vmem:[#allocation25 + $0xc0] ss:$8 sps:$4 sm:$0xff]  }
 0x6bd   :  { %10241 = vmatprep.subr.bf16.mxu1 %v11825_v62  ;;  %v11889_v62 = vld [vmem:[#allocation25 + $0x1c0] ss:$8 sps:$4 sm:$0xff]  }
 0x6be   :  { %v8807_v52 = vpop.f32.mrf.mxu0  ;;  %9052 = vmatmul.mubr.bf16.vlgmr.msra.gmra.mxu0 %v12948_v15 }
 0x6bf   :  { %v8848_v44 = vpop.f32.mrf.mxu1  ;;  %9093 = vmatmul.mubr.bf16.vlgmr.msra.gmra.mxu1 %v12950_v49  ;;  %10201 = vmatpush1.bf16.msra.mxu0 %v11820_v37 }
 0x6c0   :  { %v8849_v2 = vadd.f32 %v8848_v44, %v8807_v52  ;;  %v8809_v18 = vpop.f32.mrf.mxu0  ;;  %10242 = vmatpush1.bf16.msra.mxu1 %v11823_v17  ;;  %10202 = vmatprep.subr.bf16.mxu0 %v11828_v32  ;;  %v11856_v52 = vld [vmem:[#allocation25 + $0x10] ss:$8 sps:$4 sm:$0xff]  }
 0x6c1   :  { %v8850_v10 = vpop.f32.mrf.mxu1  ;;  %10243 = vmatprep.subr.bf16.mxu1 %v11831_v14  ;;  %v11859_v44 = vld [vmem:[#allocation25 + $0x110] ss:$8 sps:$4 sm:$0xff]   ;;  %v11894_v14 = vld [vmem:[#allocation25 + $0xb4] ss:$8 sps:$4 sm:$0xff]  }
 0x6c2   :  { %v8851_v26 = vadd.f32 %v8850_v10, %v8809_v18  ;;  %v8811_v35 = vpop.f32.mrf.mxu0  ;;  %v11867_v18 = vld [vmem:[#allocation25 + $0x104] ss:$8 sps:$4 sm:$0xff]   ;;  %v11862_v10 = vld [vmem:[#allocation25] ss:$8 sps:$4 sm:$0xff]   ;;  %v11892_v32 = vld [vmem:[#allocation25 + $0xb0] ss:$8 sps:$4 sm:$0xff]  }
 0x6c3   :  { %v8852_v31 = vpop.f32.mrf.mxu1  ;;  %10203 = vmatpush1.bf16.msra.mxu0 %v11826_v25  ;;  %v11870_v35 = vld [vmem:[#allocation25 + $0xf4] ss:$8 sps:$4 sm:$0xff]   ;;  %v11895_v25 = vld [vmem:[#allocation25 + $0x1b0] ss:$8 sps:$4 sm:$0xff]  }
 0x6c4   :  { %v8812_v33 = vpop.f32.mrf.mxu0  ;;  %10244 = vmatpush1.bf16.msra.mxu1 %v11829_v1  ;;  %10204 = vmatprep.subr.bf16.mxu0 %v11834_v50  ;;  %v11873_v31 = vld [vmem:[#allocation25 + $0x1f4] ss:$8 sps:$4 sm:$0xff]  }
 0x6c5   :  { %v8853_v47 = vpop.f32.mrf.mxu1  ;;  %10245 = vmatprep.subr.bf16.mxu1 %v11837_v6  ;;  %v11868_v33 = vld [vmem:[#allocation25 + $0xf0] ss:$8 sps:$4 sm:$0xff]   ;;  %v11897_v50 = vld [vmem:[#allocation25 + $0x1b4] ss:$8 sps:$4 sm:$0xff]   ;;  %v11900_v6 = vld [vmem:[#allocation25 + $0xa4] ss:$8 sps:$4 sm:$0xff]  }
 0x6c6   :  { %v11871_v47 = vld [vmem:[#allocation25 + $0x1f0] ss:$8 sps:$4 sm:$0xff]  }
 0x6c7   :  { %10205 = vmatpush1.bf16.msra.mxu0 %v11832_v34 }
 0x6c8   :  { %10246 = vmatpush1.bf16.msra.mxu1 %v11835_v39  ;;  %10206 = vmatprep.subr.bf16.mxu0 %v11840_v41  ;;  %v11903_v39 = vld [vmem:[#allocation25 + $0x1a4] ss:$8 sps:$4 sm:$0xff]  }
 0x6c9   :  { %10247 = vmatprep.subr.bf16.mxu1 %v11843_v55  ;;  %v11898_v55 = vld [vmem:[#allocation25 + $0xa0] ss:$8 sps:$4 sm:$0xff]  }
 0x6cb   :  { %10207 = vmatpush1.bf16.msra.mxu0 %v11838_v43 }
 0x6cc   :  { %10248 = vmatpush1.bf16.msra.mxu1 %v11841_v20  ;;  %10208 = vmatprep.subr.bf16.mxu0 %v11846_v27  ;;  %v11901_v20 = vld [vmem:[#allocation25 + $0x1a0] ss:$8 sps:$4 sm:$0xff]   ;;  %v11906_v27 = vld [vmem:[#allocation25 + $0x94] ss:$8 sps:$4 sm:$0xff]  }
 0x6cd   :  { %10249 = vmatprep.subr.bf16.mxu1 %v11849_v48 }
 0x6cf   :  { %10209 = vmatpush1.bf16.msra.mxu0 %v11844_v59  ;;  %v11909_v59 = vld [vmem:[#allocation25 + $0x194] ss:$8 sps:$4 sm:$0xff]  }
 0x6d0   :  { %10250 = vmatpush1.bf16.msra.mxu1 %v11847_v58  ;;  %10210 = vmatprep.subr.bf16.mxu0 %v11852_v60  ;;  %v11904_v60 = vld [vmem:[#allocation25 + $0x90] ss:$8 sps:$4 sm:$0xff]  }
 0x6d1   :  { %10251 = vmatprep.subr.bf16.mxu1 %v11855_v12  ;;  %v11915_v12 = vld [vmem:[#allocation25 + $0x184] ss:$8 sps:$4 sm:$0xff]  }
 0x6d3   :  { %10211 = vmatpush1.bf16.msra.mxu0 %v11850_v16  ;;  %v11907_v16 = vld [vmem:[#allocation25 + $0x190] ss:$8 sps:$4 sm:$0xff]  }
 0x6d4   :  { %10252 = vmatpush1.bf16.msra.mxu1 %v11853_v3  ;;  %10212 = vmatprep.subr.bf16.mxu0 %v11858_v36  ;;  %v11912_v3 = vld [vmem:[#allocation25 + $0x84] ss:$8 sps:$4 sm:$0xff]   ;;  %v11910_v36 = vld [vmem:[#allocation25 + $0x80] ss:$8 sps:$4 sm:$0xff]  }
 0x6d5   :  { %10253 = vmatprep.subr.bf16.mxu1 %v11861_v5  ;;  %v11913_v5 = vld [vmem:[#allocation25 + $0x180] ss:$8 sps:$4 sm:$0xff]  }
 0x6d7   :  { %10213 = vmatpush1.bf16.msra.mxu0 %v11856_v52  ;;  %v11918_v52 = vld [vmem:[#allocation25 + $0x274] ss:$8 sps:$4 sm:$0xff]  }
 0x6d8   :  { %10254 = vmatpush1.bf16.msra.mxu1 %v11859_v44  ;;  %v11921_v44 = vld [vmem:[#allocation25 + $0x374] ss:$8 sps:$4 sm:$0xff]  }
 0x6d9   :  { %10255 = vmatprep.subr.bf16.mxu1 %v11867_v18 }
 0x6fe   :  { %v8889_v8 = vpop.f32.mrf.mxu0 }
 0x6ff   :  { %v8890_v9 = vadd.f32 %v8889_v8, %v8849_v2  ;;  %v8930_v51 = vpop.f32.mrf.mxu1  ;;  %v11864_v2 = vld [vmem:[#allocation25 + $0x4] ss:$8 sps:$4 sm:$0xff]  }
 0x700   :  { %v8891_v45 = vpop.f32.mrf.mxu0  ;;  %10214 = vmatprep.subr.bf16.mxu0 %v11864_v2  ;;  %v11876_v8 = vld [vmem:[#allocation25 + $0xe4] ss:$8 sps:$4 sm:$0xff]  }
 0x701   :  { %v13043_v7 = vadd.f32 %v8930_v51, %v8890_v9  ;;  %v8892_v53 = vadd.f32 %v8891_v45, %v8851_v26  ;;  %v8932_v61 = vpop.f32.mrf.mxu1  ;;  %v11865_v26 = vld [vmem:[#allocation25 + $0x100] ss:$8 sps:$4 sm:$0xff]   ;;  %10215 = vmatpush1.bf16.msra.mxu0 %v11862_v10  ;;  %v11879_v9 = vld [vmem:[#allocation25 + $0x1e4] ss:$8 sps:$4 sm:$0xff]  }
 0x702   :  { %v8893_v15 = vpop.f32.mrf.mxu0  ;;  %10256 = vmatpush1.bf16.msra.mxu1 %v11865_v26  ;;  %10216 = vmatprep.subr.bf16.mxu0 %v11870_v35  ;;  %v11874_v51 = vld [vmem:[#allocation25 + $0xe0] ss:$8 sps:$4 sm:$0xff]  }
 0x703   :  { %v13045_v29 = vadd.f32 %v8932_v61, %v8892_v53  ;;  %v8934_v49 = vpop.f32.mrf.mxu1  ;;  %10257 = vmatprep.subr.bf16.mxu1 %v11873_v31  ;;  %v11877_v45 = vld [vmem:[#allocation25 + $0x1e0] ss:$8 sps:$4 sm:$0xff]   ;;  %v11882_v53 = vld [vmem:[#allocation25 + $0xd4] ss:$8 sps:$4 sm:$0xff]   ;;  %v11880_v15 = vld [vmem:[#allocation25 + $0xd0] ss:$8 sps:$4 sm:$0xff]  }
 0x704   :  { %v8894_v63 = vpop.f32.mrf.mxu0  ;;  %v11885_v61 = vld [vmem:[#allocation25 + $0x1d4] ss:$8 sps:$4 sm:$0xff]   ;;  %v11883_v49 = vld [vmem:[#allocation25 + $0x1d0] ss:$8 sps:$4 sm:$0xff]   ;;  %v9127_v18 = vrot.slane %v13043_v7, 4 }
 0x705   :  { %v8935_v42 = vpop.f32.mrf.mxu1  ;;  %10217 = vmatpush2.bf16.msra.mxu0 %v11868_v33  ;;  %v11888_v63 = vld [vmem:[#allocation25 + $0xc4] ss:$8 sps:$4 sm:$0xff]   ;;  %v9133_v2 = vrot.slane %v13045_v29, 4 }
 0x706   :  { %10258 = vmatpush2.bf16.msra.mxu1 %v11871_v47  ;;  %10218 = vmatprep.subr.bf16.mxu0 %v11876_v8  ;;  %v11891_v42 = vld [vmem:[#allocation25 + $0x1c4] ss:$8 sps:$4 sm:$0xff]   ;;  %v9128_v26 = vadd.f32 %v9127_v18, %v13043_v7 }
 0x707   :  { %10259 = vmatprep.subr.bf16.mxu1 %v11879_v9  ;;  %v9134_v10 = vadd.f32 %v9133_v2, %v13045_v29 }
 0x708   :  { %v9129_v31 = vrot.slane %v9128_v26, 2 }
 0x709   :  { %10219 = vmatpush2.bf16.msra.mxu0 %v11874_v51  ;;  %v9135_v35 = vrot.slane %v9134_v10, 2 }
 0x70a   :  { %10260 = vmatpush2.bf16.msra.mxu1 %v11877_v45  ;;  %10220 = vmatprep.subr.bf16.mxu0 %v11882_v53  ;;  %v9130_v47 = vadd.f32 %v9129_v31, %v9128_v26 }
 0x70b   :  { %10261 = vmatprep.subr.bf16.mxu1 %v11885_v61  ;;  %v9136_v33 = vadd.f32 %v9135_v35, %v9134_v10 }
 0x70c   :  { %v9131_v9 = vrot.slane %v9130_v47, 1 }
 0x70d   :  { %10221 = vmatpush2.bf16.msra.mxu0 %v11880_v15  ;;  %v9137_v8 = vrot.slane %v9136_v33, 1 }
 0x70e   :  { %10262 = vmatpush2.bf16.msra.mxu1 %v11883_v49  ;;  %10222 = vmatprep.subr.bf16.mxu0 %v11888_v63  ;;  %v9132_v45 = vadd.f32 %v9131_v9, %v9130_v47 }
 0x70f   :  { %10263 = vmatprep.subr.bf16.mxu1 %v11891_v42  ;;  %v9138_v51 = vadd.f32 %v9137_v8, %v9136_v33 }
 0x710   :  { %v9155_v61 = vmul.f32 0.125, %v9132_v45 }
 0x711   :  { %10223 = vmatpush2.bf16.msra.mxu0 %v11886_v13  ;;  %v9156_v53 = vmul.f32 0.125, %v9138_v51 }
 0x712   :  { %10264 = vmatpush2.bf16.msra.mxu1 %v11889_v62  ;;  %10224 = vmatprep.subr.bf16.mxu0 %v11894_v14  ;;  %v13055_v49 = vsub.f32 %v13043_v7, %v9155_v61 }
 0x713   :  { %10265 = vmatprep.subr.bf16.mxu1 %v11897_v50  ;;  %v13052_v15 = vsub.f32 %v13045_v29, %v9156_v53 }
 0x714   :  { %v9171_v50 = vmul.f32 %v13055_v49, %v13055_v49 }
 0x715   :  { %10225 = vmatpush2.bf16.msra.mxu0 %v11892_v32  ;;  %v9172_v13 = vmul.f32 %v13052_v15, %v13052_v15 }
 0x716   :  { %10266 = vmatpush2.bf16.msra.mxu1 %v11895_v25  ;;  %10226 = vmatprep.subr.bf16.mxu0 %v11900_v6 }
 0x717   :  { %10267 = vmatprep.subr.bf16.mxu1 %v11903_v39 }
 0x719   :  { %10227 = vmatpush2.bf16.msra.mxu0 %v11898_v55  ;;  %v9205_v55 = vrot.slane %v9172_v13, 4 }
 0x71a   :  { %10268 = vmatpush2.bf16.msra.mxu1 %v11901_v20  ;;  %10228 = vmatprep.subr.bf16.mxu0 %v11906_v27 }
 0x71b   :  { %10269 = vmatprep.subr.bf16.mxu1 %v11909_v59 }
 0x71d   :  { %10229 = vmatpush2.bf16.msra.mxu0 %v11904_v60 }
 0x71e   :  { %10270 = vmatpush2.bf16.msra.mxu1 %v11907_v16  ;;  %10230 = vmatprep.subr.bf16.mxu0 %v11912_v3 }
 0x71f   :  { %10271 = vmatprep.subr.bf16.mxu1 %v11915_v12 }
 0x721   :  { %10231 = vmatpush2.bf16.msra.mxu0 %v11910_v36 }
 0x722   :  { %10272 = vmatpush2.bf16.msra.mxu1 %v11913_v5  ;;  %10282 = vmatprep.subr.bf16.mxu0 %v11918_v52 }
 0x723   :  { %10323 = vmatprep.subr.bf16.mxu1 %v11921_v44 }
 0x73e   :  { %v8971_v37 = vpop.f32.mrf.mxu0 }
 0x73f   :  { %v9012_v17 = vpop.f32.mrf.mxu1 }
 0x740   :  { %v8973_v1 = vpop.f32.mrf.mxu0  ;;  %v9013_v63 = vadd.f32 %v9012_v17, %v8971_v37  ;;  %v9199_v17 = vrot.slane %v9171_v50, 4 }
 0x741   :  { %v9014_v34 = vpop.f32.mrf.mxu1 }
 0x742   :  { %v8975_v41 = vpop.f32.mrf.mxu0  ;;  %v9015_v62 = vadd.f32 %v9014_v34, %v8973_v1  ;;  %v9206_v1 = vadd.f32 %v9205_v55, %v9172_v13  ;;  %v9200_v60 = vadd.f32 %v9199_v17, %v9171_v50 }
 0x743   :  { %v9016_v43 = vpop.f32.mrf.mxu1 }
 0x744   :  { %v8976_v48 = vpop.f32.mrf.mxu0  ;;  %v9207_v12 = vrot.slane %v9206_v1, 2  ;;  %v9201_v52 = vrot.slane %v9200_v60, 2 }
 0x745   :  { %v9017_v58 = vpop.f32.mrf.mxu1 }
 0x746   :  { %v9208_v18 = vadd.f32 %v9207_v12, %v9206_v1  ;;  %v9202_v35 = vadd.f32 %v9201_v52, %v9200_v60 }
 0x748   :  { %v9209_v47 = vrot.slane %v9208_v18, 1  ;;  %v9203_v51 = vrot.slane %v9202_v35, 1 }
 0x74a   :  { %v9210_v61 = vadd.f32 %v9209_v47, %v9208_v18  ;;  %v9204_v13 = vadd.f32 %v9203_v51, %v9202_v35 }
 0x77e   :  { %v9053_v42 = vpop.f32.mrf.mxu0 }
 0x77f   :  { %v9054_v32 = vadd.f32 %v9053_v42, %v9013_v63  ;;  %v9094_v14 = vpop.f32.mrf.mxu1 }
 0x780   :  { %v9055_v25 = vpop.f32.mrf.mxu0 }
 0x781   :  { %v9095_v6 = vadd.f32 %v9094_v14, %v9054_v32  ;;  %v9056_v39 = vadd.f32 %v9055_v25, %v9015_v62  ;;  %v9096_v41 = vpop.f32.mrf.mxu1  ;;  %v9228_v14 = vmul.f32 0.125, %v9210_v61 }
 0x782   :  { %v9057_v29 = vpop.f32.mrf.mxu0 }
 0x783   :  { %v9139_v43 = vrot.slane %v9095_v6, 4  ;;  %v9097_v7 = vadd.f32 %v9096_v41, %v9056_v39  ;;  %v9098_v20 = vpop.f32.mrf.mxu1  ;;  %v9236_v29 = vadd.f32 1e-05, %v9228_v14 }
 0x784   :  { %v9058_v37 = vpop.f32.mrf.mxu0 }
 0x785   :  { %v9140_v27 = vadd.f32 %v9139_v43, %v9095_v6  ;;  %v9145_v48 = vrot.slane %v9097_v7, 4  ;;  %v9099_v59 = vpop.f32.mrf.mxu1  ;;  %12052 = vrsqrt.f32 %v9236_v29 }
 0x787   :  { %v9141_v34 = vrot.slane %v9140_v27, 2  ;;  %v9146_v58 = vadd.f32 %v9145_v48, %v9097_v7 }
 0x789   :  { %v9142_v16 = vadd.f32 %v9141_v34, %v9140_v27  ;;  %v9147_v3 = vrot.slane %v9146_v58, 2 }
 0x78b   :  { %v9143_v36 = vrot.slane %v9142_v16, 1  ;;  %v9148_v5 = vadd.f32 %v9147_v3, %v9146_v58 }
 0x78d   :  { %v9144_v44 = vadd.f32 %v9143_v36, %v9142_v16  ;;  %v9149_v2 = vrot.slane %v9148_v5, 1 }
 0x78f   :  { %v9157_v10 = vmul.f32 0.125, %v9144_v44  ;;  %v9150_v26 = vadd.f32 %v9149_v2, %v9148_v5  ;;  %v9295_v5 = vrot.slane %v9287_v4, %v12648_v56  ;;  %v9102_v44 = vld [vmem:[#allocation23] sm:$0xff]  ;;  %v9101_v2 = vld [vmem:[#allocation22] sm:$0xff] }
 0x790   :  { %v9371_v35 = vrot.slane %v9102_v44, %v12665_v19  ;;  %v9367_v47 = vrot.slane %v9102_v44, %v12683_v0  ;;  %v9387_v51 = vrot.slane %v9102_v44, %v12883_v38  ;;  %v9375_v21 = vrot.slane %v9102_v44, %v12890_v24 }
 0x791   :  { %v13061_v31 = vsub.f32 %v9095_v6, %v9157_v10  ;;  %v9158_v33 = vmul.f32 0.125, %v9150_v26  ;;  %v9227_v6 = vmul.f32 0.125, %v9204_v13  ;;  %v9363_v10 = vrot.slane %v9102_v44, %v12669_v28 }
 0x792   :  { %v12053_v59 = vpop.eup %12052 }
 0x793   :  { %v9173_v8 = vmul.f32 %v13061_v31, %v13061_v31  ;;  %v13065_v9 = vsub.f32 %v9097_v7, %v9158_v33  ;;  %v9235_v7 = vadd.f32 1e-05, %v9227_v6  ;;  %v9359_v33 = vrot.slane %v9102_v44, %v12673_v46 }
 0x795   :  { %v9211_v45 = vrot.slane %v9173_v8, 4  ;;  %v9174_v53 = vmul.f32 %v13065_v9, %v13065_v9  ;;  %12054 = vrsqrt.f32 %v9235_v7  ;;  %v11916_v7 = vld [vmem:[#allocation25 + $0x270] ss:$8 sps:$4 sm:$0xff]  }
 0x797   :  { %v9212_v63 = vadd.f32 %v9211_v45, %v9173_v8  ;;  %v9217_v42 = vrot.slane %v9174_v53, 4  ;;  %v9379_v8 = vrot.slane %v9102_v44, %v12887_v57 }
 0x799   :  { %v9213_v62 = vrot.slane %v9212_v63, 2  ;;  %v9218_v32 = vadd.f32 %v9217_v42, %v9174_v53 }
 0x79b   :  { %v9214_v25 = vadd.f32 %v9213_v62, %v9212_v63  ;;  %v9219_v50 = vrot.slane %v9218_v32, 2 }
 0x79d   :  { %v9215_v39 = vrot.slane %v9214_v25, 1  ;;  %v9220_v41 = vadd.f32 %v9219_v50, %v9218_v32 }
 0x79f   :  { %v9216_v55 = vadd.f32 %v9215_v39, %v9214_v25  ;;  %v9221_v43 = vrot.slane %v9220_v41, 1 }
 0x7a1   :  { %v9229_v20 = vmul.f32 0.125, %v9216_v55  ;;  %v9222_v37 = vadd.f32 %v9221_v43, %v9220_v41 }
 0x7a2   :  { %v12055_v1 = vpop.eup %12054 }
 0x7a3   :  { %v9237_v17 = vadd.f32 1e-05, %v9229_v20  ;;  %v9230_v27 = vmul.f32 0.125, %v9222_v37  ;;  %v9257_v58 = vcombine.low %v12055_v1, %v12053_v59  ;;  %v11922_v1 = vld [vmem:[#allocation25 + $0x260] ss:$8 sps:$4 sm:$0xff]  }
 0x7a5   :  { %v9238_v48 = vadd.f32 1e-05, %v9230_v27  ;;  %12056 = vrsqrt.f32 %v9237_v17  ;;  %v9279_v3 = vrot.slane %v9257_v58, %v12648_v56  ;;  %v11924_v17 = vld [vmem:[#allocation25 + $0x264] ss:$8 sps:$4 sm:$0xff]   ;;  %v11930_v58 = vld [vmem:[#allocation25 + $0x254] ss:$8 sps:$4 sm:$0xff]  }
 0x7a6   :  { %v11927_v27 = vld [vmem:[#allocation25 + $0x364] ss:$8 sps:$4 sm:$0xff]  }
 0x7a7   :  { %12058 = vrsqrt.f32 %v9238_v48 }
 0x7b2   :  { %v12057_v34 = vpop.eup %12056 }
 0x7b4   :  { %v12059_v60 = vpop.eup %12058 }
 0x7b5   :  { %v9258_v16 = vcombine.low %v12057_v34, %v12059_v60  ;;  %v11925_v34 = vld [vmem:[#allocation25 + $0x360] ss:$8 sps:$4 sm:$0xff]   ;;  %v11933_v60 = vld [vmem:[#allocation25 + $0x354] ss:$8 sps:$4 sm:$0xff]  }
 0x7b7   :  { %v9286_v12 = vrot.slane %v9258_v16, %v12648_v56  ;;  %v11928_v16 = vld [vmem:[#allocation25 + $0x250] ss:$8 sps:$4 sm:$0xff]  }
 0x7b9   :  { %v9288_v36 = vcombine.low %v9279_v3, %v9286_v12  ;;  %v11931_v3 = vld [vmem:[#allocation25 + $0x350] ss:$8 sps:$4 sm:$0xff]   ;;  %v11936_v12 = vld [vmem:[#allocation25 + $0x244] ss:$8 sps:$4 sm:$0xff]  }
 0x7bb   :  { %v9302_v52 = vrot.slane %v9288_v36, %v12648_v56  ;;  %v9383_v56 = vrot.slane %v9102_v44, %v12893_v54  ;;  %v11939_v36 = vld [vmem:[#allocation25 + $0x344] ss:$8 sps:$4 sm:$0xff]   ;;  %v11942_v44 = vld [vmem:[#allocation25 + $0x234] ss:$8 sps:$4 sm:$0xff]  }
 0x7bd   :  { %v9303_v18 = vcombine.low %v9295_v5, %v9302_v52  ;;  %v11934_v5 = vld [vmem:[#allocation25 + $0x240] ss:$8 sps:$4 sm:$0xff]  }
 0x7be   :  { %v11937_v52 = vld [vmem:[#allocation25 + $0x340] ss:$8 sps:$4 sm:$0xff]  }
 0x7bf   :  { %v9305_v26 = vmul.f32 %v9303_v18, %v9101_v2  ;;  %v11945_v2 = vld [vmem:[#allocation25 + $0x334] ss:$8 sps:$4 sm:$0xff]   ;;  %v11940_v18 = vld [vmem:[#allocation25 + $0x230] ss:$8 sps:$4 sm:$0xff]  }
 0x7c1   :  { %v9314_v22 = vrot.slane %v9305_v26, %v12669_v28  ;;  %v9322_v4 = vrot.slane %v9305_v26, %v12665_v19  ;;  %v9310_v45 = vrot.slane %v9305_v26, %v12673_v46  ;;  %v9318_v53 = vrot.slane %v9305_v26, %v12683_v0 }
 0x7c2   :  { %v9330_v61 = vrot.slane %v9305_v26, %v12887_v57  ;;  %v9338_v63 = vrot.slane %v9305_v26, %v12883_v38  ;;  %v9326_v42 = vrot.slane %v9305_v26, %v12890_v24  ;;  %v9334_v13 = vrot.slane %v9305_v26, %v12893_v54  ;;  %v11948_v26 = vld [vmem:[#allocation25 + $0x224] ss:$8 sps:$4 sm:$0xff]  }
 0x7c3   :  { %v9348_v62 = vmul.f32 %v9314_v22, %v12988_v23  ;;  %v9350_v32 = vmul.f32 %v9322_v4, %v13026_v40  ;;  %v9347_v14 = vmul.f32 %v9310_v45, %v12983_v11  ;;  %v9349_v19 = vmul.f32 %v9318_v53, %v13021_v30  ;;  %v11960_v22 = vld [vmem:[#allocation25 + $0x204] ss:$8 sps:$4 sm:$0xff]   ;;  %v11958_v45 = vld [vmem:[#allocation25 + $0x200] ss:$8 sps:$4 sm:$0xff]  }
 0x7c4   :  { %v9352_v25 = vmul.f32 %v9330_v61, %v13052_v15  ;;  %v9354_v0 = vmul.f32 %v9338_v63, %v13065_v9  ;;  %v9351_v57 = vmul.f32 %v9326_v42, %v13055_v49  ;;  %v9353_v38 = vmul.f32 %v9334_v13, %v13061_v31  ;;  %v11919_v31 = vld [vmem:[#allocation25 + $0x370] ss:$8 sps:$4 sm:$0xff]   ;;  %v11963_v4 = vld [vmem:[#allocation25 + $0x304] ss:$8 sps:$4 sm:$0xff]   ;;  %v11961_v53 = vld [vmem:[#allocation25 + $0x300] ss:$8 sps:$4 sm:$0xff]  }
 0x7c5   :  { %v9397_v50 = vadd.f32 %v9363_v10, %v9348_v62  ;;  %v9399_v24 = vadd.f32 %v9371_v35, %v9350_v32  ;;  %v9396_v6 = vadd.f32 %v9359_v33, %v9347_v14  ;;  %v9398_v54 = vadd.f32 %v9367_v47, %v9349_v19  ;;  %v11943_v10 = vld [vmem:[#allocation25 + $0x330] ss:$8 sps:$4 sm:$0xff]   ;;  %v11951_v35 = vld [vmem:[#allocation25 + $0x324] ss:$8 sps:$4 sm:$0xff]   ;;  %v11946_v33 = vld [vmem:[#allocation25 + $0x220] ss:$8 sps:$4 sm:$0xff]  }
 0x7c6   :  { %v9401_v39 = vadd.f32 %v9379_v8, %v9352_v25  ;;  %v9403_v23 = vadd.f32 %v9387_v51, %v9354_v0  ;;  %v13100_v41 = vadd.f32 %v9375_v21, %v9351_v57  ;;  %v13102_v40 = vadd.f32 %v9383_v56, %v9353_v38  ;;  %v11949_v47 = vld [vmem:[#allocation25 + $0x320] ss:$8 sps:$4 sm:$0xff]   ;;  %v11954_v8 = vld [vmem:[#allocation25 + $0x214] ss:$8 sps:$4 sm:$0xff]   ;;  %v11952_v21 = vld [vmem:[#allocation25 + $0x210] ss:$8 sps:$4 sm:$0xff]  }
 0x7c7   :  { %v9405_v11 = vmax.f32 %v9397_v50, 0.0  ;;  %v9407_v30 = vmax.f32 %v9399_v24, 0.0  ;;  %v9404_v29 = vmax.f32 %v9396_v6, 0.0  ;;  %v9406_v15 = vmax.f32 %v9398_v54, 0.0  ;;  %v11957_v51 = vld [vmem:[#allocation25 + $0x314] ss:$8 sps:$4 sm:$0xff]  }
 0x7c8   :  { %v9409_v55 = vmax.f32 %v9401_v39, 0.0  ;;  %v9411_v9 = vmax.f32 %v9403_v23, 0.0  ;;  %v11955_v56 = vld [vmem:[#allocation25 + $0x310] ss:$8 sps:$4 sm:$0xff]   ;;  %v11966_v61 = vld [vmem:[#allocation25 + $0x2f4] ss:$8 sps:$4 sm:$0xff]  }
 0x7c9   :  { %v9413_v43 = vpack.c.bf16 %v9405_v11, %v9405_v11  ;;  %v9415_v49 = vpack.c.bf16 %v9407_v30, %v9407_v30  ;;  %v9412_v20 = vpack.c.bf16 %v9404_v29, %v9404_v29  ;;  %v9414_v37 = vpack.c.bf16 %v9406_v15, %v9406_v15  ;;  %v11969_v63 = vld [vmem:[#allocation25 + $0x3f4] ss:$8 sps:$4 sm:$0xff]   ;;  %v11964_v42 = vld [vmem:[#allocation25 + $0x2f0] ss:$8 sps:$4 sm:$0xff]   ;;  %v11972_v62 = vld [vmem:[#allocation25 + $0x2e4] ss:$8 sps:$4 sm:$0xff]  }
 0x7ca   :  { %v9417_v48 = vpack.c.bf16 %v9409_v55, %v9409_v55  ;;  %v9419_v59 = vpack.c.bf16 %v9411_v9, %v9411_v9  ;;  %v11967_v13 = vld [vmem:[#allocation25 + $0x3f0] ss:$8 sps:$4 sm:$0xff]   ;;  %v11975_v32 = vld [vmem:[#allocation25 + $0x3e4] ss:$8 sps:$4 sm:$0xff]   ;;  %v11970_v14 = vld [vmem:[#allocation25 + $0x2e0] ss:$8 sps:$4 sm:$0xff]  }
 0x7cb   :  { %10232 = vmatprep.mubr.bf16.mxu0 %v9413_v43  ;;  %10273 = vmatprep.mubr.bf16.mxu1 %v9415_v49  ;;  %v11973_v19 = vld [vmem:[#allocation25 + $0x3e0] ss:$8 sps:$4 sm:$0xff]   ;;  %v11978_v25 = vld [vmem:[#allocation25 + $0x2d4] ss:$8 sps:$4 sm:$0xff]   ;;  %v11976_v57 = vld [vmem:[#allocation25 + $0x2d0] ss:$8 sps:$4 sm:$0xff]  }
 0x7cc   :  { %10233 = vmatmul.mubr.bf16.vlgmr.msra.gmra.mxu0 %v9412_v20  ;;  %10274 = vmatmul.mubr.bf16.vlgmr.msra.gmra.mxu1 %v9414_v37  ;;  %v11981_v0 = vld [vmem:[#allocation25 + $0x3d4] ss:$8 sps:$4 sm:$0xff]   ;;  %v11979_v38 = vld [vmem:[#allocation25 + $0x3d0] ss:$8 sps:$4 sm:$0xff]   ;;  %v11984_v50 = vld [vmem:[#allocation25 + $0x2c4] ss:$8 sps:$4 sm:$0xff]  }
 0x7cd   :  { %10283 = vmatpush1.bf16.msra.mxu0 %v11916_v7  ;;  %10324 = vmatpush1.bf16.msra.mxu1 %v11919_v31  ;;  %v11987_v24 = vld [vmem:[#allocation25 + $0x3c4] ss:$8 sps:$4 sm:$0xff]   ;;  %v11982_v6 = vld [vmem:[#allocation25 + $0x2c0] ss:$8 sps:$4 sm:$0xff]   ;;  %v11990_v39 = vld [vmem:[#allocation25 + $0x2b4] ss:$8 sps:$4 sm:$0xff]  }
 0x7ce   :  { %10314 = vmatprep.mubr.bf16.mxu0 %v9417_v48  ;;  %10355 = vmatprep.mubr.bf16.mxu1 %v9419_v59  ;;  %v11985_v54 = vld [vmem:[#allocation25 + $0x3c0] ss:$8 sps:$4 sm:$0xff]   ;;  %v11993_v23 = vld [vmem:[#allocation25 + $0x3b4] ss:$8 sps:$4 sm:$0xff]   ;;  %v11988_v11 = vld [vmem:[#allocation25 + $0x2b0] ss:$8 sps:$4 sm:$0xff]  }
 0x7cf   :  { %10284 = vmatprep.subr.bf16.mxu0 %v11924_v17  ;;  %10325 = vmatprep.subr.bf16.mxu1 %v11927_v27  ;;  %v11991_v30 = vld [vmem:[#allocation25 + $0x3b0] ss:$8 sps:$4 sm:$0xff]   ;;  %v11996_v29 = vld [vmem:[#allocation25 + $0x2a4] ss:$8 sps:$4 sm:$0xff]   ;;  %v11994_v55 = vld [vmem:[#allocation25 + $0x2a0] ss:$8 sps:$4 sm:$0xff]  }
 0x7d0   :  { %v11999_v15 = vld [vmem:[#allocation25 + $0x3a4] ss:$8 sps:$4 sm:$0xff]   ;;  %v11997_v9 = vld [vmem:[#allocation25 + $0x3a0] ss:$8 sps:$4 sm:$0xff]   ;;  %v12002_v43 = vld [vmem:[#allocation25 + $0x294] ss:$8 sps:$4 sm:$0xff]  }
 0x7d1   :  { %10285 = vmatpush1.bf16.msra.mxu0 %v11922_v1  ;;  %10326 = vmatpush1.bf16.msra.mxu1 %v11925_v34  ;;  %v12005_v49 = vld [vmem:[#allocation25 + $0x394] ss:$8 sps:$4 sm:$0xff]   ;;  %v12000_v7 = vld [vmem:[#allocation25 + $0x290] ss:$8 sps:$4 sm:$0xff]   ;;  %v12008_v20 = vld [vmem:[#allocation25 + $0x284] ss:$8 sps:$4 sm:$0xff]  }
 0x7d2   :  { %10286 = vmatprep.subr.bf16.mxu0 %v11930_v58  ;;  %10327 = vmatprep.subr.bf16.mxu1 %v11933_v60  ;;  %v12003_v31 = vld [vmem:[#allocation25 + $0x390] ss:$8 sps:$4 sm:$0xff]   ;;  %v12011_v37 = vld [vmem:[#allocation25 + $0x384] ss:$8 sps:$4 sm:$0xff]   ;;  %v12006_v17 = vld [vmem:[#allocation25 + $0x280] ss:$8 sps:$4 sm:$0xff]  }
 0x7d3   :  { %v12009_v27 = vld [vmem:[#allocation25 + $0x380] ss:$8 sps:$4 sm:$0xff]   ;;  %v9408_v48 = vmax.f32 %v13100_v41, 0.0  ;;  %v9410_v59 = vmax.f32 %v13102_v40, 0.0 }
 0x7d5   :  { %10287 = vmatpush1.bf16.msra.mxu0 %v11928_v16  ;;  %10328 = vmatpush1.bf16.msra.mxu1 %v11931_v3  ;;  %v9416_v1 = vpack.c.bf16 %v9408_v48, %v9408_v48  ;;  %v9418_v34 = vpack.c.bf16 %v9410_v59, %v9410_v59 }
 0x7d6   :  { %10288 = vmatprep.subr.bf16.mxu0 %v11936_v12  ;;  %10329 = vmatprep.subr.bf16.mxu1 %v11939_v36 }
 0x7d9   :  { %10289 = vmatpush1.bf16.msra.mxu0 %v11934_v5  ;;  %10330 = vmatpush1.bf16.msra.mxu1 %v11937_v52 }
 0x7da   :  { %10290 = vmatprep.subr.bf16.mxu0 %v11942_v44  ;;  %10331 = vmatprep.subr.bf16.mxu1 %v11945_v2  ;;  %v9548_v44 = vld [vmem:[#allocation26] sm:$0x3] }
 0x7db   :  { %v9553_v2 = vrot.slane %v9548_v44, %v12673_v46  ;;  %v9557_v41 = vrot.slane %v9548_v44, %v12669_v28 }
 0x7dd   :  { %10291 = vmatpush1.bf16.msra.mxu0 %v11940_v18  ;;  %10332 = vmatpush1.bf16.msra.mxu1 %v11943_v10 }
 0x7de   :  { %10292 = vmatprep.subr.bf16.mxu0 %v11948_v26  ;;  %10333 = vmatprep.subr.bf16.mxu1 %v11951_v35 }
 0x7e1   :  { %10293 = vmatpush1.bf16.msra.mxu0 %v11946_v33  ;;  %10334 = vmatpush1.bf16.msra.mxu1 %v11949_v47 }
 0x7e2   :  { %10294 = vmatprep.subr.bf16.mxu0 %v11954_v8  ;;  %10335 = vmatprep.subr.bf16.mxu1 %v11957_v51 }
 0x7e5   :  { %10295 = vmatpush1.bf16.msra.mxu0 %v11952_v21  ;;  %10336 = vmatpush1.bf16.msra.mxu1 %v11955_v56 }
 0x7e6   :  { %10296 = vmatprep.subr.bf16.mxu0 %v11960_v22  ;;  %10337 = vmatprep.subr.bf16.mxu1 %v11963_v4 }
 0x7e9   :  { %10297 = vmatpush1.bf16.msra.mxu0 %v11958_v45  ;;  %10338 = vmatpush1.bf16.msra.mxu1 %v11961_v53 }
 0x7ea   :  { %10298 = vmatprep.subr.bf16.mxu0 %v11966_v61  ;;  %10339 = vmatprep.subr.bf16.mxu1 %v11969_v63 }
 0x7ed   :  { %10299 = vmatpush2.bf16.msra.mxu0 %v11964_v42  ;;  %10340 = vmatpush2.bf16.msra.mxu1 %v11967_v13 }
 0x7ee   :  { %10300 = vmatprep.subr.bf16.mxu0 %v11972_v62  ;;  %10341 = vmatprep.subr.bf16.mxu1 %v11975_v32 }
 0x7f1   :  { %10301 = vmatpush2.bf16.msra.mxu0 %v11970_v14  ;;  %10342 = vmatpush2.bf16.msra.mxu1 %v11973_v19 }
 0x7f2   :  { %10302 = vmatprep.subr.bf16.mxu0 %v11978_v25  ;;  %10343 = vmatprep.subr.bf16.mxu1 %v11981_v0 }
 0x7f5   :  { %10303 = vmatpush2.bf16.msra.mxu0 %v11976_v57  ;;  %10344 = vmatpush2.bf16.msra.mxu1 %v11979_v38 }
 0x7f6   :  { %10304 = vmatprep.subr.bf16.mxu0 %v11984_v50  ;;  %10345 = vmatprep.subr.bf16.mxu1 %v11987_v24 }
 0x7f9   :  { %10305 = vmatpush2.bf16.msra.mxu0 %v11982_v6  ;;  %10346 = vmatpush2.bf16.msra.mxu1 %v11985_v54 }
 0x7fa   :  { %10306 = vmatprep.subr.bf16.mxu0 %v11990_v39  ;;  %10347 = vmatprep.subr.bf16.mxu1 %v11993_v23 }
 0x7fd   :  { %10307 = vmatpush2.bf16.msra.mxu0 %v11988_v11  ;;  %10348 = vmatpush2.bf16.msra.mxu1 %v11991_v30 }
 0x7fe   :  { %10308 = vmatprep.subr.bf16.mxu0 %v11996_v29  ;;  %10349 = vmatprep.subr.bf16.mxu1 %v11999_v15 }
 0x801   :  { %10309 = vmatpush2.bf16.msra.mxu0 %v11994_v55  ;;  %10350 = vmatpush2.bf16.msra.mxu1 %v11997_v9 }
 0x802   :  { %10310 = vmatprep.subr.bf16.mxu0 %v12002_v43  ;;  %10351 = vmatprep.subr.bf16.mxu1 %v12005_v49 }
 0x805   :  { %10311 = vmatpush2.bf16.msra.mxu0 %v12000_v7  ;;  %10352 = vmatpush2.bf16.msra.mxu1 %v12003_v31 }
 0x806   :  { %10312 = vmatprep.subr.bf16.mxu0 %v12008_v20  ;;  %10353 = vmatprep.subr.bf16.mxu1 %v12011_v37 }
 0x809   :  { %10313 = vmatpush2.bf16.msra.mxu0 %v12006_v17  ;;  %10354 = vmatpush2.bf16.msra.mxu1 %v12009_v27 }
 0x80c   :  { %10315 = vmatmul.mubr.bf16.vlgmr.msra.gmra.mxu0 %v9416_v1  ;;  %10356 = vmatmul.mubr.bf16.vlgmr.msra.gmra.mxu1 %v9418_v34 }
 0x88c   :  { %v10234_v58 = vpop.f32.mrf.mxu0  ;;  %v10275_v60 = vpop.f32.mrf.mxu1 }
 0x88d   :  { %v10235_v40 = vadd.f32 %v10234_v58, %v9553_v2 }
 0x88e   :  { %v10236_v16 = vpop.f32.mrf.mxu0  ;;  %v10277_v3 = vpop.f32.mrf.mxu1 }
 0x88f   :  { %v10237_v18 = vadd.f32 %v10236_v16, %v9557_v41  ;;  %v10276_v10 = vadd.f32 %v10275_v60, %v10235_v40 }
 0x890   :  { %v10238_v12 = vpop.f32.mrf.mxu0  ;;  %v10279_v36 = vpop.f32.mrf.mxu1 }
 0x891   :  { %v10278_v33 = vadd.f32 %v10277_v3, %v10237_v18 }
 0x892   :  { %v10239_v5 = vpop.f32.mrf.mxu0  ;;  %v10280_v52 = vpop.f32.mrf.mxu1 }
 0x8cc   :  { %v10316_v26 = vpop.f32.mrf.mxu0  ;;  %v10357_v35 = vpop.f32.mrf.mxu1 }
 0x8cd   :  { %v10317_v47 = vadd.f32 %v10316_v26, %v10276_v10 }
 0x8ce   :  { %v10318_v8 = vpop.f32.mrf.mxu0  ;;  %v10359_v51 = vpop.f32.mrf.mxu1 }
 0x8cf   :  { %v10358_v21 = vadd.f32 %v10357_v35, %v10317_v47  ;;  %v10319_v56 = vadd.f32 %v10318_v8, %v10278_v33 }
 0x8d0   :  { %v10320_v22 = vpop.f32.mrf.mxu0  ;;  %v10361_v4 = vpop.f32.mrf.mxu1 }
 0x8d1   :  { %v11649_v45 = vmul.f32 -1.442695, %v10358_v21  ;;  %v10360_v53 = vadd.f32 %v10359_v51, %v10319_v56 }
 0x8d2   :  { %v10321_v61 = vpop.f32.mrf.mxu0  ;;  %v10362_v63 = vpop.f32.mrf.mxu1 }
 0x8d3   :  { %12060 = vpow2.f32 %v11649_v45  ;;  %v11650_v46 = vmul.f32 -1.442695, %v10360_v53 }
 0x8d5   :  { %12062 = vpow2.f32 %v11650_v46 }
 0x8e0   :  { %v12061_v28 = vpop.eup %12060 }
 0x8e1   :  { %v10370_v42 = vadd.f32 1.0, %v12061_v28 }
 0x8e2   :  { %v12063_v13 = vpop.eup %12062 }
 0x8e3   :  { %12064 = vrcp.f32 %v10370_v42  ;;  %v10371_v62 = vadd.f32 1.0, %v12063_v13 }
 0x8e5   :  { %12066 = vrcp.f32 %v10371_v62 }
 0x8f0   :  { %v12065_v32 = vpop.eup %12064 }
 0x8f1   :  { %10376 = vst [vmem:[#allocation28] sm:$0xff] %v12065_v32 }
 0x8f2   :  { %v12067_v14 = vpop.eup %12066 }
 0x8f3   :  { %10377 = vst [vmem:[#allocation28 + $0x8] sm:$0xff] %v12067_v14 }
 0x8f4   :  { %12399 = shalt.err (!%p12396_p0)
}
 0x8f5   :  { %10387 = dma.vmem_to_hbm [thread:$0]  %s10385_s12, 256, %s13128_s17, [#allocation4]  }
 0x8f6   :  { %12426 = dma.done.wait [#allocation4], 256  }
 0x8f7   :  { %12427 = vsyncadd [#allocation4], 4294967040 }
 0x8f8   :  { %10391 = vsyncpa [#allocation3], 1 }
 0x8f9   :  { %10392 = vsyncpa [#allocation6], 1 }
 0x8fa   :  { %10393 = vsyncpa [#allocation9], 1 }
 0x8fb   :  { %10394 = vsyncpa [#allocation12], 1 }
 0x8fc   :  { %10395 = vsyncpa [#allocation15], 1 }
 0x8fd   :  { %10396 = vsyncpa [#allocation18], 1 }
 0x8fe   :  { %10397 = vsyncpa [#allocation21], 1 }
 0x8ff   :  { %10398 = vsyncpa [#allocation24], 1 }
 0x900   :  { %10399 = vsyncpa [#allocation27], 1 }
 0x901   :  { %10400 = vsyncpa [#allocation4], 1 }

</bundles_post_ra>
